<compile_context>
chip_gen: v7x
topology: tpu7x:2x2x1
jax: 0.10.0
libtpu: 0.0.40
codegen_flags: <defaults>
</compile_context>

<pallas_src>
import jax
import jax.numpy as jnp
from jax import lax
from jax.experimental import pallas as pl
from jax.experimental.pallas import tpu as pltpu


# ---------------------------------------------------------------------------
# Tile picking: largest multiple of `unit` that divides `total` and is <= target;
# falls back to the full extent (always a legal block).
# ---------------------------------------------------------------------------
def _pick_tile(total, unit, target):
    if total <= target:
        return total
    t = (min(target, total) // unit) * unit
    while t >= unit:
        if total % t == 0:
            return t
        t -= unit
    return total


# ---------------------------------------------------------------------------
# Phase 1: beta = softmax_R( mean_N( tanh(h @ W1 + b1) @ w2 ) )   -> (1, R) f32
# ---------------------------------------------------------------------------
def _make_score_kernel(R, N, total_rows, t_rows):
    inv_n = 1.0 / float(N)

    def kernel(h2_ref, w1_ref, b1_ref, w2t_ref, beta_ref, acc_ref):
        # h2_ref : (t_rows, D) tile of h.reshape(N*R, D)
        # w1_ref : (D, H); b1_ref: (1, H); w2t_ref: (1, H)   (resident: constant index map)
        # beta_ref (out): (1, R) f32 ; acc_ref (VMEM scratch): (1, R) f32
        step = pl.program_id(0)

        @pl.when(step == 0)
        def _init():
            acc_ref[...] = jnp.zeros_like(acc_ref)

        # One batched matmul for ALL relations in the tile (relations folded into rows).
        z = jnp.tanh(
            jnp.dot(h2_ref[...], w1_ref[...], preferred_element_type=jnp.float32)
            + b1_ref[...]
        )                                                          # (t_rows, H)
        # Second layer (H -> 1) as VPU multiply + lane (XLU) reduction, not a 1-lane matmul.
        s = jnp.sum(z * w2t_ref[...], axis=-1, keepdims=True)      # (t_rows, 1)

        # Scatter-add per-row scores into per-relation lanes (relation id = global row % R).
        row0 = step * t_rows
        row_ids = row0 + lax.broadcasted_iota(jnp.int32, (t_rows, R), 0)
        lane_rel = lax.broadcasted_iota(jnp.int32, (t_rows, R), 1)
        sel = jnp.logical_and(row_ids % R == lane_rel, row_ids < total_rows)
        contrib = jnp.where(sel, s, 0.0)                           # (t_rows, R)
        acc_ref[...] += jnp.sum(contrib, axis=0, keepdims=True)    # (1, R)

        @pl.when(step == pl.num_programs(0) - 1)
        def _finalize():
            w = acc_ref[...] * inv_n                               # mean over the N nodes
            w = w - jnp.max(w, axis=-1, keepdims=True)
            e = jnp.exp(w)
            beta_ref[...] = e * pl.reciprocal(jnp.sum(e, axis=-1, keepdims=True))

    return kernel


# ---------------------------------------------------------------------------
# Phase 2: out[n, :] = sum_r beta[r] * h[n, r, :]
# ---------------------------------------------------------------------------
def _make_wsum_kernel(R, t_n):
    def kernel(beta_ref, h2_ref, out_ref):
        # beta_ref : SMEM (1, R) f32 ; h2_ref: (t_n*R, D) ; out_ref: (t_n, D)
        # Static sublane-strided slices pick out relation r for every node of the tile;
        # beta[r] is a scalar read from SMEM broadcast over the whole (t_n, D) slab.
        acc = beta_ref[0, 0] * h2_ref[pl.ds(0, t_n, stride=R), :].astype(jnp.float32)
        for r in range(1, R):   # R is small & static -> fully unrolled pure VPU FMAs
            acc = acc + beta_ref[0, r] * h2_ref[pl.ds(r, t_n, stride=R), :].astype(jnp.float32)
        out_ref[...] = acc.astype(out_ref.dtype)

    return kernel


def relation_agg(h, w1, b1, w2, *, block_bytes=512 * 1024,
                 vmem_limit_bytes=32 * 1024 * 1024):
    """h: (N, R, D); w1: (D, H); b1: (1, H) or (H,); w2: (H, 1) or (H,). Returns (N, D)."""
    N, R, D = h.shape
    H = w1.shape[1]
    b1 = jnp.asarray(b1).reshape(1, H)
    w2t = jnp.asarray(w2).reshape(1, H)        # tiny; free

    # Free contiguous reshape (metadata only) — no HBM round trip.
    h2d = h.reshape(N * R, D)
    total_rows = N * R
    itemsize = jnp.dtype(h.dtype).itemsize

    # ---------------- Phase 1: attention weights beta ----------------
    rows_target = max(8, (block_bytes // max(1, D * itemsize)) // 8 * 8)
    t_rows = _pick_tile(total_rows, 8, rows_target)
    grid1 = total_rows // t_rows

    beta = pl.pallas_call(
        _make_score_kernel(R, N, total_rows, t_rows),
        grid=(grid1,),
        in_specs=[
            pl.BlockSpec((t_rows, D), lambda i: (i, 0)),
            pl.BlockSpec((D, H), lambda i: (0, 0)),
            pl.BlockSpec((1, H), lambda i: (0, 0)),
            pl.BlockSpec((1, H), lambda i: (0, 0)),
        ],
        out_specs=pl.BlockSpec((1, R), lambda i: (0, 0)),
        out_shape=jax.ShapeDtypeStruct((1, R), jnp.float32),
        scratch_shapes=[pltpu.VMEM((1, R), jnp.float32)],
        compiler_params=pltpu.CompilerParams(
            dimension_semantics=("arbitrary",),          # reduction over row tiles
            vmem_limit_bytes=vmem_limit_bytes,
        ),
        cost_estimate=pl.CostEstimate(
            flops=2 * N * R * D * H + 3 * N * R * H,
            transcendentals=N * R * H + R,
            bytes_accessed=N * R * D * itemsize + D * H * 4 + 2 * H * 4 + R * 4,
        ),
    )(h2d, w1, b1, w2t)

    # ---------------- Phase 2: weighted sum over relations ----------------
    n_target = max(8, (block_bytes // max(1, R * D * itemsize)) // 8 * 8)
    t_n = _pick_tile(N, 8, n_target)
    grid2 = N // t_n

    out = pl.pallas_call(
        _make_wsum_kernel(R, t_n),
        grid=(grid2,),
        in_specs=[
            pl.BlockSpec(memory_space=pltpu.MemorySpace.SMEM),   # beta (tiny, scalar reads)
            pl.BlockSpec((t_n * R, D), lambda i: (i, 0)),
        ],
        out_specs=pl.BlockSpec((t_n, D), lambda i: (i, 0)),
        out_shape=jax.ShapeDtypeStruct((N, D), h.dtype),
        compiler_params=pltpu.CompilerParams(
            dimension_semantics=("parallel",),           # independent N tiles (megacore)
            vmem_limit_bytes=vmem_limit_bytes,
        ),
        cost_estimate=pl.CostEstimate(
            flops=2 * N * R * D,
            transcendentals=0,
            bytes_accessed=N * R * D * itemsize + N * D * itemsize + R * 4,
        ),
    )(beta, h2d)
    return out


def relation_agg_ref(h, w1, b1, w2):
    """Pure-JAX reference mirroring the PyTorch module."""
    z = jnp.tanh(h @ w1 + jnp.asarray(b1).reshape(-1))   # (N, R, H)
    s = z @ jnp.asarray(w2).reshape(-1, 1)               # (N, R, 1)
    w = s.mean(axis=0)                                    # (R, 1)
    beta = jax.nn.softmax(w, axis=0)                      # (R, 1)
    return (beta[None, :, :] * h).sum(axis=1)             # (N, D)


if __name__ == "__main__":
    # Small shapes: N nodes, R relations, D=n_inp (lane-dense), H=n_hid.
    # Default 512 KiB block budget -> both phases run multi-step grids (accumulation path).
    N, R, D, H = 512, 4, 128, 32

    key = jax.random.PRNGKey(0)
    k_h, k_w1, k_b1, k_w2 = jax.random.split(key, 4)

    h = jax.random.normal(k_h, (N, R, D), dtype=jnp.float32)
    w1 = jax.random.normal(k_w1, (D, H), dtype=jnp.float32) * (1.0 / (D ** 0.5))
    b1 = jax.random.normal(k_b1, (1, H), dtype=jnp.float32) * 0.1
    w2 = jax.random.normal(k_w2, (H, 1), dtype=jnp.float32) * (1.0 / (H ** 0.5))

    out = jax.block_until_ready(jax.jit(relation_agg)(h, w1, b1, w2))
    ref = relation_agg_ref(h, w1, b1, w2)

    assert out.shape == (N, D)
    assert jnp.allclose(out, ref, atol=1e-4, rtol=1e-4), "Pallas output mismatch vs reference"

    print("KERNEL_OK")
</pallas_src>

<mosaic_0001>
module attributes {stable_mosaic.version = 11 : i64} {
  func.func @kernel(%arg0: i32, %arg1: memref<1x4xf32, #tpu.memory_space<smem>>, %arg2: memref<1024x128xf32, #tpu.memory_space<vmem>>, %arg3: memref<256x128xf32, #tpu.memory_space<vmem>>) attributes {dimension_semantics = [#tpu.dimension_semantics<parallel>], iteration_bounds = array<i64: 2>, scalar_prefetch = 0 : i64, scratch_operands = 0 : i64, tpu.core_type = #tpu.core_type<tc>, window_params = [{transform_indices = @transform_0, window_bounds = array<i64: 1, 4>}, {transform_indices = @transform_1, window_bounds = array<i64: 1024, 128>}, {transform_indices = @transform_2, window_bounds = array<i64: 256, 128>}]} {
    %c0 = arith.constant 0 : index
    %c0_0 = arith.constant 0 : index
    %0 = memref.load %arg1[%c0, %c0_0] : memref<1x4xf32, #tpu.memory_space<smem>>
    %c0_1 = arith.constant 0 : index
    %c0_2 = arith.constant 0 : index
    %1 = tpu.strided_load %arg2[%c0_1, %c0_2] {strides = array<i32: 4, 1>} : memref<1024x128xf32, #tpu.memory_space<vmem>>, vector<256x128xf32>
    %2 = vector.broadcast %0 : f32 to vector<256x128xf32>
    %3 = arith.mulf %2, %1 : vector<256x128xf32>
    %c0_3 = arith.constant 0 : index
    %c1 = arith.constant 1 : index
    %4 = memref.load %arg1[%c0_3, %c1] : memref<1x4xf32, #tpu.memory_space<smem>>
    %c1_4 = arith.constant 1 : index
    %c0_5 = arith.constant 0 : index
    %5 = tpu.strided_load %arg2[%c1_4, %c0_5] {strides = array<i32: 4, 1>} : memref<1024x128xf32, #tpu.memory_space<vmem>>, vector<256x128xf32>
    %6 = vector.broadcast %4 : f32 to vector<256x128xf32>
    %7 = arith.mulf %6, %5 : vector<256x128xf32>
    %8 = arith.addf %3, %7 : vector<256x128xf32>
    %c0_6 = arith.constant 0 : index
    %c2 = arith.constant 2 : index
    %9 = memref.load %arg1[%c0_6, %c2] : memref<1x4xf32, #tpu.memory_space<smem>>
    %c2_7 = arith.constant 2 : index
    %c0_8 = arith.constant 0 : index
    %10 = tpu.strided_load %arg2[%c2_7, %c0_8] {strides = array<i32: 4, 1>} : memref<1024x128xf32, #tpu.memory_space<vmem>>, vector<256x128xf32>
    %11 = vector.broadcast %9 : f32 to vector<256x128xf32>
    %12 = arith.mulf %11, %10 : vector<256x128xf32>
    %13 = arith.addf %8, %12 : vector<256x128xf32>
    %c0_9 = arith.constant 0 : index
    %c3 = arith.constant 3 : index
    %14 = memref.load %arg1[%c0_9, %c3] : memref<1x4xf32, #tpu.memory_space<smem>>
    %c3_10 = arith.constant 3 : index
    %c0_11 = arith.constant 0 : index
    %15 = tpu.strided_load %arg2[%c3_10, %c0_11] {strides = array<i32: 4, 1>} : memref<1024x128xf32, #tpu.memory_space<vmem>>, vector<256x128xf32>
    %16 = vector.broadcast %14 : f32 to vector<256x128xf32>
    %17 = arith.mulf %16, %15 : vector<256x128xf32>
    %18 = arith.addf %13, %17 : vector<256x128xf32>
    %c0_12 = arith.constant 0 : index
    %c0_13 = arith.constant 0 : index
    %19 = vector.load %arg3[%c0_12, %c0_13] : memref<256x128xf32, #tpu.memory_space<vmem>>, vector<256x128xf32>
    tpu.vector_store %arg3[%c0_12, %c0_13], %18 {strides = array<i32>} : memref<256x128xf32, #tpu.memory_space<vmem>>, vector<256x128xf32>,
    return
  }
  func.func @transform_0(%arg0: i32) -> (i32, i32) {
    %c0_i32 = arith.constant 0 : i32
    %c0_i32_0 = arith.constant 0 : i32
    %c0_i32_1 = arith.constant 0 : i32
    return %c0_i32, %c0_i32_0 : i32, i32
  }
  func.func @transform_1(%arg0: i32) -> (i32, i32) {
    %c0_i32 = arith.constant 0 : i32
    %c0_i32_0 = arith.constant 0 : i32
    return %arg0, %c0_i32 : i32, i32
  }
  func.func @transform_2(%arg0: i32) -> (i32, i32) {
    %c0_i32 = arith.constant 0 : i32
    %c0_i32_0 = arith.constant 0 : i32
    return %arg0, %c0_i32 : i32, i32
  }
}

module attributes {stable_mosaic.version = 11 : i64} {
  func.func @kernel(%arg0: i32, %arg1: memref<1024x128xf32, #tpu.memory_space<vmem>>, %arg2: memref<128x32xf32, #tpu.memory_space<vmem>>, %arg3: memref<1x32xf32, #tpu.memory_space<vmem>>, %arg4: memref<1x32xf32, #tpu.memory_space<vmem>>, %arg5: memref<1x4xf32, #tpu.memory_space<vmem>>, %arg6: memref<1x4xf32, #tpu.memory_space<vmem>>) attributes {dimension_semantics = [#tpu.dimension_semantics<arbitrary>], iteration_bounds = array<i64: 2>, scalar_prefetch = 0 : i64, scratch_operands = 1 : i64, tpu.core_type = #tpu.core_type<tc>, window_params = [{transform_indices = @transform_0, window_bounds = array<i64: 1024, 128>}, {pipeline_mode = #tpu.pipeline_mode<synchronous>, transform_indices = @transform_1, window_bounds = array<i64: 128, 32>}, {pipeline_mode = #tpu.pipeline_mode<synchronous>, transform_indices = @transform_2, window_bounds = array<i64: 1, 32>}, {pipeline_mode = #tpu.pipeline_mode<synchronous>, transform_indices = @transform_3, window_bounds = array<i64: 1, 32>}, {pipeline_mode = #tpu.pipeline_mode<synchronous>, transform_indices = @transform_4, window_bounds = array<i64: 1, 4>}]} {
    %c0_i32 = arith.constant 0 : i32
    %0 = arith.cmpi eq, %arg0, %c0_i32 : i32
    %1 = arith.extui %0 : i1 to i32
    %c0_i32_0 = arith.constant 0 : i32
    %2 = arith.cmpi ne, %1, %c0_i32_0 : i32
    scf.if %2 {
      %cst_21 = arith.constant 0.000000e+00 : f32
      %52 = vector.broadcast %cst_21 : f32 to vector<1x4xf32>
      %c0_22 = arith.constant 0 : index
      %c0_23 = arith.constant 0 : index
      %53 = vector.load %arg6[%c0_22, %c0_23] : memref<1x4xf32, #tpu.memory_space<vmem>>, vector<1x4xf32>
      tpu.vector_store %arg6[%c0_22, %c0_23], %52 {strides = array<i32>} : memref<1x4xf32, #tpu.memory_space<vmem>>, vector<1x4xf32>,
    } else {
    }
    %c0 = arith.constant 0 : index
    %c0_1 = arith.constant 0 : index
    %3 = vector.load %arg1[%c0, %c0_1] : memref<1024x128xf32, #tpu.memory_space<vmem>>, vector<1024x128xf32>
    %c0_2 = arith.constant 0 : index
    %c0_3 = arith.constant 0 : index
    %4 = vector.load %arg2[%c0_2, %c0_3] : memref<128x32xf32, #tpu.memory_space<vmem>>, vector<128x32xf32>
    %cst = arith.constant dense<0.000000e+00> : vector<1024x32xf32>
    %5 = tpu.matmul %3, %4, %cst {dimension_numbers = #tpu.dot_dimension_numbers<[1], [0], [0], [1], [0, 0, 1, 1], [], []>} : vector<1024x128xf32>, vector<128x32xf32>, vector<1024x32xf32> -> vector<1024x32xf32>
    %c0_4 = arith.constant 0 : index
    %c0_5 = arith.constant 0 : index
    %6 = vector.load %arg3[%c0_4, %c0_5] : memref<1x32xf32, #tpu.memory_space<vmem>>, vector<1x32xf32>
    %7 = vector.broadcast %6 : vector<1x32xf32> to vector<1024x32xf32>
    %8 = arith.addf %5, %7 : vector<1024x32xf32>
    %9 = math.tanh %8 : vector<1024x32xf32>
    %c0_6 = arith.constant 0 : index
    %c0_7 = arith.constant 0 : index
    %10 = vector.load %arg4[%c0_6, %c0_7] : memref<1x32xf32, #tpu.memory_space<vmem>>, vector<1x32xf32>
    %11 = vector.broadcast %10 : vector<1x32xf32> to vector<1024x32xf32>
    %12 = arith.mulf %9, %11 : vector<1024x32xf32>
    %cst_8 = arith.constant dense<0.000000e+00> : vector<1024xf32>
    %13 = vector.multi_reduction <add>, %12, %cst_8 [1] : vector<1024x32xf32> to vector<1024xf32>
    %14 = vector.shape_cast %13 : vector<1024xf32> to vector<1024x1xf32>
    %c1024_i32 = arith.constant 1024 : i32
    %15 = arith.muli %arg0, %c1024_i32 : i32
    %16 = tpu.iota {dimensions = array<i32: 0>} : vector<1024x4xi32>
    %17 = vector.broadcast %15 : i32 to vector<1024x4xi32>
    %18 = arith.addi %17, %16 : vector<1024x4xi32>
    %19 = tpu.iota {dimensions = array<i32: 1>} : vector<1024x4xi32>
    %c4_i32 = arith.constant 4 : i32
    %c0_i32_9 = arith.constant 0 : i32
    %20 = arith.cmpi eq, %c4_i32, %c0_i32_9 : i32
    %c1_i32 = arith.constant 1 : i32
    %21 = arith.select %20, %c1_i32, %c4_i32 : i32
    %22 = vector.broadcast %21 : i32 to vector<1024x4xi32>
    %23 = arith.remsi %18, %22 : vector<1024x4xi32>
    %c0_i32_10 = arith.constant 0 : i32
    %24 = vector.broadcast %c0_i32_10 : i32 to vector<1024x4xi32>
    %25 = arith.cmpi ne, %23, %24 : vector<1024x4xi32>
    %c0_i32_11 = arith.constant 0 : i32
    %26 = vector.broadcast %c0_i32_11 : i32 to vector<1024x4xi32>
    %27 = arith.cmpi slt, %23, %26 : vector<1024x4xi32>
    %c0_i32_12 = arith.constant 0 : i32
    %28 = arith.cmpi slt, %21, %c0_i32_12 : i32
    %29 = vector.broadcast %28 : i1 to vector<1024x4xi1>
    %30 = vector.broadcast %29 : vector<1024x4xi1> to vector<1024x4xi1>
    %31 = arith.xori %27, %30 : vector<1024x4xi1>
    %32 = arith.andi %31, %25 : vector<1024x4xi1>
    %33 = vector.broadcast %21 : i32 to vector<1024x4xi32>
    %34 = arith.addi %23, %33 : vector<1024x4xi32>
    %35 = arith.select %32, %34, %23 : vector<1024x4xi1>, vector<1024x4xi32>
    %36 = arith.cmpi eq, %35, %19 : vector<1024x4xi32>
    %c2048_i32 = arith.constant 2048 : i32
    %37 = vector.broadcast %c2048_i32 : i32 to vector<1024x4xi32>
    %38 = arith.cmpi slt, %18, %37 : vector<1024x4xi32>
    %39 = arith.andi %36, %38 : vector<1024x4xi1>
    %cst_13 = arith.constant 0.000000e+00 : f32
    %40 = vector.shape_cast %14 : vector<1024x1xf32> to vector<1024x1xf32>
    %41 = vector.broadcast %40 : vector<1024x1xf32> to vector<1024x4xf32>
    %42 = vector.broadcast %cst_13 : f32 to vector<1024x4xf32>
    %43 = arith.select %39, %41, %42 : vector<1024x4xi1>, vector<1024x4xf32>
    %c0_14 = arith.constant 0 : index
    %c0_15 = arith.constant 0 : index
    %44 = vector.load %arg6[%c0_14, %c0_15] : memref<1x4xf32, #tpu.memory_space<vmem>>, vector<1x4xf32>
    %cst_16 = arith.constant dense<0.000000e+00> : vector<4xf32>
    %45 = vector.multi_reduction <add>, %43, %cst_16 [0] : vector<1024x4xf32> to vector<4xf32>
    %46 = vector.shape_cast %45 : vector<4xf32> to vector<1x4xf32>
    %47 = arith.addf %44, %46 : vector<1x4xf32>
    %c0_17 = arith.constant 0 : index
    %c0_18 = arith.constant 0 : index
    %48 = vector.load %arg6[%c0_17, %c0_18] : memref<1x4xf32, #tpu.memory_space<vmem>>, vector<1x4xf32>
    tpu.vector_store %arg6[%c0_17, %c0_18], %47 {strides = array<i32>} : memref<1x4xf32, #tpu.memory_space<vmem>>, vector<1x4xf32>,
    %c1_i32_19 = arith.constant 1 : i32
    %49 = arith.cmpi eq, %arg0, %c1_i32_19 : i32
    %50 = arith.extui %49 : i1 to i32
    %c0_i32_20 = arith.constant 0 : i32
    %51 = arith.cmpi ne, %50, %c0_i32_20 : i32
    scf.if %51 {
      %c0_21 = arith.constant 0 : index
      %c0_22 = arith.constant 0 : index
      %52 = vector.load %arg6[%c0_21, %c0_22] : memref<1x4xf32, #tpu.memory_space<vmem>>, vector<1x4xf32>
      %cst_23 = arith.constant 0.001953125 : f32
      %53 = vector.broadcast %cst_23 : f32 to vector<1x4xf32>
      %54 = arith.mulf %52, %53 : vector<1x4xf32>
      %cst_24 = arith.constant dense<0xFF800000> : vector<1xf32>
      %55 = vector.multi_reduction <maximumf>, %54, %cst_24 [1] : vector<1x4xf32> to vector<1xf32>
      %56 = vector.shape_cast %55 : vector<1xf32> to vector<1x1xf32>
      %57 = vector.broadcast %56 : vector<1x1xf32> to vector<1x4xf32>
      %58 = arith.subf %54, %57 : vector<1x4xf32>
      %59 = math.exp %58 : vector<1x4xf32>
      %cst_25 = arith.constant dense<0.000000e+00> : vector<1xf32>
      %60 = vector.multi_reduction <add>, %59, %cst_25 [1] : vector<1x4xf32> to vector<1xf32>
      %61 = vector.shape_cast %60 : vector<1xf32> to vector<1x1xf32>
      %62 = tpu.reciprocal %61 : vector<1x1xf32> -> vector<1x1xf32>
      %63 = vector.broadcast %62 : vector<1x1xf32> to vector<1x4xf32>
      %64 = arith.mulf %59, %63 : vector<1x4xf32>
      %c0_26 = arith.constant 0 : index
      %c0_27 = arith.constant 0 : index
      %65 = vector.load %arg5[%c0_26, %c0_27] : memref<1x4xf32, #tpu.memory_space<vmem>>, vector<1x4xf32>
      tpu.vector_store %arg5[%c0_26, %c0_27], %64 {strides = array<i32>} : memref<1x4xf32, #tpu.memory_space<vmem>>, vector<1x4xf32>,
    } else {
    }
    return
  }
  func.func @transform_0(%arg0: i32) -> (i32, i32) {
    %c0_i32 = arith.constant 0 : i32
    %c0_i32_0 = arith.constant 0 : i32
    return %arg0, %c0_i32 : i32, i32
  }
  func.func @transform_1(%arg0: i32) -> (i32, i32) {
    %c0_i32 = arith.constant 0 : i32
    %c0_i32_0 = arith.constant 0 : i32
    %c0_i32_1 = arith.constant 0 : i32
    return %c0_i32, %c0_i32_0 : i32, i32
  }
  func.func @transform_2(%arg0: i32) -> (i32, i32) {
    %c0_i32 = arith.constant 0 : i32
    %c0_i32_0 = arith.constant 0 : i32
    %c0_i32_1 = arith.constant 0 : i32
    return %c0_i32, %c0_i32_0 : i32, i32
  }
  func.func @transform_3(%arg0: i32) -> (i32, i32) {
    %c0_i32 = arith.constant 0 : i32
    %c0_i32_0 = arith.constant 0 : i32
    %c0_i32_1 = arith.constant 0 : i32
    return %c0_i32, %c0_i32_0 : i32, i32
  }
  func.func @transform_4(%arg0: i32) -> (i32, i32) {
    %c0_i32 = arith.constant 0 : i32
    %c0_i32_0 = arith.constant 0 : i32
    %c0_i32_1 = arith.constant 0 : i32
    return %c0_i32, %c0_i32_0 : i32, i32
  }
}

</mosaic_0001>

<bundles_post_ra>
// kernel: relation_agg.3
= control target key start
LH: loop header
LB: loop body
LE: loop exit
PB: predicated region body
PF: predicated region fallthrough
CT: control target
= control target key end

     0   :  { %7 = vsyncpa [#allocation4], 0  ;;  %s1493_s0 = inlined_call_operand.vmem [shape: f32[1,4], index: 0, kind: input, shape index: {}]   ;;  %s1494_s1 = inlined_call_operand.vmem [shape: f32[2048,128], index: 1, kind: input, shape index: {}]   ;;  %s1495_s2 = inlined_call_operand.hbm [shape: f32[512,128], index: 2, kind: output, shape index: {}]  }
   0x1   :  { %8 = vsyncpa [#allocation3], 0 }
   0x2   :  { %10 = vsyncpa [#allocation3 + $0x1], 0  ;;  %s1065_s9 = smov 0   ;;  %s1067_s10 = smov 0  }
   0x3   :  { %s1069_s11 = smov 0   ;;  %s1071_s12 = smov 0  }
   0x4 LB: > { %s1086_s13 = sadd.s32 4294967295, %s1044_s12   ;;  %s766_s14 = sadd.s32 4294967294, %s1044_s12   ;;  %s1044_s12 = sphi %s1071_s12, %s1502_s12   ;;  %s1040_s11 = sphi %s1069_s11, %s1501_s11   ;;  %s1036_s10 = sphi %s1067_s10, %s1500_s10   ;;  %s1032_s9 = sphi %s1065_s9, %s1499_s9  }
   0x5   : > { %s1090_s15 = sadd.s32 1, %s1044_s12   ;;  %s70_s16 = sadd.s32 1, %s1040_s11 }
   0x6   : > { %s67_s17 = ssub.s32 %s1044_s12, %s1090_s15  ;;  %p80_p0 = scmp.ne.s32.totalorder %s1040_s11, %s1036_s10 }
   0x7   : > { %p68_p1 = scmp.eq.s32.totalorder %s67_s17, 0  ;;  %p81_p2 = scmp.eq.s32.totalorder %s1086_s13, 1 }
   0x8   : > { %p86_p3 = scmp.ne.s32.totalorder %s1036_s10, %s1032_s9  ;;  %p87_p4 = scmp.eq.s32.totalorder %s766_s14, 1 }
   0x9   : > { %s1101_s18 = scalar_select %p68_p1, %s1040_s11, %s70_s16  }
   0xa   : > { %p1103_p5 = por %p81_p2, %p80_p0  ;;  %p1107_p6 = por %p87_p4, %p86_p3 }
   0xb   : > { %p767_p7 = scmp.ge.s32.totalorder %s1044_s12, 1  ;;  %p94_p8 = scmp.lt.s32.totalorder %s1044_s12, 3 }
   0xc   : > { %p925_p9 = scmp.eq.s32.totalorder %s1086_s13, 0  ;;  %s107_s24 = sshll.u32 %s1493_s0, 4  ;;  %s108_s24 = int_to_ptr.vmem [resolvable:$true] %s107_s24 }
   0xd   : > { %p1114_p10 = pnand %p767_p7, %p94_p8  ;;  %s963_s25 = scalar_lea.vmem %s108_s24, 16 }
   0xe   : > { %p964_p13 = scmp.ne.s32.totalorder %s108_s24, %s963_s25  ;;  %p971_p3 = scmp.lt.s32.totalorder %s108_s24, %s108_s24 }
   0xf   : > { %p917_p11 = pneg %p1114_p10  ;;  %p972_p4 = scmp.lt.s32.totalorder %s963_s25, %s963_s25 }
  0x11   : > { %p918_p12 = pnand %p925_p9, %p917_p11  ;;  %p973_p7 = por %p972_p4, %p971_p3 }
  0x13   : > { %p965_p0 = pneg %p918_p12 }
  0x15   : > { %p966_p1 = pnand %p965_p0, %p964_p13 }
  0x17   : > { %p967_p2 = pneg %p966_p1 }
  0x19   : > { %p974_p8 = pnand %p973_p7, %p967_p2 }
  0x1b   : > { %977 = shalt.err (!%p974_p8)
}
  0x1c   : > { %s1046_s26 = smov [#allocation2]   ;;  %129 = sbr.rel (%p1114_p10) target bundleno = 122 (0x7a), region = 28 }
  0x1d   : > { %920 = dma.vmem_to_smem (!%p918_p12), %s108_s24, 16, %s1046_s26, [#allocation4]  }
  0x23   : > { %1023 = dma.done.wait (%p925_p9), [#allocation4], 16  }
  0x24   : > { %1025 = vsyncadd (%p925_p9), [#allocation4], 4294967280 }
  0x25   : > { %135 = sfence }
  0x26   : > { %s773_s27 = sshll.u32 %s1086_s13, 7  ;;  %s159_s28 = sld [smem:[#allocation2]] }
  0x27   : > { %p153_p11 = scmp.lt.s32.totalorder %s773_s27, 255  ;;  %s806_s29 = sld [smem:[#allocation2 + $0x1]] }
  0x28   : > { %s839_s30 = sld [smem:[#allocation2 + $0x2]]  ;;  %s872_s4 = sld [smem:[#allocation2 + $0x3]] }
  0x29   : > { %s1504_s27 = smov (!%p153_p11, %s773_s27), 255  ;;  %s149_s5 = sand.u32 1, %s1036_s10  }
  0x2a   : > { %s774_s3 = sshll.u32 %s1504_s27, 3  ;;  %s1153_s14 = sshll.u32 %s149_s5, 8 }
  0x2b   : > { %s1136_s8 = scalar_lea.vmem %s1494_s1, %s774_s3  ;;  %s1203_s16 = scalar_lea.vmem [#allocation5], %s1153_s14 }
  0x2c   : > { %v160_v0 = vld [vmem:[%s1136_s8] ss:$4 sm:$0xff]  ;;  %v807_v1 = vld [vmem:[%s1136_s8 + $0x1] ss:$4 sm:$0xff]  ;;  %v840_v2 = vld [vmem:[%s1136_s8 + $0x2] ss:$4 sm:$0xff]  ;;  %v1141_v3 = vstv %s159_s28 }
  0x2d   : > { %v873_v4 = vld [vmem:[%s1136_s8 + $0x3] ss:$4 sm:$0xff]  ;;  %v775_v5 = vld [vmem:[%s1136_s8 + $0x20] ss:$4 sm:$0xff]  ;;  %v808_v6 = vld [vmem:[%s1136_s8 + $0x21] ss:$4 sm:$0xff]  ;;  %v224_v7 = vmul.f32 %v1141_v3, %v160_v0  ;;  %v1155_v12 = vstv %s806_s29 }
  0x2e   : > { %v225_v8 = vmul.f32 %v775_v5, %v1141_v3  ;;  %v841_v9 = vld [vmem:[%s1136_s8 + $0x22] ss:$4 sm:$0xff]  ;;  %v874_v10 = vld [vmem:[%s1136_s8 + $0x23] ss:$4 sm:$0xff]  ;;  %v776_v11 = vld [vmem:[%s1136_s8 + $0x40] ss:$4 sm:$0xff]  ;;  %v1157_v13 = vstv %s839_s30  ;;  %v322_v17 = vmul.f32 %v807_v1, %v1155_v12  ;;  %v323_v20 = vmul.f32 %v808_v6, %v1155_v12 }
  0x2f   : > { %v226_v14 = vmul.f32 %v776_v11, %v1141_v3  ;;  %v809_v15 = vld [vmem:[%s1136_s8 + $0x41] ss:$4 sm:$0xff]  ;;  %v842_v16 = vld [vmem:[%s1136_s8 + $0x42] ss:$4 sm:$0xff]  ;;  %v452_v18 = vmul.f32 %v840_v2, %v1157_v13  ;;  %v1164_v19 = vstv %s872_s4  ;;  %v875_v21 = vld [vmem:[%s1136_s8 + $0x43] ss:$4 sm:$0xff]  ;;  %v453_v25 = vmul.f32 %v841_v9, %v1157_v13 }
  0x30   : > { %v777_v22 = vld [vmem:[%s1136_s8 + $0x60] ss:$4 sm:$0xff]  ;;  %v810_v23 = vld [vmem:[%s1136_s8 + $0x61] ss:$4 sm:$0xff]  ;;  %v582_v24 = vmul.f32 %v873_v4, %v1164_v19  ;;  %v583_v26 = vmul.f32 %v874_v10, %v1164_v19  ;;  %v324_v27 = vmul.f32 %v809_v15, %v1155_v12  ;;  %v843_v28 = vld [vmem:[%s1136_s8 + $0x62] ss:$4 sm:$0xff]  ;;  %v354_v31 = vadd.f32 %v322_v17, %v224_v7 }
  0x31   : > { %v876_v29 = vld [vmem:[%s1136_s8 + $0x63] ss:$4 sm:$0xff]  ;;  %v778_v30 = vld [vmem:[%s1136_s8 + $0x80] ss:$4 sm:$0xff]  ;;  %v355_v32 = vadd.f32 %v323_v20, %v225_v8  ;;  %v454_v33 = vmul.f32 %v842_v16, %v1157_v13  ;;  %v584_v34 = vmul.f32 %v875_v21, %v1164_v19  ;;  %v811_v35 = vld [vmem:[%s1136_s8 + $0x81] ss:$4 sm:$0xff]  ;;  %v227_v38 = vmul.f32 %v777_v22, %v1141_v3 }
  0x32   : > { %v844_v36 = vld [vmem:[%s1136_s8 + $0x82] ss:$4 sm:$0xff]  ;;  %v356_v37 = vadd.f32 %v324_v27, %v226_v14  ;;  %v325_v39 = vmul.f32 %v810_v23, %v1155_v12  ;;  %v455_v40 = vmul.f32 %v843_v28, %v1157_v13  ;;  %v877_v41 = vld [vmem:[%s1136_s8 + $0x83] ss:$4 sm:$0xff]  ;;  %v779_v42 = vld [vmem:[%s1136_s8 + $0xa0] ss:$4 sm:$0xff]  ;;  %v484_v43 = vadd.f32 %v452_v18, %v354_v31 }
  0x33   : > { %v485_v44 = vadd.f32 %v453_v25, %v355_v32  ;;  %v585_v45 = vmul.f32 %v876_v29, %v1164_v19  ;;  %v228_v46 = vmul.f32 %v778_v30, %v1141_v3  ;;  %v812_v47 = vld [vmem:[%s1136_s8 + $0xa1] ss:$4 sm:$0xff]  ;;  %v845_v48 = vld [vmem:[%s1136_s8 + $0xa2] ss:$4 sm:$0xff]  ;;  %v326_v51 = vmul.f32 %v811_v35, %v1155_v12  ;;  %v878_v53 = vld [vmem:[%s1136_s8 + $0xa3] ss:$4 sm:$0xff] }
  0x34   : > { %v486_v49 = vadd.f32 %v454_v33, %v356_v37  ;;  %v357_v50 = vadd.f32 %v325_v39, %v227_v38  ;;  %v456_v52 = vmul.f32 %v844_v36, %v1157_v13  ;;  %v780_v54 = vld [vmem:[%s1136_s8 + $0xc0] ss:$4 sm:$0xff]  ;;  %v813_v55 = vld [vmem:[%s1136_s8 + $0xc1] ss:$4 sm:$0xff]  ;;  %v614_v56 = vadd.f32 %v582_v24, %v484_v43  ;;  %v846_v60 = vld [vmem:[%s1136_s8 + $0xc2] ss:$4 sm:$0xff] }
  0x35   : > { %v615_v57 = vadd.f32 %v583_v26, %v485_v44  ;;  %v586_v58 = vmul.f32 %v877_v41, %v1164_v19  ;;  %v229_v59 = vmul.f32 %v779_v42, %v1141_v3  ;;  %v358_v63 = vadd.f32 %v326_v51, %v228_v46  ;;  %v879_v1 = vld [vmem:[%s1136_s8 + $0xc3] ss:$4 sm:$0xff]  ;;  %v781_v2 = vld [vmem:[%s1136_s8 + $0xe0] ss:$4 sm:$0xff]  ;;  %v814_v4 = vld [vmem:[%s1136_s8 + $0xe1] ss:$4 sm:$0xff] }
  0x36   : > { %v616_v61 = vadd.f32 %v584_v34, %v486_v49  ;;  %v487_v62 = vadd.f32 %v455_v40, %v357_v50  ;;  %v327_v0 = vmul.f32 %v812_v47, %v1155_v12  ;;  %646 = vst [vmem:[%s1203_s16] sm:$0xff] %v614_v56  ;;  %v457_v5 = vmul.f32 %v845_v48, %v1157_v13  ;;  %v847_v9 = vld [vmem:[%s1136_s8 + $0xe2] ss:$4 sm:$0xff]  ;;  %v880_v10 = vld [vmem:[%s1136_s8 + $0xe3] ss:$4 sm:$0xff]  ;;  %v782_v17 = vld [vmem:[%s1136_s8 + $0x100] ss:$4 sm:$0xff] }
  0x37   : > { %647 = vst [vmem:[%s1203_s16 + $0x8] sm:$0xff] %v615_v57  ;;  %v587_v6 = vmul.f32 %v878_v53, %v1164_v19  ;;  %v230_v7 = vmul.f32 %v780_v54, %v1141_v3  ;;  %v328_v8 = vmul.f32 %v813_v55, %v1155_v12  ;;  %v488_v14 = vadd.f32 %v456_v52, %v358_v63  ;;  %v815_v18 = vld [vmem:[%s1136_s8 + $0x101] ss:$4 sm:$0xff]  ;;  %v848_v24 = vld [vmem:[%s1136_s8 + $0x102] ss:$4 sm:$0xff]  ;;  %s910_s17 = sshll.u32 %s1086_s13, 12 }
  0x38   : > { %648 = vst [vmem:[%s1203_s16 + $0x10] sm:$0xff] %v616_v61  ;;  %v617_v11 = vadd.f32 %v585_v45, %v487_v62  ;;  %v359_v15 = vadd.f32 %v327_v0, %v229_v59  ;;  %v458_v16 = vmul.f32 %v846_v60, %v1157_v13  ;;  %v588_v21 = vmul.f32 %v879_v1, %v1164_v19  ;;  %v881_v25 = vld [vmem:[%s1136_s8 + $0x103] ss:$4 sm:$0xff]  ;;  %v783_v26 = vld [vmem:[%s1136_s8 + $0x120] ss:$4 sm:$0xff]  ;;  %s692_s21 = sshll.u32 %s1203_s16, 4  ;;  %s1444_s24 = scalar_lea.hbm %s1495_s2, %s910_s17  ;;  %s1446_s21 = int_to_ptr.vmem [resolvable:$true] %s692_s21 }
  0x39   : > { %v360_v20 = vadd.f32 %v328_v8, %v230_v7  ;;  %v231_v22 = vmul.f32 %v781_v2, %v1141_v3  ;;  %v329_v23 = vmul.f32 %v814_v4, %v1155_v12  ;;  %v618_v27 = vadd.f32 %v586_v58, %v488_v14  ;;  %v816_v31 = vld [vmem:[%s1136_s8 + $0x121] ss:$4 sm:$0xff]  ;;  %v849_v32 = vld [vmem:[%s1136_s8 + $0x122] ss:$4 sm:$0xff]  ;;  %v882_v37 = vld [vmem:[%s1136_s8 + $0x123] ss:$4 sm:$0xff] }
  0x3a   : > { %649 = vst [vmem:[%s1203_s16 + $0x18] sm:$0xff] %v617_v11  ;;  %v489_v28 = vadd.f32 %v457_v5, %v359_v15  ;;  %v459_v29 = vmul.f32 %v847_v9, %v1157_v13  ;;  %v589_v30 = vmul.f32 %v880_v10, %v1164_v19  ;;  %v232_v35 = vmul.f32 %v782_v17, %v1141_v3  ;;  %v784_v38 = vld [vmem:[%s1136_s8 + $0x140] ss:$4 sm:$0xff]  ;;  %v817_v39 = vld [vmem:[%s1136_s8 + $0x141] ss:$4 sm:$0xff]  ;;  %s1452_s13 = scalar_lea.sflag [#allocation3], %s149_s5 }
  0x3b   : > { %v490_v33 = vadd.f32 %v458_v16, %v360_v20  ;;  %v361_v34 = vadd.f32 %v329_v23, %v231_v22  ;;  %v330_v36 = vmul.f32 %v815_v18, %v1155_v12  ;;  %650 = vst [vmem:[%s1203_s16 + $0x20] sm:$0xff] %v618_v27  ;;  %v460_v41 = vmul.f32 %v848_v24, %v1157_v13  ;;  %v850_v44 = vld [vmem:[%s1136_s8 + $0x142] ss:$4 sm:$0xff]  ;;  %v883_v49 = vld [vmem:[%s1136_s8 + $0x143] ss:$4 sm:$0xff]  ;;  %s978_s25 = scalar_lea.vmem %s1446_s21, 4096 }
  0x3c   : > { %v619_v40 = vadd.f32 %v587_v6, %v489_v28  ;;  %v590_v42 = vmul.f32 %v881_v25, %v1164_v19  ;;  %v233_v43 = vmul.f32 %v783_v26, %v1141_v3  ;;  %v331_v48 = vmul.f32 %v816_v31, %v1155_v12  ;;  %v785_v50 = vld [vmem:[%s1136_s8 + $0x160] ss:$4 sm:$0xff]  ;;  %v818_v51 = vld [vmem:[%s1136_s8 + $0x161] ss:$4 sm:$0xff]  ;;  %v851_v56 = vld [vmem:[%s1136_s8 + $0x162] ss:$4 sm:$0xff]  ;;  %p979_p9 = scmp.ne.s32.totalorder %s1446_s21, %s978_s25 }
  0x3d   : > { %v620_v45 = vadd.f32 %v588_v21, %v490_v33  ;;  %v491_v46 = vadd.f32 %v459_v29, %v361_v34  ;;  %v362_v47 = vadd.f32 %v330_v36, %v232_v35  ;;  %v461_v52 = vmul.f32 %v849_v32, %v1157_v13  ;;  %v884_v57 = vld [vmem:[%s1136_s8 + $0x163] ss:$4 sm:$0xff]  ;;  %v786_v62 = vld [vmem:[%s1136_s8 + $0x180] ss:$4 sm:$0xff]  ;;  %v819_v63 = vld [vmem:[%s1136_s8 + $0x181] ss:$4 sm:$0xff] }
  0x3e   : > { %651 = vst [vmem:[%s1203_s16 + $0x28] sm:$0xff] %v619_v40  ;;  %v591_v53 = vmul.f32 %v882_v37, %v1164_v19  ;;  %v234_v54 = vmul.f32 %v784_v38, %v1141_v3  ;;  %v332_v55 = vmul.f32 %v817_v39, %v1155_v12  ;;  %v363_v60 = vadd.f32 %v331_v48, %v233_v43  ;;  %v852_v5 = vld [vmem:[%s1136_s8 + $0x182] ss:$4 sm:$0xff]  ;;  %v885_v6 = vld [vmem:[%s1136_s8 + $0x183] ss:$4 sm:$0xff]  ;;  %p980_p10 = pnand %p979_p9, %p1103_p5  ;;  %s1047_s26 = smov [#allocation5]  }
  0x3f   : > { %652 = vst [vmem:[%s1203_s16 + $0x30] sm:$0xff] %v620_v45  ;;  %v621_v58 = vadd.f32 %v589_v30, %v491_v46  ;;  %v492_v59 = vadd.f32 %v460_v41, %v362_v47  ;;  %v462_v61 = vmul.f32 %v850_v44, %v1157_v13  ;;  %v592_v1 = vmul.f32 %v883_v49, %v1164_v19  ;;  %v787_v7 = vld [vmem:[%s1136_s8 + $0x1a0] ss:$4 sm:$0xff]  ;;  %v820_v14 = vld [vmem:[%s1136_s8 + $0x1a1] ss:$4 sm:$0xff]  ;;  %s982_s27 = sshll.u32 %s1047_s26, 4  ;;  %s983_s27 = int_to_ptr.vmem [resolvable:$false] %s982_s27 }
  0x40   : > { %v364_v0 = vadd.f32 %v332_v55, %v234_v54  ;;  %v235_v2 = vmul.f32 %v785_v50, %v1141_v3  ;;  %v333_v4 = vmul.f32 %v818_v51, %v1155_v12  ;;  %v493_v9 = vadd.f32 %v461_v52, %v363_v60  ;;  %v853_v15 = vld [vmem:[%s1136_s8 + $0x1a2] ss:$4 sm:$0xff]  ;;  %v886_v21 = vld [vmem:[%s1136_s8 + $0x1a3] ss:$4 sm:$0xff]  ;;  %v788_v22 = vld [vmem:[%s1136_s8 + $0x1c0] ss:$4 sm:$0xff]  ;;  %p981_p12 = pneg %p980_p10  ;;  %p985_p13 = scmp.lt.s32.totalorder %s1446_s21, %s983_s27 }
  0x41   : > { %653 = vst [vmem:[%s1203_s16 + $0x38] sm:$0xff] %v621_v58  ;;  %v622_v8 = vadd.f32 %v590_v42, %v492_v59  ;;  %v463_v10 = vmul.f32 %v851_v56, %v1157_v13  ;;  %v593_v11 = vmul.f32 %v884_v57, %v1164_v19  ;;  %v236_v18 = vmul.f32 %v786_v62, %v1141_v3  ;;  %v821_v23 = vld [vmem:[%s1136_s8 + $0x1c1] ss:$4 sm:$0xff]  ;;  %v854_v28 = vld [vmem:[%s1136_s8 + $0x1c2] ss:$4 sm:$0xff]  ;;  %s984_s28 = scalar_lea.vmem %s983_s27, 8192 }
  0x42   : > { %v494_v16 = vadd.f32 %v462_v61, %v364_v0  ;;  %v365_v17 = vadd.f32 %v333_v4, %v235_v2  ;;  %v334_v20 = vmul.f32 %v819_v63, %v1155_v12  ;;  %v623_v24 = vadd.f32 %v591_v53, %v493_v9  ;;  %v887_v33 = vld [vmem:[%s1136_s8 + $0x1c3] ss:$4 sm:$0xff]  ;;  %v789_v34 = vld [vmem:[%s1136_s8 + $0x1e0] ss:$4 sm:$0xff]  ;;  %v822_v35 = vld [vmem:[%s1136_s8 + $0x1e1] ss:$4 sm:$0xff]  ;;  %p986_p0 = scmp.lt.s32.totalorder %s984_s28, %s978_s25 }
  0x43   : > { %654 = vst [vmem:[%s1203_s16 + $0x40] sm:$0xff] %v622_v8  ;;  %v464_v25 = vmul.f32 %v852_v5, %v1157_v13  ;;  %v594_v26 = vmul.f32 %v885_v6, %v1164_v19  ;;  %v237_v27 = vmul.f32 %v787_v7, %v1141_v3  ;;  %v335_v32 = vmul.f32 %v820_v14, %v1155_v12  ;;  %v855_v40 = vld [vmem:[%s1136_s8 + $0x1e2] ss:$4 sm:$0xff]  ;;  %v888_v41 = vld [vmem:[%s1136_s8 + $0x1e3] ss:$4 sm:$0xff] }
  0x44   : > { %v624_v29 = vadd.f32 %v592_v1, %v494_v16  ;;  %v495_v30 = vadd.f32 %v463_v10, %v365_v17  ;;  %v366_v31 = vadd.f32 %v334_v20, %v236_v18  ;;  %655 = vst [vmem:[%s1203_s16 + $0x48] sm:$0xff] %v623_v24  ;;  %v465_v36 = vmul.f32 %v853_v15, %v1157_v13  ;;  %v790_v46 = vld [vmem:[%s1136_s8 + $0x200] ss:$4 sm:$0xff]  ;;  %v823_v47 = vld [vmem:[%s1136_s8 + $0x201] ss:$4 sm:$0xff]  ;;  %p987_p1 = por %p986_p0, %p985_p13 }
  0x45   : > { %v595_v37 = vmul.f32 %v886_v21, %v1164_v19  ;;  %v238_v38 = vmul.f32 %v788_v22, %v1141_v3  ;;  %v336_v39 = vmul.f32 %v821_v23, %v1155_v12  ;;  %v367_v44 = vadd.f32 %v335_v32, %v237_v27  ;;  %v856_v52 = vld [vmem:[%s1136_s8 + $0x202] ss:$4 sm:$0xff]  ;;  %v889_v53 = vld [vmem:[%s1136_s8 + $0x203] ss:$4 sm:$0xff]  ;;  %v791_v54 = vld [vmem:[%s1136_s8 + $0x220] ss:$4 sm:$0xff] }
  0x46   : > { %656 = vst [vmem:[%s1203_s16 + $0x50] sm:$0xff] %v624_v29  ;;  %v625_v42 = vadd.f32 %v593_v11, %v495_v30  ;;  %v496_v43 = vadd.f32 %v464_v25, %v366_v31  ;;  %v466_v45 = vmul.f32 %v854_v28, %v1157_v13  ;;  %v596_v49 = vmul.f32 %v887_v33, %v1164_v19  ;;  %v824_v59 = vld [vmem:[%s1136_s8 + $0x221] ss:$4 sm:$0xff]  ;;  %v857_v60 = vld [vmem:[%s1136_s8 + $0x222] ss:$4 sm:$0xff]  ;;  %p988_p2 = pnand %p987_p1, %p981_p12 }
  0x47   : > { %v368_v48 = vadd.f32 %v336_v39, %v238_v38  ;;  %v239_v50 = vmul.f32 %v789_v34, %v1141_v3  ;;  %v337_v51 = vmul.f32 %v822_v35, %v1155_v12  ;;  %v497_v56 = vadd.f32 %v465_v36, %v367_v44  ;;  %v890_v1 = vld [vmem:[%s1136_s8 + $0x223] ss:$4 sm:$0xff]  ;;  %v792_v2 = vld [vmem:[%s1136_s8 + $0x240] ss:$4 sm:$0xff]  ;;  %v825_v4 = vld [vmem:[%s1136_s8 + $0x241] ss:$4 sm:$0xff] }
  0x48   : > { %657 = vst [vmem:[%s1203_s16 + $0x58] sm:$0xff] %v625_v42  ;;  %v626_v55 = vadd.f32 %v594_v26, %v496_v43  ;;  %v467_v57 = vmul.f32 %v855_v40, %v1157_v13  ;;  %v597_v58 = vmul.f32 %v888_v41, %v1164_v19  ;;  %v240_v63 = vmul.f32 %v790_v46, %v1141_v3  ;;  %v858_v9 = vld [vmem:[%s1136_s8 + $0x242] ss:$4 sm:$0xff]  ;;  %v891_v16 = vld [vmem:[%s1136_s8 + $0x243] ss:$4 sm:$0xff] }
  0x49   : > { %v498_v61 = vadd.f32 %v466_v45, %v368_v48  ;;  %v369_v62 = vadd.f32 %v337_v51, %v239_v50  ;;  %v338_v0 = vmul.f32 %v823_v47, %v1155_v12  ;;  %v627_v5 = vadd.f32 %v595_v37, %v497_v56  ;;  %v793_v17 = vld [vmem:[%s1136_s8 + $0x260] ss:$4 sm:$0xff]  ;;  %v826_v18 = vld [vmem:[%s1136_s8 + $0x261] ss:$4 sm:$0xff]  ;;  %v859_v24 = vld [vmem:[%s1136_s8 + $0x262] ss:$4 sm:$0xff] }
  0x4a   : > { %658 = vst [vmem:[%s1203_s16 + $0x60] sm:$0xff] %v626_v55  ;;  %v468_v6 = vmul.f32 %v856_v52, %v1157_v13  ;;  %v598_v7 = vmul.f32 %v889_v53, %v1164_v19  ;;  %v241_v8 = vmul.f32 %v791_v54, %v1141_v3  ;;  %v339_v15 = vmul.f32 %v824_v59, %v1155_v12  ;;  %v892_v25 = vld [vmem:[%s1136_s8 + $0x263] ss:$4 sm:$0xff]  ;;  %v794_v30 = vld [vmem:[%s1136_s8 + $0x280] ss:$4 sm:$0xff] }
  0x4b   : > { %v628_v10 = vadd.f32 %v596_v49, %v498_v61  ;;  %v499_v11 = vadd.f32 %v467_v57, %v369_v62  ;;  %v370_v14 = vadd.f32 %v338_v0, %v240_v63  ;;  %659 = vst [vmem:[%s1203_s16 + $0x68] sm:$0xff] %v627_v5  ;;  %v469_v20 = vmul.f32 %v857_v60, %v1157_v13  ;;  %v827_v31 = vld [vmem:[%s1136_s8 + $0x281] ss:$4 sm:$0xff]  ;;  %v860_v36 = vld [vmem:[%s1136_s8 + $0x282] ss:$4 sm:$0xff] }
  0x4c   : > { %v599_v21 = vmul.f32 %v890_v1, %v1164_v19  ;;  %v242_v22 = vmul.f32 %v792_v2, %v1141_v3  ;;  %v340_v23 = vmul.f32 %v825_v4, %v1155_v12  ;;  %v371_v28 = vadd.f32 %v339_v15, %v241_v8  ;;  %v893_v37 = vld [vmem:[%s1136_s8 + $0x283] ss:$4 sm:$0xff]  ;;  %v795_v38 = vld [vmem:[%s1136_s8 + $0x2a0] ss:$4 sm:$0xff]  ;;  %v828_v43 = vld [vmem:[%s1136_s8 + $0x2a1] ss:$4 sm:$0xff] }
  0x4d   : > { %660 = vst [vmem:[%s1203_s16 + $0x70] sm:$0xff] %v628_v10  ;;  %v629_v26 = vadd.f32 %v597_v58, %v499_v11  ;;  %v500_v27 = vadd.f32 %v468_v6, %v370_v14  ;;  %v470_v29 = vmul.f32 %v858_v9, %v1157_v13  ;;  %v600_v33 = vmul.f32 %v891_v16, %v1164_v19  ;;  %v861_v44 = vld [vmem:[%s1136_s8 + $0x2a2] ss:$4 sm:$0xff]  ;;  %v894_v49 = vld [vmem:[%s1136_s8 + $0x2a3] ss:$4 sm:$0xff] }
  0x4e   : > { %v372_v32 = vadd.f32 %v340_v23, %v242_v22  ;;  %v243_v34 = vmul.f32 %v793_v17, %v1141_v3  ;;  %v341_v35 = vmul.f32 %v826_v18, %v1155_v12  ;;  %v501_v40 = vadd.f32 %v469_v20, %v371_v28  ;;  %v796_v50 = vld [vmem:[%s1136_s8 + $0x2c0] ss:$4 sm:$0xff]  ;;  %v829_v51 = vld [vmem:[%s1136_s8 + $0x2c1] ss:$4 sm:$0xff]  ;;  %v862_v56 = vld [vmem:[%s1136_s8 + $0x2c2] ss:$4 sm:$0xff] }
  0x4f   : > { %661 = vst [vmem:[%s1203_s16 + $0x78] sm:$0xff] %v629_v26  ;;  %v630_v39 = vadd.f32 %v598_v7, %v500_v27  ;;  %v471_v41 = vmul.f32 %v859_v24, %v1157_v13  ;;  %v601_v42 = vmul.f32 %v892_v25, %v1164_v19  ;;  %v244_v47 = vmul.f32 %v794_v30, %v1141_v3  ;;  %v895_v61 = vld [vmem:[%s1136_s8 + $0x2c3] ss:$4 sm:$0xff]  ;;  %v797_v62 = vld [vmem:[%s1136_s8 + $0x2e0] ss:$4 sm:$0xff] }
  0x50   : > { %v502_v45 = vadd.f32 %v470_v29, %v372_v32  ;;  %v373_v46 = vadd.f32 %v341_v35, %v243_v34  ;;  %v342_v48 = vmul.f32 %v827_v31, %v1155_v12  ;;  %v631_v52 = vadd.f32 %v599_v21, %v501_v40  ;;  %v830_v63 = vld [vmem:[%s1136_s8 + $0x2e1] ss:$4 sm:$0xff]  ;;  %v863_v5 = vld [vmem:[%s1136_s8 + $0x2e2] ss:$4 sm:$0xff]  ;;  %v896_v6 = vld [vmem:[%s1136_s8 + $0x2e3] ss:$4 sm:$0xff] }
  0x51   : > { %662 = vst [vmem:[%s1203_s16 + $0x80] sm:$0xff] %v630_v39  ;;  %v472_v53 = vmul.f32 %v860_v36, %v1157_v13  ;;  %v602_v54 = vmul.f32 %v893_v37, %v1164_v19  ;;  %v245_v55 = vmul.f32 %v795_v38, %v1141_v3  ;;  %v343_v60 = vmul.f32 %v828_v43, %v1155_v12  ;;  %v798_v11 = vld [vmem:[%s1136_s8 + $0x300] ss:$4 sm:$0xff]  ;;  %v831_v14 = vld [vmem:[%s1136_s8 + $0x301] ss:$4 sm:$0xff] }
  0x52   : > { %v632_v57 = vadd.f32 %v600_v33, %v502_v45  ;;  %v503_v58 = vadd.f32 %v471_v41, %v373_v46  ;;  %v374_v59 = vadd.f32 %v342_v48, %v244_v47  ;;  %663 = vst [vmem:[%s1203_s16 + $0x88] sm:$0xff] %v631_v52  ;;  %v473_v0 = vmul.f32 %v861_v44, %v1157_v13  ;;  %v864_v20 = vld [vmem:[%s1136_s8 + $0x302] ss:$4 sm:$0xff]  ;;  %v897_v21 = vld [vmem:[%s1136_s8 + $0x303] ss:$4 sm:$0xff] }
  0x53   : > { %v603_v1 = vmul.f32 %v894_v49, %v1164_v19  ;;  %v246_v2 = vmul.f32 %v796_v50, %v1141_v3  ;;  %v344_v4 = vmul.f32 %v829_v51, %v1155_v12  ;;  %v375_v9 = vadd.f32 %v343_v60, %v245_v55  ;;  %v799_v22 = vld [vmem:[%s1136_s8 + $0x320] ss:$4 sm:$0xff]  ;;  %v832_v27 = vld [vmem:[%s1136_s8 + $0x321] ss:$4 sm:$0xff]  ;;  %v865_v28 = vld [vmem:[%s1136_s8 + $0x322] ss:$4 sm:$0xff] }
  0x54   : > { %664 = vst [vmem:[%s1203_s16 + $0x90] sm:$0xff] %v632_v57  ;;  %v633_v7 = vadd.f32 %v601_v42, %v503_v58  ;;  %v504_v8 = vadd.f32 %v472_v53, %v374_v59  ;;  %v474_v10 = vmul.f32 %v862_v56, %v1157_v13  ;;  %v604_v16 = vmul.f32 %v895_v61, %v1164_v19  ;;  %v898_v33 = vld [vmem:[%s1136_s8 + $0x323] ss:$4 sm:$0xff]  ;;  %v800_v34 = vld [vmem:[%s1136_s8 + $0x340] ss:$4 sm:$0xff] }
  0x55   : > { %v376_v15 = vadd.f32 %v344_v4, %v246_v2  ;;  %v247_v17 = vmul.f32 %v797_v62, %v1141_v3  ;;  %v345_v18 = vmul.f32 %v830_v63, %v1155_v12  ;;  %v505_v24 = vadd.f32 %v473_v0, %v375_v9  ;;  %v833_v35 = vld [vmem:[%s1136_s8 + $0x341] ss:$4 sm:$0xff]  ;;  %v866_v40 = vld [vmem:[%s1136_s8 + $0x342] ss:$4 sm:$0xff]  ;;  %v899_v45 = vld [vmem:[%s1136_s8 + $0x343] ss:$4 sm:$0xff] }
  0x56   : > { %665 = vst [vmem:[%s1203_s16 + $0x98] sm:$0xff] %v633_v7  ;;  %v634_v23 = vadd.f32 %v602_v54, %v504_v8  ;;  %v475_v25 = vmul.f32 %v863_v5, %v1157_v13  ;;  %v605_v26 = vmul.f32 %v896_v6, %v1164_v19  ;;  %v248_v31 = vmul.f32 %v798_v11, %v1141_v3  ;;  %v801_v46 = vld [vmem:[%s1136_s8 + $0x360] ss:$4 sm:$0xff]  ;;  %v834_v47 = vld [vmem:[%s1136_s8 + $0x361] ss:$4 sm:$0xff] }
  0x57   : > { %v506_v29 = vadd.f32 %v474_v10, %v376_v15  ;;  %v377_v30 = vadd.f32 %v345_v18, %v247_v17  ;;  %v346_v32 = vmul.f32 %v831_v14, %v1155_v12  ;;  %v635_v36 = vadd.f32 %v603_v1, %v505_v24  ;;  %v867_v52 = vld [vmem:[%s1136_s8 + $0x362] ss:$4 sm:$0xff]  ;;  %v900_v53 = vld [vmem:[%s1136_s8 + $0x363] ss:$4 sm:$0xff]  ;;  %v802_v58 = vld [vmem:[%s1136_s8 + $0x380] ss:$4 sm:$0xff] }
  0x58   : > { %666 = vst [vmem:[%s1203_s16 + $0xa0] sm:$0xff] %v634_v23  ;;  %v476_v37 = vmul.f32 %v864_v20, %v1157_v13  ;;  %v606_v38 = vmul.f32 %v897_v21, %v1164_v19  ;;  %v249_v39 = vmul.f32 %v799_v22, %v1141_v3  ;;  %v347_v44 = vmul.f32 %v832_v27, %v1155_v12  ;;  %v835_v59 = vld [vmem:[%s1136_s8 + $0x381] ss:$4 sm:$0xff]  ;;  %v868_v0 = vld [vmem:[%s1136_s8 + $0x382] ss:$4 sm:$0xff] }
  0x59   : > { %v636_v41 = vadd.f32 %v604_v16, %v506_v29  ;;  %v507_v42 = vadd.f32 %v475_v25, %v377_v30  ;;  %v378_v43 = vadd.f32 %v346_v32, %v248_v31  ;;  %667 = vst [vmem:[%s1203_s16 + $0xa8] sm:$0xff] %v635_v36  ;;  %v477_v48 = vmul.f32 %v865_v28, %v1157_v13  ;;  %v901_v1 = vld [vmem:[%s1136_s8 + $0x383] ss:$4 sm:$0xff]  ;;  %v803_v2 = vld [vmem:[%s1136_s8 + $0x3a0] ss:$4 sm:$0xff] }
  0x5a   : > { %v607_v49 = vmul.f32 %v898_v33, %v1164_v19  ;;  %v250_v50 = vmul.f32 %v800_v34, %v1141_v3  ;;  %v348_v51 = vmul.f32 %v833_v35, %v1155_v12  ;;  %v379_v56 = vadd.f32 %v347_v44, %v249_v39  ;;  %v836_v8 = vld [vmem:[%s1136_s8 + $0x3a1] ss:$4 sm:$0xff]  ;;  %v869_v9 = vld [vmem:[%s1136_s8 + $0x3a2] ss:$4 sm:$0xff]  ;;  %v902_v16 = vld [vmem:[%s1136_s8 + $0x3a3] ss:$4 sm:$0xff] }
  0x5b   : > { %668 = vst [vmem:[%s1203_s16 + $0xb0] sm:$0xff] %v636_v41  ;;  %v637_v54 = vadd.f32 %v605_v26, %v507_v42  ;;  %v508_v55 = vadd.f32 %v476_v37, %v378_v43  ;;  %v478_v57 = vmul.f32 %v866_v40, %v1157_v13  ;;  %v608_v61 = vmul.f32 %v899_v45, %v1164_v19  ;;  %v804_v17 = vld [vmem:[%s1136_s8 + $0x3c0] ss:$4 sm:$0xff]  ;;  %v837_v18 = vld [vmem:[%s1136_s8 + $0x3c1] ss:$4 sm:$0xff] }
  0x5c   : > { %v380_v60 = vadd.f32 %v348_v51, %v250_v50  ;;  %v251_v62 = vmul.f32 %v801_v46, %v1141_v3  ;;  %v349_v63 = vmul.f32 %v834_v47, %v1155_v12  ;;  %v509_v5 = vadd.f32 %v477_v48, %v379_v56  ;;  %v870_v24 = vld [vmem:[%s1136_s8 + $0x3c2] ss:$4 sm:$0xff]  ;;  %v903_v29 = vld [vmem:[%s1136_s8 + $0x3c3] ss:$4 sm:$0xff]  ;;  %v805_v30 = vld [vmem:[%s1136_s8 + $0x3e0] ss:$4 sm:$0xff] }
  0x5d   : > { %669 = vst [vmem:[%s1203_s16 + $0xb8] sm:$0xff] %v637_v54  ;;  %v638_v4 = vadd.f32 %v606_v38, %v508_v55  ;;  %v479_v6 = vmul.f32 %v867_v52, %v1157_v13  ;;  %v609_v7 = vmul.f32 %v900_v53, %v1164_v19  ;;  %v252_v14 = vmul.f32 %v802_v58, %v1141_v3  ;;  %v838_v31 = vld [vmem:[%s1136_s8 + $0x3e1] ss:$4 sm:$0xff]  ;;  %v871_v36 = vld [vmem:[%s1136_s8 + $0x3e2] ss:$4 sm:$0xff] }
  0x5e   : > { %v510_v10 = vadd.f32 %v478_v57, %v380_v60  ;;  %v381_v11 = vadd.f32 %v349_v63, %v251_v62  ;;  %v350_v15 = vmul.f32 %v835_v59, %v1155_v12  ;;  %v639_v20 = vadd.f32 %v607_v49, %v509_v5  ;;  %v904_v41 = vld [vmem:[%s1136_s8 + $0x3e3] ss:$4 sm:$0xff] }
  0x5f   : > { %670 = vst [vmem:[%s1203_s16 + $0xc0] sm:$0xff] %v638_v4  ;;  %v480_v21 = vmul.f32 %v868_v0, %v1157_v13  ;;  %v610_v22 = vmul.f32 %v901_v1, %v1164_v19  ;;  %v253_v23 = vmul.f32 %v803_v2, %v1141_v3  ;;  %v351_v28 = vmul.f32 %v836_v8, %v1155_v12 }
  0x60   : > { %v640_v25 = vadd.f32 %v608_v61, %v510_v10  ;;  %v511_v26 = vadd.f32 %v479_v6, %v381_v11  ;;  %v382_v27 = vadd.f32 %v350_v15, %v252_v14  ;;  %671 = vst [vmem:[%s1203_s16 + $0xc8] sm:$0xff] %v639_v20  ;;  %v481_v32 = vmul.f32 %v869_v9, %v1157_v13 }
  0x61   : > { %v611_v33 = vmul.f32 %v902_v16, %v1164_v19  ;;  %v254_v34 = vmul.f32 %v804_v17, %v1141_v3  ;;  %v352_v35 = vmul.f32 %v837_v18, %v1155_v12  ;;  %v383_v39 = vadd.f32 %v351_v28, %v253_v23 }
  0x62   : > { %672 = vst [vmem:[%s1203_s16 + $0xd0] sm:$0xff] %v640_v25  ;;  %v641_v37 = vadd.f32 %v609_v7, %v511_v26  ;;  %v512_v38 = vadd.f32 %v480_v21, %v382_v27  ;;  %v482_v40 = vmul.f32 %v870_v24, %v1157_v13  ;;  %v612_v43 = vmul.f32 %v903_v29, %v1164_v19 }
  0x63   : > { %v384_v42 = vadd.f32 %v352_v35, %v254_v34  ;;  %v255_v44 = vmul.f32 %v805_v30, %v1141_v3  ;;  %v353_v45 = vmul.f32 %v838_v31, %v1155_v12  ;;  %v513_v47 = vadd.f32 %v481_v32, %v383_v39 }
  0x64   : > { %673 = vst [vmem:[%s1203_s16 + $0xd8] sm:$0xff] %v641_v37  ;;  %v642_v46 = vadd.f32 %v610_v22, %v512_v38  ;;  %v483_v48 = vmul.f32 %v871_v36, %v1157_v13  ;;  %v613_v51 = vmul.f32 %v904_v41, %v1164_v19 }
  0x65   : > { %v514_v49 = vadd.f32 %v482_v40, %v384_v42  ;;  %v385_v50 = vadd.f32 %v353_v45, %v255_v44  ;;  %v643_v52 = vadd.f32 %v611_v33, %v513_v47 }
  0x66   : > { %674 = vst [vmem:[%s1203_s16 + $0xe0] sm:$0xff] %v642_v46 }
  0x67   : > { %v644_v3 = vadd.f32 %v612_v43, %v514_v49  ;;  %v515_v53 = vadd.f32 %v483_v48, %v385_v50  ;;  %675 = vst [vmem:[%s1203_s16 + $0xe8] sm:$0xff] %v643_v52 }
  0x69   : > { %676 = vst [vmem:[%s1203_s16 + $0xf0] sm:$0xff] %v644_v3  ;;  %v645_v12 = vadd.f32 %v613_v51, %v515_v53 }
  0x6b   : > { %677 = vst [vmem:[%s1203_s16 + $0xf8] sm:$0xff] %v645_v12 }
  0x6c   : > { %991 = shalt.err (!%p988_p2)
}
  0x6d   : > { %s992_s29 = scalar_lea.hbm %s1444_s24, 4096  ;;  %s996_s4 = scalar_lea.hbm %s1495_s2, 8192 }
  0x6e   : > { %p993_p3 = scmp.ne.s32.totalorder %s1444_s24, %s992_s29  ;;  %p997_p8 = scmp.lt.u32.totalorder %s1444_s24, %s1495_s2 }
  0x6f   : > { %p998_p11 = scmp.lt.u32.totalorder %s996_s4, %s992_s29  ;;  %p1000_p10 = scmp.lt.u32.totalorder %s992_s29, %s1444_s24 }
  0x70   : > { %p994_p4 = pnand %p993_p3, %p1103_p5 }
  0x71   : > { %p999_p9 = por %p998_p11, %p997_p8 }
  0x72   : > { %p995_p7 = pneg %p994_p4 }
  0x73   : > { %p1001_p12 = por %p1000_p10, %p999_p9 }
  0x75   : > { %p1002_p13 = pnand %p1001_p12, %p995_p7 }
  0x77   : > { %1005 = shalt.err (!%p1002_p13)
}
  0x78   : > { %s1048_s7 = smov 128   ;;  %s1049_s8 = smov 8  }
  0x79   : > { %915 = dma.vmem_to_hbm [thread:$0]  (%p1103_p5), %s1446_s21, 4096, %s1444_s24, %s1452_s13, %s1048_s7, %s1048_s7, %s1049_s8  }
  0x7a PF: > { %p927_p0 = scmp.ge.s32.totalorder %s1044_s12, 2  ;;  %s707_s14 = sand.u32 1, %s1032_s9  }
  0x7b   : > { %s708_s16 = scalar_lea.sflag [#allocation3], %s707_s14 }
  0x7c   : > { %p922_p1 = pnand %p927_p0, %p1107_p6 }
  0x7e   : > { %1027 = dma.done.wait (!%p922_p1), %s708_s16, 4096  }
  0x7f   : > { %1029 = vsyncadd (!%p922_p1), %s708_s16, 4294963200  ;;  %p13_p2 = scmp.ge.s32.totalorder %s1090_s15, 4   ;;  %s1499_s9 = smov %s1036_s10 }
  0x80   : > { %s1500_s10 = smov %s1040_s11  ;;  %s1501_s11 = smov %s1101_s18 }
  0x81   : > { %s1502_s12 = smov %s1090_s15  ;;  %15 = sbr.rel (!%p13_p2) target bundleno = 4 (0x4), region = 195 }
  0x88   :  { %713 = vsyncpa [#allocation3], 1 }
  0x89   :  { %715 = vsyncpa [#allocation3 + $0x1], 1 }
  0x8a   :  { %716 = vsyncpa [#allocation4], 1 }
  0x8b   :  { %718 = vsyncpa [#allocation4 + $0x1], 1 }

// kernel: relation_agg.2
= control target key start
LH: loop header
LB: loop body
LE: loop exit
PB: predicated region body
PF: predicated region fallthrough
CT: control target
= control target key end

     0   :  { %9 = vsyncpa [#allocation4], 0  ;;  %s8978_s0 = inlined_call_operand.hbm [shape: f32[2048,128], index: 0, kind: input, shape index: {}]   ;;  %s8979_s1 = inlined_call_operand.vmem [shape: f32[128,32], index: 1, kind: input, shape index: {}]   ;;  %s8980_s2 = inlined_call_operand.vmem [shape: f32[1,32], index: 2, kind: input, shape index: {}]   ;;  %s8981_s3 = inlined_call_operand.vmem [shape: f32[1,32], index: 3, kind: input, shape index: {}]   ;;  %s8982_s4 = inlined_call_operand.vmem [shape: f32[1,4], index: 4, kind: output, shape index: {}]  }
   0x1   :  { %11 = vsyncpa [#allocation4 + $0x1], 0  ;;  %s5309_s15 = smov 0   ;;  %s5311_s16 = smov 0  }
   0x2   :  { %s5313_s17 = smov 0   ;;  %s5315_s18 = smov 0  }
   0x3 LB: > { %s5328_s19 = sadd.s32 4294967295, %s5278_s18   ;;  %s5331_s20 = sadd.s32 1, %s5278_s18   ;;  %s5278_s18 = sphi %s5315_s18, %s9489_s18   ;;  %s5274_s17 = sphi %s5313_s17, %s9488_s17   ;;  %s5270_s16 = sphi %s5311_s16, %s9487_s16   ;;  %s5266_s15 = sphi %s5309_s15, %s9486_s15  }
   0x4   : > { %s21_s21 = ssub.s32 %s5278_s18, %s5331_s20  ;;  %s24_s22 = sadd.s32 1, %s5274_s17 }
   0x5   : > { %p22_p0 = scmp.eq.s32.totalorder %s21_s21, 0  ;;  %p31_p1 = scmp.ne.s32.totalorder %s5274_s17, %s5270_s16 }
   0x6   : > { %p32_p2 = scmp.eq.s32.totalorder %s5278_s18, 0  ;;  %p37_p3 = scmp.ne.s32.totalorder %s5270_s16, %s5266_s15 }
   0x7   : > { %s5341_s23 = scalar_select %p22_p0, %s5274_s17, %s24_s22  }
   0x8   : > { %p33_p4 = por %p32_p2, %p31_p1  ;;  %p38_p5 = scmp.eq.s32.totalorder %s5328_s19, 0 }
   0x9   : > { %p4912_p6 = scmp.lt.s32.totalorder %s5278_s18, 2  ;;  %s154_s25 = sand.u32 1, %s5274_s17  }
   0xa   : > { %p5345_p7 = por %p38_p5, %p37_p3  ;;  %s4349_s26 = sshll.u32 %s154_s25, 10 }
   0xb   : > { %s4489_s27 = sshll.u32 %s5278_s18, 14  ;;  %s158_s5 = scalar_lea.vmem [#allocation3], %s4349_s26 }
   0xc   : > { %s5354_s30 = scalar_lea.hbm %s8978_s0, %s4489_s27  ;;  %s165_s6 = sshll.u32 %s158_s5, 4  ;;  %s5356_s6 = int_to_ptr.vmem [resolvable:$true] %s165_s6 }
   0xd   : > { %p5358_p8 = pnand %p4912_p6, %p33_p4  ;;  %s5363_s8 = scalar_lea.sflag [#allocation4], %s154_s25 }
   0xe   : > { %s5214_s9 = scalar_lea.hbm %s5354_s30, 16384  ;;  %s5219_s12 = scalar_lea.hbm %s8978_s0, 32768 }
   0xf   : > { %p5215_p10 = scmp.ne.s32.totalorder %s5354_s30, %s5214_s9  ;;  %p5216_p11 = pneg %p5358_p8 }
  0x10   : > { %p5220_p0 = scmp.lt.u32.totalorder %s5354_s30, %s8978_s0  ;;  %p5221_p1 = scmp.lt.u32.totalorder %s5219_s12, %s5214_s9 }
  0x11   : > { %p5217_p12 = pnand %p5216_p11, %p5215_p10  ;;  %p5223_p3 = scmp.lt.u32.totalorder %s5214_s9, %s5354_s30 }
  0x12   : > { %p5222_p2 = por %p5221_p1, %p5220_p0 }
  0x13   : > { %p5218_p13 = pneg %p5217_p12 }
  0x14   : > { %p5224_p4 = por %p5223_p3, %p5222_p2 }
  0x16   : > { %p5225_p5 = pnand %p5224_p4, %p5218_p13 }
  0x18   : > { %5228 = shalt.err (!%p5225_p5)
}
  0x19   : > { %s5229_s15 = scalar_lea.vmem %s5356_s6, 16384  ;;  %s5280_s21 = smov [#allocation3]  }
  0x1a   : > { %p5230_p6 = scmp.ne.s32.totalorder %s5356_s6, %s5229_s15  ;;  %s5234_s22 = sshll.u32 %s5280_s21, 4  ;;  %s5235_s22 = int_to_ptr.vmem [resolvable:$false] %s5234_s22 }
  0x1b   : > { %s5236_s25 = scalar_lea.vmem %s5235_s22, 32768  ;;  %p5237_p9 = scmp.lt.s32.totalorder %s5356_s6, %s5235_s22 }
  0x1c   : > { %p5232_p10 = pnand %p5230_p6, %p5216_p11  ;;  %p5238_p0 = scmp.lt.s32.totalorder %s5236_s25, %s5229_s15 }
  0x1e   : > { %p5233_p12 = pneg %p5232_p10  ;;  %p5239_p1 = por %p5238_p0, %p5237_p9 }
  0x20   : > { %p5240_p2 = pnand %p5239_p1, %p5233_p12 }
  0x22   : > { %5243 = shalt.err (!%p5240_p2)
}
  0x23   : > { %s5281_s26 = smov 128   ;;  %s5282_s27 = smov 8  }
  0x24   : > { %4911 = dma.hbm_to_vmem [thread:$0]  (!%p5358_p8), %s5354_s30, 16384, %s5356_s6, %s5363_s8, %s5281_s26, %s5281_s26, %s5282_s27  }
  0x25   : > { %p173_p11 = scmp.lt.s32.totalorder %s5278_s18, 3  ;;  %p9010_p13 = scmp.ge.s32.totalorder %s5278_s18, 1 }
  0x27   : > { %p174_p3 = pnand %p9010_p13, %p173_p11 }
  0x29   : > { %177 = sbr.rel (%p174_p3) target bundleno = 1353 (0x549), region = 36 }
  0x30   : > { %s179_s28 = sand.u32 1, %s5270_s16  }
  0x31   : > { %s4353_s29 = sshll.u32 %s179_s28, 10  ;;  %s180_s5 = scalar_lea.sflag [#allocation4], %s179_s28 }
  0x32   : > { %s5395_s9 = scalar_lea.vmem [#allocation3], %s4353_s29 }
  0x33   : > { %5261 = dma.done.wait (%p5345_p7), %s180_s5, 16384  }
  0x34   : > { %5263 = vsyncadd (%p5345_p7), %s180_s5, 4294950912  ;;  %p4354_p9 = scmp.ne.s32.totalorder %s5328_s19, 0 }
  0x35   : > { %vm208_vm0 = vcmask (!%p4354_p9), 24576   ;;  %v5283_v0 = vmov (!%p4354_p9), 0.0  }
  0x36   : > { %207 = sbr.rel (%p4354_p9) target bundleno = 61 (0x3d), region = 44  ;;  %209 = vst.msk [vmem:[#allocation2] sm:$0x1] (!%p4354_p9), %vm208_vm0, %v5283_v0 }
  0x3d PF: > { %v338_v1 = vld [vmem:[%s8979_s1] sm:$0xff]  ;;  %v339_v2 = vld [vmem:[%s8979_s1 + $0x8] sm:$0xff]  ;;  %v340_v3 = vld [vmem:[%s8979_s1 + $0x10] sm:$0xff]  ;;  %vm9004_vm1 = vcmask 261120   ;;  %s4357_s26 = sshll.u32 %s5328_s19, 10  ;;  %p4486_p7 = scmp.ne.s32.totalorder %s5328_s19, 1 }
  0x3e   : > { %v4858_v4 = vpack.c.bf16 %v339_v2, %v338_v1  ;;  %v341_v5 = vld [vmem:[%s8979_s1 + $0x18] sm:$0xff]  ;;  %v342_v7 = vld [vmem:[%s8979_s1 + $0x20] sm:$0xff]  ;;  %v343_v8 = vld [vmem:[%s8979_s1 + $0x28] sm:$0xff] }
  0x3f   : > { %v4862_v6 = vpack.c.bf16 %v341_v5, %v340_v3  ;;  %v4866_v9 = vpack.c.bf16 %v343_v8, %v342_v7  ;;  %v210_v10 = vld [vmem:[%s5395_s9] sm:$0xff]  ;;  %v344_v11 = vld [vmem:[%s8979_s1 + $0x30] sm:$0xff]  ;;  %v345_v12 = vld [vmem:[%s8979_s1 + $0x38] sm:$0xff] }
  0x40   : > { %4859 = vmatprep.subr.bf16.mxu0 %v4858_v4  ;;  %4890 = vmatprep.subr.bf16.mxu1 %v4858_v4  ;;  %v4870_v13 = vpack.c.bf16 %v345_v12, %v344_v11  ;;  %v346_v14 = vld [vmem:[%s8979_s1 + $0x40] sm:$0xff]  ;;  %v347_v15 = vld [vmem:[%s8979_s1 + $0x48] sm:$0xff]  ;;  %v348_v17 = vld [vmem:[%s8979_s1 + $0x50] sm:$0xff] }
  0x41   : > { %4861 = vmatpush3.bf16.msra.mxu0 %v4858_v4  ;;  %4898 = vmatpush3.bf16.msra.mxu1 %v4858_v4  ;;  %v4874_v16 = vpack.c.bf16 %v347_v15, %v346_v14  ;;  %v349_v18 = vld [vmem:[%s8979_s1 + $0x58] sm:$0xff]  ;;  %v350_v20 = vld [vmem:[%s8979_s1 + $0x60] sm:$0xff]  ;;  %v351_v21 = vld [vmem:[%s8979_s1 + $0x68] sm:$0xff] }
  0x42   : > { %4863 = vmatprep.subr.bf16.mxu0 %v4862_v6  ;;  %4891 = vmatprep.subr.bf16.mxu1 %v4862_v6  ;;  %v4878_v19 = vpack.c.bf16 %v349_v18, %v348_v17  ;;  %v4882_v22 = vpack.c.bf16 %v351_v21, %v350_v20  ;;  %v352_v23 = vld [vmem:[%s8979_s1 + $0x70] sm:$0xff]  ;;  %v353_v24 = vld [vmem:[%s8979_s1 + $0x78] sm:$0xff]  ;;  %v274_v26 = vld [vmem:[%s5395_s9 + $0x200] sm:$0xff] }
  0x43   : > { %4666 = vmatprep.mubr.f32.mxu0 %v210_v10  ;;  %v4886_v25 = vpack.c.bf16 %v353_v24, %v352_v23  ;;  %v211_v27 = vld [vmem:[%s5395_s9 + $0x8] sm:$0xff]  ;;  %v212_v29 = vld [vmem:[%s5395_s9 + $0x10] sm:$0xff]  ;;  %4762 = vmatprep.mubr.f32.mxu1 %v274_v26  ;;  %v213_v31 = vld [vmem:[%s5395_s9 + $0x18] sm:$0xff] }
  0x44   : > { %v275_v28 = vld [vmem:[%s5395_s9 + $0x208] sm:$0xff]  ;;  %v276_v30 = vld [vmem:[%s5395_s9 + $0x210] sm:$0xff]  ;;  %v277_v32 = vld [vmem:[%s5395_s9 + $0x218] sm:$0xff] }
  0x45   : > { %4865 = vmatpush3.bf16.msra.mxu0 %v4862_v6  ;;  %4899 = vmatpush3.bf16.msra.mxu1 %v4862_v6  ;;  %v214_v33 = vld [vmem:[%s5395_s9 + $0x20] sm:$0xff]  ;;  %v215_v35 = vld [vmem:[%s5395_s9 + $0x28] sm:$0xff]  ;;  %v216_v37 = vld [vmem:[%s5395_s9 + $0x30] sm:$0xff] }
  0x46   : > { %4867 = vmatprep.subr.bf16.mxu0 %v4866_v9  ;;  %4892 = vmatprep.subr.bf16.mxu1 %v4866_v9  ;;  %v278_v34 = vld [vmem:[%s5395_s9 + $0x220] sm:$0xff]  ;;  %v279_v36 = vld [vmem:[%s5395_s9 + $0x228] sm:$0xff]  ;;  %v280_v38 = vld [vmem:[%s5395_s9 + $0x230] sm:$0xff] }
  0x47   : > { %v217_v39 = vld [vmem:[%s5395_s9 + $0x38] sm:$0xff]  ;;  %v218_v41 = vld [vmem:[%s5395_s9 + $0x40] sm:$0xff]  ;;  %v219_v43 = vld [vmem:[%s5395_s9 + $0x48] sm:$0xff] }
  0x48   : > { %v281_v40 = vld [vmem:[%s5395_s9 + $0x238] sm:$0xff]  ;;  %v282_v42 = vld [vmem:[%s5395_s9 + $0x240] sm:$0xff]  ;;  %v283_v44 = vld [vmem:[%s5395_s9 + $0x248] sm:$0xff] }
  0x49   : > { %4869 = vmatpush3.bf16.msra.mxu0 %v4866_v9  ;;  %4900 = vmatpush3.bf16.msra.mxu1 %v4866_v9  ;;  %v220_v45 = vld [vmem:[%s5395_s9 + $0x50] sm:$0xff]  ;;  %v221_v47 = vld [vmem:[%s5395_s9 + $0x58] sm:$0xff]  ;;  %v222_v49 = vld [vmem:[%s5395_s9 + $0x60] sm:$0xff] }
  0x4a   : > { %4871 = vmatprep.subr.bf16.mxu0 %v4870_v13  ;;  %4893 = vmatprep.subr.bf16.mxu1 %v4870_v13  ;;  %v284_v46 = vld [vmem:[%s5395_s9 + $0x250] sm:$0xff]  ;;  %v285_v48 = vld [vmem:[%s5395_s9 + $0x258] sm:$0xff]  ;;  %v286_v50 = vld [vmem:[%s5395_s9 + $0x260] sm:$0xff] }
  0x4b   : > { %v223_v51 = vld [vmem:[%s5395_s9 + $0x68] sm:$0xff]  ;;  %v224_v53 = vld [vmem:[%s5395_s9 + $0x70] sm:$0xff]  ;;  %v225_v55 = vld [vmem:[%s5395_s9 + $0x78] sm:$0xff] }
  0x4c   : > { %v287_v52 = vld [vmem:[%s5395_s9 + $0x268] sm:$0xff]  ;;  %v288_v54 = vld [vmem:[%s5395_s9 + $0x270] sm:$0xff]  ;;  %v289_v56 = vld [vmem:[%s5395_s9 + $0x278] sm:$0xff] }
  0x4d   : > { %4873 = vmatpush3.bf16.msra.mxu0 %v4870_v13  ;;  %4901 = vmatpush3.bf16.msra.mxu1 %v4870_v13  ;;  %v226_v57 = vld [vmem:[%s5395_s9 + $0x80] sm:$0xff]  ;;  %v227_v59 = vld [vmem:[%s5395_s9 + $0x88] sm:$0xff]  ;;  %v228_v61 = vld [vmem:[%s5395_s9 + $0x90] sm:$0xff] }
  0x4e   : > { %4875 = vmatprep.subr.bf16.mxu0 %v4874_v16  ;;  %4894 = vmatprep.subr.bf16.mxu1 %v4874_v16  ;;  %v290_v58 = vld [vmem:[%s5395_s9 + $0x280] sm:$0xff]  ;;  %v291_v60 = vld [vmem:[%s5395_s9 + $0x288] sm:$0xff]  ;;  %v292_v62 = vld [vmem:[%s5395_s9 + $0x290] sm:$0xff] }
  0x4f   : > { %v229_v63 = vld [vmem:[%s5395_s9 + $0x98] sm:$0xff]  ;;  %v230_v1 = vld [vmem:[%s5395_s9 + $0xa0] sm:$0xff]  ;;  %v231_v3 = vld [vmem:[%s5395_s9 + $0xa8] sm:$0xff] }
  0x50   : > { %v293_v0 = vld [vmem:[%s5395_s9 + $0x298] sm:$0xff]  ;;  %v294_v2 = vld [vmem:[%s5395_s9 + $0x2a0] sm:$0xff]  ;;  %v295_v4 = vld [vmem:[%s5395_s9 + $0x2a8] sm:$0xff] }
  0x51   : > { %4877 = vmatpush3.bf16.msra.mxu0 %v4874_v16  ;;  %4902 = vmatpush3.bf16.msra.mxu1 %v4874_v16  ;;  %v232_v5 = vld [vmem:[%s5395_s9 + $0xb0] sm:$0xff]  ;;  %v233_v7 = vld [vmem:[%s5395_s9 + $0xb8] sm:$0xff]  ;;  %v234_v9 = vld [vmem:[%s5395_s9 + $0xc0] sm:$0xff] }
  0x52   : > { %4879 = vmatprep.subr.bf16.mxu0 %v4878_v19  ;;  %4895 = vmatprep.subr.bf16.mxu1 %v4878_v19  ;;  %v296_v6 = vld [vmem:[%s5395_s9 + $0x2b0] sm:$0xff]  ;;  %v297_v8 = vld [vmem:[%s5395_s9 + $0x2b8] sm:$0xff]  ;;  %v298_v10 = vld [vmem:[%s5395_s9 + $0x2c0] sm:$0xff] }
  0x53   : > { %v235_v11 = vld [vmem:[%s5395_s9 + $0xc8] sm:$0xff]  ;;  %v236_v13 = vld [vmem:[%s5395_s9 + $0xd0] sm:$0xff]  ;;  %v237_v15 = vld [vmem:[%s5395_s9 + $0xd8] sm:$0xff] }
  0x54   : > { %v299_v12 = vld [vmem:[%s5395_s9 + $0x2c8] sm:$0xff]  ;;  %v300_v14 = vld [vmem:[%s5395_s9 + $0x2d0] sm:$0xff]  ;;  %v301_v16 = vld [vmem:[%s5395_s9 + $0x2d8] sm:$0xff] }
  0x55   : > { %4881 = vmatpush3.bf16.msra.mxu0 %v4878_v19  ;;  %4903 = vmatpush3.bf16.msra.mxu1 %v4878_v19  ;;  %v238_v17 = vld [vmem:[%s5395_s9 + $0xe0] sm:$0xff]  ;;  %v239_v19 = vld [vmem:[%s5395_s9 + $0xe8] sm:$0xff]  ;;  %v240_v21 = vld [vmem:[%s5395_s9 + $0xf0] sm:$0xff] }
  0x56   : > { %4883 = vmatprep.subr.bf16.mxu0 %v4882_v22  ;;  %4896 = vmatprep.subr.bf16.mxu1 %v4882_v22  ;;  %v302_v18 = vld [vmem:[%s5395_s9 + $0x2e0] sm:$0xff]  ;;  %v303_v20 = vld [vmem:[%s5395_s9 + $0x2e8] sm:$0xff]  ;;  %v241_v23 = vld [vmem:[%s5395_s9 + $0xf8] sm:$0xff] }
  0x57   : > { %v305_v24 = vld [vmem:[%s5395_s9 + $0x2f8] sm:$0xff]  ;;  %v306_v26 = vld [vmem:[%s5395_s9 + $0x300] sm:$0xff] }
  0x59   : > { %4885 = vmatpush3.bf16.msra.mxu0 %v4882_v22  ;;  %4904 = vmatpush3.bf16.msra.mxu1 %v4882_v22  ;;  %v304_v22 = vld [vmem:[%s5395_s9 + $0x2f0] sm:$0xff] }
  0x5a   : > { %4887 = vmatprep.subr.bf16.mxu0 %v4886_v25  ;;  %4897 = vmatprep.subr.bf16.mxu1 %v4886_v25 }
  0x5d   : > { %4889 = vmatpush3.bf16.msra.mxu0 %v4886_v25  ;;  %4905 = vmatpush3.bf16.msra.mxu1 %v4886_v25  ;;  %v242_v25 = vld [vmem:[%s5395_s9 + $0x100] sm:$0xff] }
  0x60   : > { %4667 = vmatmul.mubr.f32.vlgmr.msra.gmra.mrb[0].mxu0 %v211_v27  ;;  %4763 = vmatmul.mubr.f32.vlgmr.msra.gmra.mrb[0].mxu1 %v275_v28  ;;  %v243_v27 = vld [vmem:[%s5395_s9 + $0x108] sm:$0xff] }
  0x61   : > { %4669 = vmatprep.mubr.f32.mxu0 %v212_v29  ;;  %4765 = vmatprep.mubr.f32.mxu1 %v276_v30  ;;  %v307_v28 = vld [vmem:[%s5395_s9 + $0x308] sm:$0xff]  ;;  %v244_v29 = vld [vmem:[%s5395_s9 + $0x110] sm:$0xff] }
  0x62   : > { %v308_v30 = vld [vmem:[%s5395_s9 + $0x310] sm:$0xff] }
  0x64   : > { %4670 = vmatmul.mubr.f32.gmra.mrb[2].mxu0 %v213_v31  ;;  %4766 = vmatmul.mubr.f32.gmra.mrb[2].mxu1 %v277_v32  ;;  %v245_v31 = vld [vmem:[%s5395_s9 + $0x118] sm:$0xff] }
  0x65   : > { %4672 = vmatprep.mubr.f32.mxu0 %v214_v33  ;;  %4768 = vmatprep.mubr.f32.mxu1 %v278_v34  ;;  %v309_v32 = vld [vmem:[%s5395_s9 + $0x318] sm:$0xff]  ;;  %v246_v33 = vld [vmem:[%s5395_s9 + $0x120] sm:$0xff] }
  0x66   : > { %v310_v34 = vld [vmem:[%s5395_s9 + $0x320] sm:$0xff] }
  0x68   : > { %4673 = vmatmul.mubr.f32.gmra.mrb[4].mxu0 %v215_v35  ;;  %4769 = vmatmul.mubr.f32.gmra.mrb[4].mxu1 %v279_v36  ;;  %v247_v35 = vld [vmem:[%s5395_s9 + $0x128] sm:$0xff] }
  0x69   : > { %4675 = vmatprep.mubr.f32.mxu0 %v216_v37  ;;  %4771 = vmatprep.mubr.f32.mxu1 %v280_v38  ;;  %v311_v36 = vld [vmem:[%s5395_s9 + $0x328] sm:$0xff]  ;;  %v248_v37 = vld [vmem:[%s5395_s9 + $0x130] sm:$0xff] }
  0x6a   : > { %v312_v38 = vld [vmem:[%s5395_s9 + $0x330] sm:$0xff] }
  0x6c   : > { %4676 = vmatmul.mubr.f32.gmra.mrb[6].mxu0 %v217_v39  ;;  %4772 = vmatmul.mubr.f32.gmra.mrb[6].mxu1 %v281_v40  ;;  %v249_v39 = vld [vmem:[%s5395_s9 + $0x138] sm:$0xff] }
  0x6d   : > { %4678 = vmatprep.mubr.f32.mxu0 %v218_v41  ;;  %4774 = vmatprep.mubr.f32.mxu1 %v282_v42  ;;  %v313_v40 = vld [vmem:[%s5395_s9 + $0x338] sm:$0xff]  ;;  %v250_v41 = vld [vmem:[%s5395_s9 + $0x140] sm:$0xff] }
  0x6e   : > { %v314_v42 = vld [vmem:[%s5395_s9 + $0x340] sm:$0xff] }
  0x70   : > { %4679 = vmatmul.mubr.f32.gmra.mrb[8].mxu0 %v219_v43  ;;  %4775 = vmatmul.mubr.f32.gmra.mrb[8].mxu1 %v283_v44  ;;  %v251_v43 = vld [vmem:[%s5395_s9 + $0x148] sm:$0xff] }
  0x71   : > { %4681 = vmatprep.mubr.f32.mxu0 %v220_v45  ;;  %4777 = vmatprep.mubr.f32.mxu1 %v284_v46  ;;  %v315_v44 = vld [vmem:[%s5395_s9 + $0x348] sm:$0xff]  ;;  %v252_v45 = vld [vmem:[%s5395_s9 + $0x150] sm:$0xff]  ;;  %v253_v46 = vld [vmem:[%s5395_s9 + $0x158] sm:$0xff] }
  0x74   : > { %4682 = vmatmul.mubr.f32.gmra.mrb[10].mxu0 %v221_v47  ;;  %4778 = vmatmul.mubr.f32.gmra.mrb[10].mxu1 %v285_v48  ;;  %v254_v47 = vld [vmem:[%s5395_s9 + $0x160] sm:$0xff]  ;;  %v316_v48 = vld [vmem:[%s5395_s9 + $0x350] sm:$0xff] }
  0x75   : > { %4684 = vmatprep.mubr.f32.mxu0 %v222_v49  ;;  %4780 = vmatprep.mubr.f32.mxu1 %v286_v50  ;;  %v317_v49 = vld [vmem:[%s5395_s9 + $0x358] sm:$0xff]  ;;  %v255_v50 = vld [vmem:[%s5395_s9 + $0x168] sm:$0xff] }
  0x78   : > { %4685 = vmatmul.mubr.f32.gmra.mrb[12].mxu0 %v223_v51  ;;  %4781 = vmatmul.mubr.f32.gmra.mrb[12].mxu1 %v287_v52  ;;  %v256_v51 = vld [vmem:[%s5395_s9 + $0x170] sm:$0xff]  ;;  %v318_v52 = vld [vmem:[%s5395_s9 + $0x360] sm:$0xff] }
  0x79   : > { %4687 = vmatprep.mubr.f32.mxu0 %v224_v53  ;;  %4783 = vmatprep.mubr.f32.mxu1 %v288_v54  ;;  %v319_v53 = vld [vmem:[%s5395_s9 + $0x368] sm:$0xff]  ;;  %v257_v54 = vld [vmem:[%s5395_s9 + $0x178] sm:$0xff] }
  0x7c   : > { %4688 = vmatmul.mubr.f32.gmra.mrb[14].mxu0 %v225_v55  ;;  %4784 = vmatmul.mubr.f32.gmra.mrb[14].mxu1 %v289_v56  ;;  %v258_v55 = vld [vmem:[%s5395_s9 + $0x180] sm:$0xff]  ;;  %v320_v56 = vld [vmem:[%s5395_s9 + $0x370] sm:$0xff] }
  0x7d   : > { %4690 = vmatprep.mubr.f32.mxu0 %v226_v57  ;;  %4786 = vmatprep.mubr.f32.mxu1 %v290_v58  ;;  %v321_v57 = vld [vmem:[%s5395_s9 + $0x378] sm:$0xff]  ;;  %v259_v58 = vld [vmem:[%s5395_s9 + $0x188] sm:$0xff] }
  0x80   : > { %4691 = vmatmul.mubr.f32.gmra.mrb[16].mxu0 %v227_v59  ;;  %4787 = vmatmul.mubr.f32.gmra.mrb[16].mxu1 %v291_v60  ;;  %v260_v59 = vld [vmem:[%s5395_s9 + $0x190] sm:$0xff]  ;;  %v322_v60 = vld [vmem:[%s5395_s9 + $0x380] sm:$0xff] }
  0x81   : > { %4693 = vmatprep.mubr.f32.mxu0 %v228_v61  ;;  %4789 = vmatprep.mubr.f32.mxu1 %v292_v62  ;;  %v323_v61 = vld [vmem:[%s5395_s9 + $0x388] sm:$0xff]  ;;  %v261_v62 = vld [vmem:[%s5395_s9 + $0x198] sm:$0xff] }
  0x84   : > { %4694 = vmatmul.mubr.f32.gmra.mrb[18].mxu0 %v229_v63  ;;  %4790 = vmatmul.mubr.f32.gmra.mrb[18].mxu1 %v293_v0  ;;  %v262_v63 = vld [vmem:[%s5395_s9 + $0x1a0] sm:$0xff]  ;;  %v324_v0 = vld [vmem:[%s5395_s9 + $0x390] sm:$0xff] }
  0x85   : > { %4696 = vmatprep.mubr.f32.mxu0 %v230_v1  ;;  %4792 = vmatprep.mubr.f32.mxu1 %v294_v2  ;;  %v325_v1 = vld [vmem:[%s5395_s9 + $0x398] sm:$0xff]  ;;  %v263_v2 = vld [vmem:[%s5395_s9 + $0x1a8] sm:$0xff] }
  0x88   : > { %4697 = vmatmul.mubr.f32.gmra.mrb[20].mxu0 %v231_v3  ;;  %4793 = vmatmul.mubr.f32.gmra.mrb[20].mxu1 %v295_v4  ;;  %v264_v3 = vld [vmem:[%s5395_s9 + $0x1b0] sm:$0xff]  ;;  %v326_v4 = vld [vmem:[%s5395_s9 + $0x3a0] sm:$0xff] }
  0x89   : > { %4699 = vmatprep.mubr.f32.mxu0 %v232_v5  ;;  %4795 = vmatprep.mubr.f32.mxu1 %v296_v6  ;;  %v327_v5 = vld [vmem:[%s5395_s9 + $0x3a8] sm:$0xff]  ;;  %v265_v6 = vld [vmem:[%s5395_s9 + $0x1b8] sm:$0xff] }
  0x8c   : > { %4700 = vmatmul.mubr.f32.gmra.mrb[22].mxu0 %v233_v7  ;;  %4796 = vmatmul.mubr.f32.gmra.mrb[22].mxu1 %v297_v8  ;;  %v266_v7 = vld [vmem:[%s5395_s9 + $0x1c0] sm:$0xff]  ;;  %v328_v8 = vld [vmem:[%s5395_s9 + $0x3b0] sm:$0xff] }
  0x8d   : > { %4702 = vmatprep.mubr.f32.mxu0 %v234_v9  ;;  %4798 = vmatprep.mubr.f32.mxu1 %v298_v10  ;;  %v329_v9 = vld [vmem:[%s5395_s9 + $0x3b8] sm:$0xff]  ;;  %v267_v10 = vld [vmem:[%s5395_s9 + $0x1c8] sm:$0xff] }
  0x90   : > { %4703 = vmatmul.mubr.f32.gmra.mrb[24].mxu0 %v235_v11  ;;  %4799 = vmatmul.mubr.f32.gmra.mrb[24].mxu1 %v299_v12  ;;  %v268_v11 = vld [vmem:[%s5395_s9 + $0x1d0] sm:$0xff]  ;;  %v330_v12 = vld [vmem:[%s5395_s9 + $0x3c0] sm:$0xff] }
  0x91   : > { %4705 = vmatprep.mubr.f32.mxu0 %v236_v13  ;;  %4801 = vmatprep.mubr.f32.mxu1 %v300_v14  ;;  %v331_v13 = vld [vmem:[%s5395_s9 + $0x3c8] sm:$0xff]  ;;  %v269_v14 = vld [vmem:[%s5395_s9 + $0x1d8] sm:$0xff] }
  0x94   : > { %4706 = vmatmul.mubr.f32.gmra.mrb[26].mxu0 %v237_v15  ;;  %4802 = vmatmul.mubr.f32.gmra.mrb[26].mxu1 %v301_v16  ;;  %v270_v15 = vld [vmem:[%s5395_s9 + $0x1e0] sm:$0xff]  ;;  %v332_v16 = vld [vmem:[%s5395_s9 + $0x3d0] sm:$0xff] }
  0x95   : > { %4708 = vmatprep.mubr.f32.mxu0 %v238_v17  ;;  %4804 = vmatprep.mubr.f32.mxu1 %v302_v18  ;;  %v333_v17 = vld [vmem:[%s5395_s9 + $0x3d8] sm:$0xff]  ;;  %v271_v18 = vld [vmem:[%s5395_s9 + $0x1e8] sm:$0xff] }
  0x98   : > { %4709 = vmatmul.mubr.f32.gmra.mrb[28].mxu0 %v239_v19  ;;  %4805 = vmatmul.mubr.f32.gmra.mrb[28].mxu1 %v303_v20  ;;  %v272_v19 = vld [vmem:[%s5395_s9 + $0x1f0] sm:$0xff]  ;;  %v334_v20 = vld [vmem:[%s5395_s9 + $0x3e0] sm:$0xff] }
  0x99   : > { %4711 = vmatprep.mubr.f32.mxu0 %v240_v21  ;;  %4807 = vmatprep.mubr.f32.mxu1 %v304_v22  ;;  %v335_v21 = vld [vmem:[%s5395_s9 + $0x3e8] sm:$0xff]  ;;  %v273_v22 = vld [vmem:[%s5395_s9 + $0x1f8] sm:$0xff] }
  0x9c   : > { %4712 = vmatmul.mubr.f32.gmra.mrb[30].mxu0 %v241_v23  ;;  %4808 = vmatmul.mubr.f32.gmra.mrb[30].mxu1 %v305_v24  ;;  %v336_v23 = vld [vmem:[%s5395_s9 + $0x3f0] sm:$0xff]  ;;  %v337_v24 = vld [vmem:[%s5395_s9 + $0x3f8] sm:$0xff] }
  0x9d   : > { %4714 = vmatprep.mubr.f32.mxu0 %v242_v25  ;;  %4810 = vmatprep.mubr.f32.mxu1 %v306_v26  ;;  %v5581_v25 = vld [vmem:[%s8980_s2] ss:$0 sm:$0xff] }
  0xa0   : > { %4715 = vmatmul.mubr.f32.gmra.mrb[32].mxu0 %v243_v27  ;;  %4811 = vmatmul.mubr.f32.gmra.mrb[32].mxu1 %v307_v28 }
  0xa1   : > { %4717 = vmatprep.mubr.f32.mxu0 %v244_v29  ;;  %4813 = vmatprep.mubr.f32.mxu1 %v308_v30 }
  0xa4   : > { %4718 = vmatmul.mubr.f32.gmra.mrb[34].mxu0 %v245_v31  ;;  %4814 = vmatmul.mubr.f32.gmra.mrb[34].mxu1 %v309_v32 }
  0xa5   : > { %4720 = vmatprep.mubr.f32.mxu0 %v246_v33  ;;  %4816 = vmatprep.mubr.f32.mxu1 %v310_v34 }
  0xa8   : > { %4721 = vmatmul.mubr.f32.gmra.mrb[36].mxu0 %v247_v35  ;;  %4817 = vmatmul.mubr.f32.gmra.mrb[36].mxu1 %v311_v36 }
  0xa9   : > { %4723 = vmatprep.mubr.f32.mxu0 %v248_v37  ;;  %4819 = vmatprep.mubr.f32.mxu1 %v312_v38 }
  0xac   : > { %4724 = vmatmul.mubr.f32.gmra.mrb[38].mxu0 %v249_v39  ;;  %4820 = vmatmul.mubr.f32.gmra.mrb[38].mxu1 %v313_v40 }
  0xad   : > { %4726 = vmatprep.mubr.f32.mxu0 %v250_v41  ;;  %4822 = vmatprep.mubr.f32.mxu1 %v314_v42 }
  0xb0   : > { %4727 = vmatmul.mubr.f32.gmra.mrb[40].mxu0 %v251_v43  ;;  %4823 = vmatmul.mubr.f32.gmra.mrb[40].mxu1 %v315_v44 }
  0xb1   : > { %4729 = vmatprep.mubr.f32.mxu0 %v252_v45  ;;  %4825 = vmatprep.mubr.f32.mxu1 %v316_v48 }
  0xb4   : > { %4730 = vmatmul.mubr.f32.gmra.mrb[42].mxu0 %v253_v46  ;;  %4826 = vmatmul.mubr.f32.gmra.mrb[42].mxu1 %v317_v49  ;;  %v5596_v49 = vld [vmem:[%s8981_s3] ss:$0 sm:$0xff] }
  0xb5   : > { %4732 = vmatprep.mubr.f32.mxu0 %v254_v47  ;;  %4828 = vmatprep.mubr.f32.mxu1 %v318_v52 }
  0xb8   : > { %4733 = vmatmul.mubr.f32.gmra.mrb[44].mxu0 %v255_v50  ;;  %4829 = vmatmul.mubr.f32.gmra.mrb[44].mxu1 %v319_v53 }
  0xb9   : > { %4735 = vmatprep.mubr.f32.mxu0 %v256_v51  ;;  %4831 = vmatprep.mubr.f32.mxu1 %v320_v56 }
  0xbc   : > { %4736 = vmatmul.mubr.f32.gmra.mrb[46].mxu0 %v257_v54  ;;  %4832 = vmatmul.mubr.f32.gmra.mrb[46].mxu1 %v321_v57 }
  0xbd   : > { %4738 = vmatprep.mubr.f32.mxu0 %v258_v55  ;;  %4834 = vmatprep.mubr.f32.mxu1 %v322_v60 }
  0xc0   : > { %4739 = vmatmul.mubr.f32.gmra.mrb[48].mxu0 %v259_v58  ;;  %4835 = vmatmul.mubr.f32.gmra.mrb[48].mxu1 %v323_v61 }
  0xc1   : > { %4741 = vmatprep.mubr.f32.mxu0 %v260_v59  ;;  %4837 = vmatprep.mubr.f32.mxu1 %v324_v0 }
  0xc4   : > { %4742 = vmatmul.mubr.f32.gmra.mrb[50].mxu0 %v261_v62  ;;  %4838 = vmatmul.mubr.f32.gmra.mrb[50].mxu1 %v325_v1 }
  0xc5   : > { %4744 = vmatprep.mubr.f32.mxu0 %v262_v63  ;;  %4840 = vmatprep.mubr.f32.mxu1 %v326_v4 }
  0xc8   : > { %4745 = vmatmul.mubr.f32.gmra.mrb[52].mxu0 %v263_v2  ;;  %4841 = vmatmul.mubr.f32.gmra.mrb[52].mxu1 %v327_v5 }
  0xc9   : > { %4747 = vmatprep.mubr.f32.mxu0 %v264_v3  ;;  %4843 = vmatprep.mubr.f32.mxu1 %v328_v8 }
  0xcc   : > { %4748 = vmatmul.mubr.f32.gmra.mrb[54].mxu0 %v265_v6  ;;  %4844 = vmatmul.mubr.f32.gmra.mrb[54].mxu1 %v329_v9 }
  0xcd   : > { %4750 = vmatprep.mubr.f32.mxu0 %v266_v7  ;;  %4846 = vmatprep.mubr.f32.mxu1 %v330_v12 }
  0xd0   : > { %4751 = vmatmul.mubr.f32.gmra.mrb[56].mxu0 %v267_v10  ;;  %4847 = vmatmul.mubr.f32.gmra.mrb[56].mxu1 %v331_v13 }
  0xd1   : > { %4753 = vmatprep.mubr.f32.mxu0 %v268_v11  ;;  %4849 = vmatprep.mubr.f32.mxu1 %v332_v16 }
  0xd4   : > { %4754 = vmatmul.mubr.f32.gmra.mrb[58].mxu0 %v269_v14  ;;  %4850 = vmatmul.mubr.f32.gmra.mrb[58].mxu1 %v333_v17 }
  0xd5   : > { %4756 = vmatprep.mubr.f32.mxu0 %v270_v15  ;;  %4852 = vmatprep.mubr.f32.mxu1 %v334_v20 }
  0xd8   : > { %4757 = vmatmul.mubr.f32.gmra.mrb[60].mxu0 %v271_v18  ;;  %4853 = vmatmul.mubr.f32.gmra.mrb[60].mxu1 %v335_v21 }
  0xd9   : > { %4759 = vmatprep.mubr.f32.mxu0 %v272_v19  ;;  %4855 = vmatprep.mubr.f32.mxu1 %v336_v23 }
  0xdc   : > { %4760 = vmatmul.mubr.f32.gmra.mrb[62].mxu0 %v273_v22  ;;  %4856 = vmatmul.mubr.f32.gmra.mrb[62].mxu1 %v337_v24 }
 0x133   : > { %v4668_v26 = vpop.f32.mrb[0].mxu0  ;;  %v4764_v27 = vpop.f32.mrb[0].mxu1 }
 0x134   : > { %v433_v28 = vadd.f32 %v4668_v26, %v5581_v25  ;;  %v427_v29 = vpop.f32.mrb[1].mxu0  ;;  %v747_v30 = vpop.f32.mrb[1].mxu1  ;;  %v753_v36 = vadd.f32 %v4764_v27, %v5581_v25 }
 0x135   : > { %v428_v31 = vadd.f32 %v5581_v25, %v427_v29  ;;  %v748_v39 = vadd.f32 %v5581_v25, %v747_v30 }
 0x136   : > { %4948 = vtanh.f32 %v433_v28 }
 0x137   : > { %4950 = vtanh.f32 %v428_v31  ;;  %v4671_v32 = vpop.f32.mrb[2].mxu0  ;;  %v4767_v33 = vpop.f32.mrb[2].mxu1 }
 0x138   : > { %v443_v34 = vadd.f32 %v4671_v32, %v5581_v25  ;;  %v437_v35 = vpop.f32.mrb[3].mxu0  ;;  %v757_v37 = vpop.f32.mrb[3].mxu1  ;;  %v763_v44 = vadd.f32 %v4767_v33, %v5581_v25 }
 0x139   : > { %v438_v38 = vadd.f32 %v5581_v25, %v437_v35  ;;  %v758_v47 = vadd.f32 %v5581_v25, %v757_v37 }
 0x13a   : > { %4952 = vtanh.f32 %v443_v34 }
 0x13b   : > { %4954 = vtanh.f32 %v438_v38  ;;  %v4674_v40 = vpop.f32.mrb[4].mxu0  ;;  %v4770_v41 = vpop.f32.mrb[4].mxu1 }
 0x13c   : > { %v453_v42 = vadd.f32 %v4674_v40, %v5581_v25  ;;  %v447_v43 = vpop.f32.mrb[5].mxu0  ;;  %4956 = vtanh.f32 %v753_v36  ;;  %v767_v45 = vpop.f32.mrb[5].mxu1  ;;  %v773_v54 = vadd.f32 %v4770_v41, %v5581_v25 }
 0x13d   : > { %v448_v46 = vadd.f32 %v5581_v25, %v447_v43  ;;  %4958 = vtanh.f32 %v748_v39  ;;  %v768_v58 = vadd.f32 %v5581_v25, %v767_v45 }
 0x13e   : > { %4960 = vtanh.f32 %v453_v42 }
 0x13f   : > { %4962 = vtanh.f32 %v448_v46  ;;  %v4677_v48 = vpop.f32.mrb[6].mxu0  ;;  %v4773_v50 = vpop.f32.mrb[6].mxu1 }
 0x140   : > { %v4949_v51 = vpop.eup %4948  ;;  %v463_v52 = vadd.f32 %v4677_v48, %v5581_v25  ;;  %v457_v53 = vpop.f32.mrb[7].mxu0  ;;  %4964 = vtanh.f32 %v763_v44  ;;  %v783_v6 = vadd.f32 %v4773_v50, %v5581_v25 }
 0x141   : > { %v777_v55 = vpop.f32.mrb[7].mxu1  ;;  %v4951_v56 = vpop.eup %4950  ;;  %v458_v57 = vadd.f32 %v5581_v25, %v457_v53  ;;  %4966 = vtanh.f32 %v758_v47  ;;  %v1202_v2 = vmul.f32 %v4949_v51, %v5596_v49 }
 0x142   : > { %4968 = vtanh.f32 %v463_v52  ;;  %v1201_v59 = vmul.f32 %v4951_v56, %v5596_v49  ;;  %v778_v21 = vadd.f32 %v5581_v25, %v777_v55 }
 0x143   : > { %4970 = vtanh.f32 %v458_v57  ;;  %v4680_v60 = vpop.f32.mrb[8].mxu0  ;;  %v4776_v61 = vpop.f32.mrb[8].mxu1  ;;  %v1333_v16 = vsel %vm9004_vm1, %v1202_v2, 0.0 }
 0x144   : > { %v4953_v62 = vpop.eup %4952  ;;  %v473_v63 = vadd.f32 %v4680_v60, %v5581_v25  ;;  %v467_v0 = vpop.f32.mrb[9].mxu0  ;;  %v1330_v1 = vsel %vm9004_vm1, %v1201_v59, 0.0  ;;  %4972 = vtanh.f32 %v773_v54  ;;  %v793_v37 = vadd.f32 %v4776_v61, %v5581_v25 }
 0x145   : > { %v5606_v3 = vpop.f32.mrb[9].mxu1  ;;  %v4955_v4 = vpop.eup %4954  ;;  %v468_v5 = vadd.f32 %v5581_v25, %v467_v0  ;;  %1331 = vadd.xlane.f32.xlu0 %v1330_v1  ;;  %4974 = vtanh.f32 %v768_v58  ;;  %v1204_v17 = vmul.f32 %v4953_v62, %v5596_v49 }
 0x146   : > { %v5610_v7 = vpop.eup %4956  ;;  %4976 = vtanh.f32 %v473_v63  ;;  %v1203_v8 = vmul.f32 %v4955_v4, %v5596_v49  ;;  %v788_v53 = vadd.f32 %v5581_v25, %v5606_v3  ;;  %v1715_v3 = vlaneseq }
 0x147   : > { %v5613_v9 = vpop.eup %4958  ;;  %4978 = vtanh.f32 %v468_v5  ;;  %v4683_v10 = vpop.f32.mrb[10].mxu0  ;;  %v1339_v31 = vsel %vm9004_vm1, %v1204_v17, 0.0 }
 0x148   : > { %v5615_v11 = vpop.f32.mrb[10].mxu1  ;;  %v4961_v12 = vpop.eup %4960  ;;  %v483_v13 = vadd.f32 %v4683_v10, %v5581_v25  ;;  %v1336_v15 = vsel %vm9004_vm1, %v1203_v8, 0.0  ;;  %4980 = vtanh.f32 %v783_v6 }
 0x149   : > { %v477_v14 = vpop.f32.mrb[11].mxu0  ;;  %v5621_v18 = vpop.f32.mrb[11].mxu1  ;;  %1337 = vadd.xlane.f32.xlu1 %v1336_v15  ;;  %1334 = vadd.xlane.f32.xlu0 %v1333_v16  ;;  %v1206_v33 = vmul.f32 %v4961_v12, %v5596_v49  ;;  %v803_v2 = vadd.f32 %v5615_v11, %v5581_v25 }
 0x14a   : > { %v4963_v19 = vpop.eup %4962  ;;  %v478_v20 = vadd.f32 %v5581_v25, %v477_v14  ;;  %4982 = vtanh.f32 %v483_v13 }
 0x14b   : > { %v5625_v22 = vpop.eup %4964  ;;  %v1205_v23 = vmul.f32 %v4963_v19, %v5596_v49  ;;  %v4686_v26 = vpop.f32.mrb[12].mxu0  ;;  %v1345_v46 = vsel %vm9004_vm1, %v1206_v33, 0.0 }
 0x14c   : > { %v5628_v24 = vpop.eup %4966  ;;  %4984 = vtanh.f32 %v478_v20  ;;  %v5630_v27 = vpop.f32.mrb[12].mxu1  ;;  %v493_v29 = vadd.f32 %v4686_v26, %v5581_v25  ;;  %v798_v20 = vadd.f32 %v5581_v25, %v5621_v18 }
 0x14d   : > { %v4969_v28 = vpop.eup %4968  ;;  %v487_v30 = vpop.f32.mrb[13].mxu0  ;;  %v1342_v32 = vsel %vm9004_vm1, %v1205_v23, 0.0  ;;  %1340 = vadd.xlane.f32.xlu1 %v1339_v31  ;;  %4986 = vtanh.f32 %v778_v21  ;;  %v5684_v21 = vshrl.u32 %v1715_v3, 7 }
 0x14e   : > { %v5636_v34 = vpop.f32.mrb[13].mxu1  ;;  %v4971_v35 = vpop.eup %4970  ;;  %v488_v36 = vadd.f32 %v5581_v25, %v487_v30  ;;  %1343 = vadd.xlane.f32.xlu0 %v1342_v32  ;;  %4988 = vtanh.f32 %v493_v29  ;;  %v1208_v48 = vmul.f32 %v4969_v28, %v5596_v49  ;;  %v5689_v28 = vstv %s4357_s26 }
 0x14f   : > { %v5640_v38 = vpop.eup %4972  ;;  %v1207_v39 = vmul.f32 %v4971_v35, %v5596_v49  ;;  %v4689_v41 = vpop.f32.mrb[14].mxu0 }
 0x150   : > { %v5643_v40 = vpop.eup %4974  ;;  %4990 = vtanh.f32 %v488_v36  ;;  %v5645_v42 = vpop.f32.mrb[14].mxu1  ;;  %v503_v44 = vadd.f32 %v4689_v41, %v5581_v25  ;;  %v1351_v60 = vsel %vm9004_vm1, %v1208_v48, 0.0 }
 0x151   : > { %v4977_v43 = vpop.eup %4976  ;;  %v497_v45 = vpop.f32.mrb[15].mxu0  ;;  %v1348_v47 = vsel %vm9004_vm1, %v1207_v39, 0.0  ;;  %1346 = vadd.xlane.f32.xlu1 %v1345_v46  ;;  %4992 = vtanh.f32 %v793_v37 }
 0x152   : > { %v5651_v50 = vpop.f32.mrb[15].mxu1  ;;  %v4979_v51 = vpop.eup %4978  ;;  %v498_v52 = vadd.f32 %v5581_v25, %v497_v45  ;;  %1349 = vadd.xlane.f32.xlu0 %v1348_v47  ;;  %4994 = vtanh.f32 %v503_v44  ;;  %v1210_v62 = vmul.f32 %v4977_v43, %v5596_v49  ;;  %v813_v43 = vadd.f32 %v5630_v27, %v5581_v25 }
 0x153   : > { %v1209_v54 = vmul.f32 %v4979_v51, %v5596_v49  ;;  %v5657_v55 = vpop.eup %4980  ;;  %v4692_v56 = vpop.f32.mrb[16].mxu0  ;;  %v5704_v44 = vadd.s32 %v5689_v28, %v5684_v21  ;;  %v1266_v47 = vmul.f32 %v5610_v7, %v5596_v49  ;;  %v1268_v27 = vmul.f32 %v5625_v22, %v5596_v49 }
 0x154   : > { %4996 = vtanh.f32 %v498_v52  ;;  %v4983_v57 = vpop.eup %4982  ;;  %v513_v58 = vadd.f32 %v4692_v56, %v5581_v25  ;;  %v507_v59 = vpop.f32.mrb[17].mxu0  ;;  %v1357_v14 = vsel %vm9004_vm1, %v1210_v62, 0.0  ;;  %v1265_v52 = vmul.f32 %v5613_v9, %v5596_v49 }
 0x155   : > { %v1354_v61 = vsel %vm9004_vm1, %v1209_v54, 0.0  ;;  %v5663_v63 = vpop.f32.mrb[16].mxu1  ;;  %v508_v1 = vadd.f32 %v5581_v25, %v507_v59  ;;  %1352 = vadd.xlane.f32.xlu1 %v1351_v60  ;;  %4998 = vtanh.f32 %v788_v53  ;;  %v1212_v11 = vmul.f32 %v4983_v57, %v5596_v49 }
 0x156   : > { %v4985_v0 = vpop.eup %4984  ;;  %1355 = vadd.xlane.f32.xlu0 %v1354_v61  ;;  %v5668_v4 = vpop.f32.mrb[17].mxu1  ;;  %5000 = vtanh.f32 %v513_v58  ;;  %v808_v9 = vadd.f32 %v5581_v25, %v5636_v34  ;;  %v1976_v22 = vsub.s32 0, %v5704_v44  ;;  %v5741_v34 = vsel %vm9004_vm1, %v1268_v27, 0.0 }
 0x157   : > { %v1211_v5 = vmul.f32 %v4985_v0, %v5596_v49  ;;  %v5671_v6 = vpop.eup %4986  ;;  %5002 = vtanh.f32 %v508_v1  ;;  %v4695_v8 = vpop.f32.mrb[18].mxu0  ;;  %v1363_v18 = vsel %vm9004_vm1, %v1212_v11, 0.0  ;;  %v5731_v1 = vsel %vm9004_vm1, %v1266_v47, 0.0  ;;  %9011 = vst [vmem:[#allocation6_spill] sm:$0xff] %v5741_v34 }
 0x158   : > { %v4989_v10 = vpop.eup %4988  ;;  %v523_v12 = vadd.f32 %v4695_v8, %v5581_v25  ;;  %v517_v13 = vpop.f32.mrb[19].mxu0  ;;  %5004 = vtanh.f32 %v803_v2  ;;  %v1267_v2 = vmul.f32 %v5628_v24, %v5596_v49  ;;  %vm1975_vm2 = vcmp.lt.s32.totalorder %v5704_v44, 0 }
 0x159   : > { %v1360_v15 = vsel %vm9004_vm1, %v1211_v5, 0.0  ;;  %v5678_v16 = vpop.f32.mrb[18].mxu1  ;;  %v518_v19 = vadd.f32 %v5581_v25, %v517_v13  ;;  %1358 = vadd.xlane.f32.xlu1 %v1357_v14  ;;  %v1214_v36 = vmul.f32 %v4989_v10, %v5596_v49  ;;  %v5738_v10 = vsel %vm9004_vm1, %v1265_v52, 0.0 }
 0x15a   : > { %v4991_v17 = vpop.eup %4990  ;;  %1361 = vadd.xlane.f32.xlu0 %v1360_v15  ;;  %v5686_v23 = vpop.f32.mrb[19].mxu1  ;;  %5006 = vtanh.f32 %v523_v12  ;;  %v1270_v12 = vmul.f32 %v5640_v38, %v5596_v49  ;;  %v823_v38 = vadd.f32 %v5645_v42, %v5581_v25  ;;  %v1269_v42 = vmul.f32 %v5643_v40, %v5596_v49 }
 0x15b   : > { %v1213_v26 = vmul.f32 %v4991_v17, %v5596_v49  ;;  %v5691_v29 = vpop.eup %4992  ;;  %5008 = vtanh.f32 %v518_v19  ;;  %v4698_v30 = vpop.f32.mrb[20].mxu0  ;;  %v1369_v57 = vsel %vm9004_vm1, %v1214_v36, 0.0 }
 0x15c   : > { %v4995_v31 = vpop.eup %4994  ;;  %v533_v32 = vadd.f32 %v4698_v30, %v5581_v25  ;;  %v527_v33 = vpop.f32.mrb[21].mxu0  ;;  %5010 = vtanh.f32 %v798_v20  ;;  %v5755_v30 = vmin.u32 %v1976_v22, %v5704_v44 }
 0x15d   : > { %v1366_v35 = vsel %vm9004_vm1, %v1213_v26, 0.0  ;;  %v5697_v37 = vpop.f32.mrb[20].mxu1  ;;  %v528_v41 = vadd.f32 %v5581_v25, %v527_v33  ;;  %1364 = vadd.xlane.f32.xlu1 %v1363_v18  ;;  %v1216_v7 = vmul.f32 %v4995_v31, %v5596_v49  ;;  %v5761_v33 = vsel %vm9004_vm1, %v1267_v2, 0.0 }
 0x15e   : > { %v4997_v39 = vpop.eup %4996  ;;  %1367 = vadd.xlane.f32.xlu0 %v1366_v35  ;;  %v5706_v45 = vpop.f32.mrb[21].mxu1  ;;  %5012 = vtanh.f32 %v533_v32  ;;  %v1718_v18 = vadd.s32 16, %v5684_v21 }
 0x15f   : > { %v1215_v46 = vmul.f32 %v4997_v39, %v5596_v49  ;;  %v5711_v48 = vpop.eup %4998  ;;  %5014 = vtanh.f32 %v528_v41  ;;  %v4701_v51 = vpop.f32.mrb[22].mxu0  ;;  %v1375_v11 = vsel %vm9004_vm1, %v1216_v7, 0.0  ;;  %v5769_v39 = vsel %vm9004_vm1, %v1270_v12, 0.0 }
 0x160   : > { %v5001_v53 = vpop.eup %5000  ;;  %v543_v54 = vadd.f32 %v4701_v51, %v5581_v25  ;;  %v537_v56 = vpop.f32.mrb[23].mxu0  ;;  %5016 = vtanh.f32 %v813_v43  ;;  %9012 = vst [vmem:[#allocation7_spill] sm:$0xff] %v5769_v39  ;;  %v1717_v41 = vadd.s32 8, %v5684_v21 }
 0x161   : > { %v1372_v58 = vsel %vm9004_vm1, %v1215_v46, 0.0  ;;  %v5721_v59 = vpop.f32.mrb[22].mxu1  ;;  %v5003_v60 = vpop.eup %5002  ;;  %v538_v61 = vadd.f32 %v5581_v25, %v537_v56  ;;  %1370 = vadd.xlane.f32.xlu1 %v1369_v57  ;;  %v1218_v17 = vmul.f32 %v5001_v53, %v5596_v49  ;;  %v818_v56 = vadd.f32 %v5581_v25, %v5651_v50 }
 0x162   : > { %1373 = vadd.xlane.f32.xlu0 %v1372_v58  ;;  %v5727_v62 = vpop.f32.mrb[23].mxu1  ;;  %5018 = vtanh.f32 %v543_v54  ;;  %v1217_v0 = vmul.f32 %v5003_v60, %v5596_v49  ;;  %v5735_v5 = vpop.eup %5004  ;;  %v1979_v57 = vand.u32 3, %v5755_v30  ;;  %v5786_v60 = vand.u32 127, %v1715_v3 }
 0x163   : > { %5020 = vtanh.f32 %v538_v61  ;;  %v4704_v8 = vpop.f32.mrb[24].mxu0  ;;  %v5749_v19 = vpop.f32.mrb[24].mxu1  ;;  %v1381_v51 = vsel %vm9004_vm1, %v1218_v17, 0.0  ;;  %v5789_v61 = vadd.s32 %v5689_v28, %v1718_v18  ;;  %v1271_v50 = vmul.f32 %v5671_v6, %v5596_v49 }
 0x164   : > { %v5007_v13 = vpop.eup %5006  ;;  %v553_v14 = vadd.f32 %v4704_v8, %v5581_v25  ;;  %v547_v15 = vpop.f32.mrb[25].mxu0  ;;  %v1378_v24 = vsel %vm9004_vm1, %v1217_v0, 0.0  ;;  %5022 = vtanh.f32 %v808_v9  ;;  %v5794_v0 = vsel %vm9004_vm1, %v1269_v42, 0.0 }
 0x165   : > { %v5009_v20 = vpop.eup %5008  ;;  %v548_v26 = vadd.f32 %v5581_v25, %v547_v15  ;;  %1376 = vadd.xlane.f32.xlu1 %v1375_v11  ;;  %v5757_v31 = vpop.f32.mrb[25].mxu1  ;;  %v1220_v27 = vmul.f32 %v5007_v13, %v5596_v49  ;;  %9013 = vst [vmem:[#allocation8_spill] sm:$0xff] %v5794_v0  ;;  %v5799_v2 = vadd.s32 %v5689_v28, %v1717_v41  ;;  %v1980_v6 = vsub.s32 0, %v1979_v57 }
 0x166   : > { %1379 = vadd.xlane.f32.xlu0 %v1378_v24  ;;  %5024 = vtanh.f32 %v553_v14  ;;  %v1219_v32 = vmul.f32 %v5009_v20, %v5596_v49  ;;  %v5764_v35 = vpop.eup %5010  ;;  %v833_v20 = vadd.f32 %v5663_v63, %v5581_v25  ;;  %v1990_v30 = vsub.s32 0, %v5789_v61 }
 0x167   : > { %5026 = vtanh.f32 %v548_v26  ;;  %v4707_v36 = vpop.f32.mrb[26].mxu0  ;;  %v5776_v53 = vpop.f32.mrb[26].mxu1  ;;  %v1387_v13 = vsel %vm9004_vm1, %v1220_v27, 0.0  ;;  %v1272_v42 = vmul.f32 %v5657_v55, %v5596_v49  ;;  %v1983_v63 = vsub.s32 0, %v5799_v2 }
 0x168   : > { %v5013_v43 = vpop.eup %5012  ;;  %v563_v46 = vadd.f32 %v4707_v36, %v5581_v25  ;;  %v557_v47 = vpop.f32.mrb[27].mxu0  ;;  %v1384_v52 = vsel %vm9004_vm1, %v1219_v32, 0.0  ;;  %5028 = vtanh.f32 %v823_v38  ;;  %v5818_v36 = vsel %vm9004_vm1, %v1271_v50, 0.0 }
 0x169   : > { %v5015_v54 = vpop.eup %5014  ;;  %v558_v40 = vadd.f32 %v5581_v25, %v557_v47  ;;  %1382 = vadd.xlane.f32.xlu1 %v1381_v51  ;;  %v5782_v58 = vpop.f32.mrb[27].mxu1  ;;  %v1222_v15 = vmul.f32 %v5013_v43, %v5596_v49  ;;  %9014 = vst [vmem:[#allocation9_spill] sm:$0xff] %v5818_v36  ;;  %v5832_v55 = vsel %vm1975_vm2, %v1980_v6, %v1979_v57  ;;  %v5846_v57 = vsel %vm9004_vm1, %v1272_v42, 0.0 }
 0x16a   : > { %1385 = vadd.xlane.f32.xlu0 %v1384_v52  ;;  %5030 = vtanh.f32 %v563_v46  ;;  %v1221_v7 = vmul.f32 %v5015_v54, %v5596_v49  ;;  %v5791_v9 = vpop.eup %5016  ;;  %v5840_v50 = vmin.u32 %v1990_v30, %v5789_v61  ;;  %9015 = vst [vmem:[#allocation10_spill] sm:$0xff] %v5846_v57  ;;  %vm2871_vm3 = vcmp.ne.s32.totalorder %v5832_v55, 0 }
 0x16b   : > { %5032 = vtanh.f32 %v558_v40  ;;  %v4710_v22 = vpop.f32.mrb[28].mxu0  ;;  %v5805_v11 = vpop.f32.mrb[28].mxu1  ;;  %v1393_v47 = vsel %vm9004_vm1, %v1222_v15, 0.0  ;;  %vm2999_vm4 = vcmp.lt.s32.totalorder %v5832_v55, 0  ;;  %vm1989_vm5 = vcmp.lt.s32.totalorder %v5789_v61, 0 }
 0x16c   : > { %v5019_v8 = vpop.eup %5018  ;;  %v573_v3 = vadd.f32 %v4710_v22, %v5581_v25  ;;  %v567_v12 = vpop.f32.mrb[29].mxu0  ;;  %v1390_v14 = vsel %vm9004_vm1, %v1221_v7, 0.0  ;;  %5034 = vtanh.f32 %v818_v56  ;;  %v828_v56 = vadd.f32 %v5581_v25, %v5668_v4  ;;  %vm5896_vm6 = vmand %vm2999_vm4, %vm2871_vm3 }
 0x16d   : > { %v5021_v24 = vpop.eup %5020  ;;  %v568_v17 = vadd.f32 %v5581_v25, %v567_v12  ;;  %1388 = vadd.xlane.f32.xlu1 %v1387_v13  ;;  %v5810_v26 = vpop.f32.mrb[29].mxu1  ;;  %v1224_v52 = vmul.f32 %v5019_v8, %v5596_v49  ;;  %v1719_v8 = vadd.s32 24, %v5684_v21  ;;  %v1273_v4 = vmul.f32 %v5711_v48, %v5596_v49 }
 0x16e   : > { %1391 = vadd.xlane.f32.xlu0 %v1390_v14  ;;  %5036 = vtanh.f32 %v573_v3  ;;  %v1223_v38 = vmul.f32 %v5021_v24, %v5596_v49  ;;  %v5815_v32 = vpop.eup %5022  ;;  %v5851_v13 = vmin.u32 %v1983_v63, %v5799_v2  ;;  %v1993_v63 = vand.u32 3, %v5840_v50 }
 0x16f   : > { %5038 = vtanh.f32 %v568_v17  ;;  %v4713_v18 = vpop.f32.mrb[30].mxu0  ;;  %v5827_v27 = vpop.f32.mrb[30].mxu1  ;;  %v1399_v17 = vsel %vm9004_vm1, %v1224_v52, 0.0  ;;  %v1720_v52 = vadd.s32 32, %v5684_v21  ;;  %vm1982_vm7 = vcmp.lt.s32.totalorder %v5799_v2, 0 }
 0x170   : > { %v5025_v41 = vpop.eup %5024  ;;  %v583_v43 = vadd.f32 %v4713_v18, %v5581_v25  ;;  %v577_v46 = vpop.f32.mrb[31].mxu0  ;;  %v1396_v51 = vsel %vm9004_vm1, %v1223_v38, 0.0  ;;  %5040 = vtanh.f32 %v833_v20 }
 0x171   : > { %v5027_v54 = vpop.eup %5026  ;;  %v578_v40 = vadd.f32 %v5581_v25, %v577_v46  ;;  %1394 = vadd.xlane.f32.xlu1 %v1393_v47  ;;  %v5836_v7 = vpop.f32.mrb[31].mxu1  ;;  %v1226_v20 = vmul.f32 %v5025_v41, %v5596_v49  ;;  %v5867_v41 = vadd.s32 %v5689_v28, %v1719_v8  ;;  %v5872_v47 = vadd.s32 4, %v5832_v55 }
 0x172   : > { %1397 = vadd.xlane.f32.xlu0 %v1396_v51  ;;  %5042 = vtanh.f32 %v583_v43  ;;  %v1225_v22 = vmul.f32 %v5027_v54, %v5596_v49  ;;  %v5843_v3 = vpop.eup %5028  ;;  %v1986_v51 = vand.u32 3, %v5851_v13  ;;  %v5885_v13 = vsel %vm9004_vm1, %v1273_v4, 0.0 }
 0x173   : > { %5044 = vtanh.f32 %v578_v40  ;;  %v4716_v12 = vpop.f32.mrb[32].mxu0  ;;  %v5857_v38 = vpop.f32.mrb[32].mxu1  ;;  %9018 = vst [vmem:[#allocation13_spill] sm:$0xff] %v5867_v41  ;;  %9020 = vst [vmem:[#allocation15_spill] sm:$0xff] %v5885_v13  ;;  %v1997_v4 = vsub.s32 0, %v5867_v41  ;;  %vm1996_vm14 = vcmp.lt.s32.totalorder %v5867_v41, 0 }
 0x174   : > { %v5031_v14 = vpop.eup %5030  ;;  %v593_v15 = vadd.f32 %v4716_v12, %v5581_v25  ;;  %v587_v24 = vpop.f32.mrb[33].mxu0  ;;  %v1402_v6 = vsel %vm9004_vm1, %v1225_v22, 0.0  ;;  %9016 = vst [vmem:[#allocation11_spill] sm:$0xff] %v5857_v38  ;;  %5046 = vtanh.f32 %v828_v56  ;;  %v1405_v22 = vsel %vm9004_vm1, %v1226_v20, 0.0 }
 0x175   : > { %v5033_v30 = vpop.eup %5032  ;;  %v588_v18 = vadd.f32 %v5581_v25, %v587_v24  ;;  %1400 = vadd.xlane.f32.xlu1 %v1399_v17  ;;  %v5862_v48 = vpop.f32.mrb[33].mxu1  ;;  %v1228_v8 = vmul.f32 %v5031_v14, %v5596_v49  ;;  %v843_v17 = vadd.f32 %v5678_v16, %v5581_v25  ;;  %v9090_v20 = vmov 0 }
 0x176   : > { %1403 = vadd.xlane.f32.xlu0 %v1402_v6  ;;  %9017 = vst [vmem:[#allocation12_spill] sm:$0xff] %v5862_v48  ;;  %5048 = vtanh.f32 %v593_v15  ;;  %v1227_v42 = vmul.f32 %v5033_v30, %v5596_v49  ;;  %v5869_v43 = vpop.eup %5034  ;;  %v1994_v30 = vsub.s32 0, %v1993_v63 }
 0x177   : > { %5050 = vtanh.f32 %v588_v18  ;;  %v4719_v46 = vpop.f32.mrb[34].mxu0  ;;  %v5880_v12 = vpop.f32.mrb[34].mxu1 }
 0x178   : > { %v5037_v54 = vpop.eup %5036  ;;  %v603_v40 = vadd.f32 %v4719_v46, %v5581_v25  ;;  %v597_v56 = vpop.f32.mrb[35].mxu0  ;;  %v1408_v50 = vsel %vm9004_vm1, %v1227_v42, 0.0  ;;  %9019 = vst [vmem:[#allocation14_spill] sm:$0xff] %v5880_v12  ;;  %v1987_v42 = vsub.s32 0, %v1986_v51  ;;  %v5905_v46 = vadd.s32 %v5689_v28, %v1720_v52 }
 0x179   : > { %v5039_v15 = vpop.eup %5038  ;;  %v598_v24 = vadd.f32 %v5581_v25, %v597_v56  ;;  %1406 = vadd.xlane.f32.xlu1 %v1405_v22  ;;  %v5889_v6 = vpop.f32.mrb[35].mxu1 }
 0x17a   : > { %1409 = vadd.xlane.f32.xlu0 %v1408_v50  ;;  %9021 = vst [vmem:[#allocation16_spill] sm:$0xff] %v5889_v6  ;;  %5052 = vtanh.f32 %v603_v40  ;;  %v1229_v14 = vmul.f32 %v5039_v15, %v5596_v49  ;;  %v5901_v18 = vpop.eup %5040  ;;  %9024 = vst [vmem:[#allocation17_spill] sm:$0xff] %v5905_v46  ;;  %v1411_v50 = vsel %vm9004_vm1, %v1228_v8, 0.0  ;;  %v1230_v6 = vmul.f32 %v5037_v54, %v5596_v49 }
 0x17b   : > { %5054 = vtanh.f32 %v598_v24  ;;  %v4722_v16 = vpop.f32.mrb[36].mxu0  ;;  %v5911_v12 = vpop.f32.mrb[36].mxu1  ;;  %v838_v8 = vadd.f32 %v5581_v25, %v5686_v23  ;;  %v1274_v23 = vmul.f32 %v5691_v29, %v5596_v49  ;;  %v1721_v29 = vadd.s32 40, %v5684_v21 }
 0x17c   : > { %v5043_v40 = vpop.eup %5042  ;;  %v613_v56 = vadd.f32 %v4722_v16, %v5581_v25  ;;  %v607_v22 = vpop.f32.mrb[37].mxu0  ;;  %v1414_v15 = vsel %vm9004_vm1, %v1229_v14, 0.0  ;;  %9025 = vst [vmem:[#allocation18_spill] sm:$0xff] %v5911_v12  ;;  %5056 = vtanh.f32 %v843_v17  ;;  %v5925_v14 = vsel %vm1989_vm5, %v1994_v30, %v1993_v63 }
 0x17d   : > { %v5045_v24 = vpop.eup %5044  ;;  %v608_v13 = vadd.f32 %v5581_v25, %v607_v22  ;;  %1412 = vadd.xlane.f32.xlu1 %v1411_v50  ;;  %v5920_v16 = vpop.f32.mrb[37].mxu1  ;;  %v5928_v22 = vmin.u32 %v1997_v4, %v5867_v41  ;;  %v5934_v17 = vsel %vm1982_vm7, %v1987_v42, %v1986_v51  ;;  %v1417_v4 = vsel %vm9004_vm1, %v1230_v6, 0.0 }
 0x17e   : > { %1415 = vadd.xlane.f32.xlu0 %v1414_v15  ;;  %9026 = vst [vmem:[#allocation19_spill] sm:$0xff] %v5920_v16  ;;  %5058 = vtanh.f32 %v613_v56  ;;  %v1231_v54 = vmul.f32 %v5045_v24, %v5596_v49  ;;  %v5930_v50 = vpop.eup %5046  ;;  %v2004_v56 = vsub.s32 0, %v5905_v46  ;;  %vm2873_vm8 = vcmp.ne.s32.totalorder %v5925_v14, 0 }
 0x17f   : > { %5060 = vtanh.f32 %v608_v13  ;;  %v4725_v15 = vpop.f32.mrb[38].mxu0  ;;  %v1232_v13 = vmul.f32 %v5043_v40, %v5596_v49  ;;  %vm3001_vm9 = vcmp.lt.s32.totalorder %v5925_v14, 0  ;;  %v5949_v6 = vadd.s32 4, %v5925_v14 }
 0x180   : > { %v5049_v24 = vpop.eup %5048  ;;  %v623_v63 = vadd.f32 %v4725_v15, %v5581_v25  ;;  %v617_v30 = vpop.f32.mrb[39].mxu0  ;;  %v1420_v52 = vsel %vm9004_vm1, %v1231_v54, 0.0  ;;  %v2000_v42 = vand.u32 3, %v5928_v22  ;;  %vm2872_vm10 = vcmp.ne.s32.totalorder %v5934_v17, 0  ;;  %vm5965_vm12 = vmand %vm3001_vm9, %vm2873_vm8 }
 0x181   : > { %v5051_v16 = vpop.eup %5050  ;;  %v618_v12 = vadd.f32 %v5581_v25, %v617_v30  ;;  %1418 = vadd.xlane.f32.xlu1 %v1417_v4  ;;  %vm3000_vm11 = vcmp.lt.s32.totalorder %v5934_v17, 0  ;;  %v1234_v4 = vmul.f32 %v5049_v24, %v5596_v49  ;;  %v5976_v24 = vpop.f32.mrb[38].mxu1  ;;  %vm2003_vm15 = vcmp.lt.s32.totalorder %v5905_v46, 0 }
 0x182   : > { %1421 = vadd.xlane.f32.xlu0 %v1420_v52  ;;  %5062 = vtanh.f32 %v623_v63  ;;  %v1233_v51 = vmul.f32 %v5051_v16, %v5596_v49  ;;  %v5955_v52 = vmin.u32 %v2004_v56, %v5905_v46  ;;  %v1423_v16 = vsel %vm9004_vm1, %v1232_v13, 0.0  ;;  %9030 = vst [vmem:[#allocation21_spill] sm:$0xff] %v5976_v24  ;;  %vm5983_vm13 = vmand %vm3000_vm11, %vm2872_vm10 }
 0x183   : > { %5064 = vtanh.f32 %v618_v12  ;;  %v4728_v40 = vpop.f32.mrb[40].mxu0  ;;  %v5974_v13 = vadd.s32 %v5689_v28, %v1721_v29  ;;  %v1429_v48 = vsel %vm9004_vm1, %v1234_v4, 0.0  ;;  %v1277_v46 = vmul.f32 %v5815_v32, %v5596_v49 }
 0x184   : > { %v5053_v54 = vpop.eup %5052  ;;  %v633_v15 = vadd.f32 %v4728_v40, %v5581_v25  ;;  %v627_v63 = vpop.f32.mrb[41].mxu0  ;;  %v1426_v30 = vsel %vm9004_vm1, %v1233_v51, 0.0  ;;  %v5971_v40 = vadd.s32 4, %v5934_v17  ;;  %5066 = vtanh.f32 %v838_v8 }
 0x185   : > { %v5055_v22 = vpop.eup %5054  ;;  %v628_v56 = vadd.f32 %v5581_v25, %v627_v63  ;;  %1424 = vadd.xlane.f32.xlu1 %v1423_v16  ;;  %9029 = vst [vmem:[#allocation20_spill] sm:$0xff] %v5974_v13  ;;  %v5988_v16 = vsel %vm9004_vm1, %v1274_v23, 0.0  ;;  %v2001_v8 = vsub.s32 0, %v2000_v42  ;;  %v2007_v24 = vand.u32 3, %v5955_v52 }
 0x186   : > { %1427 = vadd.xlane.f32.xlu0 %v1426_v30  ;;  %5068 = vtanh.f32 %v633_v15  ;;  %v1235_v51 = vmul.f32 %v5055_v22, %v5596_v49  ;;  %9033 = vst [vmem:[#allocation22_spill] sm:$0xff] %v5988_v16  ;;  %v5990_v30 = vpop.f32.mrb[39].mxu1  ;;  %v5992_v29 = vpop.eup %5056  ;;  %v2011_v22 = vsub.s32 0, %v5974_v13  ;;  %vm2010_vm7 = vcmp.lt.s32.totalorder %v5974_v13, 0 }
 0x187   : > { %9034 = vst [vmem:[#allocation23_spill] sm:$0xff] %v5990_v30  ;;  %5070 = vtanh.f32 %v628_v56  ;;  %v4731_v15 = vpop.f32.mrb[42].mxu0  ;;  %v1236_v56 = vmul.f32 %v5053_v54, %v5596_v49  ;;  %v6015_v54 = vsel %vm1996_vm14, %v2001_v8, %v2000_v42 }
 0x188   : > { %v5059_v57 = vpop.eup %5058  ;;  %v643_v23 = vadd.f32 %v4731_v15, %v5581_v25  ;;  %v637_v16 = vpop.f32.mrb[43].mxu0  ;;  %v1432_v30 = vsel %vm9004_vm1, %v1235_v51, 0.0  ;;  %v853_v15 = vadd.f32 %v5697_v37, %v5581_v25  ;;  %9035 = vst [vmem:[#allocation24_spill] sm:$0xff] %v6015_v54  ;;  %vm2874_vm0 = vcmp.ne.s32.totalorder %v6015_v54, 0 }
 0x189   : > { %v5061_v36 = vpop.eup %5060  ;;  %v638_v39 = vadd.f32 %v5581_v25, %v637_v16  ;;  %1430 = vadd.xlane.f32.xlu1 %v1429_v48  ;;  %v1722_v48 = vadd.s32 48, %v5684_v21  ;;  %v1275_v16 = vmul.f32 %v5764_v35, %v5596_v49  ;;  %v1238_v42 = vmul.f32 %v5059_v57, %v5596_v49 }
 0x18a   : > { %1433 = vadd.xlane.f32.xlu0 %v1432_v30  ;;  %5072 = vtanh.f32 %v643_v23  ;;  %v1237_v4 = vmul.f32 %v5061_v36, %v5596_v49  ;;  %v2008_v30 = vsub.s32 0, %v2007_v24  ;;  %v1435_v36 = vsel %vm9004_vm1, %v1236_v56, 0.0 }
 0x18b   : > { %5074 = vtanh.f32 %v638_v39  ;;  %v4734_v51 = vpop.f32.mrb[44].mxu0  ;;  %v6028_v35 = vmin.u32 %v2011_v22, %v5974_v13  ;;  %vm3002_vm2 = vcmp.lt.s32.totalorder %v6015_v54, 0  ;;  %v6033_v56 = vadd.s32 %v5689_v28, %v1722_v48 }
 0x18c   : > { %v5063_v37 = vpop.eup %5062  ;;  %v653_v52 = vadd.f32 %v4734_v51, %v5581_v25  ;;  %v647_v23 = vpop.f32.mrb[45].mxu0  ;;  %v1438_v38 = vsel %vm9004_vm1, %v1237_v4, 0.0  ;;  %5076 = vtanh.f32 %v853_v15  ;;  %v6041_v15 = vsel %vm9004_vm1, %v1275_v16, 0.0  ;;  %vm6060_vm3 = vmand %vm3002_vm2, %vm2874_vm0 }
 0x18d   : > { %v5065_v8 = vpop.eup %5064  ;;  %v648_v39 = vadd.f32 %v5581_v25, %v647_v23  ;;  %1436 = vadd.xlane.f32.xlu1 %v1435_v36  ;;  %9036 = vst [vmem:[#allocation25_spill] sm:$0xff] %v6033_v56  ;;  %9038 = vst [vmem:[#allocation27_spill] sm:$0xff] %v6041_v15  ;;  %v6045_v22 = vsel %vm2003_vm15, %v2008_v30, %v2007_v24  ;;  %v1240_v0 = vmul.f32 %v5063_v37, %v5596_v49  ;;  %v9042_v24 = vmov 0 }
 0x18e   : > { %1439 = vadd.xlane.f32.xlu0 %v1438_v38  ;;  %5078 = vtanh.f32 %v653_v52  ;;  %v1239_v51 = vmul.f32 %v5065_v8, %v5596_v49  ;;  %v6035_v57 = vpop.eup %5066  ;;  %v6038_v38 = vadd.s32 4, %v6015_v54  ;;  %9039 = vst [vmem:[#allocation28_spill] sm:$0xff] %v6045_v22  ;;  %v6047_v52 = vpop.f32.mrb[40].mxu1  ;;  %v1441_v8 = vsel %vm9004_vm1, %v1238_v42, 0.0 }
 0x18f   : > { %5080 = vtanh.f32 %v648_v39  ;;  %v4737_v4 = vpop.f32.mrb[46].mxu0  ;;  %9040 = vst [vmem:[#allocation29_spill] sm:$0xff] %v6047_v52  ;;  %v6053_v34 = vpop.f32.mrb[41].mxu1  ;;  %v9043_v24 = vsel %vm6060_vm3, 4294967295, %v9042_v24  ;;  %v848_v30 = vadd.f32 %v5581_v25, %v5706_v45  ;;  %v1276_v37 = vmul.f32 %v5735_v5, %v5596_v49  ;;  %v6078_v45 = vld [vmem:[%s8980_s2] ss:$0 sm:$0xff] }
 0x190   : > { %9037 = vst [vmem:[#allocation26_spill] sm:$0xff] %v6038_v38  ;;  %v5069_v23 = vpop.eup %5068  ;;  %v663_v48 = vadd.f32 %v4737_v4, %v5581_v25  ;;  %v657_v36 = vpop.f32.mrb[47].mxu0  ;;  %v1444_v39 = vsel %vm9004_vm1, %v1239_v51, 0.0  ;;  %9041 = vst [vmem:[#allocation30_spill] sm:$0xff] %v6053_v34  ;;  %v2014_v42 = vand.u32 3, %v6028_v35  ;;  %v2018_v4 = vsub.s32 0, %v6033_v56 }
 0x191   : > { %v5071_v16 = vpop.eup %5070  ;;  %v658_v15 = vadd.f32 %v5581_v25, %v657_v36  ;;  %1442 = vadd.xlane.f32.xlu1 %v1441_v8  ;;  %9044 = vst [vmem:[#allocation31_spill] sm:$0xff] %v9043_v24  ;;  %v1723_v36 = vadd.s32 56, %v5684_v21  ;;  %vm2875_vm4 = vcmp.ne.s32.totalorder %v6045_v22, 0  ;;  %vm3003_vm5 = vcmp.lt.s32.totalorder %v6045_v22, 0 }
 0x192   : > { %1445 = vadd.xlane.f32.xlu0 %v1444_v39  ;;  %5082 = vtanh.f32 %v663_v48  ;;  %v1241_v51 = vmul.f32 %v5071_v16, %v5596_v49  ;;  %v1242_v39 = vmul.f32 %v5069_v23, %v5596_v49  ;;  %v1447_v48 = vsel %vm9004_vm1, %v1240_v0, 0.0  ;;  %vm6097_vm8 = vmand %vm3003_vm5, %vm2875_vm4 }
 0x193   : > { %5084 = vtanh.f32 %v658_v15  ;;  %v4740_v8 = vpop.f32.mrb[48].mxu0  ;;  %v6089_v52 = vadd.s32 4, %v6045_v22  ;;  %v6111_v23 = vsel %vm9004_vm1, %v1276_v37, 0.0  ;;  %v1724_v24 = vadd.s32 64, %v5684_v21 }
 0x194   : > { %v5073_v25 = vpop.eup %5072  ;;  %v673_v5 = vadd.f32 %v6078_v45, %v4740_v8  ;;  %v667_v35 = vpop.f32.mrb[49].mxu0  ;;  %v1450_v15 = vsel %vm9004_vm1, %v1241_v51, 0.0  ;;  %v2015_v8 = vsub.s32 0, %v2014_v42  ;;  %9049 = vst [vmem:[#allocation34_spill] sm:$0xff] %v6111_v23  ;;  %vm2017_vm11 = vcmp.lt.s32.totalorder %v6033_v56, 0 }
 0x195   : > { %v5075_v16 = vpop.eup %5074  ;;  %v668_v34 = vadd.f32 %v6078_v45, %v667_v35  ;;  %1448 = vadd.xlane.f32.xlu1 %v1447_v48  ;;  %v6102_v35 = vmin.u32 %v2018_v4, %v6033_v56  ;;  %v6105_v48 = vadd.s32 %v5689_v28, %v1723_v36  ;;  %v1244_v36 = vmul.f32 %v5073_v25, %v5596_v49 }
 0x196   : > { %1451 = vadd.xlane.f32.xlu0 %v1450_v15  ;;  %5086 = vtanh.f32 %v673_v5  ;;  %v1243_v0 = vmul.f32 %v5075_v16, %v5596_v49  ;;  %v6107_v15 = vpop.eup %5076  ;;  %v1453_v16 = vsel %vm9004_vm1, %v1242_v39, 0.0  ;;  %v6126_v37 = vsel %vm2010_vm7, %v2015_v8, %v2014_v42  ;;  %v6131_v49 = vld [vmem:[%s8981_s3] ss:$0 sm:$0xff] }
 0x197   : > { %9047 = vst [vmem:[#allocation32_spill] sm:$0xff] %v6105_v48  ;;  %9048 = vst [vmem:[#allocation33_spill] sm:$0xff] %v6107_v15  ;;  %5088 = vtanh.f32 %v668_v34  ;;  %v4743_v5 = vpop.f32.mrb[50].mxu0  ;;  %v2025_v25 = vsub.s32 0, %v6105_v48  ;;  %v6144_v42 = vadd.s32 %v5689_v28, %v1724_v24  ;;  %vm2876_vm9 = vcmp.ne.s32.totalorder %v6126_v37, 0 }
 0x198   : > { %v5079_v41 = vpop.eup %5078  ;;  %v683_v54 = vadd.f32 %v6078_v45, %v4743_v5  ;;  %v677_v4 = vpop.f32.mrb[51].mxu0  ;;  %v1456_v38 = vsel %vm9004_vm1, %v1243_v0, 0.0  ;;  %5090 = vtanh.f32 %v848_v30  ;;  %v6139_v5 = vsel %vm9004_vm1, %v1277_v46, 0.0 }
 0x199   : > { %v5081_v34 = vpop.eup %5080  ;;  %v678_v15 = vadd.f32 %v6078_v45, %v677_v4  ;;  %1454 = vadd.xlane.f32.xlu1 %v1453_v16  ;;  %v6136_v0 = vpop.f32.mrb[42].mxu1  ;;  %9051 = vst [vmem:[#allocation36_spill] sm:$0xff] %v6139_v5  ;;  %9052 = vst [vmem:[#allocation37_spill] sm:$0xff] %v6144_v42  ;;  %v1246_v32 = vmul.f32 %v6131_v49, %v5079_v41  ;;  %vm3004_vm10 = vcmp.lt.s32.totalorder %v6126_v37, 0  ;;  %vm2024_vm2 = vcmp.lt.s32.totalorder %v6105_v48, 0 }
 0x19a   : > { %1457 = vadd.xlane.f32.xlu0 %v1456_v38  ;;  %5092 = vtanh.f32 %v683_v54  ;;  %v1245_v39 = vmul.f32 %v6131_v49, %v5081_v34  ;;  %v2021_v38 = vand.u32 3, %v6102_v35  ;;  %9050 = vst [vmem:[#allocation35_spill] sm:$0xff] %v6136_v0  ;;  %v863_v54 = vadd.f32 %v6078_v45, %v5721_v59  ;;  %v6146_v8 = vpop.f32.mrb[43].mxu1  ;;  %vm6173_vm14 = vmand %vm3004_vm10, %vm2876_vm9 }
 0x19b   : > { %5094 = vtanh.f32 %v678_v15  ;;  %v4746_v30 = vpop.f32.mrb[52].mxu0  ;;  %9053 = vst [vmem:[#allocation38_spill] sm:$0xff] %v6146_v8  ;;  %v1459_v34 = vsel %vm9004_vm1, %v1244_v36, 0.0  ;;  %v6158_v36 = vmin.u32 %v2025_v25, %v6105_v48  ;;  %vm2031_vm4 = vcmp.lt.s32.totalorder %v6144_v42, 0 }
 0x19c   : > { %v5083_v16 = vpop.eup %5082  ;;  %v693_v35 = vadd.f32 %v6078_v45, %v4746_v30  ;;  %v687_v4 = vpop.f32.mrb[53].mxu0  ;;  %v1462_v15 = vsel %vm9004_vm1, %v1245_v39, 0.0  ;;  %v2022_v24 = vsub.s32 0, %v2021_v38  ;;  %v6161_v39 = vadd.s32 4, %v6126_v37 }
 0x19d   : > { %v5085_v46 = vpop.eup %5084  ;;  %v688_v0 = vadd.f32 %v6078_v45, %v687_v4  ;;  %1460 = vadd.xlane.f32.xlu1 %v1459_v34  ;;  %v2032_v30 = vsub.s32 0, %v6144_v42  ;;  %v1725_v4 = vadd.s32 72, %v5684_v21  ;;  %v1248_v25 = vmul.f32 %v6131_v49, %v5083_v16 }
 0x19e   : > { %1463 = vadd.xlane.f32.xlu0 %v1462_v15  ;;  %5096 = vtanh.f32 %v693_v35  ;;  %v1247_v59 = vmul.f32 %v6131_v49, %v5085_v46  ;;  %v1465_v35 = vsel %vm9004_vm1, %v1246_v32, 0.0  ;;  %v858_v32 = vadd.f32 %v6078_v45, %v5727_v62 }
 0x19f   : > { %5098 = vtanh.f32 %v688_v0  ;;  %v4749_v41 = vpop.f32.mrb[54].mxu0  ;;  %v1278_v16 = vmul.f32 %v6131_v49, %v5791_v9  ;;  %v2028_v13 = vand.u32 3, %v6158_v36  ;;  %v6195_v9 = vmin.u32 %v2032_v30, %v6144_v42  ;;  %v9134_v0 = vld [vmem:[#allocation11_spill] sm:$0xff] }
 0x1a0   : > { %v5087_v34 = vpop.eup %5086  ;;  %v703_v15 = vadd.f32 %v6078_v45, %v4749_v41  ;;  %v697_v8 = vpop.f32.mrb[55].mxu0  ;;  %v1468_v46 = vsel %vm9004_vm1, %v1247_v59, 0.0  ;;  %5100 = vtanh.f32 %v863_v54  ;;  %v6185_v41 = vsel %vm2017_vm11, %v2022_v24, %v2021_v38 }
 0x1a1   : > { %v5089_v5 = vpop.eup %5088  ;;  %v698_v23 = vadd.f32 %v6078_v45, %v697_v8  ;;  %1466 = vadd.xlane.f32.xlu1 %v1465_v35  ;;  %9056 = vst [vmem:[#allocation39_spill] sm:$0xff] %v6185_v41  ;;  %v1471_v36 = vsel %vm9004_vm1, %v1248_v25, 0.0  ;;  %vm2877_vm15 = vcmp.ne.s32.totalorder %v6185_v41, 0  ;;  %v6207_v30 = vsel %vm9004_vm1, %v1278_v16, 0.0 }
 0x1a2   : > { %1469 = vadd.xlane.f32.xlu0 %v1468_v46  ;;  %5102 = vtanh.f32 %v703_v15  ;;  %v1249_v59 = vmul.f32 %v6131_v49, %v5089_v5  ;;  %v6188_v22 = vpop.eup %5090  ;;  %v6198_v5 = vadd.s32 %v5689_v28, %v1725_v4  ;;  %v1250_v15 = vmul.f32 %v6131_v49, %v5087_v34  ;;  %9058 = vst [vmem:[#allocation41_spill] sm:$0xff] %v6207_v30 }
 0x1a3   : > { %5104 = vtanh.f32 %v698_v23  ;;  %v4752_v8 = vpop.f32.mrb[56].mxu0  ;;  %vm3005_vm0 = vcmp.lt.s32.totalorder %v6185_v41, 0  ;;  %v2029_v25 = vsub.s32 0, %v2028_v13  ;;  %v2035_v34 = vand.u32 3, %v6195_v9 }
 0x1a4   : > { %9057 = vst [vmem:[#allocation40_spill] sm:$0xff] %v6198_v5  ;;  %v5093_v54 = vpop.eup %5092  ;;  %v713_v38 = vadd.f32 %v6078_v45, %v4752_v8  ;;  %v707_v24 = vpop.f32.mrb[57].mxu0  ;;  %v1474_v23 = vsel %vm9004_vm1, %v1249_v59, 0.0  ;;  %5106 = vtanh.f32 %v858_v32  ;;  %v2039_v8 = vsub.s32 0, %v6198_v5  ;;  %vm6234_vm5 = vmand %vm3005_vm0, %vm2877_vm15 }
 0x1a5   : > { %v5095_v35 = vpop.eup %5094  ;;  %v708_v46 = vadd.f32 %v6078_v45, %v707_v24  ;;  %1472 = vadd.xlane.f32.xlu1 %v1471_v36  ;;  %v6214_v24 = vpop.f32.mrb[44].mxu1  ;;  %v6224_v9 = vadd.s32 4, %v6185_v41  ;;  %vm2038_vm10 = vcmp.lt.s32.totalorder %v6198_v5, 0  ;;  %v898_v63 = vadd.f32 %v6078_v45, %v5836_v7  ;;  %v9113_v7 = vld [vmem:[#allocation6_spill] sm:$0xff] }
 0x1a6   : > { %1475 = vadd.xlane.f32.xlu0 %v1474_v23  ;;  %5108 = vtanh.f32 %v713_v38  ;;  %v1251_v4 = vmul.f32 %v6131_v49, %v5095_v35  ;;  %9059 = vst [vmem:[#allocation42_spill] sm:$0xff] %v6214_v24  ;;  %v1477_v38 = vsel %vm9004_vm1, %v1250_v15, 0.0  ;;  %v1252_v35 = vmul.f32 %v6131_v49, %v5093_v54 }
 0x1a7   : > { %5110 = vtanh.f32 %v708_v46  ;;  %v4755_v59 = vpop.f32.mrb[58].mxu0  ;;  %v6220_v46 = vpop.f32.mrb[45].mxu1  ;;  %9061 = vst [vmem:[#allocation44_spill] sm:$0xff] %v6224_v9  ;;  %v9062_v54 = vmov 0  ;;  %v9126_v51 = vsel %vm6173_vm14, %v6161_v39, %v6126_v37  ;;  %v913_v37 = vadd.f32 %v6078_v45, %v9134_v0 }
 0x1a8   : > { %v5097_v32 = vpop.eup %5096  ;;  %v723_v16 = vadd.f32 %v6078_v45, %v4755_v59  ;;  %v717_v36 = vpop.f32.mrb[59].mxu0  ;;  %v1480_v23 = vsel %vm9004_vm1, %v1251_v4, 0.0  ;;  %9060 = vst [vmem:[#allocation43_spill] sm:$0xff] %v6220_v46  ;;  %v1279_v59 = vmul.f32 %v6131_v49, %v5869_v43  ;;  %v9063_v54 = vsel %vm6234_vm5, 4294967295, %v9062_v54 }
 0x1a9   : > { %v5099_v62 = vpop.eup %5098  ;;  %v718_v30 = vadd.f32 %v6078_v45, %v717_v36  ;;  %1478 = vadd.xlane.f32.xlu1 %v1477_v38  ;;  %9064 = vst [vmem:[#allocation45_spill] sm:$0xff] %v9063_v54  ;;  %v6240_v4 = vsel %vm2024_vm2, %v2029_v25, %v2028_v13  ;;  %v1726_v36 = vadd.s32 80, %v5684_v21  ;;  %v2036_v38 = vsub.s32 0, %v2035_v34 }
 0x1aa   : > { %1481 = vadd.xlane.f32.xlu0 %v1480_v23  ;;  %5112 = vtanh.f32 %v723_v16  ;;  %v1253_v15 = vmul.f32 %v6131_v49, %v5099_v62  ;;  %v6243_v43 = vpop.eup %5100  ;;  %v1254_v62 = vmul.f32 %v6131_v49, %v5097_v32  ;;  %v6247_v23 = vmin.u32 %v2039_v8, %v6198_v5 }
 0x1ab   : > { %9065 = vst [vmem:[#allocation46_spill] sm:$0xff] %v6243_v43  ;;  %5114 = vtanh.f32 %v718_v30  ;;  %v4758_v16 = vpop.f32.mrb[60].mxu0  ;;  %v1483_v48 = vsel %vm9004_vm1, %v1252_v35, 0.0  ;;  %v6253_v25 = vadd.s32 %v5689_v28, %v1726_v36  ;;  %v6261_v32 = vsel %vm9004_vm1, %v1279_v59, 0.0 }
 0x1ac   : > { %v5103_v46 = vpop.eup %5102  ;;  %v733_v24 = vadd.f32 %v6078_v45, %v4758_v16  ;;  %v727_v56 = vpop.f32.mrb[61].mxu0  ;;  %v1486_v13 = vsel %vm9004_vm1, %v1253_v15, 0.0  ;;  %9066 = vst [vmem:[#allocation47_spill] sm:$0xff] %v6261_v32  ;;  %v873_v35 = vadd.f32 %v6078_v45, %v5749_v19  ;;  %vm2878_vm7 = vcmp.ne.s32.totalorder %v6240_v4, 0 }
 0x1ad   : > { %v5105_v43 = vpop.eup %5104  ;;  %v728_v30 = vadd.f32 %v6078_v45, %v727_v56  ;;  %1484 = vadd.xlane.f32.xlu1 %v1483_v48  ;;  %v1280_v56 = vmul.f32 %v6131_v49, %v5843_v3  ;;  %v1489_v16 = vsel %vm9004_vm1, %v1254_v62, 0.0  ;;  %v6274_v59 = vsel %vm2031_vm4, %v2036_v38, %v2035_v34 }
 0x1ae   : > { %1487 = vadd.xlane.f32.xlu0 %v1486_v13  ;;  %5116 = vtanh.f32 %v733_v24  ;;  %v1255_v15 = vmul.f32 %v6131_v49, %v5105_v43  ;;  %v6269_v48 = vpop.eup %5106  ;;  %v2042_v19 = vand.u32 3, %v6247_v23  ;;  %v6277_v24 = vpop.f32.mrb[46].mxu1  ;;  %v1256_v32 = vmul.f32 %v6131_v49, %v5103_v46 }
 0x1af   : > { %5118 = vtanh.f32 %v728_v30  ;;  %v4761_v36 = vpop.f32.mrb[62].mxu0  ;;  %9067 = vst [vmem:[#allocation48_spill] sm:$0xff] %v6277_v24  ;;  %v2046_v30 = vsub.s32 0, %v6253_v25  ;;  %v6283_v41 = vpop.f32.mrb[47].mxu1  ;;  %vm3006_vm9 = vcmp.lt.s32.totalorder %v6240_v4, 0  ;;  %v6288_v38 = vadd.s32 4, %v6240_v4 }
 0x1b0   : > { %v5109_v43 = vpop.eup %5108  ;;  %v743_v13 = vadd.f32 %v6078_v45, %v4761_v36  ;;  %v737_v8 = vpop.f32.mrb[63].mxu0  ;;  %v1492_v3 = vsel %vm9004_vm1, %v1255_v15, 0.0  ;;  %9068 = vst [vmem:[#allocation49_spill] sm:$0xff] %v6283_v41  ;;  %vm2879_vm11 = vcmp.ne.s32.totalorder %v6274_v59, 0  ;;  %vm3007_vm15 = vcmp.lt.s32.totalorder %v6274_v59, 0  ;;  %vm6305_vm0 = vmand %vm3006_vm9, %vm2878_vm7 }
 0x1b1   : > { %v5111_v62 = vpop.eup %5110  ;;  %v738_v34 = vadd.f32 %v6078_v45, %v737_v8  ;;  %1490 = vadd.xlane.f32.xlu1 %v1489_v16  ;;  %v2043_v46 = vsub.s32 0, %v2042_v19  ;;  %v6295_v8 = vmin.u32 %v2046_v30, %v6253_v25  ;;  %v1727_v15 = vadd.s32 88, %v5684_v21  ;;  %vm6325_vm2 = vmand %vm3007_vm15, %vm2879_vm11 }
 0x1b2   : > { %1493 = vadd.xlane.f32.xlu0 %v1492_v3  ;;  %5120 = vtanh.f32 %v743_v13  ;;  %v1257_v23 = vmul.f32 %v6131_v49, %v5111_v62  ;;  %v1495_v16 = vsel %vm9004_vm1, %v1256_v32, 0.0  ;;  %v1258_v13 = vmul.f32 %v6131_v49, %v5109_v43 }
 0x1b3   : > { %5122 = vtanh.f32 %v738_v34  ;;  %v1728_v30 = vadd.s32 96, %v5684_v21  ;;  %v6311_v41 = vadd.s32 4, %v6274_v59  ;;  %v868_v32 = vadd.f32 %v6078_v45, %v5757_v31 }
 0x1b4   : > { %v5113_v36 = vpop.eup %5112  ;;  %v1498_v3 = vsel %vm9004_vm1, %v1257_v23, 0.0  ;;  %v1281_v43 = vmul.f32 %v6131_v49, %v5930_v50  ;;  %v6318_v23 = vadd.s32 %v5689_v28, %v1727_v15  ;;  %5124 = vtanh.f32 %v873_v35 }
 0x1b5   : > { %v5115_v34 = vpop.eup %5114  ;;  %1496 = vadd.xlane.f32.xlu1 %v1495_v16  ;;  %v6333_v31 = vadd.s32 %v5689_v28, %v1728_v30  ;;  %v6341_v15 = vsel %vm2038_vm10, %v2043_v46, %v2042_v19  ;;  %v1260_v30 = vmul.f32 %v6131_v49, %v5113_v36  ;;  %5126 = vtanh.f32 %v868_v32 }
 0x1b6   : > { %1499 = vadd.xlane.f32.xlu0 %v1498_v3  ;;  %v1259_v24 = vmul.f32 %v6131_v49, %v5115_v34  ;;  %v6330_v3 = vsel %vm9004_vm1, %v1280_v56, 0.0  ;;  %v2049_v34 = vand.u32 3, %v6295_v8  ;;  %v2053_v42 = vsub.s32 0, %v6318_v23 }
 0x1b7   : > { %9073 = vst [vmem:[#allocation50_spill] sm:$0xff] %v6330_v3  ;;  %v1501_v56 = vsel %vm9004_vm1, %v1258_v13, 0.0  ;;  %v2060_v9 = vsub.s32 0, %v6333_v31  ;;  %v6354_v46 = vsel %vm9004_vm1, %v1281_v43, 0.0  ;;  %v883_v8 = vadd.f32 %v6078_v45, %v5776_v53 }
 0x1b8   : > { %v5117_v35 = vpop.eup %5116  ;;  %v1504_v3 = vsel %vm9004_vm1, %v1259_v24, 0.0  ;;  %9074 = vst [vmem:[#allocation51_spill] sm:$0xff] %v6354_v46  ;;  %v6358_v24 = vpop.f32.mrb[48].mxu1  ;;  %v878_v13 = vadd.f32 %v6078_v45, %v5782_v58  ;;  %vm2880_vm4 = vcmp.ne.s32.totalorder %v6341_v15, 0  ;;  %vm3008_vm7 = vcmp.lt.s32.totalorder %v6341_v15, 0 }
 0x1b9   : > { %v5119_v54 = vpop.eup %5118  ;;  %1502 = vadd.xlane.f32.xlu1 %v1501_v56  ;;  %9075 = vst [vmem:[#allocation52_spill] sm:$0xff] %v6358_v24  ;;  %v4370_v56 = vmin.u32 %v2060_v9, %v6333_v31  ;;  %v6365_v50 = vpop.f32.mrb[49].mxu1  ;;  %vm2045_vm9 = vcmp.lt.s32.totalorder %v6253_v25, 0  ;;  %v2050_v53 = vsub.s32 0, %v2049_v34  ;;  %v1507_v43 = vsel %vm9004_vm1, %v1260_v30, 0.0  ;;  %vm6384_vm10 = vmand %vm3008_vm7, %vm2880_vm4 }
 0x1ba   : > { %1505 = vadd.xlane.f32.xlu0 %v1504_v3  ;;  %v1261_v36 = vmul.f32 %v6131_v49, %v5119_v54  ;;  %v4369_v3 = vmin.u32 %v2053_v42, %v6318_v23  ;;  %9076 = vst [vmem:[#allocation53_spill] sm:$0xff] %v6365_v50  ;;  %v1262_v58 = vmul.f32 %v6131_v49, %v5117_v35  ;;  %v6374_v9 = vadd.s32 4, %v6341_v15 }
 0x1bb   : > { %v1282_v50 = vmul.f32 %v6131_v49, %v5901_v18  ;;  %v2063_v24 = vand.u32 3, %v4370_v56  ;;  %v1729_v46 = vadd.s32 104, %v5684_v21  ;;  %v9077_v35 = vmov 0 }
 0x1bc   : > { %v5121_v32 = vpop.eup %5120  ;;  %v1510_v54 = vsel %vm9004_vm1, %v1261_v36, 0.0  ;;  %v2056_v19 = vand.u32 3, %v4369_v3  ;;  %v9078_v35 = vsel %vm6384_vm10, 4294967295, %v9077_v35  ;;  %5128 = vtanh.f32 %v883_v8 }
 0x1bd   : > { %v5123_v42 = vpop.eup %5122  ;;  %1508 = vadd.xlane.f32.xlu1 %v1507_v43  ;;  %v1283_v30 = vmul.f32 %v6131_v49, %v6035_v57  ;;  %v893_v18 = vadd.f32 %v6078_v45, %v5805_v11  ;;  %v6394_v36 = vsel %vm2045_vm9, %v2050_v53, %v2049_v34  ;;  %v6397_v56 = vadd.s32 %v5689_v28, %v1729_v46  ;;  %v6434_v11 = vpop.f32.mrb[50].mxu1 }
 0x1be   : > { %1511 = vadd.xlane.f32.xlu0 %v1510_v54  ;;  %v1263_v5 = vmul.f32 %v6131_v49, %v5123_v42  ;;  %v2057_v3 = vsub.s32 0, %v2056_v19  ;;  %v1730_v43 = vadd.s32 112, %v5684_v21  ;;  %v6400_v54 = vpop.eup %5124  ;;  %v1513_v8 = vsel %vm9004_vm1, %v1262_v58, 0.0  ;;  %9081 = vst [vmem:[#allocation56_spill] sm:$0xff] %v6434_v11 }
 0x1bf   : > { %v1264_v57 = vmul.f32 %v6131_v49, %v5121_v32  ;;  %vm2052_vm11 = vcmp.lt.s32.totalorder %v6318_v23, 0  ;;  %5130 = vtanh.f32 %v878_v13  ;;  %v6411_v34 = vsel %vm9004_vm1, %v1282_v50, 0.0  ;;  %v6419_v32 = vpop.eup %5126 }
 0x1c0   : > { %v1516_v42 = vsel %vm9004_vm1, %v1263_v5, 0.0  ;;  %9079 = vst [vmem:[#allocation54_spill] sm:$0xff] %v6411_v34  ;;  %v2064_v46 = vsub.s32 0, %v2063_v24  ;;  %vm2881_vm15 = vcmp.ne.s32.totalorder %v6394_v36, 0  ;;  %v6415_v5 = vsel %vm9004_vm1, %v1283_v30, 0.0  ;;  %v9144_v34 = vld [vmem:[#allocation12_spill] sm:$0xff] }
 0x1c1   : > { %1514 = vadd.xlane.f32.xlu1 %v1513_v8  ;;  %9080 = vst [vmem:[#allocation55_spill] sm:$0xff] %v6415_v5  ;;  %vm2059_vm4 = vcmp.lt.s32.totalorder %v6333_v31, 0  ;;  %v2067_v53 = vsub.s32 0, %v6397_v56  ;;  %vm3009_vm7 = vcmp.lt.s32.totalorder %v6394_v36, 0  ;;  %v6423_v58 = vadd.s32 4, %v6394_v36 }
 0x1c2   : > { %1517 = vadd.xlane.f32.xlu0 %v1516_v42  ;;  %v6425_v13 = vsel %vm2052_vm11, %v2057_v3, %v2056_v19  ;;  %v6428_v50 = vadd.s32 %v5689_v28, %v1730_v43  ;;  %v1519_v8 = vsel %vm9004_vm1, %v1264_v57, 0.0  ;;  %5132 = vtanh.f32 %v893_v18  ;;  %v6444_v43 = vpop.f32.mrb[51].mxu1  ;;  %vm6483_vm11 = vmand %vm3009_vm7, %vm2881_vm15 }
 0x1c3   : > { %v888_v30 = vadd.f32 %v6078_v45, %v5810_v26  ;;  %v4371_v42 = vmin.u32 %v2067_v53, %v6397_v56  ;;  %v6437_v5 = vsel %vm2059_vm4, %v2064_v46, %v2063_v24  ;;  %v1284_v19 = vmul.f32 %v6131_v49, %v5992_v29  ;;  %9082 = vst [vmem:[#allocation57_spill] sm:$0xff] %v6444_v43 }
 0x1c4   : > { %v1285_v3 = vmul.f32 %v6131_v49, %v6188_v22  ;;  %v2074_v18 = vsub.s32 0, %v6428_v50  ;;  %v1731_v57 = vadd.s32 120, %v5684_v21  ;;  %v6461_v22 = vadd.s32 4, %v6425_v13 }
 0x1c5   : > { %1520 = vadd.xlane.f32.xlu1 %v1519_v8  ;;  %v2070_v26 = vand.u32 3, %v4371_v42  ;;  %v1732_v46 = vadd.s32 128, %v5684_v21  ;;  %v9091_v20 = vsel %vm6483_vm11, 4294967295, %v9090_v20  ;;  %vm2883_vm9 = vcmp.ne.s32.totalorder %v6437_v5, 0  ;;  %v9162_v8 = vld [vmem:[#allocation15_spill] sm:$0xff] }
 0x1c6   : > { %1523 = vadd.xlane.f32.xlu0 %v5738_v10  ;;  %v9083_v10 = vsel %vm5896_vm6, %v5872_v47, %v5832_v55  ;;  %v4372_v24 = vmin.u32 %v2074_v18, %v6428_v50  ;;  %v6466_v53 = vpop.eup %5128  ;;  %v9087_v55 = vsel %vm5965_vm12, %v5949_v6, %v5925_v14  ;;  %vm3011_vm10 = vcmp.lt.s32.totalorder %v6437_v5, 0 }
 0x1c7   : > { %vm6455_vm4 = vcmp.eq.s32.totalorder %v9083_v10, %v5786_v60  ;;  %9086 = vst [vmem:[#allocation58_spill] sm:$0xff] %v6466_v53  ;;  %vm6474_vm6 = vcmp.eq.s32.totalorder %v9087_v55, %v5786_v60  ;;  %v2071_v12 = vsub.s32 0, %v2070_v26  ;;  %v6490_v14 = vadd.s32 %v5689_v28, %v1731_v57  ;;  %v9100_v57 = vld [vmem:[#allocation33_spill] sm:$0xff]  ;;  %v9103_v55 = vld [vmem:[#allocation26_spill] sm:$0xff]  ;;  %v9114_v53 = vld [vmem:[#allocation8_spill] sm:$0xff] }
 0x1c8   : > { %v9092_v6 = vsel %vm5983_vm13, %v5971_v40, %v5934_v17  ;;  %v6506_v42 = vadd.s32 4, %v6437_v5  ;;  %v2077_v18 = vand.u32 3, %v4372_v24  ;;  %vm9095_vm7 = vcmp.ne.s32.totalorder %v6425_v13, 0 }
 0x1c9   : > { %1526 = vadd.xlane.f32.xlu1 %v5731_v1  ;;  %vm6500_vm12 = vcmp.eq.s32.totalorder %v9092_v6, %v5786_v60  ;;  %v903_v1 = vadd.f32 %v6078_v45, %v5827_v27  ;;  %vm9096_vm13 = vcmp.lt.s32.totalorder %v6425_v13, 0  ;;  %vm9099_vm15 = vcmp.lt.s32.totalorder %v6397_v56, 0  ;;  %v6530_v24 = vpop.eup %5130  ;;  %v9104_v6 = vld [vmem:[#allocation24_spill] sm:$0xff] }
 0x1ca   : > { %1529 = vadd.xlane.f32.xlu0 %v5761_v33  ;;  %v6511_v33 = vadd.s32 %v5689_v28, %v1732_v46  ;;  %vm6517_vm1 = vmand %vm9096_vm13, %vm9095_vm7  ;;  %v6523_v40 = vsel %vm9099_vm15, %v2071_v12, %v2070_v26  ;;  %v1286_v27 = vmul.f32 %v6131_v49, %v9100_v57  ;;  %v2081_v10 = vsub.s32 0, %v6490_v14  ;;  %9101 = vst [vmem:[#allocation33_spill] sm:$0xff] %v6530_v24  ;;  %v9108_v26 = vld [vmem:[#allocation13_spill] sm:$0xff] }
 0x1cb   : > { %v9105_v43 = vsel %vm6060_vm3, %v9103_v55, %v9104_v6  ;;  %v9106_v11 = vmov 0  ;;  %vm6551_vm13 = vmand %vm3011_vm10, %vm2883_vm9  ;;  %v9109_v12 = vmov 0  ;;  %5134 = vtanh.f32 %v888_v30  ;;  %v9115_v30 = vld [vmem:[#allocation28_spill] sm:$0xff] }
 0x1cc   : > { %vm6538_vm7 = vcmp.eq.s32.totalorder %v9105_v43, %v5786_v60  ;;  %v9110_v12 = vsel %vm6551_vm13, 4294967295, %v9109_v12  ;;  %vm9111_vm3 = vcmask 261120   ;;  %v2078_v57 = vsub.s32 0, %v2077_v18 }
 0x1cd   : > { %v9107_v11 = vsel %vm6538_vm7, 4294967295, %v9106_v11  ;;  %v6556_v43 = vsel %vm9111_vm3, %v1284_v19, 0.0  ;;  %v4373_v46 = vmin.u32 %v2081_v10, %v6490_v14  ;;  %v1287_v55 = vmul.f32 %v6131_v49, %v6269_v48  ;;  %1532 = vadd.xlane.f32.xlu1 %v9113_v7  ;;  %v9119_v10 = vld [vmem:[#allocation17_spill] sm:$0xff]  ;;  %vm9120_vm7 = vmmov %vm9111_vm3 }
 0x1ce   : > { %9112 = vst [vmem:[#allocation31_spill] sm:$0xff] %v6556_v43  ;;  %v2088_v6 = vsub.s32 0, %v6511_v33  ;;  %1535 = vadd.xlane.f32.xlu0 %v9114_v53  ;;  %v9116_v19 = vsel %vm6097_vm8, %v6089_v52, %v9115_v30  ;;  %vm2884_vm15 = vcmp.ne.s32.totalorder %v6523_v40, 0  ;;  %vm3012_vm11 = vcmp.lt.s32.totalorder %v6523_v40, 0  ;;  %v6581_v53 = vpop.eup %5132  ;;  %vm9123_vm8 = vmmov %vm9111_vm3  ;;  %v9138_v52 = vld [vmem:[#allocation44_spill] sm:$0xff] }
 0x1cf   : > { %vm6571_vm9 = vcmp.eq.s32.totalorder %v9116_v19, %v5786_v60  ;;  %v6579_v48 = vsel %vm9120_vm7, %v1285_v3, 0.0  ;;  %5136 = vtanh.f32 %v903_v1  ;;  %9122 = vst [vmem:[#allocation24_spill] sm:$0xff] %v6581_v53  ;;  %v6592_v7 = vsel %vm9123_vm8, %v1286_v27, 0.0  ;;  %v9129_v27 = vld [vmem:[#allocation20_spill] sm:$0xff]  ;;  %vm6615_vm10 = vmand %vm3012_vm11, %vm2884_vm15  ;;  %v9139_v53 = vld [vmem:[#allocation39_spill] sm:$0xff] }
 0x1d0   : > { %9121 = vst [vmem:[#allocation26_spill] sm:$0xff] %v6579_v48  ;;  %5138 = vtanh.f32 %v898_v63  ;;  %9124 = vst [vmem:[#allocation13_spill] sm:$0xff] %v6592_v7  ;;  %v6595_v3 = vadd.s32 4, %v6523_v40  ;;  %vm9125_vm7 = vcmp.lt.s32.totalorder %v6428_v50, 0  ;;  %v2084_v30 = vand.u32 3, %v4373_v46  ;;  %v9135_v46 = vld [vmem:[#allocation7_spill] sm:$0xff] }
 0x1d1   : > { %v6599_v1 = vsel %vm9125_vm7, %v2078_v57, %v2077_v18  ;;  %v4374_v19 = vmin.u32 %v2088_v6, %v6511_v33  ;;  %vm6608_vm3 = vcmp.eq.s32.totalorder %v9126_v51, %v5786_v60  ;;  %vm2080_vm7 = vcmp.lt.s32.totalorder %v6490_v14, 0  ;;  %vm9132_vm13 = vmmov %vm9123_vm8  ;;  %1538 = vadd.xlane.f32.xlu1 %v9135_v46  ;;  %v9136_v6 = vld [vmem:[#allocation9_spill] sm:$0xff]  ;;  %v9281_v18 = vld [vmem:[#allocation58_spill] sm:$0xff] }
 0x1d2   : > { %v6621_v57 = vsel %vm9132_vm13, %v1287_v55, 0.0  ;;  %v1733_v39 = vadd.s32 136, %v5684_v21  ;;  %1541 = vadd.xlane.f32.xlu0 %v9136_v6  ;;  %v9140_v7 = vsel %vm6234_vm5, %v9138_v52, %v9139_v53  ;;  %v9143_v55 = vld [vmem:[#allocation25_spill] sm:$0xff]  ;;  %v908_v24 = vadd.f32 %v6078_v45, %v9144_v34  ;;  %v6642_v6 = vpop.f32.mrb[52].mxu1  ;;  %v1332_v52 = vpop.xlane.xlu0 %1331 }
 0x1d3   : > { %9133 = vst [vmem:[#allocation6_spill] sm:$0xff] %v6621_v57  ;;  %vm6634_vm14 = vcmp.eq.s32.totalorder %v9140_v7, %v5786_v60  ;;  %v2085_v57 = vsub.s32 0, %v2084_v30  ;;  %v2091_v0 = vand.u32 3, %v4374_v19  ;;  %v1734_v46 = vadd.s32 144, %v5684_v21  ;;  %9145 = vst [vmem:[#allocation8_spill] sm:$0xff] %v6642_v6  ;;  %v9149_v7 = vld [vmem:[#allocation46_spill] sm:$0xff] }
 0x1d4   : > { %vm9146_vm15 = vcmp.lt.s32.totalorder %v5704_v44, 2048  ;;  %v1288_v34 = vmul.f32 %v6131_v49, %v9149_v7  ;;  %v6657_v19 = vadd.s32 %v5689_v28, %v1733_v39  ;;  %v6659_v51 = vpop.f32.mrb[53].mxu1  ;;  %vm9151_vm8 = vcmp.lt.s32.totalorder %v5789_v61, 2048  ;;  %v9157_v39 = vld [vmem:[#allocation32_spill] sm:$0xff] }
 0x1d5   : > { %vm6648_vm5 = vmand %vm6455_vm4, %vm9146_vm15  ;;  %9150 = vst [vmem:[#allocation28_spill] sm:$0xff] %v6659_v51  ;;  %v9154_v29 = vsel %vm6305_vm0, %v6288_v38, %v6240_v4  ;;  %v6686_v47 = vsel %vm2080_vm7, %v2085_v57, %v2084_v30  ;;  %v2092_v62 = vsub.s32 0, %v2091_v0  ;;  %vm9158_vm0 = vcmp.lt.s32.totalorder %v5799_v2, 2048  ;;  %v6702_v30 = vpop.eup %5134  ;;  %v9161_v2 = vld [vmem:[#allocation10_spill] sm:$0xff]  ;;  %v6818_v53 = vpop.f32.mrb[54].mxu1 }
 0x1d6   : > { %vm6665_vm4 = vmand %vm6474_vm6, %vm9151_vm8  ;;  %vm6675_vm15 = vcmp.eq.s32.totalorder %v9154_v29, %v5786_v60  ;;  %v6698_v38 = vadd.s32 4, %v6599_v1  ;;  %vm2886_vm11 = vcmp.ne.s32.totalorder %v6686_v47, 0  ;;  %5140 = vtanh.f32 %v913_v37  ;;  %1544 = vadd.xlane.f32.xlu1 %v9161_v2  ;;  %1547 = vadd.xlane.f32.xlu0 %v9162_v8  ;;  %v9166_v37 = vld [vmem:[#allocation37_spill] sm:$0xff] }
 0x1d7   : > { %vm6693_vm8 = vmand %vm6500_vm12, %vm9158_vm0  ;;  %v3895_v57 = vsel %vm6648_vm5, %v1332_v52, 0.0  ;;  %v9163_v29 = vsel %vm6325_vm2, %v6311_v41, %v6274_v59  ;;  %vm9167_vm0 = vcmp.ne.s32.totalorder %v6599_v1, 0  ;;  %vm9168_vm5 = vcmp.lt.s32.totalorder %v6599_v1, 0  ;;  %v1338_v41 = vpop.xlane.xlu1 %1337  ;;  %v1335_v59 = vpop.xlane.xlu0 %1334 }
 0x1d8   : > { %vm6714_vm12 = vcmp.eq.s32.totalorder %v9163_v29, %v5786_v60  ;;  %vm6723_vm6 = vmand %vm9168_vm5, %vm9167_vm0  ;;  %5142 = vtanh.f32 %v908_v24  ;;  %v2095_v16 = vsub.s32 0, %v6657_v19  ;;  %v6729_v52 = vadd.s32 %v5689_v28, %v1734_v46  ;;  %v9176_v29 = vld [vmem:[#allocation14_spill] sm:$0xff] }
 0x1d9   : > { %vm9171_vm2 = vcmp.lt.s32.totalorder %v9108_v26, 2048  ;;  %vm9172_vm7 = vnez %v9107_v11  ;;  %v6740_v8 = vadd.s32 4, %v6686_v47  ;;  %vm9175_vm0 = vcmask 261120   ;;  %v6753_v26 = vpop.eup %5136 }
 0x1da   : > { %vm6735_vm13 = vmand %vm9172_vm7, %vm9171_vm2  ;;  %v6743_v24 = vsel %vm9175_vm0, %v1288_v34, 0.0  ;;  %v6747_v46 = vmul.f32 %v6131_v49, %v6419_v32  ;;  %v6751_v51 = vadd.f32 %v6078_v45, %v9176_v29  ;;  %9177 = vst [vmem:[#allocation17_spill] sm:$0xff] %v6753_v26  ;;  %v3897_v11 = vsel %vm6665_vm4, %v1338_v41, 0.0  ;;  %v6772_v26 = vpop.eup %5138  ;;  %v9210_v41 = vld [vmem:[#allocation34_spill] sm:$0xff] }
 0x1db   : > { %v3896_v6 = vsel %vm6693_vm8, %v1335_v59, 0.0  ;;  %vm9178_vm7 = vcmp.lt.s32.totalorder %v6686_v47, 0  ;;  %vm9181_vm2 = vcmp.lt.s32.totalorder %v6511_v33, 0  ;;  %v4375_v29 = vmin.u32 %v2095_v16, %v6657_v19  ;;  %v9194_v59 = vld [vmem:[#allocation27_spill] sm:$0xff] }
 0x1dc   : > { %vm6763_vm5 = vmand %vm9178_vm7, %vm2886_vm11  ;;  %v6769_v32 = vsel %vm9181_vm2, %v2092_v62, %v2091_v0  ;;  %vm9182_vm4 = vcmask 31744   ;;  %vm9184_vm8 = vcmp.lt.s32.totalorder %v9119_v10, 2048  ;;  %vm9187_vm7 = vnez %v9078_v35  ;;  %v9192_v10 = vld [vmem:[#allocation16_spill] sm:$0xff]  ;;  %v9193_v35 = vld [vmem:[#allocation22_spill] sm:$0xff]  ;;  %1553 = vadd.xlane.f32.xlu0 %v9194_v59  ;;  %v6839_v59 = vpop.f32.mrb[55].mxu1 }
 0x1dd   : > { %v4025_v44 = vsel %vm9182_vm4, %v3895_v57, 0.0  ;;  %vm9183_vm0 = vmmov %vm9182_vm4  ;;  %v9188_v0 = vsel %vm9187_vm7, %v6374_v9, %v6341_v15  ;;  %v9191_v57 = vld [vmem:[#allocation40_spill] sm:$0xff]  ;;  %v3397_v43 = vsel %vm6723_vm6, %v6698_v38, %v6599_v1  ;;  %1550 = vadd.xlane.f32.xlu1 %v9193_v35  ;;  %v2098_v1 = vand.u32 3, %v4375_v29 }
 0x1de   : > { %v4026_v4 = vsel %vm9183_vm0, %v3896_v6, 0.0  ;;  %vm6780_vm11 = vmand %vm6571_vm9, %vm9184_vm8  ;;  %vm6790_vm2 = vcmp.eq.s32.totalorder %v9188_v0, %v5786_v60  ;;  %v6801_v6 = vadd.f32 %v6078_v45, %v9192_v10  ;;  %vm9195_vm9 = vnez %v9091_v20  ;;  %v1344_v20 = vpop.xlane.xlu0 %1343 }
 0x1df   : > { %v4027_v16 = vadd.f32 %v4026_v4, %v4025_v44  ;;  %v9196_v15 = vsel %vm9195_vm9, %v6423_v58, %v6394_v36  ;;  %vm2094_vm8 = vcmp.lt.s32.totalorder %v6657_v19, 0  ;;  %v2102_v38 = vsub.s32 0, %v6729_v52  ;;  %vm9199_vm7 = vmmov %vm9182_vm4  ;;  %v1341_v4 = vpop.xlane.xlu1 %1340 }
 0x1e0   : > { %vm6811_vm0 = vcmp.eq.s32.totalorder %v9196_v15, %v5786_v60  ;;  %v4028_v44 = vsel %vm9199_vm7, %v3897_v11, 0.0  ;;  %v3398_v36 = vsel %vm6763_vm5, %v6740_v8, %v6686_v47  ;;  %v1735_v58 = vadd.s32 152, %v5684_v21  ;;  %vm9203_vm9 = vmmov %vm9182_vm4 }
 0x1e1   : > { %v4029_v0 = vadd.f32 %v4028_v44, %v4027_v16  ;;  %v3898_v29 = vsel %vm6735_vm13, %v1341_v4, 0.0  ;;  %v3899_v10 = vsel %vm6780_vm11, %v1344_v20, 0.0  ;;  %vm9200_vm7 = vcmp.lt.s32.totalorder %v9129_v27, 2048  ;;  %1556 = vadd.xlane.f32.xlu1 %v9210_v41  ;;  %v9211_v44 = vld [vmem:[#allocation36_spill] sm:$0xff]  ;;  %v6885_v20 = vpop.eup %5140 }
 0x1e2   : > { %vm6835_vm6 = vmand %vm6608_vm3, %vm9200_vm7  ;;  %v2099_v35 = vsub.s32 0, %v2098_v1  ;;  %v4030_v15 = vsel %vm9182_vm4, %v3898_v29, 0.0  ;;  %v4032_v16 = vsel %vm9203_vm9, %v3899_v10, 0.0  ;;  %vm9204_vm13 = vcmp.lt.s32.totalorder %v9143_v55, 2048  ;;  %1559 = vadd.xlane.f32.xlu0 %v9211_v44 }
 0x1e3   : > { %vm6847_vm11 = vmand %vm6634_vm14, %vm9204_vm13  ;;  %v9207_v63 = vsel %vm6517_vm1, %v6461_v22, %v6425_v13  ;;  %vm3015_vm9 = vcmp.lt.s32.totalorder %v6769_v32, 0  ;;  %v4376_v48 = vmin.u32 %v2102_v38, %v6729_v52  ;;  %v4031_v55 = vadd.f32 %v4030_v15, %v4029_v0  ;;  %v1350_v0 = vpop.xlane.xlu0 %1349 }
 0x1e4   : > { %vm6857_vm3 = vcmp.eq.s32.totalorder %v9207_v63, %v5786_v60  ;;  %vm9212_vm14 = vnez %v9110_v12  ;;  %v9214_v22 = vmov 0  ;;  %v3271_v17 = vadd.s32 4, %v6769_v32  ;;  %v1347_v12 = vpop.xlane.xlu1 %1346 }
 0x1e5   : > { %v9213_v13 = vsel %vm9212_vm14, %v6506_v42, %v6437_v5  ;;  %v6880_v38 = vsel %vm2094_vm8, %v2099_v35, %v2098_v1  ;;  %v6883_v4 = vadd.s32 %v5689_v28, %v1735_v58  ;;  %vm9216_vm13 = vcmp.lt.s32.totalorder %v9157_v39, 2048  ;;  %v6898_v58 = vpop.eup %5142  ;;  %v9249_v5 = vld [vmem:[#allocation50_spill] sm:$0xff] }
 0x1e6   : > { %vm6872_vm1 = vcmp.eq.s32.totalorder %v9213_v13, %v5786_v60  ;;  %vm6891_vm14 = vmand %vm6675_vm15, %vm9216_vm13  ;;  %v2105_v42 = vand.u32 3, %v4376_v48  ;;  %v1736_v1 = vadd.s32 160, %v5684_v21  ;;  %v4033_v29 = vadd.f32 %v4032_v16, %v4031_v55  ;;  %v9230_v48 = vld [vmem:[#allocation41_spill] sm:$0xff]  ;;  %v9231_v55 = vld [vmem:[#allocation47_spill] sm:$0xff] }
 0x1e7   : > { %v9215_v22 = vsel %vm6872_vm1, 4294967295, %v9214_v22  ;;  %v3900_v10 = vsel %vm6835_vm6, %v1347_v12, 0.0  ;;  %v3901_v7 = vsel %vm6847_vm11, %v1350_v0, 0.0  ;;  %vm9219_vm15 = vcmp.ne.s32.totalorder %v6769_v32, 0  ;;  %1562 = vadd.xlane.f32.xlu1 %v9230_v48  ;;  %1565 = vadd.xlane.f32.xlu0 %v9231_v55  ;;  %v1356_v44 = vpop.xlane.xlu0 %1355 }
 0x1e8   : > { %vm6908_vm13 = vmand %vm3015_vm9, %vm9219_vm15  ;;  %vm2101_vm4 = vcmp.lt.s32.totalorder %v6729_v52, 0  ;;  %vm9222_vm8 = vcmask 31744   ;;  %vm9224_vm1 = vcmp.lt.s32.totalorder %v9166_v37, 2048  ;;  %v9227_v16 = vsel %vm6615_vm10, %v6595_v3, %v6523_v40  ;;  %v1353_v41 = vpop.xlane.xlu1 %1352 }
 0x1e9   : > { %v4034_v35 = vsel %vm9222_vm8, %v3900_v10, 0.0  ;;  %vm9223_vm7 = vmmov %vm9222_vm8  ;;  %vm6929_vm11 = vcmp.eq.s32.totalorder %v9227_v16, %v5786_v60  ;;  %vm3652_vm9 = vcmp.lt.s32.totalorder %v6397_v56, 2048  ;;  %v3272_v37 = vadd.s32 4, %v6880_v38 }
 0x1ea   : > { %v4036_v15 = vsel %vm9223_vm7, %v3901_v7, 0.0  ;;  %vm6919_vm6 = vmand %vm6714_vm12, %vm9224_vm1  ;;  %v2106_v63 = vsub.s32 0, %v2105_v42  ;;  %v4035_v61 = vadd.f32 %v4034_v35, %v4033_v29  ;;  %vm6938_vm12 = vcmp.eq.s32.totalorder %v3397_v43, %v5786_v60 }
 0x1eb   : > { %vm9234_vm1 = vcmp.ne.s32.totalorder %v6880_v38, 0  ;;  %vm9235_vm7 = vcmp.lt.s32.totalorder %v6880_v38, 0  ;;  %vm9238_vm15 = vcmask 261120   ;;  %5144 = vtanh.f32 %v6751_v51  ;;  %1568 = vadd.xlane.f32.xlu1 %v9249_v5  ;;  %v1362_v35 = vpop.xlane.xlu0 %1361  ;;  %v9274_v5 = vld [vmem:[#allocation19_spill] sm:$0xff] }
 0x1ec   : > { %vm6947_vm8 = vmand %vm9235_vm7, %vm9234_vm1  ;;  %v6953_v3 = vsel %vm9238_vm15, %v6747_v46, 0.0  ;;  %v2109_v43 = vsub.s32 0, %v6883_v4  ;;  %v3399_v13 = vsel %vm6908_vm13, %v3271_v17, %v6769_v32  ;;  %v6962_v12 = vsel %vm2101_vm4, %v2106_v63, %v2105_v42  ;;  %v9250_v42 = vld [vmem:[#allocation51_spill] sm:$0xff]  ;;  %v1359_v39 = vpop.xlane.xlu1 %1358 }
 0x1ed   : > { %v1290_v0 = vmul.f32 %v6131_v49, %v6400_v54  ;;  %v6967_v46 = vadd.s32 %v5689_v28, %v1736_v1  ;;  %v4037_v29 = vadd.f32 %v4036_v15, %v4035_v61  ;;  %v3902_v51 = vsel %vm6891_vm14, %v1353_v41, 0.0  ;;  %1571 = vadd.xlane.f32.xlu0 %v9250_v42  ;;  %v9253_v1 = vld [vmem:[#allocation33_spill] sm:$0xff] }
 0x1ee   : > { %v3903_v10 = vsel %vm6919_vm6, %v1356_v44, 0.0  ;;  %vm9239_vm1 = vcmp.lt.s32.totalorder %v9191_v57, 2048  ;;  %vm6987_vm4 = vcmp.eq.s32.totalorder %v3398_v36, %v5786_v60  ;;  %vm2889_vm6 = vcmp.ne.s32.totalorder %v6962_v12, 0  ;;  %v6993_v57 = vpop.f32.mrb[56].mxu1  ;;  %v9269_v44 = vld [vmem:[#allocation54_spill] sm:$0xff] }
 0x1ef   : > { %vm6977_vm13 = vmand %vm6790_vm2, %vm9239_vm1  ;;  %vm9244_vm2 = vcmask 31744   ;;  %vm9246_vm15 = vcmp.lt.s32.totalorder %v6253_v25, 2048  ;;  %v3400_v8 = vsel %vm6947_vm8, %v3272_v37, %v6880_v38  ;;  %vm3017_vm5 = vcmp.lt.s32.totalorder %v6962_v12, 0  ;;  %v7009_v34 = vpop.f32.mrb[57].mxu1  ;;  %v9257_v37 = vld [vmem:[#allocation18_spill] sm:$0xff]  ;;  %1574 = vadd.xlane.f32.xlu1 %v9269_v44 }
 0x1f0   : > { %v4038_v62 = vsel %vm9244_vm2, %v3902_v51, 0.0  ;;  %vm9245_vm7 = vmmov %vm9244_vm2  ;;  %vm7014_vm2 = vcmp.eq.s32.totalorder %v3399_v13, %v5786_v60  ;;  %v7020_v9 = vadd.s32 4, %v6962_v12  ;;  %v4377_v38 = vmin.u32 %v2109_v43, %v6883_v4 }
 0x1f1   : > { %v4040_v17 = vsel %vm9245_vm7, %v3903_v10, 0.0  ;;  %vm7001_vm1 = vmand %vm6811_vm0, %vm9246_vm15  ;;  %v4039_v36 = vadd.f32 %v4038_v62, %v4037_v29  ;;  %v1291_v7 = vmul.f32 %v6131_v49, %v9253_v1  ;;  %5146 = vtanh.f32 %v6801_v6  ;;  %v1368_v29 = vpop.xlane.xlu0 %1367 }
 0x1f2   : > { %vm7027_vm8 = vmand %vm3017_vm5, %vm2889_vm6  ;;  %vm9256_vm7 = vcmask 261120   ;;  %v2116_v16 = vsub.s32 0, %v6967_v46  ;;  %v933_v63 = vadd.f32 %v6078_v45, %v9257_v37  ;;  %v3904_v49 = vsel %vm6977_vm13, %v1359_v39, 0.0  ;;  %v9279_v39 = vld [vmem:[#allocation31_spill] sm:$0xff] }
 0x1f3   : > { %v7033_v11 = vsel %vm9256_vm7, %v1290_v0, 0.0  ;;  %v4041_v61 = vadd.f32 %v4040_v17, %v4039_v36  ;;  %v3905_v48 = vsel %vm7001_vm1, %v1362_v35, 0.0  ;;  %vm9258_vm6 = vcmp.lt.s32.totalorder %v6318_v23, 2048  ;;  %v1365_v0 = vpop.xlane.xlu1 %1364  ;;  %v7097_v36 = vld [vmem:[%s8980_s2] ss:$0 sm:$0xff]  ;;  %1580 = vadd.xlane.f32.xlu1 %v9279_v39  ;;  %v9280_v35 = vld [vmem:[#allocation26_spill] sm:$0xff] }
 0x1f4   : > { %vm7046_vm15 = vmand %vm6857_vm3, %vm9258_vm6  ;;  %vm2108_vm5 = vcmp.lt.s32.totalorder %v6883_v4, 0  ;;  %vm9261_vm7 = vcmask 31744   ;;  %vm9263_vm14 = vcmp.lt.s32.totalorder %v6333_v31, 2048  ;;  %vm9264_vm13 = vnez %v9215_v22  ;;  %v9270_v31 = vld [vmem:[#allocation55_spill] sm:$0xff] }
 0x1f5   : > { %v4042_v55 = vsel %vm9261_vm7, %v3904_v49, 0.0  ;;  %vm9262_vm0 = vmmov %vm9261_vm7  ;;  %vm7062_vm1 = vcmp.eq.s32.totalorder %v3400_v8, %v5786_v60  ;;  %vm3656_vm3 = vcmp.lt.s32.totalorder %v6657_v19, 2048  ;;  %v2112_v27 = vand.u32 3, %v4377_v38  ;;  %1577 = vadd.xlane.f32.xlu0 %v9270_v31  ;;  %v7080_v62 = vpop.eup %5144  ;;  %v1374_v37 = vpop.xlane.xlu0 %1373  ;;  %v9315_v31 = vld [vmem:[#allocation23_spill] sm:$0xff] }
 0x1f6   : > { %v4044_v45 = vsel %vm9262_vm0, %v3905_v48, 0.0  ;;  %vm7057_vm10 = vmand %vm9264_vm13, %vm9263_vm14  ;;  %v4378_v43 = vmin.u32 %v2116_v16, %v6967_v46  ;;  %v4043_v41 = vadd.f32 %v4042_v55, %v4041_v61  ;;  %v3401_v22 = vsel %vm7027_vm8, %v7020_v9, %v6962_v12 }
 0x1f7   : > { %vm3657_vm14 = vcmp.lt.s32.totalorder %v6729_v52, 2048  ;;  %vm9271_vm0 = vcmask 261120   ;;  %vm2115_vm6 = vcmp.lt.s32.totalorder %v6967_v46, 0  ;;  %v2113_v51 = vsub.s32 0, %v2112_v27  ;;  %vm7090_vm8 = vmand %vm6929_vm11, %vm3652_vm9  ;;  %v1371_v16 = vpop.xlane.xlu1 %1370 }
 0x1f8   : > { %v7076_v13 = vsel %vm9271_vm0, %v1291_v7, 0.0  ;;  %v2119_v10 = vand.u32 3, %v4378_v43  ;;  %5148 = vtanh.f32 %v933_v63  ;;  %v1737_v32 = vadd.s32 168, %v5684_v21 }
 0x1f9   : > { %v4045_v17 = vadd.f32 %v4044_v45, %v4043_v41  ;;  %v3906_v12 = vsel %vm7046_vm15, %v1365_v0, 0.0  ;;  %v3907_v47 = vsel %vm7057_vm10, %v1368_v29, 0.0  ;;  %v928_v42 = vadd.f32 %v7097_v36, %v9274_v5  ;;  %vm9275_vm15 = vmmov %vm9261_vm7  ;;  %1583 = vadd.xlane.f32.xlu0 %v9280_v35  ;;  %v1380_v25 = vpop.xlane.xlu0 %1379 }
 0x1fa   : > { %v4046_v9 = vsel %vm9275_vm15, %v3906_v12, 0.0  ;;  %v4048_v38 = vsel %vm9261_vm7, %v3907_v47, 0.0  ;;  %vm9276_vm10 = vcmp.lt.s32.totalorder %v6428_v50, 2048  ;;  %v2114_v2 = vsel %vm2108_vm5, %v2113_v51, %v2112_v27  ;;  %v7119_v50 = vld [vmem:[%s8981_s3] ss:$0 sm:$0xff]  ;;  %v7153_v27 = vpop.f32.mrb[58].mxu1 }
 0x1fb   : > { %vm7107_vm11 = vmand %vm6938_vm12, %vm9276_vm10  ;;  %v2120_v1 = vsub.s32 0, %v2119_v10  ;;  %v4047_v7 = vadd.f32 %v4046_v9, %v4045_v17  ;;  %vm2890_vm9 = vcmp.ne.s32.totalorder %v2114_v2, 0  ;;  %vm3018_vm13 = vcmp.lt.s32.totalorder %v2114_v2, 0  ;;  %v7155_v43 = vpop.eup %5146  ;;  %v7169_v0 = vpop.f32.mrb[59].mxu1  ;;  %v9293_v51 = vld [vmem:[#allocation13_spill] sm:$0xff] }
 0x1fc   : > { %vm3658_vm0 = vcmp.lt.s32.totalorder %v6883_v4, 2048  ;;  %v1292_v15 = vmul.f32 %v7119_v50, %v9281_v18  ;;  %vm9282_vm12 = vcmp.lt.s32.totalorder %v6490_v14, 2048  ;;  %v3274_v61 = vadd.s32 4, %v2114_v2  ;;  %1586 = vadd.xlane.f32.xlu1 %v9293_v51 }
 0x1fd   : > { %vm7127_vm5 = vmand %vm6987_vm4, %vm9282_vm12  ;;  %v2121_v49 = vsel %vm2115_vm6, %v2120_v1, %v2119_v10  ;;  %vm3659_vm15 = vcmp.lt.s32.totalorder %v6967_v46, 2048  ;;  %v7135_v48 = vadd.s32 %v5689_v28, %v1737_v32  ;;  %v1738_v6 = vadd.s32 176, %v5684_v21  ;;  %v9294_v10 = vld [vmem:[#allocation6_spill] sm:$0xff] }
 0x1fe   : > { %v4049_v55 = vadd.f32 %v4048_v38, %v4047_v7  ;;  %v3908_v14 = vsel %vm7090_vm8, %v1371_v16, 0.0  ;;  %v3909_v54 = vsel %vm7107_vm11, %v1374_v37, 0.0  ;;  %vm7143_vm4 = vcmp.eq.s32.totalorder %v3401_v22, %v5786_v60  ;;  %vm7149_vm6 = vmand %vm3018_vm13, %vm2890_vm9  ;;  %1589 = vadd.xlane.f32.xlu0 %v9294_v10  ;;  %v1386_v16 = vpop.xlane.xlu0 %1385 }
 0x1ff   : > { %v4050_v41 = vsel %vm9261_vm7, %v3908_v14, 0.0  ;;  %vm9289_vm8 = vmmov %vm9261_vm7  ;;  %vm9290_vm10 = vcmp.lt.s32.totalorder %v6511_v33, 2048  ;;  %vm2891_vm9 = vcmp.ne.s32.totalorder %v2121_v49, 0  ;;  %v1293_v22 = vmul.f32 %v7119_v50, %v6702_v30  ;;  %v1377_v33 = vpop.xlane.xlu1 %1376 }
 0x200   : > { %v4052_v44 = vsel %vm9289_vm8, %v3909_v54, 0.0  ;;  %vm7163_vm11 = vmand %vm7014_vm2, %vm9290_vm10  ;;  %v4051_v29 = vadd.f32 %v4050_v41, %v4049_v55  ;;  %vm3019_vm13 = vcmp.lt.s32.totalorder %v2121_v49, 0  ;;  %v3275_v32 = vadd.s32 4, %v2121_v49  ;;  %1592 = vadd.xlane.f32.xlu1 %v6743_v24  ;;  %v9308_v24 = vld [vmem:[#allocation21_spill] sm:$0xff] }
 0x201   : > { %5150 = vtanh.f32 %v928_v42  ;;  %v3402_v17 = vsel %vm7149_vm6, %v3274_v61, %v2114_v2  ;;  %vm7175_vm2 = vmand %vm3019_vm13, %vm2891_vm9  ;;  %vm9297_vm12 = vcmask 261120   ;;  %v2123_v47 = vsub.s32 0, %v7135_v48 }
 0x202   : > { %v1603_v30 = vsel %vm9297_vm12, %v1292_v15, 0.0  ;;  %v7182_v8 = vadd.s32 %v5689_v28, %v1738_v6  ;;  %v4053_v5 = vadd.f32 %v4052_v44, %v4051_v29  ;;  %v3910_v42 = vsel %vm7127_vm5, %v1377_v33, 0.0  ;;  %vm7192_vm6 = vmand %vm7062_vm1, %vm3656_vm3  ;;  %v7198_v2 = vpop.eup %5148  ;;  %1595 = vadd.xlane.f32.xlu0 %v6953_v3 }
 0x203   : > { %v3911_v9 = vsel %vm7163_vm11, %v1380_v25, 0.0  ;;  %v3403_v56 = vsel %vm7175_vm2, %v3275_v32, %v2121_v49  ;;  %v4054_v1 = vsel %vm9261_vm7, %v3910_v42, 0.0  ;;  %vm9300_vm8 = vmmov %vm9261_vm7  ;;  %v4379_v23 = vmin.u32 %v2123_v47, %v7135_v48  ;;  %v1383_v15 = vpop.xlane.xlu1 %1382  ;;  %v7270_v47 = vpop.f32.mrb[60].mxu1 }
 0x204   : > { %v4056_v7 = vsel %vm9300_vm8, %v3911_v9, 0.0  ;;  %vm7206_vm5 = vmand %vm7143_vm4, %vm3657_vm14  ;;  %v4055_v35 = vadd.f32 %v4054_v1, %v4053_v5  ;;  %vm7215_vm3 = vcmp.eq.s32.totalorder %v3402_v17, %v5786_v60  ;;  %vm2122_vm10 = vcmp.lt.s32.totalorder %v7135_v48, 0  ;;  %1598 = vadd.xlane.f32.xlu1 %v7033_v11  ;;  %v1392_v11 = vpop.xlane.xlu0 %1391  ;;  %v9316_v17 = vld [vmem:[#allocation24_spill] sm:$0xff]  ;;  %v7275_v9 = vpop.f32.mrb[61].mxu1  ;;  %v9318_v1 = vld [vmem:[#allocation29_spill] sm:$0xff] }
 0x205   : > { %vm9303_vm1 = vmmov %vm9297_vm12  ;;  %v2130_v52 = vsub.s32 0, %v7182_v8  ;;  %vm7222_vm14 = vcmp.eq.s32.totalorder %v3403_v56, %v5786_v60  ;;  %v2126_v63 = vand.u32 3, %v4379_v23  ;;  %vm3660_vm4 = vcmp.lt.s32.totalorder %v7135_v48, 2048 }
 0x206   : > { %v1606_v39 = vsel %vm9303_vm1, %v1293_v22, 0.0  ;;  %v943_v3 = vadd.f32 %v7097_v36, %v9308_v24  ;;  %v4057_v61 = vadd.f32 %v4056_v7, %v4055_v35  ;;  %v3912_v49 = vsel %vm7192_vm6, %v1383_v15, 0.0  ;;  %vm9309_vm11 = vmmov %vm9261_vm7  ;;  %1601 = vadd.xlane.f32.xlu0 %v7076_v13 }
 0x207   : > { %v3913_v6 = vsel %vm7206_vm5, %v1386_v16, 0.0  ;;  %v4380_v55 = vmin.u32 %v2130_v52, %v7182_v8  ;;  %v4058_v14 = vsel %vm9309_vm11, %v3912_v49, 0.0  ;;  %vm9310_vm9 = vmmov %vm9261_vm7  ;;  %v2127_v40 = vsub.s32 0, %v2126_v63  ;;  %v1389_v51 = vpop.xlane.xlu1 %1388 }
 0x208   : > { %v4060_v54 = vsel %vm9310_vm9, %v3913_v6, 0.0  ;;  %vm7240_vm13 = vmand %vm7215_vm3, %vm3658_vm0  ;;  %vm2129_vm2 = vcmp.lt.s32.totalorder %v7182_v8, 0  ;;  %v4059_v41 = vadd.f32 %v4058_v14, %v4057_v61  ;;  %vm3661_vm0 = vcmp.lt.s32.totalorder %v7182_v8, 2048  ;;  %1604 = vadd.xlane.f32.xlu1 %v1603_v30  ;;  %v9324_v61 = vld [vmem:[#allocation30_spill] sm:$0xff] }
 0x209   : > { %vm7251_vm12 = vmand %vm7222_vm14, %vm3659_vm15  ;;  %v2133_v44 = vand.u32 3, %v4380_v55  ;;  %v938_v22 = vadd.f32 %v7097_v36, %v9315_v31  ;;  %v1739_v29 = vadd.s32 184, %v5684_v21  ;;  %v2128_v13 = vsel %vm2122_vm10, %v2127_v40, %v2126_v63  ;;  %v1398_v55 = vpop.xlane.xlu0 %1397  ;;  %v7309_v40 = vpop.f32.mrb[62].mxu1  ;;  %v9328_v31 = vld [vmem:[#allocation17_spill] sm:$0xff] }
 0x20a   : > { %5152 = vtanh.f32 %v943_v3  ;;  %v1295_v46 = vmul.f32 %v7119_v50, %v6772_v26  ;;  %v1740_v10 = vadd.s32 192, %v5684_v21  ;;  %v4061_v33 = vadd.f32 %v4060_v54, %v4059_v41  ;;  %vm9317_vm6 = vmmov %vm9261_vm7  ;;  %1607 = vadd.xlane.f32.xlu0 %v1606_v39 }
 0x20b   : > { %v7264_v32 = vpop.eup %5150  ;;  %v3914_v25 = vsel %vm7240_vm13, %v1389_v51, 0.0  ;;  %vm2892_vm15 = vcmp.ne.s32.totalorder %v2128_v13, 0  ;;  %v1294_v12 = vmul.f32 %v7119_v50, %v9316_v17  ;;  %v3915_v42 = vsel %vm7251_vm12, %v1392_v11, 0.0  ;;  %v1395_v35 = vpop.xlane.xlu1 %1394  ;;  %vm9319_vm5 = vmmov %vm9303_vm1 }
 0x20c   : > { %v4062_v5 = vsel %vm9317_vm6, %v3914_v25, 0.0  ;;  %vm3020_vm7 = vcmp.lt.s32.totalorder %v2128_v13, 0  ;;  %v3276_v26 = vadd.s32 4, %v2128_v13  ;;  %v2134_v38 = vsub.s32 0, %v2133_v44  ;;  %vm9320_vm1 = vmmov %vm9317_vm6  ;;  %v7324_v11 = vpop.f32.mrb[63].mxu1 }
 0x20d   : > { %vm3148_vm8 = vmand %vm3020_vm7, %vm2892_vm15  ;;  %5154 = vtanh.f32 %v938_v22  ;;  %v7278_v56 = vadd.s32 %v5689_v28, %v1739_v29  ;;  %v953_v7 = vadd.f32 %v7097_v36, %v9318_v1  ;;  %v4063_v19 = vadd.f32 %v4062_v5, %v4061_v33 }
 0x20e   : > { %v3404_v23 = vsel %vm3148_vm8, %v3276_v26, %v2128_v13  ;;  %v1612_v18 = vsel %vm9319_vm5, %v1295_v46, 0.0  ;;  %v7284_v52 = vadd.s32 %v5689_v28, %v1740_v10  ;;  %v4064_v30 = vsel %vm9320_vm1, %v3915_v42, 0.0  ;;  %vm9321_vm10 = vmmov %vm9319_vm5 }
 0x20f   : > { %vm3532_vm3 = vcmp.eq.s32.totalorder %v3404_v23, %v5786_v60  ;;  %v2135_v39 = vsel %vm2129_vm2, %v2134_v38, %v2133_v44  ;;  %v1609_v15 = vsel %vm9321_vm10, %v1294_v12, 0.0  ;;  %v2137_v63 = vsub.s32 0, %v7278_v56  ;;  %1613 = vadd.xlane.f32.xlu0 %v1612_v18  ;;  %vm9325_vm2 = vmmov %vm9320_vm1 }
 0x210   : > { %vm7293_vm14 = vmand %vm3532_vm3, %vm3660_vm4  ;;  %vm2893_vm11 = vcmp.ne.s32.totalorder %v2135_v39, 0  ;;  %vm3021_vm9 = vcmp.lt.s32.totalorder %v2135_v39, 0  ;;  %v3277_v37 = vadd.s32 4, %v2135_v39  ;;  %1610 = vadd.xlane.f32.xlu1 %v1609_v15  ;;  %v2144_v3 = vsub.s32 0, %v7284_v52  ;;  %v1401_v15 = vpop.xlane.xlu1 %1400 }
 0x211   : > { %v3916_v24 = vsel %vm7293_vm14, %v1395_v35, 0.0  ;;  %vm3149_vm13 = vmand %vm3021_vm9, %vm2893_vm11  ;;  %5156 = vtanh.f32 %v953_v7  ;;  %v948_v48 = vadd.f32 %v7097_v36, %v9324_v61  ;;  %v4065_v49 = vadd.f32 %v4064_v30, %v4063_v19  ;;  %v1404_v61 = vpop.xlane.xlu0 %1403 }
 0x212   : > { %v3405_v6 = vsel %vm3149_vm13, %v3277_v37, %v2135_v39  ;;  %vm2136_vm4 = vcmp.lt.s32.totalorder %v7278_v56, 0  ;;  %v4381_v14 = vmin.u32 %v2137_v63, %v7278_v56  ;;  %v4066_v54 = vsel %vm9325_vm2, %v3916_v24, 0.0  ;;  %vm9329_vm8 = vmmov %vm9319_vm5  ;;  %v9330_v37 = vld [vmem:[#allocation35_spill] sm:$0xff] }
 0x213   : > { %vm3533_vm12 = vcmp.eq.s32.totalorder %v3405_v6, %v5786_v60  ;;  %vm3662_vm15 = vcmp.lt.s32.totalorder %v7278_v56, 2048  ;;  %v4382_v45 = vmin.u32 %v2144_v3, %v7284_v52  ;;  %v1296_v22 = vmul.f32 %v7119_v50, %v9328_v31 }
 0x214   : > { %v7311_v41 = vpop.eup %5152  ;;  %vm7315_vm6 = vmand %vm3533_vm12, %vm3661_vm0  ;;  %v2140_v44 = vand.u32 3, %v4381_v14  ;;  %v1741_v29 = vadd.s32 200, %v5684_v21  ;;  %v1297_v51 = vmul.f32 %v7119_v50, %v6898_v58  ;;  %vm2143_vm7 = vcmp.lt.s32.totalorder %v7284_v52, 0 }
 0x215   : > { %v3917_v13 = vsel %vm7315_vm6, %v1398_v55, 0.0  ;;  %v2147_v8 = vand.u32 3, %v4382_v45  ;;  %v1742_v46 = vadd.s32 208, %v5684_v21  ;;  %vm3663_vm0 = vcmp.lt.s32.totalorder %v7284_v52, 2048 }
 0x216   : > { %v2141_v10 = vsub.s32 0, %v2140_v44  ;;  %v1615_v33 = vsel %vm9329_vm8, %v1296_v22, 0.0  ;;  %v7333_v25 = vadd.s32 %v5689_v28, %v1741_v29  ;;  %v4067_v58 = vadd.f32 %v4066_v54, %v4065_v49 }
 0x217   : > { %v7335_v17 = vpop.eup %5154  ;;  %v2148_v12 = vsub.s32 0, %v2147_v8  ;;  %1616 = vadd.xlane.f32.xlu1 %v1615_v33  ;;  %v1618_v5 = vsel %vm9319_vm5, %v1297_v51, 0.0  ;;  %v7339_v42 = vadd.s32 %v5689_v28, %v1742_v46  ;;  %v4068_v26 = vsel %vm9320_vm1, %v3917_v13, 0.0 }
 0x218   : > { %v2142_v38 = vsel %vm2136_vm4, %v2141_v10, %v2140_v44  ;;  %5158 = vtanh.f32 %v948_v48  ;;  %v2151_v1 = vsub.s32 0, %v7333_v25  ;;  %1619 = vadd.xlane.f32.xlu0 %v1618_v5  ;;  %v4069_v30 = vadd.f32 %v4068_v26, %v4067_v58  ;;  %v9334_v44 = vld [vmem:[#allocation38_spill] sm:$0xff] }
 0x219   : > { %vm2894_vm3 = vcmp.ne.s32.totalorder %v2142_v38, 0  ;;  %vm3022_vm10 = vcmp.lt.s32.totalorder %v2142_v38, 0  ;;  %v3278_v7 = vadd.s32 4, %v2142_v38  ;;  %v2149_v19 = vsel %vm2143_vm7, %v2148_v12, %v2147_v8  ;;  %v1407_v12 = vpop.xlane.xlu1 %1406 }
 0x21a   : > { %vm3150_vm14 = vmand %vm3022_vm10, %vm2894_vm3  ;;  %vm2895_vm11 = vcmp.ne.s32.totalorder %v2149_v19, 0  ;;  %vm3023_vm9 = vcmp.lt.s32.totalorder %v2149_v19, 0  ;;  %v3279_v23 = vadd.s32 4, %v2149_v19  ;;  %v4383_v35 = vmin.u32 %v2151_v1, %v7333_v25 }
 0x21b   : > { %v7348_v18 = vpop.eup %5156  ;;  %v3406_v39 = vsel %vm3150_vm14, %v3278_v7, %v2142_v38  ;;  %vm3151_vm13 = vmand %vm3023_vm9, %vm2895_vm11  ;;  %v2158_v16 = vsub.s32 0, %v7339_v42  ;;  %v963_v63 = vadd.f32 %v7097_v36, %v9330_v37  ;;  %vm2150_vm2 = vcmp.lt.s32.totalorder %v7333_v25, 0 }
 0x21c   : > { %vm3534_vm4 = vcmp.eq.s32.totalorder %v3406_v39, %v5786_v60  ;;  %v3407_v24 = vsel %vm3151_vm13, %v3279_v23, %v2149_v19  ;;  %v2154_v3 = vand.u32 3, %v4383_v35  ;;  %vm3664_vm7 = vcmp.lt.s32.totalorder %v7333_v25, 2048  ;;  %v9340_v19 = vld [vmem:[#allocation42_spill] sm:$0xff] }
 0x21d   : > { %vm3790_vm12 = vmand %vm3534_vm4, %vm3662_vm15  ;;  %vm3535_vm6 = vcmp.eq.s32.totalorder %v3407_v24, %v5786_v60  ;;  %v4384_v48 = vmin.u32 %v2158_v16, %v7339_v42  ;;  %v1298_v49 = vmul.f32 %v7119_v50, %v6885_v20  ;;  %v1743_v56 = vadd.s32 216, %v5684_v21  ;;  %v1410_v16 = vpop.xlane.xlu0 %1409 }
 0x21e   : > { %v3918_v6 = vsel %vm3790_vm12, %v1401_v15, 0.0  ;;  %vm7364_vm8 = vmand %vm3535_vm6, %vm3663_vm0  ;;  %v2155_v14 = vsub.s32 0, %v2154_v3  ;;  %v1299_v54 = vmul.f32 %v7119_v50, %v7155_v43  ;;  %vm2157_vm5 = vcmp.lt.s32.totalorder %v7339_v42, 0 }
 0x21f   : > { %vm9333_vm15 = vmmov %vm9320_vm1  ;;  %v2161_v4 = vand.u32 3, %v4384_v48  ;;  %vm3665_vm1 = vcmp.lt.s32.totalorder %v7339_v42, 2048  ;;  %v3919_v20 = vsel %vm7364_vm8, %v1404_v61, 0.0  ;;  %v958_v31 = vadd.f32 %v7097_v36, %v9334_v44 }
 0x220   : > { %v4070_v45 = vsel %vm9333_vm15, %v3918_v6, 0.0  ;;  %v2156_v52 = vsel %vm2150_vm2, %v2155_v14, %v2154_v3  ;;  %vm9335_vm0 = vcmask 261120   ;;  %v7384_v8 = vadd.s32 %v5689_v28, %v1743_v56  ;;  %vm9337_vm9 = vmmov %vm9333_vm15 }
 0x221   : > { %v1621_v22 = vsel %vm9335_vm0, %v1298_v49, 0.0  ;;  %vm2896_vm3 = vcmp.ne.s32.totalorder %v2156_v52, 0  ;;  %vm3024_vm10 = vcmp.lt.s32.totalorder %v2156_v52, 0  ;;  %v3280_v43 = vadd.s32 4, %v2156_v52  ;;  %vm9336_vm11 = vmmov %vm9335_vm0 }
 0x222   : > { %v2162_v29 = vsub.s32 0, %v2161_v4  ;;  %1622 = vadd.xlane.f32.xlu1 %v1621_v22  ;;  %v7381_v51 = vpop.eup %5158  ;;  %v4071_v13 = vadd.f32 %v4070_v45, %v4069_v30  ;;  %vm3152_vm14 = vmand %vm3024_vm10, %vm2896_vm3  ;;  %v1624_v46 = vsel %vm9336_vm11, %v1299_v54, 0.0  ;;  %v1744_v10 = vadd.s32 224, %v5684_v21 }
 0x223   : > { %v4072_v33 = vsel %vm9337_vm9, %v3919_v20, 0.0  ;;  %v3408_v58 = vsel %vm3152_vm14, %v3280_v43, %v2156_v52  ;;  %5160 = vtanh.f32 %v963_v63  ;;  %1625 = vadd.xlane.f32.xlu0 %v1624_v46  ;;  %v2165_v1 = vsub.s32 0, %v7384_v8  ;;  %v9341_v63 = vld [vmem:[#allocation43_spill] sm:$0xff]  ;;  %vm9342_vm8 = vmmov %vm9337_vm9 }
 0x224   : > { %v2163_v5 = vsel %vm2157_vm5, %v2162_v29, %v2161_v4  ;;  %vm3536_vm13 = vcmp.eq.s32.totalorder %v3408_v58, %v5786_v60  ;;  %5162 = vtanh.f32 %v958_v31  ;;  %v7400_v7 = vadd.s32 %v5689_v28, %v1744_v10  ;;  %vm9343_vm3 = vmmov %vm9336_vm11 }
 0x225   : > { %vm2897_vm4 = vcmp.ne.s32.totalorder %v2163_v5, 0  ;;  %vm3025_vm2 = vcmp.lt.s32.totalorder %v2163_v5, 0  ;;  %v3281_v26 = vadd.s32 4, %v2163_v5  ;;  %vm7394_vm12 = vmand %vm3536_vm13, %vm3664_vm7  ;;  %v973_v23 = vadd.f32 %v7097_v36, %v9340_v19 }
 0x226   : > { %v4073_v35 = vadd.f32 %v4072_v33, %v4071_v13  ;;  %v3920_v30 = vsel %vm7394_vm12, %v1407_v12, 0.0  ;;  %vm3153_vm6 = vmand %vm3025_vm2, %vm2897_vm4  ;;  %v1300_v25 = vmul.f32 %v7119_v50, %v7080_v62  ;;  %v1745_v39 = vadd.s32 232, %v5684_v21  ;;  %v1413_v12 = vpop.xlane.xlu1 %1412 }
 0x227   : > { %v3409_v15 = vsel %vm3153_vm6, %v3281_v26, %v2163_v5  ;;  %vm2164_vm7 = vcmp.lt.s32.totalorder %v7384_v8, 0  ;;  %v4385_v37 = vmin.u32 %v2165_v1, %v7384_v8  ;;  %v968_v24 = vadd.f32 %v7097_v36, %v9341_v63  ;;  %vm9344_vm10 = vmmov %vm9342_vm8  ;;  %v9346_v26 = vld [vmem:[#allocation48_spill] sm:$0xff]  ;;  %v1416_v63 = vpop.xlane.xlu0 %1415 }
 0x228   : > { %v4074_v3 = vsel %vm9342_vm8, %v3920_v30, 0.0  ;;  %vm3537_vm15 = vcmp.eq.s32.totalorder %v3409_v15, %v5786_v60  ;;  %vm3666_vm5 = vcmp.lt.s32.totalorder %v7384_v8, 2048  ;;  %v2172_v61 = vsub.s32 0, %v7400_v7  ;;  %vm9345_vm11 = vmmov %vm9343_vm3 }
 0x229   : > { %vm3793_vm0 = vmand %vm3537_vm15, %vm3665_vm1  ;;  %v2168_v62 = vand.u32 3, %v4385_v37  ;;  %5164 = vtanh.f32 %v973_v23  ;;  %v1627_v48 = vsel %vm9343_vm3, %v1300_v25, 0.0  ;;  %v7421_v49 = vadd.s32 %v5689_v28, %v1745_v39 }
 0x22a   : > { %v3921_v6 = vsel %vm3793_vm0, %v1410_v16, 0.0  ;;  %v4386_v55 = vmin.u32 %v2172_v61, %v7400_v7  ;;  %1628 = vadd.xlane.f32.xlu1 %v1627_v48  ;;  %v1301_v14 = vmul.f32 %v7119_v50, %v7264_v32  ;;  %v1746_v56 = vadd.s32 240, %v5684_v21 }
 0x22b   : > { %v4075_v54 = vadd.f32 %v4074_v3, %v4073_v35  ;;  %v2169_v45 = vsub.s32 0, %v2168_v62  ;;  %vm2171_vm1 = vcmp.lt.s32.totalorder %v7400_v7, 0  ;;  %v2179_v42 = vsub.s32 0, %v7421_v49 }
 0x22c   : > { %v4076_v4 = vsel %vm9344_vm10, %v3921_v6, 0.0  ;;  %v2175_v20 = vand.u32 3, %v4386_v55  ;;  %vm3667_vm14 = vcmp.lt.s32.totalorder %v7400_v7, 2048  ;;  %v1630_v52 = vsel %vm9345_vm11, %v1301_v14, 0.0 }
 0x22d   : > { %v7432_v44 = vpop.eup %5160  ;;  %v2170_v32 = vsel %vm2164_vm7, %v2169_v45, %v2168_v62  ;;  %5166 = vtanh.f32 %v968_v24  ;;  %v4387_v31 = vmin.u32 %v2179_v42, %v7421_v49  ;;  %1631 = vadd.xlane.f32.xlu0 %v1630_v52  ;;  %v7438_v22 = vadd.s32 %v5689_v28, %v1746_v56 }
 0x22e   : > { %vm2898_vm9 = vcmp.ne.s32.totalorder %v2170_v32, 0  ;;  %vm3026_vm13 = vcmp.lt.s32.totalorder %v2170_v32, 0  ;;  %v3282_v43 = vadd.s32 4, %v2170_v32  ;;  %v2176_v29 = vsub.s32 0, %v2175_v20  ;;  %v7440_v13 = vpop.eup %5162 }
 0x22f   : > { %v4077_v46 = vadd.f32 %v4076_v4, %v4075_v54  ;;  %vm3154_vm4 = vmand %vm3026_vm13, %vm2898_vm9  ;;  %vm2178_vm2 = vcmp.lt.s32.totalorder %v7421_v49, 0  ;;  %v2182_v10 = vand.u32 3, %v4387_v31  ;;  %v2186_v33 = vsub.s32 0, %v7438_v22  ;;  %v1419_v4 = vpop.xlane.xlu1 %1418 }
 0x230   : > { %v3410_v58 = vsel %vm3154_vm4, %v3282_v43, %v2170_v32  ;;  %v2177_v5 = vsel %vm2171_vm1, %v2176_v29, %v2175_v20  ;;  %vm3668_vm12 = vcmp.lt.s32.totalorder %v7421_v49, 2048  ;;  %v983_v38 = vadd.f32 %v7097_v36, %v9346_v26  ;;  %v9354_v43 = vld [vmem:[#allocation52_spill] sm:$0xff] }
 0x231   : > { %vm3538_vm6 = vcmp.eq.s32.totalorder %v3410_v58, %v5786_v60  ;;  %vm2899_vm7 = vcmp.ne.s32.totalorder %v2177_v5, 0  ;;  %vm3027_vm8 = vcmp.lt.s32.totalorder %v2177_v5, 0  ;;  %v3283_v1 = vadd.s32 4, %v2177_v5  ;;  %v1422_v58 = vpop.xlane.xlu0 %1421 }
 0x232   : > { %vm3794_vm15 = vmand %vm3538_vm6, %vm3666_vm5  ;;  %v2183_v19 = vsub.s32 0, %v2182_v10  ;;  %vm2185_vm0 = vcmp.lt.s32.totalorder %v7438_v22, 0  ;;  %v4388_v23 = vmin.u32 %v2186_v33, %v7438_v22  ;;  %v1302_v35 = vmul.f32 %v7119_v50, %v7198_v2  ;;  %v9348_v2 = vld [vmem:[#allocation49_spill] sm:$0xff] }
 0x233   : > { %v7456_v30 = vpop.eup %5164  ;;  %v3922_v25 = vsel %vm3794_vm15, %v1413_v12, 0.0  ;;  %vm3155_vm3 = vmand %vm3027_vm8, %vm2899_vm7  ;;  %v1747_v39 = vadd.s32 248, %v5684_v21  ;;  %v1303_v15 = vmul.f32 %v7119_v50, %v7335_v17  ;;  %v1748_v8 = vadd.s32 256, %v5684_v21 }
 0x234   : > { %vm9347_vm5 = vmmov %vm9344_vm10  ;;  %v3411_v37 = vsel %vm3155_vm3, %v3283_v1, %v2177_v5  ;;  %v2184_v24 = vsel %vm2178_vm2, %v2183_v19, %v2182_v10  ;;  %v2189_v3 = vand.u32 3, %v4388_v23  ;;  %v978_v61 = vadd.f32 %v7097_v36, %v9348_v2  ;;  %v9358_v23 = vld [vmem:[#allocation53_spill] sm:$0xff] }
 0x235   : > { %v4078_v16 = vsel %vm9347_vm5, %v3922_v25, 0.0  ;;  %vm3539_vm1 = vcmp.eq.s32.totalorder %v3411_v37, %v5786_v60  ;;  %vm2900_vm10 = vcmp.ne.s32.totalorder %v2184_v24, 0  ;;  %vm3028_vm11 = vcmp.lt.s32.totalorder %v2184_v24, 0  ;;  %vm9351_vm6 = vmmov %vm9347_vm5  ;;  %v9364_v1 = vld [vmem:[#allocation57_spill] sm:$0xff] }
 0x236   : > { %vm3795_vm9 = vmand %vm3539_vm1, %vm3667_vm14  ;;  %v3284_v17 = vadd.s32 4, %v2184_v24  ;;  %v2190_v62 = vsub.s32 0, %v2189_v3  ;;  %vm9349_vm13 = vcmask 261120   ;;  %v7472_v6 = vadd.s32 %v5689_v28, %v1747_v39 }
 0x237   : > { %v1633_v48 = vsel %vm9349_vm13, %v1302_v35, 0.0  ;;  %v7474_v55 = vpop.eup %5166  ;;  %v4079_v14 = vadd.f32 %v4078_v16, %v4077_v46  ;;  %v3923_v56 = vsel %vm3795_vm9, %v1416_v63, 0.0  ;;  %vm3156_vm4 = vmand %vm3028_vm11, %vm2900_vm10  ;;  %v7478_v45 = vadd.s32 %v5689_v28, %v1748_v8 }
 0x238   : > { %1634 = vadd.xlane.f32.xlu1 %v1633_v48  ;;  %vm9350_vm2 = vmmov %vm9349_vm13  ;;  %v4080_v7 = vsel %vm9351_vm6, %v3923_v56, 0.0  ;;  %v3412_v42 = vsel %vm3156_vm4, %v3284_v17, %v2184_v24  ;;  %v2191_v20 = vsel %vm2185_vm0, %v2190_v62, %v2189_v3  ;;  %vm3669_vm14 = vcmp.lt.s32.totalorder %v7438_v22, 2048 }
 0x239   : > { %v1636_v54 = vsel %vm9350_vm2, %v1303_v15, 0.0  ;;  %vm3540_vm7 = vcmp.eq.s32.totalorder %v3412_v42, %v5786_v60  ;;  %vm2901_vm8 = vcmp.ne.s32.totalorder %v2191_v20, 0  ;;  %vm3029_vm15 = vcmp.lt.s32.totalorder %v2191_v20, 0  ;;  %vm9355_vm10 = vmmov %vm9351_vm6 }
 0x23a   : > { %1637 = vadd.xlane.f32.xlu0 %v1636_v54  ;;  %5168 = vtanh.f32 %v983_v38  ;;  %vm7487_vm3 = vmand %vm3540_vm7, %vm3668_vm12  ;;  %v3285_v32 = vadd.s32 4, %v2191_v20  ;;  %v2193_v31 = vsub.s32 0, %v7472_v6  ;;  %v993_v29 = vadd.f32 %v7097_v36, %v9354_v43 }
 0x23b   : > { %5170 = vtanh.f32 %v978_v61  ;;  %v4081_v46 = vadd.f32 %v4080_v7, %v4079_v14  ;;  %v3924_v10 = vsel %vm7487_vm3, %v1419_v4, 0.0  ;;  %vm3157_vm0 = vmand %vm3029_vm15, %vm2901_vm8  ;;  %vm2192_vm5 = vcmp.lt.s32.totalorder %v7472_v6, 0 }
 0x23c   : > { %v2200_v49 = vsub.s32 0, %v7478_v45  ;;  %v3413_v33 = vsel %vm3157_vm0, %v3285_v32, %v2191_v20  ;;  %v4389_v12 = vmin.u32 %v2193_v31, %v7472_v6  ;;  %vm3670_vm12 = vcmp.lt.s32.totalorder %v7472_v6, 2048  ;;  %vm9359_vm13 = vmmov %vm9350_vm2  ;;  %v1425_v20 = vpop.xlane.xlu1 %1424  ;;  %v9360_v32 = vld [vmem:[#allocation56_spill] sm:$0xff] }
 0x23d   : > { %vm2199_vm1 = vcmp.lt.s32.totalorder %v7478_v45, 0  ;;  %v4082_v5 = vsel %vm9355_vm10, %v3924_v10, 0.0  ;;  %vm3541_vm11 = vcmp.eq.s32.totalorder %v3413_v33, %v5786_v60  ;;  %v1304_v38 = vmul.f32 %v7119_v50, %v7311_v41 }
 0x23e   : > { %v4390_v26 = vmin.u32 %v2200_v49, %v7478_v45  ;;  %vm7508_vm9 = vmand %vm3541_vm11, %vm3669_vm14  ;;  %v2196_v19 = vand.u32 3, %v4389_v12  ;;  %v988_v35 = vadd.f32 %v7097_v36, %v9358_v23  ;;  %v1749_v25 = vadd.s32 264, %v5684_v21 }
 0x23f   : > { %v1305_v39 = vmul.f32 %v7119_v50, %v7381_v51  ;;  %v3925_v15 = vsel %vm7508_vm9, %v1422_v58, 0.0  ;;  %v1639_v41 = vsel %vm9359_vm13, %v1304_v38, 0.0  ;;  %v1750_v22 = vadd.s32 272, %v5684_v21 }
 0x240   : > { %v2203_v8 = vand.u32 3, %v4390_v26  ;;  %v2197_v16 = vsub.s32 0, %v2196_v19  ;;  %vm3671_vm4 = vcmp.lt.s32.totalorder %v7478_v45, 2048  ;;  %1640 = vadd.xlane.f32.xlu1 %v1639_v41  ;;  %v7523_v37 = vadd.s32 %v5689_v28, %v1749_v25 }
 0x241   : > { %v1642_v63 = vsel %vm9350_vm2, %v1305_v39, 0.0  ;;  %v4083_v24 = vadd.f32 %v4082_v5, %v4081_v46  ;;  %5172 = vtanh.f32 %v993_v29  ;;  %v7527_v51 = vadd.s32 %v5689_v28, %v1750_v22  ;;  %v1428_v46 = vpop.xlane.xlu0 %1427 }
 0x242   : > { %v2204_v3 = vsub.s32 0, %v2203_v8  ;;  %1643 = vadd.xlane.f32.xlu0 %v1642_v63  ;;  %v4084_v2 = vsel %vm9351_vm6, %v3925_v15, 0.0  ;;  %v2198_v61 = vsel %vm2192_vm5, %v2197_v16, %v2196_v19  ;;  %5174 = vtanh.f32 %v988_v35 }
 0x243   : > { %v2207_v17 = vsub.s32 0, %v7523_v37  ;;  %vm2902_vm14 = vcmp.ne.s32.totalorder %v2198_v61, 0  ;;  %vm3030_vm7 = vcmp.lt.s32.totalorder %v2198_v61, 0  ;;  %v3286_v48 = vadd.s32 4, %v2198_v61 }
 0x244   : > { %v7533_v62 = vpop.eup %5168  ;;  %v2205_v14 = vsel %vm2199_vm1, %v2204_v3, %v2203_v8  ;;  %vm3158_vm8 = vmand %vm3030_vm7, %vm2902_vm14  ;;  %v4085_v42 = vadd.f32 %v4084_v2, %v4083_v24  ;;  %v2214_v52 = vsub.s32 0, %v7527_v51  ;;  %v1003_v31 = vadd.f32 %v7097_v36, %v9360_v32  ;;  %v1431_v24 = vpop.xlane.xlu1 %1430 }
 0x245   : > { %v7537_v56 = vpop.eup %5170  ;;  %vm2903_vm15 = vcmp.ne.s32.totalorder %v2205_v14, 0  ;;  %vm3031_vm3 = vcmp.lt.s32.totalorder %v2205_v14, 0  ;;  %v3287_v54 = vadd.s32 4, %v2205_v14  ;;  %v4391_v7 = vmin.u32 %v2207_v17, %v7523_v37 }
 0x246   : > { %v3414_v4 = vsel %vm3158_vm8, %v3286_v48, %v2198_v61  ;;  %vm3159_vm0 = vmand %vm3031_vm3, %vm2903_vm15  ;;  %vm2206_vm1 = vcmp.lt.s32.totalorder %v7523_v37, 0  ;;  %vm3672_vm9 = vcmp.lt.s32.totalorder %v7523_v37, 2048  ;;  %v4392_v10 = vmin.u32 %v2214_v52, %v7527_v51  ;;  %v1434_v52 = vpop.xlane.xlu0 %1433 }
 0x247   : > { %vm3542_vm5 = vcmp.eq.s32.totalorder %v3414_v4, %v5786_v60  ;;  %v3415_v43 = vsel %vm3159_vm0, %v3287_v54, %v2205_v14  ;;  %v2210_v29 = vand.u32 3, %v4391_v7  ;;  %v1306_v49 = vmul.f32 %v7119_v50, %v7348_v18  ;;  %v9370_v14 = vld [vmem:[#allocation8_spill] sm:$0xff] }
 0x248   : > { %vm3798_vm10 = vmand %vm3542_vm5, %vm3670_vm12  ;;  %vm3543_vm11 = vcmp.eq.s32.totalorder %v3415_v43, %v5786_v60  ;;  %v1751_v6 = vadd.s32 280, %v5684_v21  ;;  %v1307_v5 = vmul.f32 %v7119_v50, %v7440_v13  ;;  %vm2213_vm2 = vcmp.lt.s32.totalorder %v7527_v51, 0 }
 0x249   : > { %v3926_v33 = vsel %vm3798_vm10, %v1425_v20, 0.0  ;;  %vm7554_vm13 = vmand %vm3543_vm11, %vm3671_vm4  ;;  %v2211_v12 = vsub.s32 0, %v2210_v29  ;;  %v2217_v38 = vand.u32 3, %v4392_v10  ;;  %v998_v19 = vadd.f32 %v7097_v36, %v9364_v1 }
 0x24a   : > { %vm9363_vm12 = vmmov %vm9351_vm6  ;;  %vm3673_vm6 = vcmp.lt.s32.totalorder %v7527_v51, 2048  ;;  %v3927_v18 = vsel %vm7554_vm13, %v1428_v46, 0.0  ;;  %vm9365_vm4 = vcmask 261120   ;;  %v7576_v8 = vadd.s32 %v5689_v28, %v1751_v6 }
 0x24b   : > { %v4086_v26 = vsel %vm9363_vm12, %v3926_v33, 0.0  ;;  %v2212_v45 = vsel %vm2206_vm1, %v2211_v12, %v2210_v29  ;;  %v1645_v23 = vsel %vm9365_vm4, %v1306_v49, 0.0  ;;  %v7571_v35 = vpop.eup %5172  ;;  %v2218_v25 = vsub.s32 0, %v2217_v38  ;;  %vm9366_vm15 = vmmov %vm9365_vm4 }
 0x24c   : > { %vm2904_vm14 = vcmp.ne.s32.totalorder %v2212_v45, 0  ;;  %vm3032_vm7 = vcmp.lt.s32.totalorder %v2212_v45, 0  ;;  %v3288_v13 = vadd.s32 4, %v2212_v45  ;;  %1646 = vadd.xlane.f32.xlu1 %v1645_v23  ;;  %v7573_v39 = vpop.eup %5174  ;;  %v4087_v15 = vadd.f32 %v4086_v26, %v4085_v42  ;;  %vm9367_vm3 = vmmov %vm9363_vm12 }
 0x24d   : > { %vm3160_vm8 = vmand %vm3032_vm7, %vm2904_vm14  ;;  %v1648_v41 = vsel %vm9366_vm15, %v1307_v5, 0.0  ;;  %v1752_v22 = vadd.s32 288, %v5684_v21  ;;  %v4088_v16 = vsel %vm9367_vm3, %v3927_v18, 0.0  ;;  %v2219_v3 = vsel %vm2213_vm2, %v2218_v25, %v2217_v38 }
 0x24e   : > { %v3416_v63 = vsel %vm3160_vm8, %v3288_v13, %v2212_v45  ;;  %5176 = vtanh.f32 %v1003_v31  ;;  %1649 = vadd.xlane.f32.xlu0 %v1648_v41  ;;  %vm2905_vm5 = vcmp.ne.s32.totalorder %v2219_v3, 0  ;;  %vm3033_vm1 = vcmp.lt.s32.totalorder %v2219_v3, 0  ;;  %v9371_v31 = vld [vmem:[#allocation28_spill] sm:$0xff]  ;;  %vm9372_vm13 = vmmov %vm9367_vm3 }
 0x24f   : > { %vm3544_vm0 = vcmp.eq.s32.totalorder %v3416_v63, %v5786_v60  ;;  %v3289_v2 = vadd.s32 4, %v2219_v3  ;;  %5178 = vtanh.f32 %v998_v19  ;;  %v2221_v17 = vsub.s32 0, %v7576_v8  ;;  %vm3161_vm11 = vmand %vm3033_vm1, %vm2905_vm5 }
 0x250   : > { %vm7586_vm10 = vmand %vm3544_vm0, %vm3672_vm9  ;;  %v7592_v48 = vadd.s32 %v5689_v28, %v1752_v22  ;;  %v1013_v54 = vadd.f32 %v7097_v36, %v9370_v14  ;;  %v4089_v7 = vadd.f32 %v4088_v16, %v4087_v15  ;;  %v1308_v37 = vmul.f32 %v7119_v50, %v7432_v44 }
 0x251   : > { %v3928_v42 = vsel %vm7586_vm10, %v1431_v24, 0.0  ;;  %v1753_v4 = vadd.s32 296, %v5684_v21  ;;  %v3417_v20 = vsel %vm3161_vm11, %v3289_v2, %v2219_v3  ;;  %vm2220_vm9 = vcmp.lt.s32.totalorder %v7576_v8, 0  ;;  %vm9373_vm14 = vmmov %vm9366_vm15  ;;  %v1437_v24 = vpop.xlane.xlu1 %1436 }
 0x252   : > { %v4393_v32 = vmin.u32 %v2221_v17, %v7576_v8  ;;  %v1008_v43 = vadd.f32 %v7097_v36, %v9371_v31  ;;  %v4090_v29 = vsel %vm9372_vm13, %v3928_v42, 0.0  ;;  %vm3545_vm12 = vcmp.eq.s32.totalorder %v3417_v20, %v5786_v60  ;;  %vm9374_vm7 = vmmov %vm9367_vm3 }
 0x253   : > { %vm3674_vm2 = vcmp.lt.s32.totalorder %v7576_v8, 2048  ;;  %v2228_v46 = vsub.s32 0, %v7592_v48  ;;  %vm3801_vm4 = vmand %vm3545_vm12, %vm3673_vm6  ;;  %5180 = vtanh.f32 %v1013_v54  ;;  %v1651_v10 = vsel %vm9373_vm14, %v1308_v37, 0.0 }
 0x254   : > { %v2224_v44 = vand.u32 3, %v4393_v32  ;;  %v7613_v49 = vadd.s32 %v5689_v28, %v1753_v4  ;;  %v3929_v33 = vsel %vm3801_vm4, %v1434_v52, 0.0  ;;  %1652 = vadd.xlane.f32.xlu1 %v1651_v10  ;;  %v1309_v12 = vmul.f32 %v7119_v50, %v7474_v55  ;;  %vm9375_vm15 = vmmov %vm9373_vm14  ;;  %v1440_v32 = vpop.xlane.xlu0 %1439 }
 0x255   : > { %v4394_v58 = vmin.u32 %v2228_v46, %v7592_v48  ;;  %v1754_v6 = vadd.s32 304, %v5684_v21  ;;  %v4091_v5 = vadd.f32 %v4090_v29, %v4089_v7  ;;  %vm2227_vm6 = vcmp.lt.s32.totalorder %v7592_v48, 0 }
 0x256   : > { %v2225_v26 = vsub.s32 0, %v2224_v44  ;;  %v2235_v51 = vsub.s32 0, %v7613_v49  ;;  %v4092_v38 = vsel %vm9374_vm7, %v3929_v33, 0.0  ;;  %vm3675_vm8 = vcmp.lt.s32.totalorder %v7592_v48, 2048 }
 0x257   : > { %v2231_v18 = vand.u32 3, %v4394_v58  ;;  %v1654_v45 = vsel %vm9375_vm15, %v1309_v12, 0.0  ;;  %5182 = vtanh.f32 %v1008_v43  ;;  %v7630_v23 = vadd.s32 %v5689_v28, %v1754_v6  ;;  %v1443_v58 = vpop.xlane.xlu1 %1442 }
 0x258   : > { %v7624_v1 = vpop.eup %5176  ;;  %v2226_v55 = vsel %vm2220_vm9, %v2225_v26, %v2224_v44  ;;  %v4395_v19 = vmin.u32 %v2235_v51, %v7613_v49  ;;  %1655 = vadd.xlane.f32.xlu0 %v1654_v45  ;;  %v4093_v41 = vadd.f32 %v4092_v38, %v4091_v5  ;;  %vm2234_vm1 = vcmp.lt.s32.totalorder %v7613_v49, 0 }
 0x259   : > { %vm2906_vm3 = vcmp.ne.s32.totalorder %v2226_v55, 0  ;;  %vm3034_vm0 = vcmp.lt.s32.totalorder %v2226_v55, 0  ;;  %v3290_v13 = vadd.s32 4, %v2226_v55  ;;  %v2232_v25 = vsub.s32 0, %v2231_v18  ;;  %v7632_v15 = vpop.eup %5178 }
 0x25a   : > { %vm3162_vm5 = vmand %vm3034_vm0, %vm2906_vm3  ;;  %v2238_v22 = vand.u32 3, %v4395_v19  ;;  %v2242_v16 = vsub.s32 0, %v7630_v23  ;;  %vm2241_vm10 = vcmp.lt.s32.totalorder %v7630_v23, 0  ;;  %v1023_v2 = vadd.f32 %v7097_v36, %v6818_v53  ;;  %v1446_v19 = vpop.xlane.xlu0 %1445 }
 0x25b   : > { %v3418_v63 = vsel %vm3162_vm5, %v3290_v13, %v2226_v55  ;;  %v2233_v3 = vsel %vm2227_vm6, %v2232_v25, %v2231_v18  ;;  %v1018_v54 = vadd.f32 %v7097_v36, %v6839_v59  ;;  %v1310_v7 = vmul.f32 %v7119_v50, %v7456_v30  ;;  %v7685_v18 = vld [vmem:[%s8980_s2] ss:$0 sm:$0xff] }
 0x25c   : > { %vm3546_vm11 = vcmp.eq.s32.totalorder %v3418_v63, %v5786_v60  ;;  %vm2907_vm9 = vcmp.ne.s32.totalorder %v2233_v3, 0  ;;  %vm3035_vm13 = vcmp.lt.s32.totalorder %v2233_v3, 0  ;;  %v3291_v61 = vadd.s32 4, %v2233_v3 }
 0x25d   : > { %vm3802_vm12 = vmand %vm3546_vm11, %vm3674_vm2  ;;  %v2239_v17 = vsub.s32 0, %v2238_v22  ;;  %v4396_v14 = vmin.u32 %v2242_v16, %v7630_v23  ;;  %v7649_v42 = vpop.eup %5180  ;;  %v1755_v37 = vadd.s32 312, %v5684_v21  ;;  %v1311_v4 = vmul.f32 %v7119_v50, %v7537_v56 }
 0x25e   : > { %v3930_v53 = vsel %vm3802_vm12, %v1437_v24, 0.0  ;;  %vm3163_vm4 = vmand %vm3035_vm13, %vm2907_vm9  ;;  %v1756_v8 = vadd.s32 320, %v5684_v21  ;;  %vm9377_vm3 = vcmask 261120   ;;  %vm3676_vm5 = vcmp.lt.s32.totalorder %v7613_v49, 2048 }
 0x25f   : > { %vm9376_vm2 = vmmov %vm9374_vm7  ;;  %v3419_v52 = vsel %vm3163_vm4, %v3291_v61, %v2233_v3  ;;  %v2240_v59 = vsel %vm2234_vm1, %v2239_v17, %v2238_v22  ;;  %v2245_v36 = vand.u32 3, %v4396_v14  ;;  %v1657_v56 = vsel %vm9377_vm3, %v1310_v7, 0.0 }
 0x260   : > { %v4094_v20 = vsel %vm9376_vm2, %v3930_v53, 0.0  ;;  %vm3547_vm14 = vcmp.eq.s32.totalorder %v3419_v52, %v5786_v60  ;;  %vm2908_vm6 = vcmp.ne.s32.totalorder %v2240_v59, 0  ;;  %vm3036_vm7 = vcmp.lt.s32.totalorder %v2240_v59, 0  ;;  %1658 = vadd.xlane.f32.xlu1 %v1657_v56  ;;  %vm9378_vm1 = vmmov %vm9377_vm3 }
 0x261   : > { %v4095_v30 = vadd.f32 %v4094_v20, %v4093_v41  ;;  %vm3803_vm15 = vmand %vm3547_vm14, %vm3675_vm8  ;;  %v3292_v31 = vadd.s32 4, %v2240_v59  ;;  %v2246_v50 = vsub.s32 0, %v2245_v36  ;;  %v7663_v43 = vadd.s32 %v5689_v28, %v1755_v37  ;;  %v7665_v29 = vpop.eup %5182 }
 0x262   : > { %v3931_v46 = vsel %vm3803_vm15, %v1440_v32, 0.0  ;;  %vm3164_vm0 = vmand %vm3036_vm7, %vm2908_vm6  ;;  %v1660_v44 = vsel %vm9378_vm1, %v1311_v4, 0.0  ;;  %v7670_v10 = vadd.s32 %v5689_v28, %v1756_v8  ;;  %vm3677_vm11 = vcmp.lt.s32.totalorder %v7630_v23, 2048 }
 0x263   : > { %vm9379_vm8 = vmmov %vm9376_vm2  ;;  %v3420_v33 = vsel %vm3164_vm0, %v3292_v31, %v2240_v59  ;;  %v2247_v12 = vsel %vm2241_vm10, %v2246_v50, %v2245_v36  ;;  %1661 = vadd.xlane.f32.xlu0 %v1660_v44  ;;  %5184 = vtanh.f32 %v1023_v2  ;;  %v2249_v26 = vsub.s32 0, %v7663_v43  ;;  %v1449_v31 = vpop.xlane.xlu1 %1448  ;;  %v1452_v44 = vpop.xlane.xlu0 %1451 }
 0x264   : > { %v4096_v48 = vsel %vm9379_vm8, %v3931_v46, 0.0  ;;  %vm3548_vm9 = vcmp.eq.s32.totalorder %v3420_v33, %v5786_v60  ;;  %vm2909_vm13 = vcmp.ne.s32.totalorder %v2247_v12, 0  ;;  %vm3037_vm12 = vcmp.lt.s32.totalorder %v2247_v12, 0  ;;  %vm9380_vm14 = vmmov %vm9379_vm8 }
 0x265   : > { %v4097_v6 = vadd.f32 %v4096_v48, %v4095_v30  ;;  %vm3804_vm4 = vmand %vm3548_vm9, %vm3676_vm5  ;;  %v3293_v5 = vadd.s32 4, %v2247_v12  ;;  %5186 = vtanh.f32 %v1018_v54  ;;  %vm2248_vm10 = vcmp.lt.s32.totalorder %v7663_v43, 0 }
 0x266   : > { %v3932_v51 = vsel %vm3804_vm4, %v1443_v58, 0.0  ;;  %vm3165_vm2 = vmand %vm3037_vm12, %vm2909_vm13  ;;  %v2256_v38 = vsub.s32 0, %v7670_v10  ;;  %v1033_v45 = vadd.f32 %v7685_v18, %v6993_v57  ;;  %v4397_v13 = vmin.u32 %v2249_v26, %v7663_v43  ;;  %v7700_v57 = vld [vmem:[%s8981_s3] ss:$0 sm:$0xff] }
 0x267   : > { %v4098_v49 = vsel %vm9380_vm14, %v3932_v51, 0.0  ;;  %v3421_v55 = vsel %vm3165_vm2, %v3293_v5, %v2247_v12  ;;  %vm3678_vm6 = vcmp.lt.s32.totalorder %v7663_v43, 2048  ;;  %vm2255_vm7 = vcmp.lt.s32.totalorder %v7670_v10, 0  ;;  %vm9381_vm0 = vmmov %vm9378_vm1 }
 0x268   : > { %vm3549_vm15 = vcmp.eq.s32.totalorder %v3421_v55, %v5786_v60  ;;  %v4398_v25 = vmin.u32 %v2256_v38, %v7670_v10  ;;  %v1028_v41 = vadd.f32 %v7685_v18, %v7009_v34  ;;  %v1312_v22 = vmul.f32 %v7700_v57, %v7533_v62  ;;  %vm9382_vm5 = vmmov %vm9379_vm8 }
 0x269   : > { %v4099_v16 = vadd.f32 %v4098_v49, %v4097_v6  ;;  %vm3805_vm3 = vmand %vm3549_vm15, %vm3677_vm11  ;;  %v2252_v63 = vand.u32 3, %v4397_v13  ;;  %v1757_v24 = vadd.s32 328, %v5684_v21  ;;  %v1313_v3 = vmul.f32 %v7700_v57, %v7573_v39 }
 0x26a   : > { %v3933_v2 = vsel %vm3805_vm3, %v1446_v19, 0.0  ;;  %v2259_v34 = vand.u32 3, %v4398_v25  ;;  %v1663_v61 = vsel %vm9381_vm0, %v1312_v22, 0.0  ;;  %v1758_v17 = vadd.s32 336, %v5684_v21  ;;  %vm9383_vm1 = vmmov %vm9381_vm0 }
 0x26b   : > { %v4100_v14 = vsel %vm9382_vm5, %v3933_v2, 0.0  ;;  %v2253_v54 = vsub.s32 0, %v2252_v63  ;;  %1664 = vadd.xlane.f32.xlu1 %v1663_v61  ;;  %v7713_v62 = vadd.s32 %v5689_v28, %v1757_v24  ;;  %v1666_v23 = vsel %vm9383_vm1, %v1313_v3, 0.0 }
 0x26c   : > { %v2260_v7 = vsub.s32 0, %v2259_v34  ;;  %vm3679_vm8 = vcmp.lt.s32.totalorder %v7670_v10, 2048  ;;  %5188 = vtanh.f32 %v1033_v45  ;;  %1667 = vadd.xlane.f32.xlu0 %v1666_v23  ;;  %v7718_v39 = vadd.s32 %v5689_v28, %v1758_v17 }
 0x26d   : > { %v4101_v53 = vadd.f32 %v4100_v14, %v4099_v16  ;;  %v2254_v37 = vsel %vm2248_vm10, %v2253_v54, %v2252_v63  ;;  %5190 = vtanh.f32 %v1028_v41  ;;  %v2263_v4 = vsub.s32 0, %v7713_v62  ;;  %v7723_v8 = vpop.eup %5184  ;;  %v1455_v63 = vpop.xlane.xlu1 %1454 }
 0x26e   : > { %vm2910_vm11 = vcmp.ne.s32.totalorder %v2254_v37, 0  ;;  %vm3038_vm9 = vcmp.lt.s32.totalorder %v2254_v37, 0  ;;  %v3294_v20 = vadd.s32 4, %v2254_v37  ;;  %v2261_v52 = vsel %vm2255_vm7, %v2260_v7, %v2259_v34 }
 0x26f   : > { %v7727_v32 = vpop.eup %5186  ;;  %vm3166_vm13 = vmand %vm3038_vm9, %vm2910_vm11  ;;  %vm2911_vm12 = vcmp.ne.s32.totalorder %v2261_v52, 0  ;;  %vm3039_vm4 = vcmp.lt.s32.totalorder %v2261_v52, 0  ;;  %v3295_v59 = vadd.s32 4, %v2261_v52  ;;  %v4399_v36 = vmin.u32 %v2263_v4, %v7713_v62 }
 0x270   : > { %v3422_v30 = vsel %vm3166_vm13, %v3294_v20, %v2254_v37  ;;  %vm3167_vm2 = vmand %vm3039_vm4, %vm2911_vm12  ;;  %vm2262_vm10 = vcmp.lt.s32.totalorder %v7713_v62, 0  ;;  %v2270_v50 = vsub.s32 0, %v7718_v39  ;;  %v1043_v56 = vadd.f32 %v7685_v18, %v7153_v27 }
 0x271   : > { %vm3550_vm14 = vcmp.eq.s32.totalorder %v3422_v30, %v5786_v60  ;;  %v3423_v46 = vsel %vm3167_vm2, %v3295_v59, %v2261_v52  ;;  %v2266_v48 = vand.u32 3, %v4399_v36  ;;  %vm3680_vm7 = vcmp.lt.s32.totalorder %v7713_v62, 2048 }
 0x272   : > { %vm3806_vm15 = vmand %vm3550_vm14, %vm3678_vm6  ;;  %vm3551_vm3 = vcmp.eq.s32.totalorder %v3423_v46, %v5786_v60  ;;  %vm2269_vm0 = vcmp.lt.s32.totalorder %v7718_v39, 0  ;;  %v4400_v33 = vmin.u32 %v2270_v50, %v7718_v39  ;;  %v1314_v58 = vmul.f32 %v7700_v57, %v7571_v35 }
 0x273   : > { %v3934_v27 = vsel %vm3806_vm15, %v1449_v31, 0.0  ;;  %vm7745_vm5 = vmand %vm3551_vm3, %vm3679_vm8  ;;  %v2267_v6 = vsub.s32 0, %v2266_v48  ;;  %v1759_v43 = vadd.s32 344, %v5684_v21  ;;  %v1315_v5 = vmul.f32 %v7700_v57, %v7632_v15 }
 0x274   : > { %vm9386_vm6 = vcmask 31744   ;;  %v3935_v51 = vsel %vm7745_vm5, %v1452_v44, 0.0  ;;  %v2273_v38 = vand.u32 3, %v4400_v33  ;;  %vm3681_vm1 = vcmp.lt.s32.totalorder %v7718_v39, 2048 }
 0x275   : > { %v4102_v26 = vsel %vm9386_vm6, %v3934_v27, 0.0  ;;  %v2268_v10 = vsel %vm2262_vm10, %v2267_v6, %v2266_v48  ;;  %v1038_v45 = vadd.f32 %v7685_v18, %v7169_v0  ;;  %vm9387_vm8 = vcmask 261120   ;;  %vm9388_vm13 = vmmov %vm9386_vm6 }
 0x276   : > { %v4103_v35 = vadd.f32 %v4102_v26, %v4101_v53  ;;  %v1669_v49 = vsel %vm9387_vm8, %v1314_v58, 0.0  ;;  %v7761_v55 = vpop.eup %5188  ;;  %vm2912_vm11 = vcmp.ne.s32.totalorder %v2268_v10, 0  ;;  %vm3040_vm9 = vcmp.lt.s32.totalorder %v2268_v10, 0  ;;  %vm9389_vm4 = vmmov %vm9387_vm8  ;;  %v1458_v53 = vpop.xlane.xlu0 %1457 }
 0x277   : > { %v3296_v15 = vadd.s32 4, %v2268_v10  ;;  %v2274_v19 = vsub.s32 0, %v2273_v38  ;;  %1670 = vadd.xlane.f32.xlu1 %v1669_v49  ;;  %v7763_v13 = vpop.eup %5190  ;;  %v4104_v25 = vsel %vm9388_vm13, %v3935_v51, 0.0  ;;  %vm3168_vm12 = vmand %vm3040_vm9, %vm2912_vm11  ;;  %v7767_v41 = vadd.s32 %v5689_v28, %v1759_v43 }
 0x278   : > { %v1672_v22 = vsel %vm9389_vm4, %v1315_v5, 0.0  ;;  %v1760_v0 = vadd.s32 352, %v5684_v21  ;;  %5192 = vtanh.f32 %v1043_v56  ;;  %v1053_v3 = vadd.f32 %v7685_v18, %v7270_v47  ;;  %vm9390_vm5 = vmmov %vm9386_vm6 }
 0x279   : > { %v3424_v16 = vsel %vm3168_vm12, %v3296_v15, %v2268_v10  ;;  %v2275_v24 = vsel %vm2269_vm0, %v2274_v19, %v2273_v38  ;;  %1673 = vadd.xlane.f32.xlu0 %v1672_v22  ;;  %v4105_v34 = vadd.f32 %v4104_v25, %v4103_v35  ;;  %5194 = vtanh.f32 %v1038_v45  ;;  %vm9391_vm9 = vmmov %vm9389_vm4  ;;  %v1461_v38 = vpop.xlane.xlu1 %1460 }
 0x27a   : > { %vm3552_vm2 = vcmp.eq.s32.totalorder %v3424_v16, %v5786_v60  ;;  %vm2913_vm10 = vcmp.ne.s32.totalorder %v2275_v24, 0  ;;  %vm3041_vm14 = vcmp.lt.s32.totalorder %v2275_v24, 0  ;;  %v3297_v2 = vadd.s32 4, %v2275_v24  ;;  %vm9392_vm13 = vmmov %vm9390_vm5 }
 0x27b   : > { %vm3808_vm15 = vmand %vm3552_vm2, %vm3680_vm7  ;;  %v2277_v61 = vsub.s32 0, %v7767_v41  ;;  %v7780_v17 = vadd.s32 %v5689_v28, %v1760_v0  ;;  %v1048_v47 = vadd.f32 %v7685_v18, %v7275_v9  ;;  %v1316_v54 = vmul.f32 %v7700_v57, %v7624_v1 }
 0x27c   : > { %v3936_v14 = vsel %vm3808_vm15, %v1455_v63, 0.0  ;;  %vm3169_vm3 = vmand %vm3041_vm14, %vm2913_vm10  ;;  %v1761_v23 = vadd.s32 360, %v5684_v21  ;;  %vm2276_vm7 = vcmp.lt.s32.totalorder %v7767_v41, 0  ;;  %vm3682_vm0 = vcmp.lt.s32.totalorder %v7767_v41, 2048 }
 0x27d   : > { %v3425_v7 = vsel %vm3169_vm3, %v3297_v2, %v2275_v24  ;;  %v4401_v62 = vmin.u32 %v2277_v61, %v7767_v41  ;;  %v4106_v37 = vsel %vm9390_vm5, %v3936_v14, 0.0  ;;  %v2284_v4 = vsub.s32 0, %v7780_v17  ;;  %vm9393_vm12 = vmmov %vm9389_vm4 }
 0x27e   : > { %vm3553_vm6 = vcmp.eq.s32.totalorder %v3425_v7, %v5786_v60  ;;  %5196 = vtanh.f32 %v1053_v3  ;;  %vm2283_vm11 = vcmp.lt.s32.totalorder %v7780_v17, 0  ;;  %v1675_v1 = vsel %vm9391_vm9, %v1316_v54, 0.0  ;;  %vm9394_vm9 = vmmov %vm9392_vm13  ;;  %v1464_v3 = vpop.xlane.xlu0 %1463 }
 0x27f   : > { %vm3809_vm8 = vmand %vm3553_vm6, %vm3681_vm1  ;;  %v2280_v9 = vand.u32 3, %v4401_v62  ;;  %v7798_v20 = vadd.s32 %v5689_v28, %v1761_v23  ;;  %v4402_v59 = vmin.u32 %v2284_v4, %v7780_v17  ;;  %1676 = vadd.xlane.f32.xlu1 %v1675_v1  ;;  %v1317_v36 = vmul.f32 %v7700_v57, %v7665_v29  ;;  %v1467_v62 = vpop.xlane.xlu1 %1466 }
 0x280   : > { %v3937_v52 = vsel %vm3809_vm8, %v1458_v53, 0.0  ;;  %v1762_v30 = vadd.s32 368, %v5684_v21  ;;  %v4107_v31 = vadd.f32 %v4106_v37, %v4105_v34  ;;  %vm3683_vm1 = vcmp.lt.s32.totalorder %v7780_v17, 2048 }
 0x281   : > { %v2281_v39 = vsub.s32 0, %v2280_v9  ;;  %v2291_v50 = vsub.s32 0, %v7798_v20  ;;  %v4108_v56 = vsel %vm9392_vm13, %v3937_v52, 0.0  ;;  %v2287_v46 = vand.u32 3, %v4402_v59 }
 0x282   : > { %5198 = vtanh.f32 %v1048_v47  ;;  %v1678_v44 = vsel %vm9393_vm12, %v1317_v36, 0.0  ;;  %v7808_v48 = vpop.eup %5192  ;;  %vm2290_vm4 = vcmp.lt.s32.totalorder %v7798_v20, 0  ;;  %v7815_v58 = vadd.s32 %v5689_v28, %v1762_v30  ;;  %v1470_v30 = vpop.xlane.xlu0 %1469 }
 0x283   : > { %v2282_v33 = vsel %vm2276_vm7, %v2281_v39, %v2280_v9  ;;  %v4403_v29 = vmin.u32 %v2291_v50, %v7798_v20  ;;  %1679 = vadd.xlane.f32.xlu0 %v1678_v44  ;;  %v2288_v12 = vsub.s32 0, %v2287_v46  ;;  %v7817_v6 = vpop.eup %5194  ;;  %v4109_v43 = vadd.f32 %v4108_v56, %v4107_v31 }
 0x284   : > { %vm2914_vm2 = vcmp.ne.s32.totalorder %v2282_v33, 0  ;;  %vm3042_vm10 = vcmp.lt.s32.totalorder %v2282_v33, 0  ;;  %v3298_v27 = vadd.s32 4, %v2282_v33  ;;  %vm3684_vm15 = vcmp.lt.s32.totalorder %v7798_v20, 2048 }
 0x285   : > { %vm3170_vm14 = vmand %vm3042_vm10, %vm2914_vm2  ;;  %v2294_v5 = vand.u32 3, %v4403_v29  ;;  %v2298_v26 = vsub.s32 0, %v7815_v58  ;;  %v2289_v35 = vsel %vm2283_vm11, %v2288_v12, %v2287_v46  ;;  %vm2297_vm3 = vcmp.lt.s32.totalorder %v7815_v58, 0 }
 0x286   : > { %v3426_v51 = vsel %vm3170_vm14, %v3298_v27, %v2282_v33  ;;  %v1063_v10 = vadd.f32 %v7685_v18, %v7309_v40  ;;  %vm2915_vm5 = vcmp.ne.s32.totalorder %v2289_v35, 0  ;;  %vm3043_vm6 = vcmp.lt.s32.totalorder %v2289_v35, 0 }
 0x287   : > { %vm3554_vm7 = vcmp.eq.s32.totalorder %v3426_v51, %v5786_v60  ;;  %v3299_v45 = vadd.s32 4, %v2289_v35  ;;  %v2295_v15 = vsub.s32 0, %v2294_v5  ;;  %v4404_v19 = vmin.u32 %v2298_v26, %v7815_v58  ;;  %vm3171_vm11 = vmand %vm3043_vm6, %vm2915_vm5 }
 0x288   : > { %v7827_v49 = vpop.eup %5196  ;;  %vm3810_vm8 = vmand %vm3554_vm7, %vm3682_vm0  ;;  %v1058_v25 = vadd.f32 %v7685_v18, %v7324_v11  ;;  %v1318_v22 = vmul.f32 %v7700_v57, %v7649_v42  ;;  %v1763_v0 = vadd.s32 376, %v5684_v21  ;;  %v1319_v16 = vmul.f32 %v7700_v57, %v7727_v32 }
 0x289   : > { %v3938_v40 = vsel %vm3810_vm8, %v1461_v38, 0.0  ;;  %v1764_v63 = vadd.s32 384, %v5684_v21  ;;  %v3427_v24 = vsel %vm3171_vm11, %v3299_v45, %v2289_v35  ;;  %v2296_v2 = vsel %vm2290_vm4, %v2295_v15, %v2294_v5  ;;  %vm9397_vm7 = vmmov %vm9394_vm9 }
 0x28a   : > { %v4110_v41 = vsel %vm9394_vm9, %v3938_v40, 0.0  ;;  %v2301_v11 = vand.u32 3, %v4404_v19  ;;  %vm3555_vm0 = vcmp.eq.s32.totalorder %v3427_v24, %v5786_v60  ;;  %vm2916_vm13 = vcmp.ne.s32.totalorder %v2296_v2, 0 }
 0x28b   : > { %v4111_v18 = vadd.f32 %v4110_v41, %v4109_v43  ;;  %vm3044_vm12 = vcmp.lt.s32.totalorder %v2296_v2, 0  ;;  %vm3811_vm2 = vmand %vm3555_vm0, %vm3683_vm1  ;;  %v3300_v32 = vadd.s32 4, %v2296_v2  ;;  %vm9395_vm10 = vcmask 261120  }
 0x28c   : > { %v7844_v42 = vpop.eup %5198  ;;  %v2302_v34 = vsub.s32 0, %v2301_v11  ;;  %v1681_v61 = vsel %vm9395_vm10, %v1318_v22, 0.0  ;;  %v7850_v14 = vadd.s32 %v5689_v28, %v1763_v0  ;;  %v3939_v47 = vsel %vm3811_vm2, %v1464_v3, 0.0  ;;  %vm3172_vm4 = vmand %vm3044_vm12, %vm2916_vm13 }
 0x28d   : > { %1682 = vadd.xlane.f32.xlu1 %v1681_v61  ;;  %vm9396_vm14 = vmmov %vm9395_vm10  ;;  %v7854_v23 = vadd.s32 %v5689_v28, %v1764_v63  ;;  %v1320_v7 = vmul.f32 %v7700_v57, %v7723_v8  ;;  %v4112_v17 = vsel %vm9397_vm7, %v3939_v47, 0.0  ;;  %v3428_v53 = vsel %vm3172_vm4, %v3300_v32, %v2296_v2  ;;  %v1473_v2 = vpop.xlane.xlu1 %1472  ;;  %v1476_v32 = vpop.xlane.xlu0 %1475 }
 0x28e   : > { %v1684_v54 = vsel %vm9396_vm14, %v1319_v16, 0.0  ;;  %v2303_v37 = vsel %vm2297_vm3, %v2302_v34, %v2301_v11  ;;  %vm3685_vm1 = vcmp.lt.s32.totalorder %v7815_v58, 2048  ;;  %vm3556_vm5 = vcmp.eq.s32.totalorder %v3428_v53, %v5786_v60  ;;  %vm9400_vm0 = vmmov %vm9395_vm10 }
 0x28f   : > { %1685 = vadd.xlane.f32.xlu0 %v1684_v54  ;;  %vm2917_vm6 = vcmp.ne.s32.totalorder %v2303_v37, 0  ;;  %vm3045_vm8 = vcmp.lt.s32.totalorder %v2303_v37, 0  ;;  %5200 = vtanh.f32 %v1063_v10  ;;  %vm7865_vm11 = vmand %vm3556_vm5, %vm3684_vm15  ;;  %v3301_v8 = vadd.s32 4, %v2303_v37 }
 0x290   : > { %5202 = vtanh.f32 %v1058_v25  ;;  %vm2304_vm9 = vcmp.lt.s32.totalorder %v7850_v14, 0  ;;  %v2305_v9 = vsub.s32 0, %v7850_v14  ;;  %v4113_v1 = vadd.f32 %v4112_v17, %v4111_v18  ;;  %vm3173_vm3 = vmand %vm3045_vm8, %vm2917_vm6 }
 0x291   : > { %v3940_v52 = vsel %vm7865_vm11, %v1467_v62, 0.0  ;;  %v2312_v59 = vsub.s32 0, %v7854_v23  ;;  %v1687_v36 = vsel %vm9400_vm0, %v1320_v7, 0.0  ;;  %v3429_v20 = vsel %vm3173_vm3, %v3301_v8, %v2303_v37  ;;  %vm9401_vm13 = vmmov %vm9397_vm7 }
 0x292   : > { %v4405_v31 = vmin.u32 %v2305_v9, %v7850_v14  ;;  %vm3686_vm15 = vcmp.lt.s32.totalorder %v7850_v14, 2048  ;;  %1688 = vadd.xlane.f32.xlu1 %v1687_v36  ;;  %v1765_v39 = vadd.s32 392, %v5684_v21  ;;  %v4114_v50 = vsel %vm9401_vm13, %v3940_v52, 0.0  ;;  %vm9404_vm10 = vmmov %vm9400_vm0  ;;  %v1479_v36 = vpop.xlane.xlu1 %1478 }
 0x293   : > { %vm3557_vm12 = vcmp.eq.s32.totalorder %v3429_v20, %v5786_v60  ;;  %v4406_v56 = vmin.u32 %v2312_v59, %v7854_v23  ;;  %v1321_v46 = vmul.f32 %v7700_v57, %v7763_v13  ;;  %v1766_v27 = vadd.s32 400, %v5684_v21 }
 0x294   : > { %vm7885_vm2 = vmand %vm3557_vm12, %vm3685_vm1  ;;  %v2308_v33 = vand.u32 3, %v4405_v31  ;;  %v7890_v29 = vadd.s32 %v5689_v28, %v1765_v39  ;;  %v1322_v12 = vmul.f32 %v7700_v57, %v7761_v55  ;;  %v1767_v58 = vadd.s32 408, %v5684_v21 }
 0x295   : > { %v3941_v43 = vsel %vm7885_vm2, %v1470_v30, 0.0  ;;  %v2315_v5 = vand.u32 3, %v4406_v56  ;;  %v1690_v13 = vsel %vm9404_vm10, %v1321_v46, 0.0  ;;  %vm2311_vm4 = vcmp.lt.s32.totalorder %v7854_v23, 0  ;;  %vm9405_vm1 = vmmov %vm9400_vm0 }
 0x296   : > { %v2309_v26 = vsub.s32 0, %v2308_v33  ;;  %vm3687_vm14 = vcmp.lt.s32.totalorder %v7854_v23, 2048  ;;  %v2319_v51 = vsub.s32 0, %v7890_v29  ;;  %1691 = vadd.xlane.f32.xlu0 %v1690_v13  ;;  %v4115_v38 = vadd.f32 %v4114_v50, %v4113_v1  ;;  %v1482_v13 = vpop.xlane.xlu0 %1481 }
 0x297   : > { %v4116_v35 = vsel %vm9397_vm7, %v3941_v43, 0.0  ;;  %v2316_v55 = vsub.s32 0, %v2315_v5  ;;  %v7904_v10 = vadd.s32 %v5689_v28, %v1766_v27  ;;  %v1693_v19 = vsel %vm9405_vm1, %v1322_v12, 0.0 }
 0x298   : > { %v2310_v45 = vsel %vm2304_vm9, %v2309_v26, %v2308_v33  ;;  %v4407_v15 = vmin.u32 %v2319_v51, %v7890_v29  ;;  %v7911_v25 = vadd.s32 %v5689_v28, %v1767_v58  ;;  %1694 = vadd.xlane.f32.xlu1 %v1693_v19  ;;  %v4117_v24 = vadd.f32 %v4116_v35, %v4115_v38 }
 0x299   : > { %v7913_v22 = vpop.eup %5200  ;;  %vm2918_vm5 = vcmp.ne.s32.totalorder %v2310_v45, 0  ;;  %vm3046_vm6 = vcmp.lt.s32.totalorder %v2310_v45, 0  ;;  %v3302_v40 = vadd.s32 4, %v2310_v45  ;;  %v2317_v0 = vsel %vm2311_vm4, %v2316_v55, %v2315_v5 }
 0x29a   : > { %v7917_v16 = vpop.eup %5202  ;;  %vm3174_vm8 = vmand %vm3046_vm6, %vm2918_vm5  ;;  %vm2919_vm11 = vcmp.ne.s32.totalorder %v2317_v0, 0  ;;  %vm3047_vm9 = vcmp.lt.s32.totalorder %v2317_v0, 0  ;;  %v3303_v63 = vadd.s32 4, %v2317_v0  ;;  %v2322_v41 = vand.u32 3, %v4407_v15 }
 0x29b   : > { %v3430_v3 = vsel %vm3174_vm8, %v3302_v40, %v2310_v45  ;;  %vm3175_vm3 = vmand %vm3047_vm9, %vm2919_vm11  ;;  %vm2318_vm0 = vcmp.lt.s32.totalorder %v7890_v29, 0  ;;  %v2326_v11 = vsub.s32 0, %v7904_v10  ;;  %vm3688_vm12 = vcmp.lt.s32.totalorder %v7890_v29, 2048 }
 0x29c   : > { %vm3558_vm13 = vcmp.eq.s32.totalorder %v3430_v3, %v5786_v60  ;;  %v3431_v18 = vsel %vm3175_vm3, %v3303_v63, %v2317_v0  ;;  %v2323_v34 = vsub.s32 0, %v2322_v41  ;;  %vm2325_vm4 = vcmp.lt.s32.totalorder %v7904_v10, 0 }
 0x29d   : > { %vm3814_vm2 = vmand %vm3558_vm13, %vm3686_vm15  ;;  %vm3559_vm10 = vcmp.eq.s32.totalorder %v3431_v18, %v5786_v60  ;;  %v4408_v61 = vmin.u32 %v2326_v11, %v7904_v10  ;;  %v2333_v47 = vsub.s32 0, %v7911_v25  ;;  %v1323_v17 = vmul.f32 %v7700_v57, %v7817_v6 }
 0x29e   : > { %v3942_v54 = vsel %vm3814_vm2, %v1473_v2, 0.0  ;;  %vm3815_vm7 = vmand %vm3559_vm10, %vm3687_vm14  ;;  %v2324_v7 = vsel %vm2318_vm0, %v2323_v34, %v2322_v41  ;;  %v1768_v53 = vadd.s32 416, %v5684_v21  ;;  %vm9406_vm1 = vcmask 31744   ;;  %v1485_v41 = vpop.xlane.xlu1 %1484 }
 0x29f   : > { %v4118_v14 = vsel %vm9406_vm1, %v3942_v54, 0.0  ;;  %v3943_v62 = vsel %vm3815_vm7, %v1476_v32, 0.0  ;;  %vm2920_vm15 = vcmp.ne.s32.totalorder %v2324_v7, 0  ;;  %vm3048_vm5 = vcmp.lt.s32.totalorder %v2324_v7, 0  ;;  %vm9407_vm6 = vmmov %vm9406_vm1 }
 0x2a0   : > { %v4119_v37 = vadd.f32 %v4118_v14, %v4117_v24  ;;  %v4120_v4 = vsel %vm9407_vm6, %v3943_v62, 0.0  ;;  %vm3176_vm8 = vmand %vm3048_vm5, %vm2920_vm15  ;;  %v3304_v8 = vadd.s32 4, %v2324_v7  ;;  %v2329_v9 = vand.u32 3, %v4408_v61 }
 0x2a1   : > { %v4409_v23 = vmin.u32 %v2333_v47, %v7911_v25  ;;  %vm9408_vm14 = vcmask 261120   ;;  %v7939_v52 = vadd.s32 %v5689_v28, %v1768_v53  ;;  %v1324_v6 = vmul.f32 %v7700_v57, %v7808_v48  ;;  %vm9410_vm7 = vmmov %vm9406_vm1  ;;  %v1488_v47 = vpop.xlane.xlu0 %1487 }
 0x2a2   : > { %v1696_v1 = vsel %vm9408_vm14, %v1323_v17, 0.0  ;;  %v3432_v59 = vsel %vm3176_vm8, %v3304_v8, %v2324_v7  ;;  %v2330_v20 = vsub.s32 0, %v2329_v9  ;;  %vm3689_vm11 = vcmp.lt.s32.totalorder %v7904_v10, 2048  ;;  %vm9409_vm13 = vmmov %vm9408_vm14 }
 0x2a3   : > { %1697 = vadd.xlane.f32.xlu0 %v1696_v1  ;;  %v1769_v30 = vadd.s32 424, %v5684_v21  ;;  %v4121_v31 = vadd.f32 %v4120_v4, %v4119_v37  ;;  %vm3560_vm9 = vcmp.eq.s32.totalorder %v3432_v59, %v5786_v60  ;;  %v2336_v39 = vand.u32 3, %v4409_v23  ;;  %v1491_v1 = vpop.xlane.xlu1 %1490 }
 0x2a4   : > { %v2340_v50 = vsub.s32 0, %v7939_v52  ;;  %vm3816_vm3 = vmand %vm3560_vm9, %vm3688_vm12  ;;  %v2331_v48 = vsel %vm2325_vm4, %v2330_v20, %v2329_v9  ;;  %vm2332_vm0 = vcmp.lt.s32.totalorder %v7911_v25, 0  ;;  %v1699_v56 = vsel %vm9409_vm13, %v1324_v6, 0.0 }
 0x2a5   : > { %v7954_v46 = vadd.s32 %v5689_v28, %v1769_v30  ;;  %v3944_v44 = vsel %vm3816_vm3, %v1479_v36, 0.0  ;;  %vm2921_vm2 = vcmp.ne.s32.totalorder %v2331_v48, 0  ;;  %vm3049_vm10 = vcmp.lt.s32.totalorder %v2331_v48, 0  ;;  %1700 = vadd.xlane.f32.xlu1 %v1699_v56  ;;  %vm9411_vm9 = vmmov %vm9409_vm13 }
 0x2a6   : > { %v3305_v33 = vadd.s32 4, %v2331_v48  ;;  %v4122_v27 = vsel %vm9410_vm7, %v3944_v44, 0.0  ;;  %vm3177_vm1 = vmand %vm3049_vm10, %vm2921_vm2  ;;  %v2337_v29 = vsub.s32 0, %v2336_v39  ;;  %vm3690_vm12 = vcmp.lt.s32.totalorder %v7911_v25, 2048 }
 0x2a7   : > { %v4410_v12 = vmin.u32 %v2340_v50, %v7939_v52  ;;  %v4123_v43 = vadd.f32 %v4122_v27, %v4121_v31  ;;  %vm2339_vm4 = vcmp.lt.s32.totalorder %v7939_v52, 0  ;;  %v2347_v58 = vsub.s32 0, %v7954_v46  ;;  %vm9412_vm3 = vmmov %vm9410_vm7 }
 0x2a8   : > { %v3433_v5 = vsel %vm3177_vm1, %v3305_v33, %v2331_v48  ;;  %v2338_v26 = vsel %vm2332_vm0, %v2337_v29, %v2336_v39  ;;  %v1325_v38 = vmul.f32 %v7700_v57, %v7844_v42  ;;  %v1770_v40 = vadd.s32 432, %v5684_v21 }
 0x2a9   : > { %vm3561_vm15 = vcmp.eq.s32.totalorder %v3433_v5, %v5786_v60  ;;  %v2343_v51 = vand.u32 3, %v4410_v12  ;;  %vm2922_vm6 = vcmp.ne.s32.totalorder %v2338_v26, 0  ;;  %vm3050_vm8 = vcmp.lt.s32.totalorder %v2338_v26, 0 }
 0x2aa   : > { %vm3817_vm5 = vmand %vm3561_vm15, %vm3689_vm11  ;;  %v3306_v35 = vadd.s32 4, %v2338_v26  ;;  %v4411_v55 = vmin.u32 %v2347_v58, %v7954_v46  ;;  %v1702_v19 = vsel %vm9411_vm9, %v1325_v38, 0.0  ;;  %v1326_v10 = vmul.f32 %v7700_v57, %v7827_v49 }
 0x2ab   : > { %v3945_v45 = vsel %vm3817_vm5, %v1482_v13, 0.0  ;;  %vm3178_vm14 = vmand %vm3050_vm8, %vm2922_vm6  ;;  %v2344_v15 = vsub.s32 0, %v2343_v51  ;;  %1703 = vadd.xlane.f32.xlu0 %v1702_v19  ;;  %vm2346_vm0 = vcmp.lt.s32.totalorder %v7954_v46, 0  ;;  %v7979_v3 = vadd.s32 %v5689_v28, %v1770_v40 }
 0x2ac   : > { %v4124_v0 = vsel %vm9412_vm3, %v3945_v45, 0.0  ;;  %v3434_v63 = vsel %vm3178_vm14, %v3306_v35, %v2338_v26  ;;  %v2350_v42 = vand.u32 3, %v4411_v55  ;;  %vm3691_vm1 = vcmp.lt.s32.totalorder %v7939_v52, 2048  ;;  %vm9414_vm15 = vmmov %vm9411_vm9 }
 0x2ad   : > { %vm3562_vm11 = vcmp.eq.s32.totalorder %v3434_v63, %v5786_v60  ;;  %v2345_v24 = vsel %vm2339_vm4, %v2344_v15, %v2343_v51  ;;  %v4125_v18 = vadd.f32 %v4124_v0, %v4123_v43  ;;  %v2354_v49 = vsub.s32 0, %v7979_v3  ;;  %vm9413_vm4 = vmmov %vm9412_vm3  ;;  %v1494_v43 = vpop.xlane.xlu0 %1493 }
 0x2ae   : > { %vm3818_vm13 = vmand %vm3562_vm11, %vm3690_vm12  ;;  %vm2923_vm2 = vcmp.ne.s32.totalorder %v2345_v24, 0  ;;  %vm3051_vm10 = vcmp.lt.s32.totalorder %v2345_v24, 0  ;;  %v3307_v2 = vadd.s32 4, %v2345_v24  ;;  %v2351_v11 = vsub.s32 0, %v2350_v42 }
 0x2af   : > { %v3946_v32 = vsel %vm3818_vm13, %v1485_v41, 0.0  ;;  %vm3179_vm7 = vmand %vm3051_vm10, %vm2923_vm2  ;;  %v1705_v7 = vsel %vm9414_vm15, %v1326_v10, 0.0  ;;  %vm3692_vm8 = vcmp.lt.s32.totalorder %v7954_v46, 2048  ;;  %v4412_v17 = vmin.u32 %v2354_v49, %v7979_v3 }
 0x2b0   : > { %v4126_v34 = vsel %vm9413_vm4, %v3946_v32, 0.0  ;;  %v3435_v61 = vsel %vm3179_vm7, %v3307_v2, %v2345_v24  ;;  %v2352_v54 = vsel %vm2346_vm0, %v2351_v11, %v2350_v42  ;;  %1706 = vadd.xlane.f32.xlu1 %v1705_v7  ;;  %v1771_v53 = vadd.s32 440, %v5684_v21  ;;  %vm9415_vm13 = vmmov %vm9414_vm15 }
 0x2b1   : > { %vm3563_vm12 = vcmp.eq.s32.totalorder %v3435_v61, %v5786_v60  ;;  %vm2924_vm5 = vcmp.ne.s32.totalorder %v2352_v54, 0  ;;  %vm3052_vm6 = vcmp.lt.s32.totalorder %v2352_v54, 0  ;;  %v3308_v25 = vadd.s32 4, %v2352_v54  ;;  %vm9416_vm4 = vmmov %vm9415_vm13 }
 0x2b2   : > { %vm3819_vm14 = vmand %vm3563_vm12, %vm3691_vm1  ;;  %v1327_v14 = vmul.f32 %v7700_v57, %v7917_v16  ;;  %v4127_v62 = vadd.f32 %v4126_v34, %v4125_v18  ;;  %v1772_v4 = vadd.s32 448, %v5684_v21  ;;  %v1328_v8 = vmul.f32 %v7700_v57, %v7913_v22  ;;  %v1500_v34 = vpop.xlane.xlu0 %1499 }
 0x2b3   : > { %v3947_v37 = vsel %vm3819_vm14, %v1488_v47, 0.0  ;;  %vm3180_vm9 = vmand %vm3052_vm6, %vm2924_vm5  ;;  %v2357_v52 = vand.u32 3, %v4412_v17  ;;  %v7998_v6 = vadd.s32 %v5689_v28, %v1771_v53  ;;  %vm2353_vm0 = vcmp.lt.s32.totalorder %v7979_v3, 0 }
 0x2b4   : > { %v4128_v9 = vsel %vm9412_vm3, %v3947_v37, 0.0  ;;  %v3436_v23 = vsel %vm3180_vm9, %v3308_v25, %v2352_v54  ;;  %v1708_v16 = vsel %vm9415_vm13, %v1327_v14, 0.0  ;;  %v8004_v59 = vadd.s32 %v5689_v28, %v1772_v4  ;;  %vm9417_vm15 = vmmov %vm9412_vm3 }
 0x2b5   : > { %vm3564_vm11 = vcmp.eq.s32.totalorder %v3436_v23, %v5786_v60  ;;  %v2358_v57 = vsub.s32 0, %v2357_v52  ;;  %vm3693_vm10 = vcmp.lt.s32.totalorder %v7979_v3, 2048  ;;  %v2361_v22 = vsub.s32 0, %v7998_v6  ;;  %1709 = vadd.xlane.f32.xlu0 %v1708_v16  ;;  %v1497_v3 = vpop.xlane.xlu1 %1496 }
 0x2b6   : > { %vm3820_vm2 = vmand %vm3564_vm11, %vm3692_vm8  ;;  %v1773_v36 = vadd.s32 456, %v5684_v21  ;;  %v4129_v20 = vadd.f32 %v4128_v9, %v4127_v62  ;;  %vm2360_vm7 = vcmp.lt.s32.totalorder %v7998_v6, 0  ;;  %v2368_v31 = vsub.s32 0, %v8004_v59 }
 0x2b7   : > { %v3948_v30 = vsel %vm3820_vm2, %v1491_v1, 0.0  ;;  %v2359_v39 = vsel %vm2353_vm0, %v2358_v57, %v2357_v52  ;;  %v4413_v50 = vmin.u32 %v2361_v22, %v7998_v6  ;;  %vm3694_vm1 = vcmp.lt.s32.totalorder %v7998_v6, 2048  ;;  %vm9418_vm11 = vmmov %vm9417_vm15 }
 0x2b8   : > { %v1711_v48 = vsel %vm9416_vm4, %v1328_v8, 0.0  ;;  %v4130_v56 = vsel %vm9417_vm15, %v3948_v30, 0.0  ;;  %vm2925_vm12 = vcmp.ne.s32.totalorder %v2359_v39, 0  ;;  %vm3053_vm5 = vcmp.lt.s32.totalorder %v2359_v39, 0 }
 0x2b9   : > { %v3309_v46 = vadd.s32 4, %v2359_v39  ;;  %1712 = vadd.xlane.f32.xlu1 %v1711_v48  ;;  %vm3181_vm6 = vmand %vm3053_vm5, %vm2925_vm12  ;;  %v2364_v44 = vand.u32 3, %v4413_v50  ;;  %v4414_v33 = vmin.u32 %v2368_v31, %v8004_v59  ;;  %v8019_v27 = vadd.s32 %v5689_v28, %v1773_v36  ;;  %v1506_v31 = vpop.xlane.xlu0 %1505 }
 0x2ba   : > { %v1774_v29 = vadd.s32 464, %v5684_v21  ;;  %vm2367_vm8 = vcmp.lt.s32.totalorder %v8004_v59, 0  ;;  %vm3695_vm14 = vcmp.lt.s32.totalorder %v8004_v59, 2048  ;;  %v1775_v5 = vadd.s32 472, %v5684_v21  ;;  %v1503_v59 = vpop.xlane.xlu1 %1502 }
 0x2bb   : > { %v3437_v12 = vsel %vm3181_vm6, %v3309_v46, %v2359_v39  ;;  %v2365_v13 = vsub.s32 0, %v2364_v44  ;;  %v2371_v58 = vand.u32 3, %v4414_v33  ;;  %v1776_v26 = vadd.s32 480, %v5684_v21 }
 0x2bc   : > { %vm3565_vm9 = vcmp.eq.s32.totalorder %v3437_v12, %v5786_v60  ;;  %v4131_v51 = vadd.f32 %v4130_v56, %v4129_v20  ;;  %v2375_v38 = vsub.s32 0, %v8019_v27  ;;  %v8031_v35 = vadd.s32 %v5689_v28, %v1774_v29 }
 0x2bd   : > { %vm3821_vm3 = vmand %vm3565_vm9, %vm3693_vm10  ;;  %v1777_v55 = vadd.s32 488, %v5684_v21  ;;  %v2366_v15 = vsel %vm2360_vm7, %v2365_v13, %v2364_v44  ;;  %v2372_v19 = vsub.s32 0, %v2371_v58  ;;  %v8037_v40 = vadd.s32 %v5689_v28, %v1775_v5 }
 0x2be   : > { %v3949_v45 = vsel %vm3821_vm3, %v1494_v43, 0.0  ;;  %vm2926_vm0 = vcmp.ne.s32.totalorder %v2366_v15, 0  ;;  %vm3054_vm13 = vcmp.lt.s32.totalorder %v2366_v15, 0  ;;  %v3310_v63 = vadd.s32 4, %v2366_v15 }
 0x2bf   : > { %v4132_v0 = vsel %vm9418_vm11, %v3949_v45, 0.0  ;;  %vm3182_vm2 = vmand %vm3054_vm13, %vm2926_vm0  ;;  %v2373_v41 = vsel %vm2367_vm8, %v2372_v19, %v2371_v58  ;;  %vm2374_vm10 = vcmp.lt.s32.totalorder %v8019_v27, 0  ;;  %v4415_v42 = vmin.u32 %v2375_v38, %v8019_v27 }
 0x2c0   : > { %v8045_v10 = vadd.s32 %v5689_v28, %v1776_v26  ;;  %v3438_v24 = vsel %vm3182_vm2, %v3310_v63, %v2366_v15  ;;  %vm2927_vm7 = vcmp.ne.s32.totalorder %v2373_v41, 0  ;;  %vm3055_vm4 = vcmp.lt.s32.totalorder %v2373_v41, 0  ;;  %vm9419_vm13 = vmmov %vm9418_vm11  ;;  %v1509_v26 = vpop.xlane.xlu1 %1508 }
 0x2c1   : > { %v3311_v2 = vadd.s32 4, %v2373_v41  ;;  %v4133_v11 = vadd.f32 %v4132_v0, %v4131_v51  ;;  %vm3566_vm15 = vcmp.eq.s32.totalorder %v3438_v24, %v5786_v60  ;;  %vm3183_vm12 = vmand %vm3055_vm4, %vm2927_vm7  ;;  %v2378_v18 = vand.u32 3, %v4415_v42 }
 0x2c2   : > { %v2382_v32 = vsub.s32 0, %v8031_v35  ;;  %vm3822_vm5 = vmand %vm3566_vm15, %vm3694_vm1  ;;  %vm3696_vm6 = vcmp.lt.s32.totalorder %v8019_v27, 2048  ;;  %vm2381_vm8 = vcmp.lt.s32.totalorder %v8031_v35, 0  ;;  %v2389_v61 = vsub.s32 0, %v8037_v40 }
 0x2c3   : > { %v3439_v49 = vsel %vm3183_vm12, %v3311_v2, %v2373_v41  ;;  %v3950_v47 = vsel %vm3822_vm5, %v1497_v3, 0.0  ;;  %v2379_v54 = vsub.s32 0, %v2378_v18  ;;  %vm3697_vm3 = vcmp.lt.s32.totalorder %v8031_v35, 2048 }
 0x2c4   : > { %vm3567_vm9 = vcmp.eq.s32.totalorder %v3439_v49, %v5786_v60  ;;  %v4416_v7 = vmin.u32 %v2382_v32, %v8031_v35  ;;  %v4134_v25 = vsel %vm9418_vm11, %v3950_v47, 0.0  ;;  %vm2388_vm0 = vcmp.lt.s32.totalorder %v8037_v40, 0  ;;  %v1515_v47 = vpop.xlane.xlu1 %1514 }
 0x2c5   : > { %vm3823_vm1 = vmand %vm3567_vm9, %vm3695_vm14  ;;  %v4417_v17 = vmin.u32 %v2389_v61, %v8037_v40  ;;  %v2396_v53 = vsub.s32 0, %v8045_v10  ;;  %v4135_v14 = vadd.f32 %v4134_v25, %v4133_v11  ;;  %v2380_v37 = vsel %vm2374_vm10, %v2379_v54, %v2378_v18 }
 0x2c6   : > { %v3951_v62 = vsel %vm3823_vm1, %v1500_v34, 0.0  ;;  %v2385_v4 = vand.u32 3, %v4416_v7  ;;  %vm2928_vm2 = vcmp.ne.s32.totalorder %v2380_v37, 0  ;;  %vm3056_vm7 = vcmp.lt.s32.totalorder %v2380_v37, 0 }
 0x2c7   : > { %v4136_v8 = vsel %vm9419_vm13, %v3951_v62, 0.0  ;;  %v3312_v9 = vadd.s32 4, %v2380_v37  ;;  %vm3184_vm4 = vmand %vm3056_vm7, %vm2928_vm2  ;;  %v2392_v1 = vand.u32 3, %v4417_v17  ;;  %vm3698_vm14 = vcmp.lt.s32.totalorder %v8037_v40, 2048 }
 0x2c8   : > { %v2386_v23 = vsub.s32 0, %v2385_v4  ;;  %v4418_v52 = vmin.u32 %v2396_v53, %v8045_v10  ;;  %v4137_v6 = vadd.f32 %v4136_v8, %v4135_v14  ;;  %vm2395_vm15 = vcmp.lt.s32.totalorder %v8045_v10, 0 }
 0x2c9   : > { %v3440_v16 = vsel %vm3184_vm4, %v3312_v9, %v2380_v37  ;;  %v8070_v57 = vadd.s32 %v5689_v28, %v1777_v55  ;;  %v2393_v36 = vsub.s32 0, %v2392_v1  ;;  %v1778_v39 = vadd.s32 496, %v5684_v21  ;;  %v1512_v55 = vpop.xlane.xlu0 %1511 }
 0x2ca   : > { %vm3568_vm10 = vcmp.eq.s32.totalorder %v3440_v16, %v5786_v60  ;;  %v2387_v22 = vsel %vm2381_vm8, %v2386_v23, %v2385_v4  ;;  %v2399_v20 = vand.u32 3, %v4418_v52  ;;  %vm9420_vm8 = vmmov %vm9419_vm13  ;;  %v1779_v41 = vadd.s32 504, %v5684_v21 }
 0x2cb   : > { %vm3824_vm12 = vmand %vm3568_vm10, %vm3696_vm6  ;;  %vm2929_vm5 = vcmp.ne.s32.totalorder %v2387_v22, 0  ;;  %vm3057_vm9 = vcmp.lt.s32.totalorder %v2387_v22, 0  ;;  %v3313_v30 = vadd.s32 4, %v2387_v22  ;;  %v2394_v48 = vsel %vm2388_vm0, %v2393_v36, %v2392_v1 }
 0x2cc   : > { %v3952_v50 = vsel %vm3824_vm12, %v1503_v59, 0.0  ;;  %vm3185_vm11 = vmand %vm3057_vm9, %vm2929_vm5  ;;  %v2400_v56 = vsub.s32 0, %v2399_v20  ;;  %v2403_v46 = vsub.s32 0, %v8070_v57  ;;  %vm2930_vm1 = vcmp.ne.s32.totalorder %v2394_v48, 0 }
 0x2cd   : > { %v4138_v44 = vsel %vm9420_vm8, %v3952_v50, 0.0  ;;  %v3441_v33 = vsel %vm3185_vm11, %v3313_v30, %v2387_v22  ;;  %vm3058_vm13 = vcmp.lt.s32.totalorder %v2394_v48, 0  ;;  %v3314_v29 = vadd.s32 4, %v2394_v48  ;;  %vm9421_vm5 = vmmov %vm9420_vm8  ;;  %v1518_v59 = vpop.xlane.xlu0 %1517 }
 0x2ce   : > { %v4139_v27 = vadd.f32 %v4138_v44, %v4137_v6  ;;  %vm3569_vm6 = vcmp.eq.s32.totalorder %v3441_v33, %v5786_v60  ;;  %vm3186_vm2 = vmand %vm3058_vm13, %vm2930_vm1  ;;  %v2401_v12 = vsel %vm2395_vm15, %v2400_v56, %v2399_v20  ;;  %v4419_v5 = vmin.u32 %v2403_v46, %v8070_v57 }
 0x2cf   : > { %vm3825_vm7 = vmand %vm3569_vm6, %vm3697_vm3  ;;  %vm2931_vm0 = vcmp.ne.s32.totalorder %v2401_v12, 0  ;;  %vm3059_vm4 = vcmp.lt.s32.totalorder %v2401_v12, 0  ;;  %v3315_v43 = vadd.s32 4, %v2401_v12  ;;  %v3442_v58 = vsel %vm3186_vm2, %v3314_v29, %v2394_v48 }
 0x2d0   : > { %v3953_v13 = vsel %vm3825_vm7, %v1506_v31, 0.0  ;;  %vm3187_vm10 = vmand %vm3059_vm4, %vm2931_vm0  ;;  %vm3699_vm12 = vcmp.lt.s32.totalorder %v8045_v10, 2048  ;;  %v8090_v51 = vadd.s32 %v5689_v28, %v1778_v39  ;;  %vm3570_vm15 = vcmp.eq.s32.totalorder %v3442_v58, %v5786_v60 }
 0x2d1   : > { %v4140_v38 = vsel %vm9421_vm5, %v3953_v13, 0.0  ;;  %v3443_v35 = vsel %vm3187_vm10, %v3315_v43, %v2401_v12  ;;  %v2406_v45 = vand.u32 3, %v4419_v5  ;;  %vm3826_vm3 = vmand %vm3570_vm15, %vm3698_vm14  ;;  %vm2402_vm11 = vcmp.lt.s32.totalorder %v8070_v57, 0  ;;  %v1521_v43 = vpop.xlane.xlu1 %1520 }
 0x2d2   : > { %v4141_v15 = vadd.f32 %v4140_v38, %v4139_v27  ;;  %vm3571_vm9 = vcmp.eq.s32.totalorder %v3443_v35, %v5786_v60  ;;  %v2410_v19 = vsub.s32 0, %v8090_v51  ;;  %v3954_v0 = vsel %vm3826_vm3, %v1509_v26, 0.0  ;;  %vm9422_vm1 = vmmov %vm9421_vm5  ;;  %v1524_v38 = vpop.xlane.xlu0 %1523 }
 0x2d3   : > { %vm3827_vm8 = vmand %vm3571_vm9, %vm3699_vm12  ;;  %v2407_v63 = vsub.s32 0, %v2406_v45  ;;  %v4142_v42 = vsel %vm9422_vm1, %v3954_v0, 0.0  ;;  %v1780_v3 = vadd.s32 512, %v5684_v21  ;;  %v8105_v18 = vadd.s32 %v5689_v28, %v1779_v41 }
 0x2d4   : > { %v3955_v10 = vsel %vm3827_vm8, %v1512_v55, 0.0  ;;  %v4420_v24 = vmin.u32 %v2410_v19, %v8090_v51  ;;  %v4143_v40 = vadd.f32 %v4142_v42, %v4141_v15  ;;  %vm9423_vm14 = vmmov %vm9422_vm1  ;;  %vm3700_vm7 = vcmp.lt.s32.totalorder %v8070_v57, 2048 }
 0x2d5   : > { %v4144_v2 = vsel %vm9423_vm14, %v3955_v10, 0.0  ;;  %v2408_v11 = vsel %vm2402_vm11, %v2407_v63, %v2406_v45  ;;  %vm2409_vm0 = vcmp.lt.s32.totalorder %v8090_v51, 0  ;;  %vm3701_vm4 = vcmp.lt.s32.totalorder %v8090_v51, 2048  ;;  %vm9424_vm9 = vmmov %vm9422_vm1 }
 0x2d6   : > { %vm2932_vm13 = vcmp.ne.s32.totalorder %v2408_v11, 0  ;;  %vm3060_vm6 = vcmp.lt.s32.totalorder %v2408_v11, 0  ;;  %v3316_v32 = vadd.s32 4, %v2408_v11  ;;  %v2413_v49 = vand.u32 3, %v4420_v24 }
 0x2d7   : > { %vm3188_vm2 = vmand %vm3060_vm6, %vm2932_vm13  ;;  %v2417_v34 = vsub.s32 0, %v8105_v18  ;;  %v8112_v7 = vadd.s32 %v5689_v28, %v1780_v3  ;;  %v1781_v25 = vadd.s32 520, %v5684_v21  ;;  %v4145_v17 = vadd.f32 %v4144_v2, %v4143_v40 }
 0x2d8   : > { %v3444_v61 = vsel %vm3188_vm2, %v3316_v32, %v2408_v11  ;;  %v2414_v54 = vsub.s32 0, %v2413_v49  ;;  %v1782_v14 = vadd.s32 528, %v5684_v21  ;;  %vm2416_vm5 = vcmp.lt.s32.totalorder %v8105_v18, 0 }
 0x2d9   : > { %vm3572_vm10 = vcmp.eq.s32.totalorder %v3444_v61, %v5786_v60  ;;  %v4421_v53 = vmin.u32 %v2417_v34, %v8105_v18  ;;  %v2424_v37 = vsub.s32 0, %v8112_v7  ;;  %v1783_v4 = vadd.s32 536, %v5684_v21 }
 0x2da   : > { %vm3828_vm12 = vmand %vm3572_vm10, %vm3700_vm7  ;;  %v2415_v62 = vsel %vm2409_vm0, %v2414_v54, %v2413_v49  ;;  %v8124_v6 = vadd.s32 %v5689_v28, %v1781_v25  ;;  %vm3702_vm8 = vcmp.lt.s32.totalorder %v8105_v18, 2048  ;;  %vm2423_vm1 = vcmp.lt.s32.totalorder %v8112_v7, 0  ;;  %v1527_v49 = vpop.xlane.xlu1 %1526 }
 0x2db   : > { %v3956_v8 = vsel %vm3828_vm12, %v1515_v47, 0.0  ;;  %vm2933_vm15 = vcmp.ne.s32.totalorder %v2415_v62, 0  ;;  %vm3061_vm3 = vcmp.lt.s32.totalorder %v2415_v62, 0  ;;  %v3317_v9 = vadd.s32 4, %v2415_v62  ;;  %vm9425_vm7 = vmmov %vm9424_vm9 }
 0x2dc   : > { %v4146_v23 = vsel %vm9424_vm9, %v3956_v8, 0.0  ;;  %vm3189_vm11 = vmand %vm3061_vm3, %vm2933_vm15  ;;  %v2420_v1 = vand.u32 3, %v4421_v53  ;;  %v4422_v52 = vmin.u32 %v2424_v37, %v8112_v7  ;;  %v8129_v57 = vadd.s32 %v5689_v28, %v1782_v14 }
 0x2dd   : > { %v3445_v16 = vsel %vm3189_vm11, %v3317_v9, %v2415_v62  ;;  %vm3703_vm13 = vcmp.lt.s32.totalorder %v8112_v7, 2048  ;;  %v4147_v20 = vadd.f32 %v4146_v23, %v4145_v17  ;;  %v2431_v30 = vsub.s32 0, %v8124_v6  ;;  %v1530_v7 = vpop.xlane.xlu0 %1529 }
 0x2de   : > { %vm3573_vm14 = vcmp.eq.s32.totalorder %v3445_v16, %v5786_v60  ;;  %v2421_v22 = vsub.s32 0, %v2420_v1  ;;  %v2427_v36 = vand.u32 3, %v4422_v52  ;;  %v2438_v31 = vsub.s32 0, %v8129_v57 }
 0x2df   : > { %vm3829_vm6 = vmand %vm3573_vm14, %vm3701_vm4  ;;  %v8138_v39 = vadd.s32 %v5689_v28, %v1783_v4  ;;  %vm2430_vm2 = vcmp.lt.s32.totalorder %v8124_v6, 0  ;;  %v4423_v27 = vmin.u32 %v2431_v30, %v8124_v6  ;;  %vm3704_vm12 = vcmp.lt.s32.totalorder %v8124_v6, 2048 }
 0x2e0   : > { %v3957_v50 = vsel %vm3829_vm6, %v1518_v59, 0.0  ;;  %v2422_v48 = vsel %vm2416_vm5, %v2421_v22, %v2420_v1  ;;  %v2428_v56 = vsub.s32 0, %v2427_v36  ;;  %v4424_v29 = vmin.u32 %v2438_v31, %v8129_v57  ;;  %vm9426_vm6 = vmmov %vm9425_vm7  ;;  %v1533_v31 = vpop.xlane.xlu1 %1532 }
 0x2e1   : > { %v4148_v46 = vsel %vm9425_vm7, %v3957_v50, 0.0  ;;  %vm2934_vm0 = vcmp.ne.s32.totalorder %v2422_v48, 0  ;;  %vm3062_vm10 = vcmp.lt.s32.totalorder %v2422_v48, 0  ;;  %v3318_v44 = vadd.s32 4, %v2422_v48 }
 0x2e2   : > { %vm3190_vm4 = vmand %vm3062_vm10, %vm2934_vm0  ;;  %v2429_v33 = vsel %vm2423_vm1, %v2428_v56, %v2427_v36  ;;  %v4149_v13 = vadd.f32 %v4148_v46, %v4147_v20  ;;  %v2434_v58 = vand.u32 3, %v4423_v27  ;;  %v2441_v26 = vand.u32 3, %v4424_v29 }
 0x2e3   : > { %v3446_v12 = vsel %vm3190_vm4, %v3318_v44, %v2422_v48  ;;  %vm2935_vm5 = vcmp.ne.s32.totalorder %v2429_v33, 0  ;;  %vm3063_vm15 = vcmp.lt.s32.totalorder %v2429_v33, 0  ;;  %v3319_v5 = vadd.s32 4, %v2429_v33 }
 0x2e4   : > { %vm3574_vm3 = vcmp.eq.s32.totalorder %v3446_v12, %v5786_v60  ;;  %vm3191_vm9 = vmand %vm3063_vm15, %vm2935_vm5  ;;  %vm2437_vm1 = vcmp.lt.s32.totalorder %v8129_v57, 0  ;;  %v2445_v35 = vsub.s32 0, %v8138_v39  ;;  %v1784_v55 = vadd.s32 544, %v5684_v21 }
 0x2e5   : > { %vm3830_vm11 = vmand %vm3574_vm3, %vm3702_vm8  ;;  %v3447_v51 = vsel %vm3191_vm9, %v3319_v5, %v2429_v33  ;;  %v2435_v15 = vsub.s32 0, %v2434_v58  ;;  %v2442_v19 = vsub.s32 0, %v2441_v26  ;;  %v1785_v42 = vadd.s32 552, %v5684_v21  ;;  %v1536_v5 = vpop.xlane.xlu0 %1535 }
 0x2e6   : > { %v3958_v45 = vsel %vm3830_vm11, %v1521_v43, 0.0  ;;  %vm3575_vm14 = vcmp.eq.s32.totalorder %v3447_v51, %v5786_v60  ;;  %v4425_v63 = vmin.u32 %v2445_v35, %v8138_v39  ;;  %v8161_v41 = vadd.s32 %v5689_v28, %v1784_v55  ;;  %vm9427_vm8 = vmmov %vm9426_vm6 }
 0x2e7   : > { %v4150_v0 = vsel %vm9426_vm6, %v3958_v45, 0.0  ;;  %vm3831_vm7 = vmand %vm3575_vm14, %vm3703_vm13  ;;  %v2436_v3 = vsel %vm2430_vm2, %v2435_v15, %v2434_v58  ;;  %v2443_v40 = vsel %vm2437_vm1, %v2442_v19, %v2441_v26  ;;  %vm3705_vm15 = vcmp.lt.s32.totalorder %v8129_v57, 2048 }
 0x2e8   : > { %v4151_v10 = vadd.f32 %v4150_v0, %v4149_v13  ;;  %v3959_v24 = vsel %vm3831_vm7, %v1524_v38, 0.0  ;;  %vm2936_vm0 = vcmp.ne.s32.totalorder %v2436_v3, 0  ;;  %vm3064_vm10 = vcmp.lt.s32.totalorder %v2436_v3, 0 }
 0x2e9   : > { %v4152_v2 = vsel %vm9427_vm8, %v3959_v24, 0.0  ;;  %v3320_v11 = vadd.s32 4, %v2436_v3  ;;  %vm3192_vm4 = vmand %vm3064_vm10, %vm2936_vm0  ;;  %vm2937_vm13 = vcmp.ne.s32.totalorder %v2443_v40, 0  ;;  %vm3065_vm5 = vcmp.lt.s32.totalorder %v2443_v40, 0 }
 0x2ea   : > { %v3321_v18 = vadd.s32 4, %v2443_v40  ;;  %vm3193_vm3 = vmand %vm3065_vm5, %vm2937_vm13  ;;  %vm2444_vm9 = vcmp.lt.s32.totalorder %v8138_v39, 0  ;;  %v2448_v34 = vand.u32 3, %v4425_v63  ;;  %v2452_v61 = vsub.s32 0, %v8161_v41 }
 0x2eb   : > { %v3448_v32 = vsel %vm3192_vm4, %v3320_v11, %v2436_v3  ;;  %v4153_v47 = vadd.f32 %v4152_v2, %v4151_v10  ;;  %v8172_v25 = vadd.s32 %v5689_v28, %v1785_v42  ;;  %v1786_v14 = vadd.s32 560, %v5684_v21 }
 0x2ec   : > { %vm3576_vm2 = vcmp.eq.s32.totalorder %v3448_v32, %v5786_v60  ;;  %v3449_v54 = vsel %vm3193_vm3, %v3321_v18, %v2443_v40  ;;  %v2449_v17 = vsub.s32 0, %v2448_v34  ;;  %v4426_v53 = vmin.u32 %v2452_v61, %v8161_v41 }
 0x2ed   : > { %vm3832_vm11 = vmand %vm3576_vm2, %vm3704_vm12  ;;  %vm3577_vm1 = vcmp.eq.s32.totalorder %v3449_v54, %v5786_v60  ;;  %vm3706_vm6 = vcmp.lt.s32.totalorder %v8138_v39, 2048  ;;  %vm2451_vm7 = vcmp.lt.s32.totalorder %v8161_v41, 0  ;;  %v2459_v37 = vsub.s32 0, %v8172_v25 }
 0x2ee   : > { %v3960_v62 = vsel %vm3832_vm11, %v1527_v49, 0.0  ;;  %vm3833_vm14 = vmand %vm3577_vm1, %vm3705_vm15  ;;  %v2450_v9 = vsel %vm2444_vm9, %v2449_v17, %v2448_v34  ;;  %v2455_v23 = vand.u32 3, %v4426_v53  ;;  %v8190_v57 = vadd.s32 %v5689_v28, %v1786_v14 }
 0x2ef   : > { %v4154_v4 = vsel %vm9427_vm8, %v3960_v62, 0.0  ;;  %v3961_v8 = vsel %vm3833_vm14, %v1530_v7, 0.0  ;;  %vm9428_vm12 = vmmov %vm9427_vm8  ;;  %vm2938_vm0 = vcmp.ne.s32.totalorder %v2450_v9, 0  ;;  %vm3066_vm10 = vcmp.lt.s32.totalorder %v2450_v9, 0 }
 0x2f0   : > { %v4155_v1 = vadd.f32 %v4154_v4, %v4153_v47  ;;  %v4156_v52 = vsel %vm9428_vm12, %v3961_v8, 0.0  ;;  %vm3194_vm4 = vmand %vm3066_vm10, %vm2938_vm0  ;;  %v3322_v6 = vadd.s32 4, %v2450_v9  ;;  %v2456_v16 = vsub.s32 0, %v2455_v23 }
 0x2f1   : > { %v4427_v59 = vmin.u32 %v2459_v37, %v8172_v25  ;;  %vm3707_vm13 = vcmp.lt.s32.totalorder %v8161_v41, 2048  ;;  %vm2458_vm5 = vcmp.lt.s32.totalorder %v8172_v25, 0  ;;  %v1787_v22 = vadd.s32 568, %v5684_v21  ;;  %v1539_v41 = vpop.xlane.xlu1 %1538 }
 0x2f2   : > { %v1788_v36 = vadd.s32 576, %v5684_v21  ;;  %v4157_v20 = vadd.f32 %v4156_v52, %v4155_v1  ;;  %v3450_v30 = vsel %vm3194_vm4, %v3322_v6, %v2450_v9  ;;  %v2457_v50 = vsel %vm2451_vm7, %v2456_v16, %v2455_v23  ;;  %vm9429_vm7 = vmmov %vm9427_vm8 }
 0x2f3   : > { %v2462_v48 = vand.u32 3, %v4427_v59  ;;  %vm3578_vm15 = vcmp.eq.s32.totalorder %v3450_v30, %v5786_v60  ;;  %vm2939_vm3 = vcmp.ne.s32.totalorder %v2457_v50, 0  ;;  %vm3067_vm9 = vcmp.lt.s32.totalorder %v2457_v50, 0 }
 0x2f4   : > { %v3323_v56 = vadd.s32 4, %v2457_v50  ;;  %vm3834_vm2 = vmand %vm3578_vm15, %vm3706_vm6  ;;  %v2466_v44 = vsub.s32 0, %v8190_v57  ;;  %v8203_v33 = vadd.s32 %v5689_v28, %v1787_v22  ;;  %v1789_v27 = vadd.s32 584, %v5684_v21 }
 0x2f5   : > { %v2463_v46 = vsub.s32 0, %v2462_v48  ;;  %v3962_v29 = vsel %vm3834_vm2, %v1533_v31, 0.0  ;;  %vm3195_vm11 = vmand %vm3067_vm9, %vm2939_vm3  ;;  %vm3708_vm1 = vcmp.lt.s32.totalorder %v8172_v25, 2048  ;;  %vm2465_vm14 = vcmp.lt.s32.totalorder %v8190_v57, 0  ;;  %v1542_v25 = vpop.xlane.xlu0 %1541  ;;  %v1545_v4 = vpop.xlane.xlu1 %1544 }
 0x2f6   : > { %v8209_v12 = vadd.s32 %v5689_v28, %v1788_v36  ;;  %v4158_v39 = vsel %vm9429_vm7, %v3962_v29, 0.0  ;;  %v3451_v43 = vsel %vm3195_vm11, %v3323_v56, %v2457_v50  ;;  %v4428_v58 = vmin.u32 %v2466_v44, %v8190_v57  ;;  %vm9430_vm15 = vmmov %vm9429_vm7 }
 0x2f7   : > { %v2464_v13 = vsel %vm2458_vm5, %v2463_v46, %v2462_v48  ;;  %vm3709_vm6 = vcmp.lt.s32.totalorder %v8190_v57, 2048  ;;  %v4159_v26 = vadd.f32 %v4158_v39, %v4157_v20  ;;  %vm3579_vm8 = vcmp.eq.s32.totalorder %v3451_v43, %v5786_v60 }
 0x2f8   : > { %vm2940_vm12 = vcmp.ne.s32.totalorder %v2464_v13, 0  ;;  %vm3068_vm0 = vcmp.lt.s32.totalorder %v2464_v13, 0  ;;  %vm3835_vm10 = vmand %vm3579_vm8, %vm3707_vm13  ;;  %v3324_v51 = vadd.s32 4, %v2464_v13  ;;  %v2469_v38 = vand.u32 3, %v4428_v58 }
 0x2f9   : > { %v2473_v35 = vsub.s32 0, %v8203_v33  ;;  %v8221_v55 = vadd.s32 %v5689_v28, %v1789_v27  ;;  %v3963_v45 = vsel %vm3835_vm10, %v1536_v5, 0.0  ;;  %vm3196_vm4 = vmand %vm3068_vm0, %vm2940_vm12  ;;  %vm2472_vm5 = vcmp.lt.s32.totalorder %v8203_v33, 0  ;;  %v1548_v31 = vpop.xlane.xlu0 %1547  ;;  %v1551_v46 = vpop.xlane.xlu1 %1550 }
 0x2fa   : > { %v2480_v15 = vsub.s32 0, %v8209_v12  ;;  %v1790_v19 = vadd.s32 592, %v5684_v21  ;;  %v4160_v0 = vsel %vm9430_vm15, %v3963_v45, 0.0  ;;  %v3452_v63 = vsel %vm3196_vm4, %v3324_v51, %v2464_v13  ;;  %vm9431_vm12 = vmmov %vm9430_vm15 }
 0x2fb   : > { %v2470_v42 = vsub.s32 0, %v2469_v38  ;;  %v4429_v10 = vmin.u32 %v2473_v35, %v8203_v33  ;;  %v4161_v24 = vadd.f32 %v4160_v0, %v4159_v26  ;;  %vm3580_vm13 = vcmp.eq.s32.totalorder %v3452_v63, %v5786_v60 }
 0x2fc   : > { %vm3710_vm3 = vcmp.lt.s32.totalorder %v8203_v33, 2048  ;;  %v4430_v3 = vmin.u32 %v2480_v15, %v8209_v12  ;;  %vm3836_vm9 = vmand %vm3580_vm13, %vm3708_vm1  ;;  %vm2479_vm2 = vcmp.lt.s32.totalorder %v8209_v12, 0  ;;  %v2487_v11 = vsub.s32 0, %v8221_v55 }
 0x2fd   : > { %v2471_v40 = vsel %vm2465_vm14, %v2470_v42, %v2469_v38  ;;  %v2476_v2 = vand.u32 3, %v4429_v10  ;;  %v3964_v18 = vsel %vm3836_vm9, %v1539_v41, 0.0  ;;  %vm3711_vm8 = vcmp.lt.s32.totalorder %v8209_v12, 2048  ;;  %v1554_v41 = vpop.xlane.xlu0 %1553 }
 0x2fe   : > { %vm2941_vm11 = vcmp.ne.s32.totalorder %v2471_v40, 0  ;;  %vm3069_vm7 = vcmp.lt.s32.totalorder %v2471_v40, 0  ;;  %v3325_v32 = vadd.s32 4, %v2471_v40  ;;  %v4162_v49 = vsel %vm9431_vm12, %v3964_v18, 0.0 }
 0x2ff   : > { %vm3197_vm0 = vmand %vm3069_vm7, %vm2941_vm11  ;;  %v2477_v34 = vsub.s32 0, %v2476_v2  ;;  %v2483_v61 = vand.u32 3, %v4430_v3  ;;  %v4431_v47 = vmin.u32 %v2487_v11, %v8221_v55  ;;  %v4163_v54 = vadd.f32 %v4162_v49, %v4161_v24 }
 0x300   : > { %v3453_v7 = vsel %vm3197_vm0, %v3325_v32, %v2471_v40  ;;  %vm2486_vm1 = vcmp.lt.s32.totalorder %v8221_v55, 0  ;;  %v8242_v17 = vadd.s32 %v5689_v28, %v1790_v19  ;;  %vm3712_vm13 = vcmp.lt.s32.totalorder %v8221_v55, 2048 }
 0x301   : > { %vm3581_vm14 = vcmp.eq.s32.totalorder %v3453_v7, %v5786_v60  ;;  %v2478_v53 = vsel %vm2472_vm5, %v2477_v34, %v2476_v2  ;;  %v2484_v14 = vsub.s32 0, %v2483_v61  ;;  %v2490_v62 = vand.u32 3, %v4431_v47  ;;  %vm9432_vm5 = vmmov %vm9431_vm12 }
 0x302   : > { %vm3837_vm10 = vmand %vm3581_vm14, %vm3709_vm6  ;;  %vm2942_vm4 = vcmp.ne.s32.totalorder %v2478_v53, 0  ;;  %vm3070_vm15 = vcmp.lt.s32.totalorder %v2478_v53, 0  ;;  %v3326_v37 = vadd.s32 4, %v2478_v53  ;;  %v2494_v1 = vsub.s32 0, %v8242_v17 }
 0x303   : > { %v3965_v8 = vsel %vm3837_vm10, %v1542_v25, 0.0  ;;  %vm3198_vm9 = vmand %vm3070_vm15, %vm2942_vm4  ;;  %v2485_v9 = vsel %vm2479_vm2, %v2484_v14, %v2483_v61  ;;  %v2491_v23 = vsub.s32 0, %v2490_v62  ;;  %vm2493_vm4 = vcmp.lt.s32.totalorder %v8242_v17, 0 }
 0x304   : > { %v4164_v52 = vsel %vm9432_vm5, %v3965_v8, 0.0  ;;  %v3454_v6 = vsel %vm3198_vm9, %v3326_v37, %v2478_v53  ;;  %vm2943_vm11 = vcmp.ne.s32.totalorder %v2485_v9, 0  ;;  %vm3071_vm7 = vcmp.lt.s32.totalorder %v2485_v9, 0  ;;  %vm9433_vm15 = vmmov %vm9432_vm5  ;;  %v1557_v37 = vpop.xlane.xlu1 %1556 }
 0x305   : > { %v4165_v16 = vadd.f32 %v4164_v52, %v4163_v54  ;;  %vm3582_vm6 = vcmp.eq.s32.totalorder %v3454_v6, %v5786_v60  ;;  %vm3199_vm12 = vmand %vm3071_vm7, %vm2943_vm11  ;;  %v3327_v59 = vadd.s32 4, %v2485_v9  ;;  %v2492_v57 = vsel %vm2486_vm1, %v2491_v23, %v2490_v62 }
 0x306   : > { %vm3838_vm0 = vmand %vm3582_vm6, %vm3710_vm3  ;;  %vm2944_vm2 = vcmp.ne.s32.totalorder %v2492_v57, 0  ;;  %vm3072_vm14 = vcmp.lt.s32.totalorder %v2492_v57, 0  ;;  %v3328_v22 = vadd.s32 4, %v2492_v57  ;;  %v4432_v36 = vmin.u32 %v2494_v1, %v8242_v17 }
 0x307   : > { %v3966_v20 = vsel %vm3838_vm0, %v1545_v4, 0.0  ;;  %v3455_v30 = vsel %vm3199_vm12, %v3327_v59, %v2485_v9  ;;  %vm3200_vm10 = vmand %vm3072_vm14, %vm2944_vm2  ;;  %v1791_v50 = vadd.s32 600, %v5684_v21  ;;  %v1792_v29 = vadd.s32 608, %v5684_v21 }
 0x308   : > { %v4166_v48 = vsel %vm9433_vm15, %v3966_v20, 0.0  ;;  %vm3583_vm1 = vcmp.eq.s32.totalorder %v3455_v30, %v5786_v60  ;;  %v3456_v56 = vsel %vm3200_vm10, %v3328_v22, %v2492_v57  ;;  %v2497_v44 = vand.u32 3, %v4432_v36  ;;  %vm9434_vm11 = vmmov %vm9433_vm15 }
 0x309   : > { %v4167_v33 = vadd.f32 %v4166_v48, %v4165_v16  ;;  %vm3839_vm3 = vmand %vm3583_vm1, %vm3711_vm8  ;;  %vm3584_vm9 = vcmp.eq.s32.totalorder %v3456_v56, %v5786_v60  ;;  %v1920_v27 = vadd.s32 %v5689_v28, %v1791_v50  ;;  %v1793_v5 = vadd.s32 616, %v5684_v21 }
 0x30a   : > { %v3967_v39 = vsel %vm3839_vm3, %v1548_v31, 0.0  ;;  %vm3840_vm5 = vmand %vm3584_vm9, %vm3712_vm13  ;;  %v2498_v43 = vsub.s32 0, %v2497_v44  ;;  %v1794_v13 = vadd.s32 624, %v5684_v21  ;;  %vm3713_vm12 = vcmp.lt.s32.totalorder %v8242_v17, 2048  ;;  %v1560_v31 = vpop.xlane.xlu0 %1559 }
 0x30b   : > { %v4168_v58 = vsel %vm9434_vm11, %v3967_v39, 0.0  ;;  %v3968_v26 = vsel %vm3840_vm5, %v1551_v46, 0.0  ;;  %v2501_v12 = vsub.s32 0, %v1920_v27  ;;  %vm9435_vm8 = vmmov %vm9434_vm11  ;;  %v8279_v15 = vadd.s32 %v5689_v28, %v1792_v29 }
 0x30c   : > { %v4169_v51 = vadd.f32 %v4168_v58, %v4167_v33  ;;  %v4170_v38 = vsel %vm9435_vm8, %v3968_v26, 0.0  ;;  %v2499_v35 = vsel %vm2493_vm4, %v2498_v43, %v2497_v44  ;;  %v8282_v19 = vadd.s32 %v5689_v28, %v1793_v5  ;;  %vm9436_vm15 = vmmov %vm9435_vm8 }
 0x30d   : > { %vm2945_vm7 = vcmp.ne.s32.totalorder %v2499_v35, 0  ;;  %vm3073_vm6 = vcmp.lt.s32.totalorder %v2499_v35, 0  ;;  %v3329_v45 = vadd.s32 4, %v2499_v35  ;;  %v4433_v55 = vmin.u32 %v2501_v12, %v1920_v27 }
 0x30e   : > { %vm3201_vm13 = vmand %vm3073_vm6, %vm2945_vm7  ;;  %v8285_v0 = vadd.s32 %v5689_v28, %v1794_v13  ;;  %vm2500_vm0 = vcmp.lt.s32.totalorder %v1920_v27, 0  ;;  %v4171_v10 = vadd.f32 %v4170_v38, %v4169_v51  ;;  %vm3714_vm14 = vcmp.lt.s32.totalorder %v1920_v27, 2048  ;;  %v1563_v27 = vpop.xlane.xlu1 %1562 }
 0x30f   : > { %v3457_v63 = vsel %vm3201_vm13, %v3329_v45, %v2499_v35  ;;  %v2504_v42 = vand.u32 3, %v4433_v55  ;;  %v2508_v24 = vsub.s32 0, %v8279_v15  ;;  %v2515_v40 = vsub.s32 0, %v8282_v19  ;;  %v1566_v55 = vpop.xlane.xlu0 %1565 }
 0x310   : > { %vm3585_vm2 = vcmp.eq.s32.totalorder %v3457_v63, %v5786_v60  ;;  %v1795_v2 = vadd.s32 632, %v5684_v21  ;;  %v1796_v11 = vadd.s32 640, %v5684_v21  ;;  %vm2507_vm4 = vcmp.lt.s32.totalorder %v8279_v15, 0 }
 0x311   : > { %vm3841_vm10 = vmand %vm3585_vm2, %vm3713_vm12  ;;  %v2505_v3 = vsub.s32 0, %v2504_v42  ;;  %v4434_v32 = vmin.u32 %v2508_v24, %v8279_v15  ;;  %v2522_v49 = vsub.s32 0, %v8285_v0  ;;  %vm3715_vm1 = vcmp.lt.s32.totalorder %v8279_v15, 2048 }
 0x312   : > { %v3969_v18 = vsel %vm3841_vm10, %v1554_v41, 0.0  ;;  %v4435_v47 = vmin.u32 %v2515_v40, %v8282_v19  ;;  %vm2514_vm5 = vcmp.lt.s32.totalorder %v8282_v19, 0  ;;  %v8302_v53 = vadd.s32 %v5689_v28, %v1795_v2 }
 0x313   : > { %v4172_v34 = vsel %vm9436_vm15, %v3969_v18, 0.0  ;;  %v2506_v61 = vsel %vm2500_vm0, %v2505_v3, %v2504_v42  ;;  %v2511_v7 = vand.u32 3, %v4434_v32  ;;  %v4436_v17 = vmin.u32 %v2522_v49, %v8285_v0  ;;  %vm9437_vm0 = vmmov %vm9436_vm15  ;;  %v1569_v18 = vpop.xlane.xlu1 %1568 }
 0x314   : > { %vm2946_vm3 = vcmp.ne.s32.totalorder %v2506_v61, 0  ;;  %vm3074_vm9 = vcmp.lt.s32.totalorder %v2506_v61, 0  ;;  %v3330_v54 = vadd.s32 4, %v2506_v61  ;;  %v2518_v25 = vand.u32 3, %v4435_v47 }
 0x315   : > { %vm3202_vm11 = vmand %vm3074_vm9, %vm2946_vm3  ;;  %v4173_v14 = vadd.f32 %v4172_v34, %v4171_v10  ;;  %vm3716_vm8 = vcmp.lt.s32.totalorder %v8282_v19, 2048  ;;  %vm2521_vm7 = vcmp.lt.s32.totalorder %v8285_v0, 0  ;;  %v2512_v4 = vsub.s32 0, %v2511_v7 }
 0x316   : > { %v3458_v62 = vsel %vm3202_vm11, %v3330_v54, %v2506_v61  ;;  %v2519_v8 = vsub.s32 0, %v2518_v25  ;;  %v2525_v9 = vand.u32 3, %v4436_v17  ;;  %vm3717_vm12 = vcmp.lt.s32.totalorder %v8285_v0, 2048 }
 0x317   : > { %vm3586_vm6 = vcmp.eq.s32.totalorder %v3458_v62, %v5786_v60  ;;  %v2529_v23 = vsub.s32 0, %v8302_v53  ;;  %v8311_v1 = vadd.s32 %v5689_v28, %v1796_v11  ;;  %v1797_v52 = vadd.s32 648, %v5684_v21 }
 0x318   : > { %vm3842_vm13 = vmand %vm3586_vm6, %vm3714_vm14  ;;  %v1798_v6 = vadd.s32 656, %v5684_v21  ;;  %v2513_v59 = vsel %vm2507_vm4, %v2512_v4, %v2511_v7  ;;  %v2520_v57 = vsel %vm2514_vm5, %v2519_v8, %v2518_v25  ;;  %v2526_v22 = vsub.s32 0, %v2525_v9  ;;  %v1572_v7 = vpop.xlane.xlu0 %1571 }
 0x319   : > { %v3970_v16 = vsel %vm3842_vm13, %v1557_v37, 0.0  ;;  %vm2947_vm2 = vcmp.ne.s32.totalorder %v2513_v59, 0  ;;  %vm3075_vm14 = vcmp.lt.s32.totalorder %v2513_v59, 0  ;;  %v3331_v20 = vadd.s32 4, %v2513_v59 }
 0x31a   : > { %v4174_v36 = vsel %vm9437_vm0, %v3970_v16, 0.0  ;;  %vm3203_vm10 = vmand %vm3075_vm14, %vm2947_vm2  ;;  %vm2948_vm15 = vcmp.ne.s32.totalorder %v2520_v57, 0  ;;  %vm3076_vm3 = vcmp.lt.s32.totalorder %v2520_v57, 0  ;;  %v3332_v50 = vadd.s32 4, %v2520_v57 }
 0x31b   : > { %v4175_v30 = vadd.f32 %v4174_v36, %v4173_v14  ;;  %v3459_v48 = vsel %vm3203_vm10, %v3331_v20, %v2513_v59  ;;  %vm3204_vm9 = vmand %vm3076_vm3, %vm2948_vm15  ;;  %v2527_v56 = vsel %vm2521_vm7, %v2526_v22, %v2525_v9  ;;  %v4437_v46 = vmin.u32 %v2529_v23, %v8302_v53 }
 0x31c   : > { %v2536_v44 = vsub.s32 0, %v8311_v1  ;;  %vm3587_vm4 = vcmp.eq.s32.totalorder %v3459_v48, %v5786_v60  ;;  %v3460_v33 = vsel %vm3204_vm9, %v3332_v50, %v2520_v57  ;;  %vm2949_vm5 = vcmp.ne.s32.totalorder %v2527_v56, 0  ;;  %v1575_v57 = vpop.xlane.xlu1 %1574 }
 0x31d   : > { %vm3077_vm11 = vcmp.lt.s32.totalorder %v2527_v56, 0  ;;  %vm3843_vm6 = vmand %vm3587_vm4, %vm3715_vm1  ;;  %vm3588_vm13 = vcmp.eq.s32.totalorder %v3460_v33, %v5786_v60  ;;  %v3333_v29 = vadd.s32 4, %v2527_v56  ;;  %v2532_v39 = vand.u32 3, %v4437_v46 }
 0x31e   : > { %v4438_v43 = vmin.u32 %v2536_v44, %v8311_v1  ;;  %v3971_v5 = vsel %vm3843_vm6, %v1560_v31, 0.0  ;;  %vm3844_vm7 = vmand %vm3588_vm13, %vm3716_vm8  ;;  %vm2528_vm0 = vcmp.lt.s32.totalorder %v8302_v53, 0  ;;  %vm2535_vm2 = vcmp.lt.s32.totalorder %v8311_v1, 0 }
 0x31f   : > { %v8334_v13 = vadd.s32 %v5689_v28, %v1797_v52  ;;  %vm9438_vm14 = vcmask 31744   ;;  %v3972_v26 = vsel %vm3844_vm7, %v1563_v27, 0.0  ;;  %vm3205_vm1 = vmand %vm3077_vm11, %vm2949_vm5  ;;  %v2533_v12 = vsub.s32 0, %v2532_v39 }
 0x320   : > { %v4176_v58 = vsel %vm9438_vm14, %v3971_v5, 0.0  ;;  %v2539_v51 = vand.u32 3, %v4438_v43  ;;  %vm9439_vm10 = vmmov %vm9438_vm14  ;;  %v3461_v45 = vsel %vm3205_vm1, %v3333_v29, %v2527_v56  ;;  %v8339_v15 = vadd.s32 %v5689_v28, %v1798_v6 }
 0x321   : > { %v4177_v38 = vadd.f32 %v4176_v58, %v4175_v30  ;;  %v4178_v35 = vsel %vm9439_vm10, %v3972_v26, 0.0  ;;  %vm3589_vm8 = vcmp.eq.s32.totalorder %v3461_v45, %v5786_v60  ;;  %v2534_v19 = vsel %vm2528_vm0, %v2533_v12, %v2532_v39  ;;  %vm9440_vm11 = vmmov %vm9439_vm10  ;;  %v1578_v58 = vpop.xlane.xlu0 %1577 }
 0x322   : > { %v2540_v63 = vsub.s32 0, %v2539_v51  ;;  %v2543_v41 = vsub.s32 0, %v8334_v13  ;;  %vm3845_vm15 = vmand %vm3589_vm8, %vm3717_vm12  ;;  %vm2950_vm3 = vcmp.ne.s32.totalorder %v2534_v19, 0  ;;  %vm3078_vm9 = vcmp.lt.s32.totalorder %v2534_v19, 0 }
 0x323   : > { %v4179_v42 = vadd.f32 %v4178_v35, %v4177_v38  ;;  %v3334_v10 = vadd.s32 4, %v2534_v19  ;;  %v3973_v24 = vsel %vm3845_vm15, %v1566_v55, 0.0  ;;  %vm3206_vm4 = vmand %vm3078_vm9, %vm2950_vm3  ;;  %vm3718_vm5 = vcmp.lt.s32.totalorder %v8302_v53, 2048 }
 0x324   : > { %v2541_v3 = vsel %vm2535_vm2, %v2540_v63, %v2539_v51  ;;  %v4439_v40 = vmin.u32 %v2543_v41, %v8334_v13  ;;  %v4180_v2 = vsel %vm9440_vm11, %v3973_v24, 0.0  ;;  %vm3719_vm14 = vcmp.lt.s32.totalorder %v8311_v1, 2048  ;;  %vm9441_vm2 = vmmov %vm9439_vm10  ;;  %v1581_v24 = vpop.xlane.xlu1 %1580 }
 0x325   : > { %v3462_v11 = vsel %vm3206_vm4, %v3334_v10, %v2534_v19  ;;  %vm2951_vm6 = vcmp.ne.s32.totalorder %v2541_v3, 0  ;;  %vm3079_vm13 = vcmp.lt.s32.totalorder %v2541_v3, 0  ;;  %v4181_v0 = vadd.f32 %v4180_v2, %v4179_v42  ;;  %vm9442_vm9 = vmmov %vm9441_vm2 }
 0x326   : > { %vm3590_vm12 = vcmp.eq.s32.totalorder %v3462_v11, %v5786_v60  ;;  %vm3207_vm7 = vmand %vm3079_vm13, %vm2951_vm6  ;;  %v3335_v32 = vadd.s32 4, %v2541_v3  ;;  %v2546_v49 = vand.u32 3, %v4439_v40  ;;  %vm2542_vm1 = vcmp.lt.s32.totalorder %v8334_v13, 0 }
 0x327   : > { %vm3846_vm0 = vmand %vm3590_vm12, %vm3718_vm5  ;;  %v2550_v34 = vsub.s32 0, %v8339_v15  ;;  %v1799_v61 = vadd.s32 664, %v5684_v21  ;;  %v1800_v17 = vadd.s32 672, %v5684_v21  ;;  %v1801_v9 = vadd.s32 680, %v5684_v21 }
 0x328   : > { %v3974_v47 = vsel %vm3846_vm0, %v1569_v18, 0.0  ;;  %v3463_v54 = vsel %vm3207_vm7, %v3335_v32, %v2541_v3  ;;  %v2547_v25 = vsub.s32 0, %v2546_v49  ;;  %vm3720_vm5 = vcmp.lt.s32.totalorder %v8334_v13, 2048  ;;  %vm9443_vm0 = vmmov %vm9441_vm2  ;;  %v1584_v32 = vpop.xlane.xlu0 %1583 }
 0x329   : > { %v4182_v53 = vsel %vm9441_vm2, %v3974_v47, 0.0  ;;  %vm3591_vm10 = vcmp.eq.s32.totalorder %v3463_v54, %v5786_v60  ;;  %v4440_v14 = vmin.u32 %v2550_v34, %v8339_v15  ;;  %v8360_v62 = vadd.s32 %v5689_v28, %v1799_v61 }
 0x32a   : > { %v4183_v37 = vadd.f32 %v4182_v53, %v4181_v0  ;;  %vm3847_vm8 = vmand %vm3591_vm10, %vm3719_vm14  ;;  %v2548_v4 = vsel %vm2542_vm1, %v2547_v25, %v2546_v49  ;;  %v8363_v8 = vadd.s32 %v5689_v28, %v1800_v17  ;;  %vm2549_vm11 = vcmp.lt.s32.totalorder %v8339_v15, 0 }
 0x32b   : > { %v3975_v23 = vsel %vm3847_vm8, %v1572_v7, 0.0  ;;  %vm2952_vm15 = vcmp.ne.s32.totalorder %v2548_v4, 0  ;;  %vm3080_vm3 = vcmp.lt.s32.totalorder %v2548_v4, 0  ;;  %v3336_v1 = vadd.s32 4, %v2548_v4 }
 0x32c   : > { %v4184_v52 = vsel %vm9442_vm9, %v3975_v23, 0.0  ;;  %vm3208_vm4 = vmand %vm3080_vm3, %vm2952_vm15  ;;  %v2553_v6 = vand.u32 3, %v4440_v14  ;;  %v2557_v16 = vsub.s32 0, %v8360_v62  ;;  %vm3721_vm6 = vcmp.lt.s32.totalorder %v8339_v15, 2048 }
 0x32d   : > { %v3464_v59 = vsel %vm3208_vm4, %v3336_v1, %v2548_v4  ;;  %vm2556_vm13 = vcmp.lt.s32.totalorder %v8360_v62, 0  ;;  %v2564_v20 = vsub.s32 0, %v8363_v8  ;;  %v4185_v30 = vadd.f32 %v4184_v52, %v4183_v37  ;;  %v1587_v1 = vpop.xlane.xlu1 %1586 }
 0x32e   : > { %vm3592_vm12 = vcmp.eq.s32.totalorder %v3464_v59, %v5786_v60  ;;  %v2554_v22 = vsub.s32 0, %v2553_v6  ;;  %v4441_v36 = vmin.u32 %v2557_v16, %v8360_v62  ;;  %v8376_v31 = vadd.s32 %v5689_v28, %v1801_v9 }
 0x32f   : > { %vm3848_vm7 = vmand %vm3592_vm12, %vm3720_vm5  ;;  %v1802_v50 = vadd.s32 688, %v5684_v21  ;;  %v1803_v48 = vadd.s32 696, %v5684_v21  ;;  %v4442_v33 = vmin.u32 %v2564_v20, %v8363_v8  ;;  %vm3722_vm10 = vcmp.lt.s32.totalorder %v8360_v62, 2048 }
 0x330   : > { %v3976_v56 = vsel %vm3848_vm7, %v1575_v57, 0.0  ;;  %v2555_v46 = vsel %vm2549_vm11, %v2554_v22, %v2553_v6  ;;  %v2560_v44 = vand.u32 3, %v4441_v36  ;;  %vm2563_vm8 = vcmp.lt.s32.totalorder %v8363_v8, 0 }
 0x331   : > { %v4186_v27 = vsel %vm9443_vm0, %v3976_v56, 0.0  ;;  %vm2953_vm14 = vcmp.ne.s32.totalorder %v2555_v46, 0  ;;  %vm3081_vm1 = vcmp.lt.s32.totalorder %v2555_v46, 0  ;;  %v3337_v29 = vadd.s32 4, %v2555_v46 }
 0x332   : > { %vm3209_vm2 = vmand %vm3081_vm1, %vm2953_vm14  ;;  %v2561_v39 = vsub.s32 0, %v2560_v44  ;;  %v2567_v43 = vand.u32 3, %v4442_v33  ;;  %v4187_v5 = vadd.f32 %v4186_v27, %v4185_v30  ;;  %v2571_v26 = vsub.s32 0, %v8376_v31 }
 0x333   : > { %v3465_v13 = vsel %vm3209_vm2, %v3337_v29, %v2555_v46  ;;  %v8386_v12 = vadd.s32 %v5689_v28, %v1802_v50  ;;  %v8392_v35 = vadd.s32 %v5689_v28, %v1803_v48  ;;  %vm3723_vm11 = vcmp.lt.s32.totalorder %v8363_v8, 2048  ;;  %v1590_v48 = vpop.xlane.xlu0 %1589 }
 0x334   : > { %vm3593_vm15 = vcmp.eq.s32.totalorder %v3465_v13, %v5786_v60  ;;  %v2562_v51 = vsel %vm2556_vm13, %v2561_v39, %v2560_v44  ;;  %v2568_v38 = vsub.s32 0, %v2567_v43  ;;  %v4443_v55 = vmin.u32 %v2571_v26, %v8376_v31  ;;  %vm9444_vm13 = vmmov %vm9443_vm0 }
 0x335   : > { %vm3849_vm3 = vmand %vm3593_vm15, %vm3721_vm6  ;;  %vm2954_vm9 = vcmp.ne.s32.totalorder %v2562_v51, 0  ;;  %vm3082_vm4 = vcmp.lt.s32.totalorder %v2562_v51, 0  ;;  %v3338_v45 = vadd.s32 4, %v2562_v51  ;;  %v2578_v41 = vsub.s32 0, %v8386_v12 }
 0x336   : > { %v3977_v19 = vsel %vm3849_vm3, %v1578_v58, 0.0  ;;  %vm3210_vm5 = vmand %vm3082_vm4, %vm2954_vm9  ;;  %v2569_v63 = vsel %vm2563_vm8, %v2568_v38, %v2567_v43  ;;  %v2574_v40 = vand.u32 3, %v4443_v55  ;;  %vm2570_vm1 = vcmp.lt.s32.totalorder %v8376_v31, 0  ;;  %v1593_v43 = vpop.xlane.xlu1 %1592 }
 0x337   : > { %v4188_v42 = vsel %vm9444_vm13, %v3977_v19, 0.0  ;;  %v3466_v10 = vsel %vm3210_vm5, %v3338_v45, %v2562_v51  ;;  %vm2955_vm12 = vcmp.ne.s32.totalorder %v2569_v63, 0  ;;  %vm3083_vm6 = vcmp.lt.s32.totalorder %v2569_v63, 0  ;;  %vm9445_vm15 = vmmov %vm9444_vm13 }
 0x338   : > { %v4189_v15 = vadd.f32 %v4188_v42, %v4187_v5  ;;  %vm3594_vm7 = vcmp.eq.s32.totalorder %v3466_v10, %v5786_v60  ;;  %vm3211_vm0 = vmand %vm3083_vm6, %vm2955_vm12  ;;  %v3339_v3 = vadd.s32 4, %v2569_v63  ;;  %vm3724_vm2 = vcmp.lt.s32.totalorder %v8376_v31, 2048 }
 0x339   : > { %vm3850_vm14 = vmand %vm3594_vm7, %vm3722_vm10  ;;  %v4444_v2 = vmin.u32 %v2578_v41, %v8386_v12  ;;  %v2585_v11 = vsub.s32 0, %v8392_v35  ;;  %v2575_v49 = vsub.s32 0, %v2574_v40  ;;  %vm2577_vm8 = vcmp.lt.s32.totalorder %v8386_v12, 0 }
 0x33a   : > { %v3978_v18 = vsel %vm3850_vm14, %v1581_v24, 0.0  ;;  %v3467_v0 = vsel %vm3211_vm0, %v3339_v3, %v2569_v63  ;;  %v1804_v25 = vadd.s32 704, %v5684_v21  ;;  %v1805_v17 = vadd.s32 712, %v5684_v21  ;;  %vm9446_vm5 = vmmov %vm9444_vm13 }
 0x33b   : > { %v4190_v34 = vsel %vm9445_vm15, %v3978_v18, 0.0  ;;  %vm3595_vm3 = vcmp.eq.s32.totalorder %v3467_v0, %v5786_v60  ;;  %v2581_v61 = vand.u32 3, %v4444_v2  ;;  %v4445_v47 = vmin.u32 %v2585_v11, %v8392_v35  ;;  %v1596_v11 = vpop.xlane.xlu0 %1595 }
 0x33c   : > { %v4191_v54 = vadd.f32 %v4190_v34, %v4189_v15  ;;  %vm3851_vm10 = vmand %vm3595_vm3, %vm3723_vm11  ;;  %v2576_v7 = vsel %vm2570_vm1, %v2575_v49, %v2574_v40  ;;  %v8421_v9 = vadd.s32 %v5689_v28, %v1804_v25  ;;  %vm2584_vm11 = vcmp.lt.s32.totalorder %v8392_v35, 0 }
 0x33d   : > { %v3979_v53 = vsel %vm3851_vm10, %v1584_v32, 0.0  ;;  %vm2956_vm9 = vcmp.ne.s32.totalorder %v2576_v7, 0  ;;  %vm3084_vm4 = vcmp.lt.s32.totalorder %v2576_v7, 0  ;;  %v3340_v14 = vadd.s32 4, %v2576_v7  ;;  %vm9447_vm3 = vmmov %vm9446_vm5 }
 0x33e   : > { %v4192_v62 = vsel %vm9446_vm5, %v3979_v53, 0.0  ;;  %vm3212_vm13 = vmand %vm3084_vm4, %vm2956_vm9  ;;  %v2582_v37 = vsub.s32 0, %v2581_v61  ;;  %v2588_v4 = vand.u32 3, %v4445_v47  ;;  %v8425_v52 = vadd.s32 %v5689_v28, %v1805_v17 }
 0x33f   : > { %v4193_v8 = vadd.f32 %v4192_v62, %v4191_v54  ;;  %v3468_v23 = vsel %vm3212_vm13, %v3340_v14, %v2576_v7  ;;  %v1806_v59 = vadd.s32 720, %v5684_v21  ;;  %v2592_v22 = vsub.s32 0, %v8421_v9  ;;  %vm9448_vm13 = vmmov %vm9447_vm3  ;;  %v1599_v14 = vpop.xlane.xlu1 %1598 }
 0x340   : > { %vm3596_vm12 = vcmp.eq.s32.totalorder %v3468_v23, %v5786_v60  ;;  %v2583_v6 = vsel %vm2577_vm8, %v2582_v37, %v2581_v61  ;;  %v2589_v16 = vsub.s32 0, %v2588_v4  ;;  %vm3725_vm1 = vcmp.lt.s32.totalorder %v8386_v12, 2048 }
 0x341   : > { %vm3852_vm6 = vmand %vm3596_vm12, %vm3724_vm2  ;;  %vm2957_vm7 = vcmp.ne.s32.totalorder %v2583_v6, 0  ;;  %vm3085_vm0 = vcmp.lt.s32.totalorder %v2583_v6, 0  ;;  %v3341_v57 = vadd.s32 4, %v2583_v6  ;;  %vm3726_vm15 = vcmp.lt.s32.totalorder %v8392_v35, 2048 }
 0x342   : > { %v3980_v36 = vsel %vm3852_vm6, %v1587_v1, 0.0  ;;  %vm3213_vm14 = vmand %vm3085_vm0, %vm2957_vm7  ;;  %v2590_v20 = vsel %vm2584_vm11, %v2589_v16, %v2588_v4  ;;  %v4446_v46 = vmin.u32 %v2592_v22, %v8421_v9  ;;  %vm2591_vm5 = vcmp.lt.s32.totalorder %v8421_v9, 0  ;;  %v1602_v16 = vpop.xlane.xlu0 %1601 }
 0x343   : > { %v4194_v30 = vsel %vm9447_vm3, %v3980_v36, 0.0  ;;  %v3469_v50 = vsel %vm3213_vm14, %v3341_v57, %v2583_v6  ;;  %vm2958_vm8 = vcmp.ne.s32.totalorder %v2590_v20, 0  ;;  %vm3086_vm10 = vcmp.lt.s32.totalorder %v2590_v20, 0  ;;  %vm9449_vm0 = vmmov %vm9447_vm3 }
 0x344   : > { %v4195_v31 = vadd.f32 %v4194_v30, %v4193_v8  ;;  %vm3597_vm2 = vcmp.eq.s32.totalorder %v3469_v50, %v5786_v60  ;;  %vm3214_vm9 = vmand %vm3086_vm10, %vm2958_vm8  ;;  %v3342_v56 = vadd.s32 4, %v2590_v20  ;;  %v2599_v44 = vsub.s32 0, %v8425_v52 }
 0x345   : > { %vm3853_vm4 = vmand %vm3597_vm2, %vm3725_vm1  ;;  %v8442_v33 = vadd.s32 %v5689_v28, %v1806_v59  ;;  %v1807_v27 = vadd.s32 728, %v5684_v21  ;;  %v2595_v5 = vand.u32 3, %v4446_v46  ;;  %v1808_v13 = vadd.s32 736, %v5684_v21  ;;  %v1605_v46 = vpop.xlane.xlu1 %1604 }
 0x346   : > { %v3981_v29 = vsel %vm3853_vm4, %v1590_v48, 0.0  ;;  %v3470_v39 = vsel %vm3214_vm9, %v3342_v56, %v2590_v20  ;;  %vm3727_vm12 = vcmp.lt.s32.totalorder %v8421_v9, 2048  ;;  %v4447_v26 = vmin.u32 %v2599_v44, %v8425_v52 }
 0x347   : > { %v4196_v58 = vsel %vm9448_vm13, %v3981_v29, 0.0  ;;  %vm3598_vm11 = vcmp.eq.s32.totalorder %v3470_v39, %v5786_v60  ;;  %v2596_v51 = vsub.s32 0, %v2595_v5  ;;  %vm2598_vm7 = vcmp.lt.s32.totalorder %v8425_v52, 0 }
 0x348   : > { %v4197_v12 = vadd.f32 %v4196_v58, %v4195_v31  ;;  %vm3854_vm6 = vmand %vm3598_vm11, %vm3726_vm15  ;;  %v2606_v38 = vsub.s32 0, %v8442_v33  ;;  %v2602_v55 = vand.u32 3, %v4447_v26  ;;  %v8455_v19 = vadd.s32 %v5689_v28, %v1807_v27 }
 0x349   : > { %v3982_v45 = vsel %vm3854_vm6, %v1593_v43, 0.0  ;;  %v8458_v63 = vadd.s32 %v5689_v28, %v1808_v13  ;;  %v2597_v42 = vsel %vm2591_vm5, %v2596_v51, %v2595_v5  ;;  %vm3728_vm14 = vcmp.lt.s32.totalorder %v8425_v52, 2048  ;;  %vm9450_vm6 = vmmov %vm9449_vm0  ;;  %v1608_v51 = vpop.xlane.xlu0 %1607 }
 0x34a   : > { %v4198_v41 = vsel %vm9449_vm0, %v3982_v45, 0.0  ;;  %v4448_v35 = vmin.u32 %v2606_v38, %v8442_v33  ;;  %vm2959_vm1 = vcmp.ne.s32.totalorder %v2597_v42, 0  ;;  %vm3087_vm15 = vcmp.lt.s32.totalorder %v2597_v42, 0 }
 0x34b   : > { %v3343_v10 = vadd.s32 4, %v2597_v42  ;;  %vm2605_vm3 = vcmp.lt.s32.totalorder %v8442_v33, 0  ;;  %vm3215_vm8 = vmand %vm3087_vm15, %vm2959_vm1  ;;  %v2603_v24 = vsub.s32 0, %v2602_v55  ;;  %vm3729_vm10 = vcmp.lt.s32.totalorder %v8442_v33, 2048 }
 0x34c   : > { %v2609_v15 = vand.u32 3, %v4448_v35  ;;  %v2613_v3 = vsub.s32 0, %v8455_v19  ;;  %v4199_v40 = vadd.f32 %v4198_v41, %v4197_v12  ;;  %v2620_v18 = vsub.s32 0, %v8458_v63 }
 0x34d   : > { %v3471_v2 = vsel %vm3215_vm8, %v3343_v10, %v2597_v42  ;;  %v1809_v0 = vadd.s32 744, %v5684_v21  ;;  %v2604_v32 = vsel %vm2598_vm7, %v2603_v24, %v2602_v55  ;;  %vm2612_vm11 = vcmp.lt.s32.totalorder %v8455_v19, 0  ;;  %vm9451_vm8 = vmmov %vm9450_vm6 }
 0x34e   : > { %vm3599_vm2 = vcmp.eq.s32.totalorder %v3471_v2, %v5786_v60  ;;  %v2610_v49 = vsub.s32 0, %v2609_v15  ;;  %v4449_v34 = vmin.u32 %v2613_v3, %v8455_v19  ;;  %vm2960_vm4 = vcmp.ne.s32.totalorder %v2604_v32, 0 }
 0x34f   : > { %vm3855_vm9 = vmand %vm3599_vm2, %vm3727_vm12  ;;  %vm3088_vm5 = vcmp.lt.s32.totalorder %v2604_v32, 0  ;;  %v3344_v61 = vadd.s32 4, %v2604_v32  ;;  %v4450_v47 = vmin.u32 %v2620_v18, %v8458_v63  ;;  %v8486_v8 = vadd.s32 %v5689_v28, %v1809_v0  ;;  %v1611_v18 = vpop.xlane.xlu1 %1610 }
 0x350   : > { %v3983_v54 = vsel %vm3855_vm9, %v1596_v11, 0.0  ;;  %vm3216_vm13 = vmand %vm3088_vm5, %vm2960_vm4  ;;  %v2611_v7 = vsel %vm2605_vm3, %v2610_v49, %v2609_v15  ;;  %v2616_v25 = vand.u32 3, %v4449_v34  ;;  %vm2619_vm3 = vcmp.lt.s32.totalorder %v8458_v63, 0 }
 0x351   : > { %v4200_v17 = vsel %vm9450_vm6, %v3983_v54, 0.0  ;;  %v3472_v53 = vsel %vm3216_vm13, %v3344_v61, %v2604_v32  ;;  %vm2961_vm7 = vcmp.ne.s32.totalorder %v2611_v7, 0  ;;  %vm3089_vm0 = vcmp.lt.s32.totalorder %v2611_v7, 0 }
 0x352   : > { %v4201_v62 = vadd.f32 %v4200_v17, %v4199_v40  ;;  %vm3600_vm12 = vcmp.eq.s32.totalorder %v3472_v53, %v5786_v60  ;;  %vm3217_vm1 = vmand %vm3089_vm0, %vm2961_vm7  ;;  %v3345_v37 = vadd.s32 4, %v2611_v7  ;;  %v2617_v4 = vsub.s32 0, %v2616_v25 }
 0x353   : > { %vm3856_vm15 = vmand %vm3600_vm12, %vm3728_vm14  ;;  %v2623_v9 = vand.u32 3, %v4450_v47  ;;  %v1810_v23 = vadd.s32 752, %v5684_v21  ;;  %v1811_v57 = vadd.s32 760, %v5684_v21  ;;  %vm3730_vm5 = vcmp.lt.s32.totalorder %v8455_v19, 2048 }
 0x354   : > { %v3984_v1 = vsel %vm3856_vm15, %v1599_v14, 0.0  ;;  %v3473_v6 = vsel %vm3217_vm1, %v3345_v37, %v2611_v7  ;;  %v2618_v59 = vsel %vm2612_vm11, %v2617_v4, %v2616_v25  ;;  %vm3731_vm11 = vcmp.lt.s32.totalorder %v8458_v63, 2048  ;;  %v1614_v14 = vpop.xlane.xlu0 %1613 }
 0x355   : > { %v4202_v22 = vsel %vm9451_vm8, %v3984_v1, 0.0  ;;  %vm3601_vm14 = vcmp.eq.s32.totalorder %v3473_v6, %v5786_v60  ;;  %vm2962_vm2 = vcmp.ne.s32.totalorder %v2618_v59, 0  ;;  %vm3090_vm9 = vcmp.lt.s32.totalorder %v2618_v59, 0  ;;  %vm9452_vm8 = vmmov %vm9450_vm6 }
 0x356   : > { %v4203_v52 = vadd.f32 %v4202_v22, %v4201_v62  ;;  %vm3857_vm4 = vmand %vm3601_vm14, %vm3729_vm10  ;;  %v3346_v36 = vadd.s32 4, %v2618_v59  ;;  %v2624_v20 = vsub.s32 0, %v2623_v9  ;;  %v2627_v50 = vsub.s32 0, %v8486_v8 }
 0x357   : > { %v3985_v30 = vsel %vm3857_vm4, %v1602_v16, 0.0  ;;  %vm3218_vm13 = vmand %vm3090_vm9, %vm2962_vm2  ;;  %v8500_v48 = vadd.s32 %v5689_v28, %v1810_v23  ;;  %v8506_v33 = vadd.s32 %v5689_v28, %v1811_v57  ;;  %v1812_v27 = vadd.s32 768, %v5684_v21 }
 0x358   : > { %v4204_v31 = vsel %vm9450_vm6, %v3985_v30, 0.0  ;;  %v3474_v56 = vsel %vm3218_vm13, %v3346_v36, %v2618_v59  ;;  %v2625_v44 = vsel %vm2619_vm3, %v2624_v20, %v2623_v9  ;;  %v4451_v43 = vmin.u32 %v2627_v50, %v8486_v8  ;;  %vm9453_vm13 = vmmov %vm9450_vm6 }
 0x359   : > { %vm3602_vm10 = vcmp.eq.s32.totalorder %v3474_v56, %v5786_v60  ;;  %vm2963_vm7 = vcmp.ne.s32.totalorder %v2625_v44, 0  ;;  %vm3091_vm0 = vcmp.lt.s32.totalorder %v2625_v44, 0  ;;  %v4205_v29 = vadd.f32 %v4204_v31, %v4203_v52 }
 0x35a   : > { %vm3858_vm12 = vmand %vm3602_vm10, %vm3730_vm5  ;;  %v3347_v39 = vadd.s32 4, %v2625_v44  ;;  %v2634_v5 = vsub.s32 0, %v8500_v48  ;;  %vm2626_vm15 = vcmp.lt.s32.totalorder %v8486_v8, 0  ;;  %vm3732_vm3 = vcmp.lt.s32.totalorder %v8486_v8, 2048  ;;  %v1617_v8 = vpop.xlane.xlu1 %1616 }
 0x35b   : > { %v3986_v13 = vsel %vm3858_vm12, %v1605_v46, 0.0  ;;  %vm3219_vm1 = vmand %vm3091_vm0, %vm2963_vm7  ;;  %v2641_v58 = vsub.s32 0, %v8506_v33  ;;  %v2630_v38 = vand.u32 3, %v4451_v43  ;;  %vm2633_vm2 = vcmp.lt.s32.totalorder %v8500_v48, 0 }
 0x35c   : > { %v4206_v26 = vsel %vm9452_vm8, %v3986_v13, 0.0  ;;  %v3475_v12 = vsel %vm3219_vm1, %v3347_v39, %v2625_v44  ;;  %v4452_v45 = vmin.u32 %v2634_v5, %v8500_v48  ;;  %vm3733_vm9 = vcmp.lt.s32.totalorder %v8500_v48, 2048 }
 0x35d   : > { %vm3603_vm14 = vcmp.eq.s32.totalorder %v3475_v12, %v5786_v60  ;;  %v4453_v55 = vmin.u32 %v2641_v58, %v8506_v33  ;;  %v4207_v19 = vadd.f32 %v4206_v26, %v4205_v29  ;;  %v2631_v41 = vsub.s32 0, %v2630_v38  ;;  %v1620_v29 = vpop.xlane.xlu0 %1619 }
 0x35e   : > { %vm3859_vm4 = vmand %vm3603_vm14, %vm3731_vm11  ;;  %v2637_v42 = vand.u32 3, %v4452_v45  ;;  %v8526_v35 = vadd.s32 %v5689_v28, %v1812_v27  ;;  %vm2640_vm5 = vcmp.lt.s32.totalorder %v8506_v33, 0  ;;  %v1813_v15 = vadd.s32 776, %v5684_v21 }
 0x35f   : > { %v3987_v10 = vsel %vm3859_vm4, %v1608_v51, 0.0  ;;  %v2644_v24 = vand.u32 3, %v4453_v55  ;;  %v2632_v40 = vsel %vm2626_vm15, %v2631_v41, %v2630_v38  ;;  %v1814_v63 = vadd.s32 784, %v5684_v21 }
 0x360   : > { %v4208_v3 = vsel %vm9453_vm13, %v3987_v10, 0.0  ;;  %v2638_v2 = vsub.s32 0, %v2637_v42  ;;  %vm2964_vm11 = vcmp.ne.s32.totalorder %v2632_v40, 0  ;;  %vm3092_vm6 = vcmp.lt.s32.totalorder %v2632_v40, 0 }
 0x361   : > { %v3348_v11 = vadd.s32 4, %v2632_v40  ;;  %v1815_v0 = vadd.s32 792, %v5684_v21  ;;  %v4209_v32 = vadd.f32 %v4208_v3, %v4207_v19  ;;  %vm3220_vm10 = vmand %vm3092_vm6, %vm2964_vm11  ;;  %v2645_v34 = vsub.s32 0, %v2644_v24 }
 0x362   : > { %v2639_v49 = vsel %vm2633_vm2, %v2638_v2, %v2637_v42  ;;  %v2648_v61 = vsub.s32 0, %v8526_v35  ;;  %v8543_v17 = vadd.s32 %v5689_v28, %v1813_v15  ;;  %vm3734_vm13 = vcmp.lt.s32.totalorder %v8506_v33, 2048 }
 0x363   : > { %v3476_v47 = vsel %vm3220_vm10, %v3348_v11, %v2632_v40  ;;  %vm2965_vm7 = vcmp.ne.s32.totalorder %v2639_v49, 0  ;;  %vm3093_vm0 = vcmp.lt.s32.totalorder %v2639_v49, 0  ;;  %v3349_v54 = vadd.s32 4, %v2639_v49 }
 0x364   : > { %vm3604_vm12 = vcmp.eq.s32.totalorder %v3476_v47, %v5786_v60  ;;  %vm3221_vm1 = vmand %vm3093_vm0, %vm2965_vm7  ;;  %v2646_v7 = vsel %vm2640_vm5, %v2645_v34, %v2644_v24  ;;  %v4454_v25 = vmin.u32 %v2648_v61, %v8526_v35  ;;  %vm9454_vm5 = vcmask 31744   ;;  %v1623_v24 = vpop.xlane.xlu1 %1622 }
 0x365   : > { %vm3860_vm15 = vmand %vm3604_vm12, %vm3732_vm3  ;;  %v3477_v53 = vsel %vm3221_vm1, %v3349_v54, %v2639_v49  ;;  %vm2966_vm8 = vcmp.ne.s32.totalorder %v2646_v7, 0  ;;  %vm3094_vm14 = vcmp.lt.s32.totalorder %v2646_v7, 0  ;;  %v3350_v62 = vadd.s32 4, %v2646_v7  ;;  %v1626_v54 = vpop.xlane.xlu0 %1625 }
 0x366   : > { %v3988_v37 = vsel %vm3860_vm15, %v1611_v18, 0.0  ;;  %vm3605_vm2 = vcmp.eq.s32.totalorder %v3477_v53, %v5786_v60  ;;  %vm3222_vm4 = vmand %vm3094_vm14, %vm2966_vm8  ;;  %v2651_v4 = vand.u32 3, %v4454_v25  ;;  %vm2647_vm3 = vcmp.lt.s32.totalorder %v8526_v35, 0 }
 0x367   : > { %v4210_v9 = vsel %vm9454_vm5, %v3988_v37, 0.0  ;;  %vm3861_vm11 = vmand %vm3605_vm2, %vm3733_vm9  ;;  %v3478_v23 = vsel %vm3222_vm4, %v3350_v62, %v2646_v7  ;;  %v2655_v1 = vsub.s32 0, %v8543_v17  ;;  %v8558_v52 = vadd.s32 %v5689_v28, %v1814_v63 }
 0x368   : > { %v4211_v6 = vadd.f32 %v4210_v9, %v4209_v32  ;;  %v3989_v16 = vsel %vm3861_vm11, %v1614_v14, 0.0  ;;  %vm3606_vm6 = vcmp.eq.s32.totalorder %v3478_v23, %v5786_v60  ;;  %v2652_v59 = vsub.s32 0, %v2651_v4  ;;  %vm9455_vm10 = vmmov %vm9454_vm5 }
 0x369   : > { %v4212_v57 = vsel %vm9455_vm10, %v3989_v16, 0.0  ;;  %vm3862_vm7 = vmand %vm3606_vm6, %vm3734_vm13  ;;  %v4455_v22 = vmin.u32 %v2655_v1, %v8543_v17  ;;  %v8561_v36 = vadd.s32 %v5689_v28, %v1815_v0  ;;  %v1816_v48 = vadd.s32 800, %v5684_v21 }
 0x36a   : > { %v4213_v20 = vadd.f32 %v4212_v57, %v4211_v6  ;;  %v3990_v30 = vsel %vm3862_vm7, %v1617_v8, 0.0  ;;  %v2653_v50 = vsel %vm2647_vm3, %v2652_v59, %v2651_v4  ;;  %vm9456_vm9 = vmmov %vm9454_vm5  ;;  %vm3735_vm15 = vcmp.lt.s32.totalorder %v8526_v35, 2048  ;;  %v1629_v4 = vpop.xlane.xlu1 %1628 }
 0x36b   : > { %v4214_v31 = vsel %vm9456_vm9, %v3990_v30, 0.0  ;;  %vm2967_vm0 = vcmp.ne.s32.totalorder %v2653_v50, 0  ;;  %vm3095_vm12 = vcmp.lt.s32.totalorder %v2653_v50, 0  ;;  %v3351_v56 = vadd.s32 4, %v2653_v50  ;;  %vm9457_vm11 = vmmov %vm9456_vm9 }
 0x36c   : > { %vm3223_vm1 = vmand %vm3095_vm12, %vm2967_vm0  ;;  %vm2654_vm8 = vcmp.lt.s32.totalorder %v8543_v17, 0  ;;  %v2658_v46 = vand.u32 3, %v4455_v22  ;;  %v2662_v44 = vsub.s32 0, %v8558_v52  ;;  %v4215_v33 = vadd.f32 %v4214_v31, %v4213_v20  ;;  %v1632_v31 = vpop.xlane.xlu0 %1631 }
 0x36d   : > { %v3479_v27 = vsel %vm3223_vm1, %v3351_v56, %v2653_v50  ;;  %vm3736_vm14 = vcmp.lt.s32.totalorder %v8543_v17, 2048  ;;  %v2669_v39 = vsub.s32 0, %v8561_v36  ;;  %vm2661_vm4 = vcmp.lt.s32.totalorder %v8558_v52, 0 }
 0x36e   : > { %vm3607_vm2 = vcmp.eq.s32.totalorder %v3479_v27, %v5786_v60  ;;  %v2659_v43 = vsub.s32 0, %v2658_v46  ;;  %v4456_v5 = vmin.u32 %v2662_v44, %v8558_v52  ;;  %vm3737_vm5 = vcmp.lt.s32.totalorder %v8558_v52, 2048 }
 0x36f   : > { %vm3863_vm13 = vmand %vm3607_vm2, %vm3735_vm15  ;;  %v4457_v13 = vmin.u32 %v2669_v39, %v8561_v36  ;;  %v8576_v58 = vadd.s32 %v5689_v28, %v1816_v48  ;;  %v1817_v26 = vadd.s32 808, %v5684_v21  ;;  %v1818_v45 = vadd.s32 816, %v5684_v21 }
 0x370   : > { %v3991_v12 = vsel %vm3863_vm13, %v1620_v29, 0.0  ;;  %v2660_v51 = vsel %vm2654_vm8, %v2659_v43, %v2658_v46  ;;  %v2665_v38 = vand.u32 3, %v4456_v5  ;;  %vm2668_vm7 = vcmp.lt.s32.totalorder %v8561_v36, 0  ;;  %vm9458_vm2 = vmmov %vm9457_vm11 }
 0x371   : > { %v4216_v55 = vsel %vm9457_vm11, %v3991_v12, 0.0  ;;  %vm2968_vm3 = vcmp.ne.s32.totalorder %v2660_v51, 0  ;;  %vm3096_vm6 = vcmp.lt.s32.totalorder %v2660_v51, 0  ;;  %v3352_v19 = vadd.s32 4, %v2660_v51  ;;  %v1635_v12 = vpop.xlane.xlu1 %1634 }
 0x372   : > { %vm3224_vm10 = vmand %vm3096_vm6, %vm2968_vm3  ;;  %v2666_v41 = vsub.s32 0, %v2665_v38  ;;  %v2672_v42 = vand.u32 3, %v4457_v13  ;;  %vm3738_vm9 = vcmp.lt.s32.totalorder %v8561_v36, 2048  ;;  %v4217_v35 = vadd.f32 %v4216_v55, %v4215_v33 }
 0x373   : > { %v3480_v10 = vsel %vm3224_vm10, %v3352_v19, %v2660_v51  ;;  %v2676_v15 = vsub.s32 0, %v8576_v58  ;;  %v8587_v3 = vadd.s32 %v5689_v28, %v1817_v26  ;;  %v8593_v63 = vadd.s32 %v5689_v28, %v1818_v45 }
 0x374   : > { %vm3608_vm0 = vcmp.eq.s32.totalorder %v3480_v10, %v5786_v60  ;;  %v2667_v40 = vsel %vm2661_vm4, %v2666_v41, %v2665_v38  ;;  %v2673_v2 = vsub.s32 0, %v2672_v42  ;;  %v1819_v34 = vadd.s32 824, %v5684_v21 }
 0x375   : > { %vm3864_vm12 = vmand %vm3608_vm0, %vm3736_vm14  ;;  %vm2969_vm1 = vcmp.ne.s32.totalorder %v2667_v40, 0  ;;  %vm3097_vm15 = vcmp.lt.s32.totalorder %v2667_v40, 0  ;;  %v3353_v11 = vadd.s32 4, %v2667_v40  ;;  %v4458_v18 = vmin.u32 %v2676_v15, %v8576_v58 }
 0x376   : > { %v3992_v0 = vsel %vm3864_vm12, %v1623_v24, 0.0  ;;  %vm3225_vm8 = vmand %vm3097_vm15, %vm2969_vm1  ;;  %v2674_v32 = vsel %vm2668_vm7, %v2673_v2, %v2672_v42  ;;  %v2683_v49 = vsub.s32 0, %v8587_v3  ;;  %vm2675_vm6 = vcmp.lt.s32.totalorder %v8576_v58, 0 }
 0x377   : > { %v4218_v61 = vsel %vm9458_vm2, %v3992_v0, 0.0  ;;  %v3481_v47 = vsel %vm3225_vm8, %v3353_v11, %v2667_v40  ;;  %vm2970_vm4 = vcmp.ne.s32.totalorder %v2674_v32, 0  ;;  %vm3098_vm14 = vcmp.lt.s32.totalorder %v2674_v32, 0  ;;  %vm9459_vm0 = vmmov %vm9458_vm2 }
 0x378   : > { %v4219_v7 = vadd.f32 %v4218_v61, %v4217_v35  ;;  %vm3609_vm13 = vcmp.eq.s32.totalorder %v3481_v47, %v5786_v60  ;;  %vm3226_vm11 = vmand %vm3098_vm14, %vm2970_vm4  ;;  %v3354_v25 = vadd.s32 4, %v2674_v32  ;;  %v2679_v17 = vand.u32 3, %v4458_v18  ;;  %v1638_v35 = vpop.xlane.xlu0 %1637  ;;  %v1641_v47 = vpop.xlane.xlu1 %1640 }
 0x379   : > { %vm3865_vm3 = vmand %vm3609_vm13, %vm3737_vm5  ;;  %vm3739_vm10 = vcmp.lt.s32.totalorder %v8576_v58, 2048  ;;  %v4459_v53 = vmin.u32 %v2683_v49, %v8587_v3  ;;  %v2690_v14 = vsub.s32 0, %v8593_v63  ;;  %vm2682_vm7 = vcmp.lt.s32.totalorder %v8587_v3, 0 }
 0x37a   : > { %v3993_v62 = vsel %vm3865_vm3, %v1626_v54, 0.0  ;;  %v3482_v37 = vsel %vm3226_vm11, %v3354_v25, %v2674_v32  ;;  %v2680_v9 = vsub.s32 0, %v2679_v17  ;;  %v8619_v59 = vadd.s32 %v5689_v28, %v1819_v34  ;;  %vm9460_vm8 = vmmov %vm9459_vm0 }
 0x37b   : > { %v4220_v23 = vsel %vm9459_vm0, %v3993_v62, 0.0  ;;  %vm3610_vm12 = vcmp.eq.s32.totalorder %v3482_v37, %v5786_v60  ;;  %v2686_v8 = vand.u32 3, %v4459_v53  ;;  %v4460_v1 = vmin.u32 %v2690_v14, %v8593_v63 }
 0x37c   : > { %v4221_v6 = vadd.f32 %v4220_v23, %v4219_v7  ;;  %vm3866_vm5 = vmand %vm3610_vm12, %vm3738_vm9  ;;  %v2681_v16 = vsel %vm2675_vm6, %v2680_v9, %v2679_v17  ;;  %v1820_v57 = vadd.s32 832, %v5684_v21  ;;  %vm3740_vm4 = vcmp.lt.s32.totalorder %v8587_v3, 2048 }
 0x37d   : > { %v3994_v22 = vsel %vm3866_vm5, %v1629_v4, 0.0  ;;  %vm2971_vm1 = vcmp.ne.s32.totalorder %v2681_v16, 0  ;;  %vm3099_vm15 = vcmp.lt.s32.totalorder %v2681_v16, 0  ;;  %v3355_v52 = vadd.s32 4, %v2681_v16 }
 0x37e   : > { %v4222_v20 = vsel %vm9460_vm8, %v3994_v22, 0.0  ;;  %vm3227_vm2 = vmand %vm3099_vm15, %vm2971_vm1  ;;  %v2687_v30 = vsub.s32 0, %v2686_v8  ;;  %v2693_v36 = vand.u32 3, %v4460_v1  ;;  %vm2689_vm9 = vcmp.lt.s32.totalorder %v8593_v63, 0 }
 0x37f   : > { %v4223_v50 = vadd.f32 %v4222_v20, %v4221_v6  ;;  %v3483_v48 = vsel %vm3227_vm2, %v3355_v52, %v2681_v16  ;;  %v2697_v56 = vsub.s32 0, %v8619_v59  ;;  %v8630_v33 = vadd.s32 %v5689_v28, %v1820_v57 }
 0x380   : > { %vm3611_vm14 = vcmp.eq.s32.totalorder %v3483_v48, %v5786_v60  ;;  %v2688_v46 = vsel %vm2682_vm7, %v2687_v30, %v2686_v8  ;;  %v2694_v44 = vsub.s32 0, %v2693_v36  ;;  %vm3741_vm0 = vcmp.lt.s32.totalorder %v8593_v63, 2048  ;;  %vm9461_vm7 = vmmov %vm9460_vm8  ;;  %v1644_v8 = vpop.xlane.xlu0 %1643 }
 0x381   : > { %vm3867_vm13 = vmand %vm3611_vm14, %vm3739_vm10  ;;  %vm2972_vm11 = vcmp.ne.s32.totalorder %v2688_v46, 0  ;;  %vm3100_vm3 = vcmp.lt.s32.totalorder %v2688_v46, 0  ;;  %v3356_v27 = vadd.s32 4, %v2688_v46  ;;  %v4461_v29 = vmin.u32 %v2697_v56, %v8619_v59 }
 0x382   : > { %v3995_v39 = vsel %vm3867_vm13, %v1632_v31, 0.0  ;;  %vm3228_vm6 = vmand %vm3100_vm3, %vm2972_vm11  ;;  %v2695_v43 = vsel %vm2689_vm9, %v2694_v44, %v2693_v36  ;;  %v2704_v5 = vsub.s32 0, %v8630_v33  ;;  %vm2696_vm8 = vcmp.lt.s32.totalorder %v8619_v59, 0 }
 0x383   : > { %v4224_v13 = vsel %vm9461_vm7, %v3995_v39, 0.0  ;;  %v3484_v26 = vsel %vm3228_vm6, %v3356_v27, %v2688_v46  ;;  %vm2973_vm12 = vcmp.ne.s32.totalorder %v2695_v43, 0  ;;  %vm3101_vm5 = vcmp.lt.s32.totalorder %v2695_v43, 0  ;;  %vm9462_vm2 = vmmov %vm9461_vm7  ;;  %v1647_v27 = vpop.xlane.xlu1 %1646 }
 0x384   : > { %v4225_v58 = vadd.f32 %v4224_v13, %v4223_v50  ;;  %vm3612_vm10 = vcmp.eq.s32.totalorder %v3484_v26, %v5786_v60  ;;  %vm3229_vm1 = vmand %vm3101_vm5, %vm2973_vm12  ;;  %v3357_v51 = vadd.s32 4, %v2695_v43  ;;  %v2700_v38 = vand.u32 3, %v4461_v29  ;;  %v1650_v26 = vpop.xlane.xlu0 %1649 }
 0x385   : > { %vm3868_vm15 = vmand %vm3612_vm10, %vm3740_vm4  ;;  %v4462_v45 = vmin.u32 %v2704_v5, %v8630_v33  ;;  %v1821_v55 = vadd.s32 840, %v5684_v21  ;;  %v1822_v19 = vadd.s32 848, %v5684_v21  ;;  %v1823_v24 = vadd.s32 856, %v5684_v21 }
 0x386   : > { %v3996_v41 = vsel %vm3868_vm15, %v1635_v12, 0.0  ;;  %v3485_v42 = vsel %vm3229_vm1, %v3357_v51, %v2695_v43  ;;  %v2701_v10 = vsub.s32 0, %v2700_v38  ;;  %vm2703_vm14 = vcmp.lt.s32.totalorder %v8630_v33, 0  ;;  %vm9463_vm3 = vmmov %vm9462_vm2 }
 0x387   : > { %v4226_v15 = vsel %vm9462_vm2, %v3996_v41, 0.0  ;;  %vm3613_vm9 = vcmp.eq.s32.totalorder %v3485_v42, %v5786_v60  ;;  %v2707_v3 = vand.u32 3, %v4462_v45  ;;  %v8649_v40 = vadd.s32 %v5689_v28, %v1821_v55 }
 0x388   : > { %v4227_v2 = vadd.f32 %v4226_v15, %v4225_v58  ;;  %vm3869_vm4 = vmand %vm3613_vm9, %vm3741_vm0  ;;  %v2702_v11 = vsel %vm2696_vm8, %v2701_v10, %v2700_v38  ;;  %v8657_v18 = vadd.s32 %v5689_v28, %v1822_v19  ;;  %vm3742_vm7 = vcmp.lt.s32.totalorder %v8619_v59, 2048 }
 0x389   : > { %v3997_v0 = vsel %vm3869_vm4, %v1638_v35, 0.0  ;;  %vm2974_vm13 = vcmp.ne.s32.totalorder %v2702_v11, 0  ;;  %vm3102_vm11 = vcmp.lt.s32.totalorder %v2702_v11, 0  ;;  %v3358_v32 = vadd.s32 4, %v2702_v11  ;;  %vm9464_vm9 = vmmov %vm9463_vm3 }
 0x38a   : > { %v4228_v49 = vsel %vm9463_vm3, %v3997_v0, 0.0  ;;  %vm3230_vm6 = vmand %vm3102_vm11, %vm2974_vm13  ;;  %v2708_v34 = vsub.s32 0, %v2707_v3  ;;  %v2711_v63 = vsub.s32 0, %v8649_v40  ;;  %vm3743_vm0 = vcmp.lt.s32.totalorder %v8630_v33, 2048 }
 0x38b   : > { %v3486_v61 = vsel %vm3230_vm6, %v3358_v32, %v2702_v11  ;;  %vm2710_vm12 = vcmp.lt.s32.totalorder %v8649_v40, 0  ;;  %v8665_v54 = vadd.s32 %v5689_v28, %v1823_v24  ;;  %v2718_v17 = vsub.s32 0, %v8657_v18 }
 0x38c   : > { %vm3614_vm5 = vcmp.eq.s32.totalorder %v3486_v61, %v5786_v60  ;;  %v2709_v7 = vsel %vm2703_vm14, %v2708_v34, %v2707_v3  ;;  %v4463_v25 = vmin.u32 %v2711_v63, %v8649_v40  ;;  %v4229_v53 = vadd.f32 %v4228_v49, %v4227_v2  ;;  %v1653_v3 = vpop.xlane.xlu1 %1652 }
 0x38d   : > { %vm3870_vm10 = vmand %vm3614_vm5, %vm3742_vm7  ;;  %vm2975_vm1 = vcmp.ne.s32.totalorder %v2709_v7, 0  ;;  %vm3103_vm15 = vcmp.lt.s32.totalorder %v2709_v7, 0  ;;  %v3359_v14 = vadd.s32 4, %v2709_v7  ;;  %vm3744_vm2 = vcmp.lt.s32.totalorder %v8649_v40, 2048 }
 0x38e   : > { %v3998_v62 = vsel %vm3870_vm10, %v1641_v47, 0.0  ;;  %vm3231_vm8 = vmand %vm3103_vm15, %vm2975_vm1  ;;  %v2714_v37 = vand.u32 3, %v4463_v25  ;;  %v4464_v4 = vmin.u32 %v2718_v17, %v8657_v18  ;;  %vm2717_vm4 = vcmp.lt.s32.totalorder %v8657_v18, 0 }
 0x38f   : > { %v4230_v9 = vsel %vm9464_vm9, %v3998_v62, 0.0  ;;  %v3487_v23 = vsel %vm3231_vm8, %v3359_v14, %v2709_v7  ;;  %v2725_v1 = vsub.s32 0, %v8665_v54  ;;  %vm3745_vm13 = vcmp.lt.s32.totalorder %v8657_v18, 2048 }
 0x390   : > { %vm3615_vm14 = vcmp.eq.s32.totalorder %v3487_v23, %v5786_v60  ;;  %v2715_v6 = vsub.s32 0, %v2714_v37  ;;  %v2721_v16 = vand.u32 3, %v4464_v4  ;;  %v4231_v59 = vadd.f32 %v4230_v9, %v4229_v53  ;;  %v1656_v53 = vpop.xlane.xlu0 %1655 }
 0x391   : > { %vm3871_vm11 = vmand %vm3615_vm14, %vm3743_vm0  ;;  %v4465_v57 = vmin.u32 %v2725_v1, %v8665_v54  ;;  %v1824_v22 = vadd.s32 864, %v5684_v21  ;;  %v1825_v52 = vadd.s32 872, %v5684_v21  ;;  %v1826_v50 = vadd.s32 880, %v5684_v21 }
 0x392   : > { %v3999_v20 = vsel %vm3871_vm11, %v1644_v8, 0.0  ;;  %v2716_v30 = vsel %vm2710_vm12, %v2715_v6, %v2714_v37  ;;  %v2722_v36 = vsub.s32 0, %v2721_v16  ;;  %vm2724_vm0 = vcmp.lt.s32.totalorder %v8665_v54, 0 }
 0x393   : > { %v4232_v48 = vsel %vm9463_vm3, %v3999_v20, 0.0  ;;  %vm2976_vm6 = vcmp.ne.s32.totalorder %v2716_v30, 0  ;;  %vm3104_vm7 = vcmp.lt.s32.totalorder %v2716_v30, 0  ;;  %v3360_v31 = vadd.s32 4, %v2716_v30 }
 0x394   : > { %vm3232_vm5 = vmand %vm3104_vm7, %vm2976_vm6  ;;  %v2723_v56 = vsel %vm2717_vm4, %v2722_v36, %v2721_v16  ;;  %v2728_v46 = vand.u32 3, %v4465_v57  ;;  %v8692_v44 = vadd.s32 %v5689_v28, %v1824_v22  ;;  %v4233_v39 = vadd.f32 %v4232_v48, %v4231_v59  ;;  %v1659_v48 = vpop.xlane.xlu1 %1658 }
 0x395   : > { %v3488_v33 = vsel %vm3232_vm5, %v3360_v31, %v2716_v30  ;;  %vm2977_vm12 = vcmp.ne.s32.totalorder %v2723_v56, 0  ;;  %vm3105_vm10 = vcmp.lt.s32.totalorder %v2723_v56, 0  ;;  %v3361_v29 = vadd.s32 4, %v2723_v56  ;;  %vm9465_vm4 = vmmov %vm9463_vm3 }
 0x396   : > { %vm3616_vm1 = vcmp.eq.s32.totalorder %v3488_v33, %v5786_v60  ;;  %vm3233_vm15 = vmand %vm3105_vm10, %vm2977_vm12  ;;  %v2729_v43 = vsub.s32 0, %v2728_v46  ;;  %v2732_v5 = vsub.s32 0, %v8692_v44  ;;  %v8699_v12 = vadd.s32 %v5689_v28, %v1825_v52 }
 0x397   : > { %vm3872_vm8 = vmand %vm3616_vm1, %vm3744_vm2  ;;  %v3489_v13 = vsel %vm3233_vm15, %v3361_v29, %v2723_v56  ;;  %v8702_v58 = vadd.s32 %v5689_v28, %v1826_v50  ;;  %v1827_v51 = vadd.s32 888, %v5684_v21  ;;  %vm3746_vm6 = vcmp.lt.s32.totalorder %v8665_v54, 2048 }
 0x398   : > { %v4000_v38 = vsel %vm3872_vm8, %v1647_v27, 0.0  ;;  %vm3617_vm9 = vcmp.eq.s32.totalorder %v3489_v13, %v5786_v60  ;;  %v2730_v45 = vsel %vm2724_vm0, %v2729_v43, %v2728_v46  ;;  %v4466_v55 = vmin.u32 %v2732_v5, %v8692_v44  ;;  %vm9466_vm7 = vmmov %vm9465_vm4  ;;  %v1662_v27 = vpop.xlane.xlu0 %1661 }
 0x399   : > { %v4234_v19 = vsel %vm9465_vm4, %v4000_v38, 0.0  ;;  %vm3873_vm2 = vmand %vm3617_vm9, %vm3745_vm13  ;;  %vm2978_vm14 = vcmp.ne.s32.totalorder %v2730_v45, 0  ;;  %vm3106_vm11 = vcmp.lt.s32.totalorder %v2730_v45, 0  ;;  %v3362_v41 = vadd.s32 4, %v2730_v45 }
 0x39a   : > { %v4235_v42 = vadd.f32 %v4234_v19, %v4233_v39  ;;  %v4001_v35 = vsel %vm3873_vm2, %v1650_v26, 0.0  ;;  %vm3234_vm3 = vmand %vm3106_vm11, %vm2978_vm14  ;;  %v2735_v10 = vand.u32 3, %v4466_v55  ;;  %vm2731_vm5 = vcmp.lt.s32.totalorder %v8692_v44, 0 }
 0x39b   : > { %v4236_v24 = vsel %vm9466_vm7, %v4001_v35, 0.0  ;;  %v3490_v15 = vsel %vm3234_vm3, %v3362_v41, %v2730_v45  ;;  %v2739_v40 = vsub.s32 0, %v8699_v12  ;;  %vm3747_vm13 = vcmp.lt.s32.totalorder %v8692_v44, 2048  ;;  %vm9467_vm1 = vmmov %vm9465_vm4 }
 0x39c   : > { %vm3618_vm0 = vcmp.eq.s32.totalorder %v3490_v15, %v5786_v60  ;;  %v2736_v2 = vsub.s32 0, %v2735_v10  ;;  %vm2738_vm10 = vcmp.lt.s32.totalorder %v8699_v12, 0  ;;  %v2746_v18 = vsub.s32 0, %v8702_v58 }
 0x39d   : > { %vm3874_vm12 = vmand %vm3618_vm0, %vm3746_vm6  ;;  %v4467_v11 = vmin.u32 %v2739_v40, %v8699_v12  ;;  %v8722_v0 = vadd.s32 %v5689_v28, %v1827_v51  ;;  %v4237_v32 = vadd.f32 %v4236_v24, %v4235_v42  ;;  %v1828_v63 = vadd.s32 896, %v5684_v21  ;;  %v1665_v42 = vpop.xlane.xlu1 %1664 }
 0x39e   : > { %v4002_v49 = vsel %vm3874_vm12, %v1653_v3, 0.0  ;;  %v2737_v34 = vsel %vm2731_vm5, %v2736_v2, %v2735_v10  ;;  %vm3748_vm4 = vcmp.lt.s32.totalorder %v8699_v12, 2048  ;;  %v4468_v7 = vmin.u32 %v2746_v18, %v8702_v58  ;;  %vm9468_vm5 = vmmov %vm9467_vm1  ;;  %v1668_v2 = vpop.xlane.xlu0 %1667 }
 0x39f   : > { %v4238_v61 = vsel %vm9467_vm1, %v4002_v49, 0.0  ;;  %vm2979_vm15 = vcmp.ne.s32.totalorder %v2737_v34, 0  ;;  %vm3107_vm8 = vcmp.lt.s32.totalorder %v2737_v34, 0  ;;  %v3363_v47 = vadd.s32 4, %v2737_v34 }
 0x3a0   : > { %vm3235_vm9 = vmand %vm3107_vm8, %vm2979_vm15  ;;  %v2742_v54 = vand.u32 3, %v4467_v11  ;;  %v1829_v25 = vadd.s32 904, %v5684_v21  ;;  %vm2745_vm2 = vcmp.lt.s32.totalorder %v8702_v58, 0  ;;  %v2753_v14 = vsub.s32 0, %v8722_v0 }
 0x3a1   : > { %v3491_v17 = vsel %vm3235_vm9, %v3363_v47, %v2737_v34  ;;  %v8732_v62 = vadd.s32 %v5689_v28, %v1828_v63  ;;  %v4239_v37 = vadd.f32 %v4238_v61, %v4237_v32  ;;  %v2749_v9 = vand.u32 3, %v4468_v7 }
 0x3a2   : > { %vm3619_vm14 = vcmp.eq.s32.totalorder %v3491_v17, %v5786_v60  ;;  %v2743_v4 = vsub.s32 0, %v2742_v54  ;;  %vm3749_vm3 = vcmp.lt.s32.totalorder %v8702_v58, 2048  ;;  %vm2752_vm6 = vcmp.lt.s32.totalorder %v8722_v0, 0 }
 0x3a3   : > { %vm3875_vm11 = vmand %vm3619_vm14, %vm3747_vm13  ;;  %v4469_v23 = vmin.u32 %v2753_v14, %v8722_v0  ;;  %v2760_v8 = vsub.s32 0, %v8732_v62  ;;  %v2750_v16 = vsub.s32 0, %v2749_v9  ;;  %vm3750_vm7 = vcmp.lt.s32.totalorder %v8722_v0, 2048  ;;  %v1671_v14 = vpop.xlane.xlu1 %1670 }
 0x3a4   : > { %v4003_v1 = vsel %vm3875_vm11, %v1656_v53, 0.0  ;;  %v2744_v6 = vsel %vm2738_vm10, %v2743_v4, %v2742_v54  ;;  %v8745_v59 = vadd.s32 %v5689_v28, %v1829_v25  ;;  %v1830_v29 = vadd.s32 912, %v5684_v21  ;;  %vm9469_vm11 = vmmov %vm9468_vm5 }
 0x3a5   : > { %v4240_v57 = vsel %vm9468_vm5, %v4003_v1, 0.0  ;;  %vm2980_vm0 = vcmp.ne.s32.totalorder %v2744_v6, 0  ;;  %vm3108_vm13 = vcmp.lt.s32.totalorder %v2744_v6, 0  ;;  %v3364_v22 = vadd.s32 4, %v2744_v6 }
 0x3a6   : > { %v4241_v52 = vadd.f32 %v4240_v57, %v4239_v37  ;;  %vm3236_vm12 = vmand %vm3108_vm13, %vm2980_vm0  ;;  %v2751_v20 = vsel %vm2745_vm2, %v2750_v16, %v2749_v9  ;;  %v2756_v30 = vand.u32 3, %v4469_v23  ;;  %v4470_v36 = vmin.u32 %v2760_v8, %v8732_v62 }
 0x3a7   : > { %v3492_v50 = vsel %vm3236_vm12, %v3364_v22, %v2744_v6  ;;  %vm2981_vm10 = vcmp.ne.s32.totalorder %v2751_v20, 0  ;;  %vm3109_vm1 = vcmp.lt.s32.totalorder %v2751_v20, 0  ;;  %v3365_v31 = vadd.s32 4, %v2751_v20  ;;  %vm9470_vm12 = vmmov %vm9469_vm11 }
 0x3a8   : > { %vm3620_vm15 = vcmp.eq.s32.totalorder %v3492_v50, %v5786_v60  ;;  %vm3237_vm8 = vmand %vm3109_vm1, %vm2981_vm10  ;;  %v2757_v56 = vsub.s32 0, %v2756_v30  ;;  %v2763_v46 = vand.u32 3, %v4470_v36  ;;  %v2767_v44 = vsub.s32 0, %v8745_v59 }
 0x3a9   : > { %vm3876_vm9 = vmand %vm3620_vm15, %vm3748_vm4  ;;  %v3493_v33 = vsel %vm3237_vm8, %v3365_v31, %v2751_v20  ;;  %vm2759_vm2 = vcmp.lt.s32.totalorder %v8732_v62, 0  ;;  %v1831_v39 = vadd.s32 920, %v5684_v21  ;;  %vm3751_vm8 = vcmp.lt.s32.totalorder %v8732_v62, 2048 }
 0x3aa   : > { %v4004_v43 = vsel %vm3876_vm9, %v1659_v48, 0.0  ;;  %vm3621_vm14 = vcmp.eq.s32.totalorder %v3493_v33, %v5786_v60  ;;  %v2758_v5 = vsel %vm2752_vm6, %v2757_v56, %v2756_v30  ;;  %v2764_v13 = vsub.s32 0, %v2763_v46 }
 0x3ab   : > { %v4242_v26 = vsel %vm9469_vm11, %v4004_v43, 0.0  ;;  %vm3877_vm4 = vmand %vm3621_vm14, %vm3749_vm3  ;;  %vm2982_vm5 = vcmp.ne.s32.totalorder %v2758_v5, 0  ;;  %vm3110_vm0 = vcmp.lt.s32.totalorder %v2758_v5, 0  ;;  %v3366_v12 = vadd.s32 4, %v2758_v5 }
 0x3ac   : > { %v4243_v51 = vadd.f32 %v4242_v26, %v4241_v52  ;;  %v4005_v38 = vsel %vm3877_vm4, %v1662_v27, 0.0  ;;  %vm3238_vm13 = vmand %vm3110_vm0, %vm2982_vm5  ;;  %v2765_v45 = vsel %vm2759_vm2, %v2764_v13, %v2763_v46  ;;  %v4471_v55 = vmin.u32 %v2767_v44, %v8745_v59  ;;  %v1674_v27 = vpop.xlane.xlu0 %1673  ;;  %v1677_v26 = vpop.xlane.xlu1 %1676 }
 0x3ad   : > { %v4244_v19 = vsel %vm9470_vm12, %v4005_v38, 0.0  ;;  %v3494_v41 = vsel %vm3238_vm13, %v3366_v12, %v2758_v5  ;;  %vm2983_vm6 = vcmp.ne.s32.totalorder %v2765_v45, 0  ;;  %vm3111_vm10 = vcmp.lt.s32.totalorder %v2765_v45, 0  ;;  %vm9471_vm2 = vmmov %vm9469_vm11 }
 0x3ae   : > { %v4245_v35 = vadd.f32 %v4244_v19, %v4243_v51  ;;  %vm3622_vm3 = vcmp.eq.s32.totalorder %v3494_v41, %v5786_v60  ;;  %vm3239_vm1 = vmand %vm3111_vm10, %vm2983_vm6  ;;  %v3367_v58 = vadd.s32 4, %v2765_v45  ;;  %v2770_v10 = vand.u32 3, %v4471_v55 }
 0x3af   : > { %vm3878_vm15 = vmand %vm3622_vm3, %vm3750_vm7  ;;  %vm2766_vm9 = vcmp.lt.s32.totalorder %v8745_v59, 0  ;;  %v8774_v24 = vadd.s32 %v5689_v28, %v1830_v29  ;;  %v8777_v15 = vadd.s32 %v5689_v28, %v1831_v39  ;;  %v1832_v18 = vadd.s32 928, %v5684_v21 }
 0x3b0   : > { %v4006_v3 = vsel %vm3878_vm15, %v1665_v42, 0.0  ;;  %v3495_v40 = vsel %vm3239_vm1, %v3367_v58, %v2765_v45  ;;  %v2771_v11 = vsub.s32 0, %v2770_v10  ;;  %v1833_v49 = vadd.s32 936, %v5684_v21  ;;  %vm9472_vm5 = vmmov %vm9471_vm2 }
 0x3b1   : > { %v4246_v32 = vsel %vm9471_vm2, %v4006_v3, 0.0  ;;  %vm3623_vm7 = vcmp.eq.s32.totalorder %v3495_v40, %v5786_v60  ;;  %v2774_v0 = vsub.s32 0, %v8774_v24  ;;  %v1834_v61 = vadd.s32 944, %v5684_v21  ;;  %vm9473_vm15 = vmmov %vm9471_vm2  ;;  %v1680_v3 = vpop.xlane.xlu0 %1679 }
 0x3b2   : > { %v4247_v34 = vadd.f32 %v4246_v32, %v4245_v35  ;;  %vm3879_vm14 = vmand %vm3623_vm7, %vm3751_vm8  ;;  %v2772_v63 = vsel %vm2766_vm9, %v2771_v11, %v2770_v10  ;;  %vm3752_vm13 = vcmp.lt.s32.totalorder %v8745_v59, 2048  ;;  %v2781_v17 = vsub.s32 0, %v8777_v15  ;;  %v1683_v32 = vpop.xlane.xlu1 %1682 }
 0x3b3   : > { %v4007_v47 = vsel %vm3879_vm14, %v1668_v2, 0.0  ;;  %vm2984_vm11 = vcmp.ne.s32.totalorder %v2772_v63, 0  ;;  %vm3112_vm4 = vcmp.lt.s32.totalorder %v2772_v63, 0  ;;  %v3368_v54 = vadd.s32 4, %v2772_v63 }
 0x3b4   : > { %v4248_v7 = vsel %vm9472_vm5, %v4007_v47, 0.0  ;;  %vm3240_vm0 = vmand %vm3112_vm4, %vm2984_vm11  ;;  %v4472_v25 = vmin.u32 %v2774_v0, %v8774_v24  ;;  %vm2773_vm12 = vcmp.lt.s32.totalorder %v8774_v24, 0  ;;  %v8791_v62 = vadd.s32 %v5689_v28, %v1832_v18 }
 0x3b5   : > { %v3496_v53 = vsel %vm3240_vm0, %v3368_v54, %v2772_v63  ;;  %v8794_v37 = vadd.s32 %v5689_v28, %v1833_v49  ;;  %vm3753_vm10 = vcmp.lt.s32.totalorder %v8774_v24, 2048  ;;  %v4473_v9 = vmin.u32 %v2781_v17, %v8777_v15 }
 0x3b6   : > { %vm3624_vm6 = vcmp.eq.s32.totalorder %v3496_v53, %v5786_v60  ;;  %v2777_v4 = vand.u32 3, %v4472_v25  ;;  %v4249_v23 = vadd.f32 %v4248_v7, %v4247_v34  ;;  %vm2780_vm1 = vcmp.lt.s32.totalorder %v8777_v15, 0 }
 0x3b7   : > { %vm3880_vm3 = vmand %vm3624_vm6, %vm3752_vm13  ;;  %v2788_v8 = vsub.s32 0, %v8791_v62  ;;  %v8802_v1 = vadd.s32 %v5689_v28, %v1834_v61  ;;  %v2784_v59 = vand.u32 3, %v4473_v9  ;;  %v2795_v57 = vsub.s32 0, %v8794_v37 }
 0x3b8   : > { %v4008_v6 = vsel %vm3880_vm3, %v1671_v14, 0.0  ;;  %v2778_v16 = vsub.s32 0, %v2777_v4  ;;  %vm3754_vm8 = vcmp.lt.s32.totalorder %v8777_v15, 2048  ;;  %vm2787_vm9 = vcmp.lt.s32.totalorder %v8791_v62, 0 }
 0x3b9   : > { %v4250_v22 = vsel %vm9473_vm15, %v4008_v6, 0.0  ;;  %v4474_v52 = vmin.u32 %v2788_v8, %v8791_v62  ;;  %v2785_v30 = vsub.s32 0, %v2784_v59  ;;  %vm3755_vm2 = vcmp.lt.s32.totalorder %v8791_v62, 2048  ;;  %v1686_v8 = vpop.xlane.xlu0 %1685 }
 0x3ba   : > { %v2779_v20 = vsel %vm2773_vm12, %v2778_v16, %v2777_v4  ;;  %vm2794_vm7 = vcmp.lt.s32.totalorder %v8794_v37, 0  ;;  %v4475_v36 = vmin.u32 %v2795_v57, %v8794_v37  ;;  %v4251_v31 = vadd.f32 %v4250_v22, %v4249_v23 }
 0x3bb   : > { %vm2985_vm14 = vcmp.ne.s32.totalorder %v2779_v20, 0  ;;  %vm3113_vm11 = vcmp.lt.s32.totalorder %v2779_v20, 0  ;;  %v3369_v50 = vadd.s32 4, %v2779_v20  ;;  %v2791_v48 = vand.u32 3, %v4474_v52 }
 0x3bc   : > { %vm3241_vm4 = vmand %vm3113_vm11, %vm2985_vm14  ;;  %v2786_v56 = vsel %vm2780_vm1, %v2785_v30, %v2784_v59  ;;  %v2798_v46 = vand.u32 3, %v4475_v36  ;;  %vm3756_vm5 = vcmp.lt.s32.totalorder %v8794_v37, 2048  ;;  %v2802_v44 = vsub.s32 0, %v8802_v1 }
 0x3bd   : > { %v3497_v33 = vsel %vm3241_vm4, %v3369_v50, %v2779_v20  ;;  %vm2986_vm0 = vcmp.ne.s32.totalorder %v2786_v56, 0  ;;  %vm3114_vm13 = vcmp.lt.s32.totalorder %v2786_v56, 0  ;;  %v3370_v29 = vadd.s32 4, %v2786_v56 }
 0x3be   : > { %vm3625_vm12 = vcmp.eq.s32.totalorder %v3497_v33, %v5786_v60  ;;  %vm3242_vm6 = vmand %vm3114_vm13, %vm2986_vm0  ;;  %v2792_v39 = vsub.s32 0, %v2791_v48  ;;  %v2799_v43 = vsub.s32 0, %v2798_v46  ;;  %v4476_v5 = vmin.u32 %v2802_v44, %v8802_v1  ;;  %v1689_v44 = vpop.xlane.xlu1 %1688 }
 0x3bf   : > { %vm3881_vm3 = vmand %vm3625_vm12, %vm3753_vm10  ;;  %v3498_v13 = vsel %vm3242_vm6, %v3370_v29, %v2786_v56  ;;  %v1835_v12 = vadd.s32 952, %v5684_v21  ;;  %v1836_v51 = vadd.s32 960, %v5684_v21  ;;  %v1837_v38 = vadd.s32 968, %v5684_v21 }
 0x3c0   : > { %v4009_v45 = vsel %vm3881_vm3, %v1674_v27, 0.0  ;;  %vm3626_vm1 = vcmp.eq.s32.totalorder %v3498_v13, %v5786_v60  ;;  %v2793_v55 = vsel %vm2787_vm9, %v2792_v39, %v2791_v48  ;;  %v2800_v19 = vsel %vm2794_vm7, %v2799_v43, %v2798_v46  ;;  %vm9474_vm12 = vmmov %vm9473_vm15 }
 0x3c1   : > { %v4252_v41 = vsel %vm9473_vm15, %v4009_v45, 0.0  ;;  %vm3882_vm10 = vmand %vm3626_vm1, %vm3754_vm8  ;;  %vm2987_vm14 = vcmp.ne.s32.totalorder %v2793_v55, 0  ;;  %vm3115_vm11 = vcmp.lt.s32.totalorder %v2793_v55, 0  ;;  %v3371_v42 = vadd.s32 4, %v2793_v55 }
 0x3c2   : > { %v4253_v35 = vadd.f32 %v4252_v41, %v4251_v31  ;;  %v4010_v58 = vsel %vm3882_vm10, %v1677_v26, 0.0  ;;  %vm3243_vm4 = vmand %vm3115_vm11, %vm2987_vm14  ;;  %vm2988_vm0 = vcmp.ne.s32.totalorder %v2800_v19, 0  ;;  %vm3116_vm13 = vcmp.lt.s32.totalorder %v2800_v19, 0 }
 0x3c3   : > { %v4254_v10 = vsel %vm9474_vm12, %v4010_v58, 0.0  ;;  %v3499_v24 = vsel %vm3243_vm4, %v3371_v42, %v2793_v55  ;;  %vm3244_vm9 = vmand %vm3116_vm13, %vm2988_vm0  ;;  %v3372_v40 = vadd.s32 4, %v2800_v19  ;;  %v2805_v2 = vand.u32 3, %v4476_v5  ;;  %v1695_v58 = vpop.xlane.xlu1 %1694 }
 0x3c4   : > { %v4255_v11 = vadd.f32 %v4254_v10, %v4253_v35  ;;  %vm3627_vm7 = vcmp.eq.s32.totalorder %v3499_v24, %v5786_v60  ;;  %vm2801_vm8 = vcmp.lt.s32.totalorder %v8802_v1, 0  ;;  %v8837_v15 = vadd.s32 %v5689_v28, %v1835_v12  ;;  %vm9475_vm1 = vmmov %vm9474_vm12 }
 0x3c5   : > { %vm3883_vm6 = vmand %vm3627_vm7, %vm3755_vm2  ;;  %v3500_v18 = vsel %vm3244_vm9, %v3372_v40, %v2800_v19  ;;  %v2806_v0 = vsub.s32 0, %v2805_v2  ;;  %v8842_v49 = vadd.s32 %v5689_v28, %v1836_v51  ;;  %v8847_v61 = vadd.s32 %v5689_v28, %v1837_v38  ;;  %v1692_v38 = vpop.xlane.xlu0 %1691 }
 0x3c6   : > { %v4011_v34 = vsel %vm3883_vm6, %v1680_v3, 0.0  ;;  %vm3628_vm3 = vcmp.eq.s32.totalorder %v3500_v18, %v5786_v60  ;;  %v2809_v63 = vsub.s32 0, %v8837_v15  ;;  %vm3757_vm2 = vcmp.lt.s32.totalorder %v8802_v1, 2048  ;;  %vm9476_vm11 = vmmov %vm9475_vm1 }
 0x3c7   : > { %v4256_v47 = vsel %vm9475_vm1, %v4011_v34, 0.0  ;;  %vm3884_vm15 = vmand %vm3628_vm3, %vm3756_vm5  ;;  %v2807_v54 = vsel %vm2801_vm8, %v2806_v0, %v2805_v2  ;;  %v1838_v7 = vadd.s32 976, %v5684_v21  ;;  %v2816_v4 = vsub.s32 0, %v8842_v49 }
 0x3c8   : > { %v4257_v25 = vadd.f32 %v4256_v47, %v4255_v11  ;;  %v4012_v17 = vsel %vm3884_vm15, %v1683_v32, 0.0  ;;  %vm2989_vm10 = vcmp.ne.s32.totalorder %v2807_v54, 0  ;;  %vm3117_vm14 = vcmp.lt.s32.totalorder %v2807_v54, 0 }
 0x3c9   : > { %v4258_v53 = vsel %vm9476_vm11, %v4012_v17, 0.0  ;;  %vm3245_vm4 = vmand %vm3117_vm14, %vm2989_vm10  ;;  %v3373_v14 = vadd.s32 4, %v2807_v54  ;;  %v4477_v62 = vmin.u32 %v2809_v63, %v8837_v15  ;;  %vm2808_vm0 = vcmp.lt.s32.totalorder %v8837_v15, 0  ;;  %v1698_v34 = vpop.xlane.xlu0 %1697 }
 0x3ca   : > { %vm3758_vm5 = vcmp.lt.s32.totalorder %v8837_v15, 2048  ;;  %vm2815_vm13 = vcmp.lt.s32.totalorder %v8842_v49, 0  ;;  %v2823_v37 = vsub.s32 0, %v8847_v61  ;;  %v4259_v9 = vadd.f32 %v4258_v53, %v4257_v25 }
 0x3cb   : > { %v3501_v23 = vsel %vm3245_vm4, %v3373_v14, %v2807_v54  ;;  %v2812_v6 = vand.u32 3, %v4477_v62  ;;  %v4478_v16 = vmin.u32 %v2816_v4, %v8842_v49  ;;  %vm3759_vm9 = vcmp.lt.s32.totalorder %v8842_v49, 2048 }
 0x3cc   : > { %vm3629_vm12 = vcmp.eq.s32.totalorder %v3501_v23, %v5786_v60  ;;  %v4479_v59 = vmin.u32 %v2823_v37, %v8847_v61  ;;  %v8866_v57 = vadd.s32 %v5689_v28, %v1838_v7  ;;  %vm2822_vm8 = vcmp.lt.s32.totalorder %v8847_v61, 0 }
 0x3cd   : > { %vm3885_vm7 = vmand %vm3629_vm12, %vm3757_vm2  ;;  %v2813_v22 = vsub.s32 0, %v2812_v6  ;;  %v2819_v52 = vand.u32 3, %v4478_v16  ;;  %v1839_v20 = vadd.s32 984, %v5684_v21  ;;  %vm3760_vm6 = vcmp.lt.s32.totalorder %v8847_v61, 2048 }
 0x3ce   : > { %v4013_v30 = vsel %vm3885_vm7, %v1686_v8, 0.0  ;;  %v2826_v36 = vand.u32 3, %v4479_v59  ;;  %v2830_v50 = vsub.s32 0, %v8866_v57  ;;  %vm2829_vm3 = vcmp.lt.s32.totalorder %v8866_v57, 0 }
 0x3cf   : > { %v2814_v48 = vsel %vm2808_vm0, %v2813_v22, %v2812_v6  ;;  %v2820_v31 = vsub.s32 0, %v2819_v52  ;;  %v1840_v1 = vadd.s32 992, %v5684_v21  ;;  %v4260_v56 = vsel %vm9475_vm1, %v4013_v30, 0.0  ;;  %v1701_v30 = vpop.xlane.xlu1 %1700 }
 0x3d0   : > { %vm2990_vm15 = vcmp.ne.s32.totalorder %v2814_v48, 0  ;;  %vm3118_vm2 = vcmp.lt.s32.totalorder %v2814_v48, 0  ;;  %v3374_v46 = vadd.s32 4, %v2814_v48  ;;  %v2827_v27 = vsub.s32 0, %v2826_v36 }
 0x3d1   : > { %vm3246_vm10 = vmand %vm3118_vm2, %vm2990_vm15  ;;  %v2821_v33 = vsel %vm2815_vm13, %v2820_v31, %v2819_v52  ;;  %v4480_v29 = vmin.u32 %v2830_v50, %v8866_v57  ;;  %v8883_v39 = vadd.s32 %v5689_v28, %v1839_v20  ;;  %v4261_v13 = vadd.f32 %v4260_v56, %v4259_v9 }
 0x3d2   : > { %v3502_v43 = vsel %vm3246_vm10, %v3374_v46, %v2814_v48  ;;  %vm2991_vm14 = vcmp.ne.s32.totalorder %v2821_v33, 0  ;;  %vm3119_vm11 = vcmp.lt.s32.totalorder %v2821_v33, 0  ;;  %v3375_v5 = vadd.s32 4, %v2821_v33 }
 0x3d3   : > { %vm3630_vm4 = vcmp.eq.s32.totalorder %v3502_v43, %v5786_v60  ;;  %vm3247_vm0 = vmand %vm3119_vm11, %vm2991_vm14  ;;  %v2828_v26 = vsel %vm2822_vm8, %v2827_v27, %v2826_v36  ;;  %v2833_v12 = vand.u32 3, %v4480_v29  ;;  %v2837_v41 = vsub.s32 0, %v8883_v39 }
 0x3d4   : > { %vm3886_vm13 = vmand %vm3630_vm4, %vm3758_vm5  ;;  %v3503_v51 = vsel %vm3247_vm0, %v3375_v5, %v2821_v33  ;;  %vm2992_vm12 = vcmp.ne.s32.totalorder %v2828_v26, 0  ;;  %vm3120_vm7 = vcmp.lt.s32.totalorder %v2828_v26, 0  ;;  %v3376_v45 = vadd.s32 4, %v2828_v26  ;;  %v1704_v33 = vpop.xlane.xlu0 %1703 }
 0x3d5   : > { %v4014_v55 = vsel %vm3886_vm13, %v1689_v44, 0.0  ;;  %vm3631_vm1 = vcmp.eq.s32.totalorder %v3503_v51, %v5786_v60  ;;  %vm3248_vm15 = vmand %vm3120_vm7, %vm2992_vm12  ;;  %v2834_v19 = vsub.s32 0, %v2833_v12  ;;  %vm9477_vm2 = vcmask 31744  }
 0x3d6   : > { %v4262_v42 = vsel %vm9477_vm2, %v4014_v55, 0.0  ;;  %vm3887_vm8 = vmand %vm3631_vm1, %vm3759_vm9  ;;  %v3504_v35 = vsel %vm3248_vm15, %v3376_v45, %v2828_v26  ;;  %v8896_v10 = vadd.s32 %v5689_v28, %v1840_v1  ;;  %v1841_v24 = vadd.s32 1000, %v5684_v21 }
 0x3d7   : > { %v4263_v3 = vadd.f32 %v4262_v42, %v4261_v13  ;;  %v4015_v40 = vsel %vm3887_vm8, %v1692_v38, 0.0  ;;  %vm3632_vm5 = vcmp.eq.s32.totalorder %v3504_v35, %v5786_v60  ;;  %v2835_v2 = vsel %vm2829_vm3, %v2834_v19, %v2833_v12  ;;  %vm9478_vm10 = vmmov %vm9477_vm2  ;;  %v1707_v12 = vpop.xlane.xlu1 %1706 }
 0x3d8   : > { %v4264_v11 = vsel %vm9478_vm10, %v4015_v40, 0.0  ;;  %vm3888_vm14 = vmand %vm3632_vm5, %vm3760_vm6  ;;  %vm2993_vm9 = vcmp.ne.s32.totalorder %v2835_v2, 0  ;;  %vm3121_vm11 = vcmp.lt.s32.totalorder %v2835_v2, 0  ;;  %v3377_v15 = vadd.s32 4, %v2835_v2 }
 0x3d9   : > { %v4016_v18 = vsel %vm3888_vm14, %v1695_v58, 0.0  ;;  %vm3249_vm4 = vmand %vm3121_vm11, %vm2993_vm9  ;;  %vm3761_vm0 = vcmp.lt.s32.totalorder %v8866_v57, 2048  ;;  %v4481_v32 = vmin.u32 %v2837_v41, %v8883_v39  ;;  %v4265_v0 = vadd.f32 %v4264_v11, %v4263_v3  ;;  %v1710_v3 = vpop.xlane.xlu0 %1709 }
 0x3da   : > { %v3505_v49 = vsel %vm3249_vm4, %v3377_v15, %v2835_v2  ;;  %v2844_v63 = vsub.s32 0, %v8896_v10  ;;  %vm9479_vm3 = vmmov %vm9477_vm2  ;;  %v8911_v54 = vadd.s32 %v5689_v28, %v1841_v24  ;;  %vm2836_vm12 = vcmp.lt.s32.totalorder %v8883_v39, 0 }
 0x3db   : > { %v4266_v47 = vsel %vm9479_vm3, %v4016_v18, 0.0  ;;  %vm3633_vm13 = vcmp.eq.s32.totalorder %v3505_v49, %v5786_v60  ;;  %v2840_v61 = vand.u32 3, %v4481_v32  ;;  %v1842_v25 = vadd.s32 1008, %v5684_v21  ;;  %vm9480_vm1 = vmmov %vm9477_vm2  ;;  %v1713_v11 = vpop.xlane.xlu1 %1712 }
 0x3dc   : > { %vm3889_vm6 = vmand %vm3633_vm13, %vm3761_vm0  ;;  %v4482_v7 = vmin.u32 %v2844_v63, %v8896_v10  ;;  %v1843_v17 = vadd.s32 1016, %v5684_v21  ;;  %v2851_v62 = vsub.s32 0, %v8911_v54  ;;  %v4267_v4 = vadd.f32 %v4266_v47, %v4265_v0 }
 0x3dd   : > { %v4017_v53 = vsel %vm3889_vm6, %v1698_v34, 0.0  ;;  %v2841_v14 = vsub.s32 0, %v2840_v61  ;;  %vm2843_vm7 = vcmp.lt.s32.totalorder %v8896_v10, 0  ;;  %v8920_v9 = vadd.s32 %v5689_v28, %v1842_v25  ;;  %vm9481_vm6 = vmmov %vm9480_vm1  ;;  %v4023_v25 = vld [vmem:[#allocation2] sm:$0x1] }
 0x3de   : > { %v2847_v37 = vand.u32 3, %v4482_v7  ;;  %v4268_v23 = vsel %vm9480_vm1, %v4017_v53, 0.0  ;;  %v4483_v6 = vmin.u32 %v2851_v62, %v8911_v54  ;;  %v8925_v16 = vadd.s32 %v5689_v28, %v1843_v17 }
 0x3df   : > { %v2842_v8 = vsel %vm2836_vm12, %v2841_v14, %v2840_v61  ;;  %vm3762_vm5 = vcmp.lt.s32.totalorder %v8883_v39, 2048  ;;  %vm2850_vm10 = vcmp.lt.s32.totalorder %v8911_v54, 0  ;;  %v2858_v22 = vsub.s32 0, %v8920_v9 }
 0x3e0   : > { %vm2994_vm15 = vcmp.ne.s32.totalorder %v2842_v8, 0  ;;  %vm3122_vm2 = vcmp.lt.s32.totalorder %v2842_v8, 0  ;;  %v3378_v21 = vadd.s32 4, %v2842_v8  ;;  %v2848_v59 = vsub.s32 0, %v2847_v37 }
 0x3e1   : > { %vm3250_vm8 = vmand %vm3122_vm2, %vm2994_vm15  ;;  %v2854_v57 = vand.u32 3, %v4483_v6  ;;  %v4269_v52 = vadd.f32 %v4268_v23, %v4267_v4  ;;  %v2865_v28 = vsub.s32 0, %v8925_v16  ;;  %v4484_v31 = vmin.u32 %v2858_v22, %v8920_v9 }
 0x3e2   : > { %v3506_v20 = vsel %vm3250_vm8, %v3378_v21, %v2842_v8  ;;  %v2849_v36 = vsel %vm2843_vm7, %v2848_v59, %v2847_v37  ;;  %vm3763_vm3 = vcmp.lt.s32.totalorder %v8896_v10, 2048  ;;  %vm2857_vm13 = vcmp.lt.s32.totalorder %v8920_v9, 0 }
 0x3e3   : > { %vm3634_vm14 = vcmp.eq.s32.totalorder %v3506_v20, %v5786_v60  ;;  %vm2995_vm9 = vcmp.ne.s32.totalorder %v2849_v36, 0  ;;  %vm3123_vm11 = vcmp.lt.s32.totalorder %v2849_v36, 0  ;;  %v3379_v50 = vadd.s32 4, %v2849_v36 }
 0x3e4   : > { %vm3890_vm4 = vmand %vm3634_vm14, %vm3762_vm5  ;;  %v2855_v48 = vsub.s32 0, %v2854_v57  ;;  %v4485_v1 = vmin.u32 %v2865_v28, %v8925_v16  ;;  %v2861_v29 = vand.u32 3, %v4484_v31  ;;  %vm3764_vm8 = vcmp.lt.s32.totalorder %v8911_v54, 2048 }
 0x3e5   : > { %v4018_v56 = vsel %vm3890_vm4, %v1701_v30, 0.0  ;;  %vm3251_vm0 = vmand %vm3123_vm11, %vm2995_vm9  ;;  %vm2864_vm5 = vcmp.lt.s32.totalorder %v8925_v16, 0 }
 0x3e6   : > { %v4270_v46 = vsel %vm9481_vm6, %v4018_v56, 0.0  ;;  %v3507_v44 = vsel %vm3251_vm0, %v3379_v50, %v2849_v36  ;;  %v2856_v27 = vsel %vm2850_vm10, %v2855_v48, %v2854_v57  ;;  %v2862_v5 = vsub.s32 0, %v2861_v29  ;;  %vm9482_vm14 = vmmov %vm9481_vm6 }
 0x3e7   : > { %v4271_v39 = vadd.f32 %v4270_v46, %v4269_v52  ;;  %vm3635_vm12 = vcmp.eq.s32.totalorder %v3507_v44, %v5786_v60  ;;  %vm2996_vm7 = vcmp.ne.s32.totalorder %v2856_v27, 0  ;;  %vm3124_vm1 = vcmp.lt.s32.totalorder %v2856_v27, 0 }
 0x3e8   : > { %vm3891_vm15 = vmand %vm3635_vm12, %vm3763_vm3  ;;  %v3380_v43 = vadd.s32 4, %v2856_v27  ;;  %v2868_v13 = vand.u32 3, %v4485_v1  ;;  %v2863_v45 = vsel %vm2857_vm13, %v2862_v5, %v2861_v29  ;;  %vm3765_vm0 = vcmp.lt.s32.totalorder %v8920_v9, 2048 }
 0x3e9   : > { %v4019_v26 = vsel %vm3891_vm15, %v1704_v33, 0.0  ;;  %vm3252_vm2 = vmand %vm3124_vm1, %vm2996_vm7  ;;  %vm2997_vm9 = vcmp.ne.s32.totalorder %v2863_v45, 0  ;;  %vm3125_vm11 = vcmp.lt.s32.totalorder %v2863_v45, 0  ;;  %v3381_v41 = vadd.s32 4, %v2863_v45 }
 0x3ea   : > { %v4272_v51 = vsel %vm9482_vm14, %v4019_v26, 0.0  ;;  %v3508_v38 = vsel %vm3252_vm2, %v3380_v43, %v2856_v27  ;;  %v2869_v55 = vsub.s32 0, %v2868_v13  ;;  %vm3253_vm3 = vmand %vm3125_vm11, %vm2997_vm9  ;;  %vm3766_vm1 = vcmp.lt.s32.totalorder %v8925_v16, 2048 }
 0x3eb   : > { %v4273_v19 = vadd.f32 %v4272_v51, %v4271_v39  ;;  %vm3636_vm10 = vcmp.eq.s32.totalorder %v3508_v38, %v5786_v60  ;;  %vm9483_vm7 = vmmov %vm9482_vm14  ;;  %v3509_v24 = vsel %vm3253_vm3, %v3381_v41, %v2863_v45  ;;  %vm4287_vm9 = vcmask 24576  }
 0x3ec   : > { %vm3892_vm4 = vmand %vm3636_vm10, %vm3764_vm8  ;;  %v2870_v42 = vsel %vm2864_vm5, %v2869_v55, %v2868_v13  ;;  %vm3637_vm15 = vcmp.eq.s32.totalorder %v3509_v24, %v5786_v60 }
 0x3ed   : > { %v4020_v35 = vsel %vm3892_vm4, %v1707_v12, 0.0  ;;  %vm2998_vm6 = vcmp.ne.s32.totalorder %v2870_v42, 0  ;;  %vm3126_vm12 = vcmp.lt.s32.totalorder %v2870_v42, 0  ;;  %v3382_v58 = vadd.s32 4, %v2870_v42  ;;  %vm3893_vm2 = vmand %vm3637_vm15, %vm3765_vm0 }
 0x3ee   : > { %v4274_v10 = vsel %vm9483_vm7, %v4020_v35, 0.0  ;;  %vm3254_vm13 = vmand %vm3126_vm12, %vm2998_vm6  ;;  %v4021_v15 = vsel %vm3893_vm2, %v1710_v3, 0.0 }
 0x3ef   : > { %v4275_v40 = vadd.f32 %v4274_v10, %v4273_v19  ;;  %v3510_v2 = vsel %vm3254_vm13, %v3382_v58, %v2870_v42  ;;  %vm9484_vm14 = vmmov %vm9483_vm7 }
 0x3f0   : > { %vm3638_vm8 = vcmp.eq.s32.totalorder %v3510_v2, %v5786_v60  ;;  %v4276_v18 = vsel %vm9484_vm14, %v4021_v15, 0.0  ;;  %vm9485_vm10 = vmmov %vm9483_vm7 }
 0x3f1   : > { %vm3894_vm5 = vmand %vm3638_vm8, %vm3766_vm1  ;;  %v4277_v0 = vadd.f32 %v4276_v18, %v4275_v40 }
 0x3f2   : > { %v4022_v32 = vsel %vm3894_vm5, %v1713_v11, 0.0 }
 0x3f3   : > { %v4278_v49 = vsel %vm9485_vm10, %v4022_v32, 0.0 }
 0x3f4   : > { %v4279_v34 = vadd.f32 %v4278_v49, %v4277_v0 }
 0x3f6   : > { %v4280_v63 = vrot.slane %v4279_v34, 4 }
 0x3f8   : > { %v4281_v47 = vadd.f32 %v4280_v63, %v4279_v34 }
 0x3fa   : > { %v4282_v61 = vrot.slane %v4281_v47, 2 }
 0x3fc   : > { %v4283_v54 = vadd.f32 %v4282_v61, %v4281_v47 }
 0x3fe   : > { %v4284_v7 = vrot.slane %v4283_v54, 1  ;;  %4292 = sbr.rel (%p4486_p7) target bundleno = 1353 (0x549), region = 48 }
 0x400   : > { %v4285_v17 = vadd.f32 %v4284_v7, %v4283_v54 }
 0x402   : > { %v4286_v53 = vadd.f32 %v4285_v17, %v4023_v25 }
 0x404   : > { %4288 = vst.msk [vmem:[#allocation2] sm:$0x1] %vm4287_vm9, %v4286_v53 }
 0x40b   : > { %v4293_v60 = vld [vmem:[#allocation2] sm:$0x1] }
 0x40c   : > { %v4294_v14 = vmul.f32 0.001953125, %v4293_v60 }
 0x40e   : > { %v4295_v62 = vsel %vm4287_vm9, %v4294_v14, -inf }
 0x40f   : > { %4296 = vmax.xlane.f32.xlu0 %v4295_v62 }
 0x49c   : > { %v4297_v4 = vpop.xlane.xlu0 %4296 }
 0x49d   : > { %v4298_v37 = vsub.f32 %v4294_v14, %v4297_v4 }
 0x49f   : > { %v4299_v9 = vmul.f32 1.442695, %v4298_v37 }
 0x4a1   : > { %5210 = vpow2.f32 %v4299_v9 }
 0x4ab   : > { %v5211_v23 = vpop.eup %5210 }
 0x4ac   : > { %v4301_v8 = vsel %vm4287_vm9, %v5211_v23, 0.0 }
 0x4ad   : > { %4302 = vadd.xlane.f32.xlu0 %v4301_v8 }
 0x53a   : > { %v4303_v6 = vpop.xlane.xlu0 %4302 }
 0x53b   : > { %5212 = vrcp.f32 %v4303_v6 }
 0x545   : > { %v5213_v16 = vpop.eup %5212 }
 0x546   : > { %v4305_v21 = vmul.f32 %v5213_v16, %v5211_v23 }
 0x548   : > { %4306 = vst.msk [vmem:[%s8982_s4] sm:$0x1] %vm4287_vm9, %v4305_v21 }
 0x549 PF: > { %p14_p8 = scmp.ge.s32.totalorder %s5331_s20, 4   ;;  %s9486_s15 = smov %s5270_s16 }
 0x54a   : > { %s9487_s16 = smov %s5274_s17  ;;  %s9488_s17 = smov %s5341_s23 }
 0x54b   : > { %s9489_s18 = smov %s5331_s20  ;;  %16 = sbr.rel (!%p14_p8) target bundleno = 3 (0x3), region = 80 }
 0x552   :  { %4318 = vsyncpa [#allocation4], 1 }
 0x553   :  { %4320 = vsyncpa [#allocation4 + $0x1], 1 }

</bundles_post_ra>
